<compile_context>
chip_gen: v5e
topology: v5e:2x2
jax: 0.10.0
libtpu: 0.0.40
codegen_flags: <defaults>
</compile_context>

<pallas_src>
import jax
import jax.numpy as jnp
from jax.experimental import pallas as pl
from jax.experimental.pallas import tpu as pltpu


_COMPILER_PARAMS = pltpu.CompilerParams(
    dimension_semantics=("parallel",),          # row/batch grid axis is embarrassingly parallel
    vmem_limit_bytes=32 * 1024 * 1024,          # explicit; fits v5e/v6e/v7x comfortably
)


# --------------------------------------------------------------------------- #
# Pallas kernels                                                               #
# --------------------------------------------------------------------------- #
def _conv_pool_kernel(x_ref, w_ref, b_ref, o_ref):
    """Fused conv(k=2) + bias + ReLU + maxpool(2x2, stride 2).

    x_ref: (4, TM, K) -- pool-phase-stacked im2col rows (phase p, row m, taps*cin).
    o_ref: (TM, N)    -- pooled, activated output rows.
    Computes relu(max_p(x_p @ w) + b); bias-add / ReLU hoisted out of the phase loop.
    """
    w = w_ref[...]
    m = jnp.dot(x_ref[0], w, preferred_element_type=jnp.float32)
    for p in range(1, x_ref.shape[0]):
        m = jnp.maximum(m, jnp.dot(x_ref[p], w, preferred_element_type=jnp.float32))
    o_ref[...] = jnp.maximum(m + b_ref[...], 0.0).astype(o_ref.dtype)


def _head_kernel(x_ref, w3_ref, b3_ref, w1_ref, b1_ref, w2_ref, b2_ref,
                 wf3_ref, bf3_ref, w4_ref, b4_ref, o_ref):
    """Fused conv3 + ReLU + fc1 + fc2 + fc3 + fc4 (dropout = identity at inference).

    x_ref : (25, TB, 128) conv3 im2col, position-major (p = h*5 + w).
    w1_ref: (25, 64, 512) fc1 weights pre-permuted to (position, channel, out) order,
            so the torch NCHW flatten is realized without any runtime transpose and the
            conv3 activation stays in VMEM/vregs.
    """
    w3 = w3_ref[...]
    b3 = b3_ref[...]
    tb = x_ref.shape[1]
    acc = jnp.zeros((tb, w1_ref.shape[2]), jnp.float32)
    for p in range(x_ref.shape[0]):                               # 25 spatial positions
        z = jnp.dot(x_ref[p], w3, preferred_element_type=jnp.float32) + b3
        z = jnp.maximum(z, 0.0)                                   # relu(conv3)
        acc = acc + jnp.dot(z, w1_ref[p], preferred_element_type=jnp.float32)
    h = jnp.maximum(acc + b1_ref[...], 0.0)                       # relu(fc1)
    h = jnp.maximum(jnp.dot(h, w2_ref[...], preferred_element_type=jnp.float32)
                    + b2_ref[...], 0.0)                           # relu(fc2)
    h = jnp.maximum(jnp.dot(h, wf3_ref[...], preferred_element_type=jnp.float32)
                    + bf3_ref[...], 0.0)                          # relu(fc3)
    o_ref[...] = (jnp.dot(h, w4_ref[...], preferred_element_type=jnp.float32)
                  + b4_ref[...]).astype(o_ref.dtype)              # fc4 logits


# --------------------------------------------------------------------------- #
# pallas_call wrappers                                                         #
# --------------------------------------------------------------------------- #
def _full_spec(a):
    """Whole-array block, resident across the grid (constant index_map)."""
    return pl.BlockSpec(a.shape, lambda i, _n=a.ndim: (0,) * _n)


def conv_pool(phases, w, b, tile_m=512):
    """phases: (4, M, K) -> (M, N) pooled+activated conv output rows."""
    _, m_total, k = phases.shape
    n = w.shape[1]
    tm = min(tile_m, m_total)
    return pl.pallas_call(
        _conv_pool_kernel,
        out_shape=jax.ShapeDtypeStruct((m_total, n), jnp.float32),
        grid=(pl.cdiv(m_total, tm),),
        in_specs=[pl.BlockSpec((4, tm, k), lambda i: (0, i, 0)),
                  _full_spec(w), _full_spec(b)],
        out_specs=pl.BlockSpec((tm, n), lambda i: (i, 0)),
        compiler_params=_COMPILER_PARAMS,
    )(phases, w, b)


def head(xp, params, tile_b=128):
    """xp: (25, B, 128) conv3 im2col -> (B, 8) logits (conv3 + fc stack fused)."""
    p_pos, batch, k = xp.shape
    tb = min(tile_b, batch)
    weights = (params["w3"], params["b3"], params["fc1_w"], params["fc1_b"],
               params["fc2_w"], params["fc2_b"], params["fc3_w"], params["fc3_b"],
               params["fc4_w"], params["fc4_b"])
    return pl.pallas_call(
        _head_kernel,
        out_shape=jax.ShapeDtypeStruct((batch, 8), jnp.float32),
        grid=(pl.cdiv(batch, tb),),
        in_specs=[pl.BlockSpec((p_pos, tb, k), lambda i: (0, i, 0))]
                 + [_full_spec(a) for a in weights],
        out_specs=pl.BlockSpec((tb, 8), lambda i: (i, 0)),
        compiler_params=_COMPILER_PARAMS,
    )(xp, *weights)


# --------------------------------------------------------------------------- #
# Plain-JAX glue: im2col / pooling-phase extraction (pure data movement).      #
# --------------------------------------------------------------------------- #
def _pool_phase_stack(x, hp, wp):
    """4 pooling phases of a stride-1 k=2 conv, built from ONE stride-1 im2col.

    Returns (4, B*hp*wp, 4*C); rows ordered (batch, i, j), columns (kh, kw, c).
    """
    b, _, _, c = x.shape
    ho, wo = 2 * hp, 2 * wp
    s1 = jnp.concatenate(
        [x[:, kh:kh + ho, kw:kw + wo, :] for kh in range(2) for kw in range(2)],
        axis=-1)                                                   # (B, ho, wo, 4*C)
    phases = [s1[:, a::2, bb::2, :].reshape(b * hp * wp, 4 * c)
              for a in range(2) for bb in range(2)]
    return jnp.stack(phases, axis=0)


def _conv3_patches(x):
    """im2col for the final k=2 conv, position-major: (25, B, 4*C)."""
    b, h, w, c = x.shape
    ho, wo = h - 1, w - 1
    p = jnp.concatenate(
        [x[:, kh:kh + ho, kw:kw + wo, :] for kh in range(2) for kw in range(2)],
        axis=-1)                                                   # (B, 5, 5, 4*C)
    return jnp.transpose(p.reshape(b, ho * wo, 4 * c), (1, 0, 2))


# --------------------------------------------------------------------------- #
# Forward pass (matches CNNModel.forward; input is NCHW like torch).           #
# --------------------------------------------------------------------------- #
def cnn_forward(x_nchw, params):
    b = x_nchw.shape[0]
    x = jnp.transpose(x_nchw, (0, 2, 3, 1))                        # NCHW -> NHWC

    # conv1 (3->16) + relu + maxpool : 27x27 -> 26x26 -> 13x13
    y = conv_pool(_pool_phase_stack(x, 13, 13), params["w1"], params["b1"])
    y = y.reshape(b, 13, 13, 16)

    # conv2 (16->32) + relu + maxpool : 13x13 -> 12x12 -> 6x6
    y = conv_pool(_pool_phase_stack(y, 6, 6), params["w2"], params["b2"])
    y = y.reshape(b, 6, 6, 32)

    # conv3 (32->64) + relu + flatten + fc1..fc4 (Dropout(0.4) = identity in eval)
    return head(_conv3_patches(y), params)


# --------------------------------------------------------------------------- #
# Parameter init (torch layouts) + one-time conversion to kernel layouts.      #
# --------------------------------------------------------------------------- #
def init_torch_params(key):
    ks = jax.random.split(key, 14)

    def conv(kw_, kb_, cout, cin):
        w = jax.random.normal(kw_, (cout, cin, 2, 2), jnp.float32) / jnp.sqrt(4.0 * cin)
        return w, 0.01 * jax.random.normal(kb_, (cout,), jnp.float32)

    def lin(kw_, kb_, dout, din):
        w = jax.random.normal(kw_, (dout, din), jnp.float32) / jnp.sqrt(float(din))
        return w, 0.01 * jax.random.normal(kb_, (dout,), jnp.float32)

    c1w, c1b = conv(ks[0], ks[1], 16, 3)
    c2w, c2b = conv(ks[2], ks[3], 32, 16)
    c3w, c3b = conv(ks[4], ks[5], 64, 32)
    f1w, f1b = lin(ks[6], ks[7], 512, 64 * 5 * 5)
    f2w, f2b = lin(ks[8], ks[9], 256, 512)
    f3w, f3b = lin(ks[10], ks[11], 128, 256)
    f4w, f4b = lin(ks[12], ks[13], 8, 128)
    return dict(conv1_w=c1w, conv1_b=c1b, conv2_w=c2w, conv2_b=c2b,
                conv3_w=c3w, conv3_b=c3b, fc1_w=f1w, fc1_b=f1b,
                fc2_w=f2w, fc2_b=f2b, fc3_w=f3w, fc3_b=f3b, fc4_w=f4w, fc4_b=f4b)


def convert_params(tp):
    """Torch-layout weights -> kernel layouts (one-time cost, amortized over forwards)."""
    def conv_w(w):                       # (Cout,Cin,2,2) -> (4*Cin, Cout), rows (kh,kw,cin)
        cout, cin = w.shape[0], w.shape[1]
        return jnp.transpose(w, (2, 3, 1, 0)).reshape(4 * cin, cout)

    def row(v):
        return v.reshape(1, -1)

    # fc1: torch rows index the flattened NCHW features as (c, h, w); permute once to
    # (h*5+w, c, out) so the NHWC conv3 output is consumed with no runtime flatten/transpose.
    f1 = jnp.transpose(tp["fc1_w"].reshape(512, 64, 5, 5), (2, 3, 1, 0)).reshape(25, 64, 512)

    return {
        "w1": conv_w(tp["conv1_w"]), "b1": row(tp["conv1_b"]),
        "w2": conv_w(tp["conv2_w"]), "b2": row(tp["conv2_b"]),
        "w3": conv_w(tp["conv3_w"]), "b3": row(tp["conv3_b"]),
        "fc1_w": f1,                              "fc1_b": row(tp["fc1_b"]),
        "fc2_w": jnp.transpose(tp["fc2_w"]),      "fc2_b": row(tp["fc2_b"]),
        "fc3_w": jnp.transpose(tp["fc3_w"]),      "fc3_b": row(tp["fc3_b"]),
        "fc4_w": jnp.transpose(tp["fc4_w"]),      "fc4_b": row(tp["fc4_b"]),
    }


# --------------------------------------------------------------------------- #
# Independent pure-JAX reference (torch semantics) for a correctness check.    #
# --------------------------------------------------------------------------- #
def reference_forward(x, tp):
    prec = jax.lax.Precision.HIGHEST

    def conv_relu(z, w, bias):
        y = jax.lax.conv_general_dilated(
            z, w, window_strides=(1, 1), padding="VALID",
            dimension_numbers=("NCHW", "OIHW", "NCHW"), precision=prec)
        return jnp.maximum(y + bias[None, :, None, None], 0.0)

    def pool(z):
        n, c, h, w = z.shape
        return z.reshape(n, c, h // 2, 2, w // 2, 2).max(axis=(3, 5))

    def fc(z, w, bias, relu=True):
        y = jnp.dot(z, w.T, precision=prec) + bias
        return jnp.maximum(y, 0.0) if relu else y

    x = pool(conv_relu(x, tp["conv1_w"], tp["conv1_b"]))
    x = pool(conv_relu(x, tp["conv2_w"], tp["conv2_b"]))
    x = conv_relu(x, tp["conv3_w"], tp["conv3_b"])
    x = x.reshape(x.shape[0], -1)                                  # torch NCHW flatten
    x = fc(x, tp["fc1_w"], tp["fc1_b"])
    x = fc(x, tp["fc2_w"], tp["fc2_b"])
    x = fc(x, tp["fc3_w"], tp["fc3_b"])
    return fc(x, tp["fc4_w"], tp["fc4_b"], relu=False)


if __name__ == "__main__":
    key = jax.random.PRNGKey(0)
    pkey, xkey = jax.random.split(key)
    torch_params = init_torch_params(pkey)
    params = convert_params(torch_params)

    # fc1 expects 64*5*5 features => input spatial must be 27x27 (NCHW, 3 channels)
    x = jax.random.normal(xkey, (2, 3, 27, 27), jnp.float32)

    out = jax.block_until_ready(jax.jit(cnn_forward)(x, params))
    assert out.shape == (2, 8) and out.dtype == jnp.float32

    ref = jax.block_until_ready(reference_forward(x, torch_params))
    err = float(jnp.max(jnp.abs(out - ref)))
    assert err <= 5e-3 * (1.0 + float(jnp.max(jnp.abs(ref)))), f"mismatch: {err}"

    print("KERNEL_OK")
</pallas_src>

<mosaic_0001>
module attributes {stable_mosaic.version = 11 : i64} {
  func.func @_conv_pool_kernel(%arg0: i32, %arg1: memref<4x338x12xf32, #tpu.memory_space<vmem>>, %arg2: memref<12x16xf32, #tpu.memory_space<vmem>>, %arg3: memref<1x16xf32, #tpu.memory_space<vmem>>, %arg4: memref<338x16xf32, #tpu.memory_space<vmem>>) attributes {dimension_semantics = [#tpu.dimension_semantics<parallel>], iteration_bounds = array<i64: 1>, scalar_prefetch = 0 : i64, scratch_operands = 0 : i64, tpu.core_type = #tpu.core_type<tc>, window_params = [{transform_indices = @transform_0, window_bounds = array<i64: 4, 338, 12>}, {pipeline_mode = #tpu.pipeline_mode<synchronous>, transform_indices = @transform_1, window_bounds = array<i64: 12, 16>}, {pipeline_mode = #tpu.pipeline_mode<synchronous>, transform_indices = @transform_2, window_bounds = array<i64: 1, 16>}, {transform_indices = @transform_3, window_bounds = array<i64: 338, 16>}]} {
    %c0 = arith.constant 0 : index
    %c0_0 = arith.constant 0 : index
    %0 = vector.load %arg2[%c0, %c0_0] : memref<12x16xf32, #tpu.memory_space<vmem>>, vector<12x16xf32>
    %c0_1 = arith.constant 0 : index
    %c0_2 = arith.constant 0 : index
    %c0_3 = arith.constant 0 : index
    %1 = vector.load %arg1[%c0_1, %c0_2, %c0_3] : memref<4x338x12xf32, #tpu.memory_space<vmem>>, vector<1x338x12xf32>
    %2 = vector.shape_cast %1 : vector<1x338x12xf32> to vector<338x12xf32>
    %cst = arith.constant dense<0.000000e+00> : vector<338x16xf32>
    %3 = tpu.matmul %2, %0, %cst {dimension_numbers = #tpu.dot_dimension_numbers<[1], [0], [0], [1], [0, 0, 1, 1], [], []>} : vector<338x12xf32>, vector<12x16xf32>, vector<338x16xf32> -> vector<338x16xf32>
    %c1 = arith.constant 1 : index
    %c0_4 = arith.constant 0 : index
    %c0_5 = arith.constant 0 : index
    %4 = vector.load %arg1[%c1, %c0_4, %c0_5] : memref<4x338x12xf32, #tpu.memory_space<vmem>>, vector<1x338x12xf32>
    %5 = vector.shape_cast %4 : vector<1x338x12xf32> to vector<338x12xf32>
    %cst_6 = arith.constant dense<0.000000e+00> : vector<338x16xf32>
    %6 = tpu.matmul %5, %0, %cst_6 {dimension_numbers = #tpu.dot_dimension_numbers<[1], [0], [0], [1], [0, 0, 1, 1], [], []>} : vector<338x12xf32>, vector<12x16xf32>, vector<338x16xf32> -> vector<338x16xf32>
    %7 = arith.maximumf %3, %6 : vector<338x16xf32>
    %c2 = arith.constant 2 : index
    %c0_7 = arith.constant 0 : index
    %c0_8 = arith.constant 0 : index
    %8 = vector.load %arg1[%c2, %c0_7, %c0_8] : memref<4x338x12xf32, #tpu.memory_space<vmem>>, vector<1x338x12xf32>
    %9 = vector.shape_cast %8 : vector<1x338x12xf32> to vector<338x12xf32>
    %cst_9 = arith.constant dense<0.000000e+00> : vector<338x16xf32>
    %10 = tpu.matmul %9, %0, %cst_9 {dimension_numbers = #tpu.dot_dimension_numbers<[1], [0], [0], [1], [0, 0, 1, 1], [], []>} : vector<338x12xf32>, vector<12x16xf32>, vector<338x16xf32> -> vector<338x16xf32>
    %11 = arith.maximumf %7, %10 : vector<338x16xf32>
    %c3 = arith.constant 3 : index
    %c0_10 = arith.constant 0 : index
    %c0_11 = arith.constant 0 : index
    %12 = vector.load %arg1[%c3, %c0_10, %c0_11] : memref<4x338x12xf32, #tpu.memory_space<vmem>>, vector<1x338x12xf32>
    %13 = vector.shape_cast %12 : vector<1x338x12xf32> to vector<338x12xf32>
    %cst_12 = arith.constant dense<0.000000e+00> : vector<338x16xf32>
    %14 = tpu.matmul %13, %0, %cst_12 {dimension_numbers = #tpu.dot_dimension_numbers<[1], [0], [0], [1], [0, 0, 1, 1], [], []>} : vector<338x12xf32>, vector<12x16xf32>, vector<338x16xf32> -> vector<338x16xf32>
    %15 = arith.maximumf %11, %14 : vector<338x16xf32>
    %c0_13 = arith.constant 0 : index
    %c0_14 = arith.constant 0 : index
    %16 = vector.load %arg3[%c0_13, %c0_14] : memref<1x16xf32, #tpu.memory_space<vmem>>, vector<1x16xf32>
    %17 = vector.broadcast %16 : vector<1x16xf32> to vector<338x16xf32>
    %18 = arith.addf %15, %17 : vector<338x16xf32>
    %cst_15 = arith.constant 0.000000e+00 : f32
    %19 = vector.broadcast %cst_15 : f32 to vector<338x16xf32>
    %20 = arith.maximumf %18, %19 : vector<338x16xf32>
    %c0_16 = arith.constant 0 : index
    %c0_17 = arith.constant 0 : index
    %21 = vector.load %arg4[%c0_16, %c0_17] : memref<338x16xf32, #tpu.memory_space<vmem>>, vector<338x16xf32>
    tpu.vector_store %arg4[%c0_16, %c0_17], %20 {strides = array<i32>} : memref<338x16xf32, #tpu.memory_space<vmem>>, vector<338x16xf32>,
    return
  }
  func.func @transform_0(%arg0: i32) -> (i32, i32, i32) {
    %c0_i32 = arith.constant 0 : i32
    %c0_i32_0 = arith.constant 0 : i32
    %c0_i32_1 = arith.constant 0 : i32
    return %c0_i32, %arg0, %c0_i32_0 : i32, i32, i32
  }
  func.func @transform_1(%arg0: i32) -> (i32, i32) {
    %c0_i32 = arith.constant 0 : i32
    %c0_i32_0 = arith.constant 0 : i32
    %c0_i32_1 = arith.constant 0 : i32
    return %c0_i32, %c0_i32_0 : i32, i32
  }
  func.func @transform_2(%arg0: i32) -> (i32, i32) {
    %c0_i32 = arith.constant 0 : i32
    %c0_i32_0 = arith.constant 0 : i32
    %c0_i32_1 = arith.constant 0 : i32
    return %c0_i32, %c0_i32_0 : i32, i32
  }
  func.func @transform_3(%arg0: i32) -> (i32, i32) {
    %c0_i32 = arith.constant 0 : i32
    %c0_i32_0 = arith.constant 0 : i32
    return %arg0, %c0_i32 : i32, i32
  }
}

module attributes {stable_mosaic.version = 11 : i64} {
  func.func @_conv_pool_kernel(%arg0: i32, %arg1: memref<4x72x64xf32, #tpu.memory_space<vmem>>, %arg2: memref<64x32xf32, #tpu.memory_space<vmem>>, %arg3: memref<1x32xf32, #tpu.memory_space<vmem>>, %arg4: memref<72x32xf32, #tpu.memory_space<vmem>>) attributes {dimension_semantics = [#tpu.dimension_semantics<parallel>], iteration_bounds = array<i64: 1>, scalar_prefetch = 0 : i64, scratch_operands = 0 : i64, tpu.core_type = #tpu.core_type<tc>, window_params = [{transform_indices = @transform_0, window_bounds = array<i64: 4, 72, 64>}, {pipeline_mode = #tpu.pipeline_mode<synchronous>, transform_indices = @transform_1, window_bounds = array<i64: 64, 32>}, {pipeline_mode = #tpu.pipeline_mode<synchronous>, transform_indices = @transform_2, window_bounds = array<i64: 1, 32>}, {transform_indices = @transform_3, window_bounds = array<i64: 72, 32>}]} {
    %c0 = arith.constant 0 : index
    %c0_0 = arith.constant 0 : index
    %0 = vector.load %arg2[%c0, %c0_0] : memref<64x32xf32, #tpu.memory_space<vmem>>, vector<64x32xf32>
    %c0_1 = arith.constant 0 : index
    %c0_2 = arith.constant 0 : index
    %c0_3 = arith.constant 0 : index
    %1 = vector.load %arg1[%c0_1, %c0_2, %c0_3] : memref<4x72x64xf32, #tpu.memory_space<vmem>>, vector<1x72x64xf32>
    %2 = vector.shape_cast %1 : vector<1x72x64xf32> to vector<72x64xf32>
    %cst = arith.constant dense<0.000000e+00> : vector<72x32xf32>
    %3 = tpu.matmul %2, %0, %cst {dimension_numbers = #tpu.dot_dimension_numbers<[1], [0], [0], [1], [0, 0, 1, 1], [], []>} : vector<72x64xf32>, vector<64x32xf32>, vector<72x32xf32> -> vector<72x32xf32>
    %c1 = arith.constant 1 : index
    %c0_4 = arith.constant 0 : index
    %c0_5 = arith.constant 0 : index
    %4 = vector.load %arg1[%c1, %c0_4, %c0_5] : memref<4x72x64xf32, #tpu.memory_space<vmem>>, vector<1x72x64xf32>
    %5 = vector.shape_cast %4 : vector<1x72x64xf32> to vector<72x64xf32>
    %cst_6 = arith.constant dense<0.000000e+00> : vector<72x32xf32>
    %6 = tpu.matmul %5, %0, %cst_6 {dimension_numbers = #tpu.dot_dimension_numbers<[1], [0], [0], [1], [0, 0, 1, 1], [], []>} : vector<72x64xf32>, vector<64x32xf32>, vector<72x32xf32> -> vector<72x32xf32>
    %7 = arith.maximumf %3, %6 : vector<72x32xf32>
    %c2 = arith.constant 2 : index
    %c0_7 = arith.constant 0 : index
    %c0_8 = arith.constant 0 : index
    %8 = vector.load %arg1[%c2, %c0_7, %c0_8] : memref<4x72x64xf32, #tpu.memory_space<vmem>>, vector<1x72x64xf32>
    %9 = vector.shape_cast %8 : vector<1x72x64xf32> to vector<72x64xf32>
    %cst_9 = arith.constant dense<0.000000e+00> : vector<72x32xf32>
    %10 = tpu.matmul %9, %0, %cst_9 {dimension_numbers = #tpu.dot_dimension_numbers<[1], [0], [0], [1], [0, 0, 1, 1], [], []>} : vector<72x64xf32>, vector<64x32xf32>, vector<72x32xf32> -> vector<72x32xf32>
    %11 = arith.maximumf %7, %10 : vector<72x32xf32>
    %c3 = arith.constant 3 : index
    %c0_10 = arith.constant 0 : index
    %c0_11 = arith.constant 0 : index
    %12 = vector.load %arg1[%c3, %c0_10, %c0_11] : memref<4x72x64xf32, #tpu.memory_space<vmem>>, vector<1x72x64xf32>
    %13 = vector.shape_cast %12 : vector<1x72x64xf32> to vector<72x64xf32>
    %cst_12 = arith.constant dense<0.000000e+00> : vector<72x32xf32>
    %14 = tpu.matmul %13, %0, %cst_12 {dimension_numbers = #tpu.dot_dimension_numbers<[1], [0], [0], [1], [0, 0, 1, 1], [], []>} : vector<72x64xf32>, vector<64x32xf32>, vector<72x32xf32> -> vector<72x32xf32>
    %15 = arith.maximumf %11, %14 : vector<72x32xf32>
    %c0_13 = arith.constant 0 : index
    %c0_14 = arith.constant 0 : index
    %16 = vector.load %arg3[%c0_13, %c0_14] : memref<1x32xf32, #tpu.memory_space<vmem>>, vector<1x32xf32>
    %17 = vector.broadcast %16 : vector<1x32xf32> to vector<72x32xf32>
    %18 = arith.addf %15, %17 : vector<72x32xf32>
    %cst_15 = arith.constant 0.000000e+00 : f32
    %19 = vector.broadcast %cst_15 : f32 to vector<72x32xf32>
    %20 = arith.maximumf %18, %19 : vector<72x32xf32>
    %c0_16 = arith.constant 0 : index
    %c0_17 = arith.constant 0 : index
    %21 = vector.load %arg4[%c0_16, %c0_17] : memref<72x32xf32, #tpu.memory_space<vmem>>, vector<72x32xf32>
    tpu.vector_store %arg4[%c0_16, %c0_17], %20 {strides = array<i32>} : memref<72x32xf32, #tpu.memory_space<vmem>>, vector<72x32xf32>,
    return
  }
  func.func @transform_0(%arg0: i32) -> (i32, i32, i32) {
    %c0_i32 = arith.constant 0 : i32
    %c0_i32_0 = arith.constant 0 : i32
    %c0_i32_1 = arith.constant 0 : i32
    return %c0_i32, %arg0, %c0_i32_0 : i32, i32, i32
  }
  func.func @transform_1(%arg0: i32) -> (i32, i32) {
    %c0_i32 = arith.constant 0 : i32
    %c0_i32_0 = arith.constant 0 : i32
    %c0_i32_1 = arith.constant 0 : i32
    return %c0_i32, %c0_i32_0 : i32, i32
  }
  func.func @transform_2(%arg0: i32) -> (i32, i32) {
    %c0_i32 = arith.constant 0 : i32
    %c0_i32_0 = arith.constant 0 : i32
    %c0_i32_1 = arith.constant 0 : i32
    return %c0_i32, %c0_i32_0 : i32, i32
  }
  func.func @transform_3(%arg0: i32) -> (i32, i32) {
    %c0_i32 = arith.constant 0 : i32
    %c0_i32_0 = arith.constant 0 : i32
    return %arg0, %c0_i32 : i32, i32
  }
}

module attributes {stable_mosaic.version = 11 : i64} {
  func.func @_head_kernel(%arg0: i32, %arg1: memref<25x2x128xf32, #tpu.memory_space<vmem>>, %arg2: memref<128x64xf32, #tpu.memory_space<vmem>>, %arg3: memref<1x64xf32, #tpu.memory_space<vmem>>, %arg4: memref<25x64x512xf32, #tpu.memory_space<vmem>>, %arg5: memref<1x512xf32, #tpu.memory_space<vmem>>, %arg6: memref<512x256xf32, #tpu.memory_space<vmem>>, %arg7: memref<1x256xf32, #tpu.memory_space<vmem>>, %arg8: memref<256x128xf32, #tpu.memory_space<vmem>>, %arg9: memref<1x128xf32, #tpu.memory_space<vmem>>, %arg10: memref<128x8xf32, #tpu.memory_space<vmem>>, %arg11: memref<1x8xf32, #tpu.memory_space<vmem>>, %arg12: memref<2x8xf32, #tpu.memory_space<vmem>>) attributes {dimension_semantics = [#tpu.dimension_semantics<parallel>], iteration_bounds = array<i64: 1>, scalar_prefetch = 0 : i64, scratch_operands = 0 : i64, tpu.core_type = #tpu.core_type<tc>, window_params = [{transform_indices = @transform_0, window_bounds = array<i64: 25, 2, 128>}, {pipeline_mode = #tpu.pipeline_mode<synchronous>, transform_indices = @transform_1, window_bounds = array<i64: 128, 64>}, {pipeline_mode = #tpu.pipeline_mode<synchronous>, transform_indices = @transform_2, window_bounds = array<i64: 1, 64>}, {pipeline_mode = #tpu.pipeline_mode<synchronous>, transform_indices = @transform_3, window_bounds = array<i64: 25, 64, 512>}, {pipeline_mode = #tpu.pipeline_mode<synchronous>, transform_indices = @transform_4, window_bounds = array<i64: 1, 512>}, {pipeline_mode = #tpu.pipeline_mode<synchronous>, transform_indices = @transform_5, window_bounds = array<i64: 512, 256>}, {pipeline_mode = #tpu.pipeline_mode<synchronous>, transform_indices = @transform_6, window_bounds = array<i64: 1, 256>}, {pipeline_mode = #tpu.pipeline_mode<synchronous>, transform_indices = @transform_7, window_bounds = array<i64: 256, 128>}, {pipeline_mode = #tpu.pipeline_mode<synchronous>, transform_indices = @transform_8, window_bounds = array<i64: 1, 128>}, {pipeline_mode = #tpu.pipeline_mode<synchronous>, transform_indices = @transform_9, window_bounds = array<i64: 128, 8>}, {pipeline_mode = #tpu.pipeline_mode<synchronous>, transform_indices = @transform_10, window_bounds = array<i64: 1, 8>}, {transform_indices = @transform_11, window_bounds = array<i64: 2, 8>}]} {
    %c0 = arith.constant 0 : index
    %c0_0 = arith.constant 0 : index
    %0 = vector.load %arg2[%c0, %c0_0] : memref<128x64xf32, #tpu.memory_space<vmem>>, vector<128x64xf32>
    %c0_1 = arith.constant 0 : index
    %c0_2 = arith.constant 0 : index
    %1 = vector.load %arg3[%c0_1, %c0_2] : memref<1x64xf32, #tpu.memory_space<vmem>>, vector<1x64xf32>
    %cst = arith.constant 0.000000e+00 : f32
    %2 = vector.broadcast %cst : f32 to vector<2x512xf32>
    %c0_3 = arith.constant 0 : index
    %c0_4 = arith.constant 0 : index
    %c0_5 = arith.constant 0 : index
    %3 = vector.load %arg1[%c0_3, %c0_4, %c0_5] : memref<25x2x128xf32, #tpu.memory_space<vmem>>, vector<1x2x128xf32>
    %4 = vector.shape_cast %3 : vector<1x2x128xf32> to vector<2x128xf32>
    %cst_6 = arith.constant dense<0.000000e+00> : vector<2x64xf32>
    %5 = tpu.matmul %4, %0, %cst_6 {dimension_numbers = #tpu.dot_dimension_numbers<[1], [0], [0], [1], [0, 0, 1, 1], [], []>} : vector<2x128xf32>, vector<128x64xf32>, vector<2x64xf32> -> vector<2x64xf32>
    %6 = vector.broadcast %1 : vector<1x64xf32> to vector<2x64xf32>
    %7 = arith.addf %5, %6 : vector<2x64xf32>
    %cst_7 = arith.constant 0.000000e+00 : f32
    %8 = vector.broadcast %cst_7 : f32 to vector<2x64xf32>
    %9 = arith.maximumf %7, %8 : vector<2x64xf32>
    %c0_8 = arith.constant 0 : index
    %c0_9 = arith.constant 0 : index
    %c0_10 = arith.constant 0 : index
    %10 = vector.load %arg4[%c0_8, %c0_9, %c0_10] : memref<25x64x512xf32, #tpu.memory_space<vmem>>, vector<1x64x512xf32>
    %11 = vector.shape_cast %10 : vector<1x64x512xf32> to vector<64x512xf32>
    %cst_11 = arith.constant dense<0.000000e+00> : vector<2x512xf32>
    %12 = tpu.matmul %9, %11, %cst_11 {dimension_numbers = #tpu.dot_dimension_numbers<[1], [0], [0], [1], [0, 0, 1, 1], [], []>} : vector<2x64xf32>, vector<64x512xf32>, vector<2x512xf32> -> vector<2x512xf32>
    %13 = arith.addf %2, %12 : vector<2x512xf32>
    %c1 = arith.constant 1 : index
    %c0_12 = arith.constant 0 : index
    %c0_13 = arith.constant 0 : index
    %14 = vector.load %arg1[%c1, %c0_12, %c0_13] : memref<25x2x128xf32, #tpu.memory_space<vmem>>, vector<1x2x128xf32>
    %15 = vector.shape_cast %14 : vector<1x2x128xf32> to vector<2x128xf32>
    %cst_14 = arith.constant dense<0.000000e+00> : vector<2x64xf32>
    %16 = tpu.matmul %15, %0, %cst_14 {dimension_numbers = #tpu.dot_dimension_numbers<[1], [0], [0], [1], [0, 0, 1, 1], [], []>} : vector<2x128xf32>, vector<128x64xf32>, vector<2x64xf32> -> vector<2x64xf32>
    %17 = vector.broadcast %1 : vector<1x64xf32> to vector<2x64xf32>
    %18 = arith.addf %16, %17 : vector<2x64xf32>
    %cst_15 = arith.constant 0.000000e+00 : f32
    %19 = vector.broadcast %cst_15 : f32 to vector<2x64xf32>
    %20 = arith.maximumf %18, %19 : vector<2x64xf32>
    %c1_16 = arith.constant 1 : index
    %c0_17 = arith.constant 0 : index
    %c0_18 = arith.constant 0 : index
    %21 = vector.load %arg4[%c1_16, %c0_17, %c0_18] : memref<25x64x512xf32, #tpu.memory_space<vmem>>, vector<1x64x512xf32>
    %22 = vector.shape_cast %21 : vector<1x64x512xf32> to vector<64x512xf32>
    %cst_19 = arith.constant dense<0.000000e+00> : vector<2x512xf32>
    %23 = tpu.matmul %20, %22, %cst_19 {dimension_numbers = #tpu.dot_dimension_numbers<[1], [0], [0], [1], [0, 0, 1, 1], [], []>} : vector<2x64xf32>, vector<64x512xf32>, vector<2x512xf32> -> vector<2x512xf32>
    %24 = arith.addf %13, %23 : vector<2x512xf32>
    %c2 = arith.constant 2 : index
    %c0_20 = arith.constant 0 : index
    %c0_21 = arith.constant 0 : index
    %25 = vector.load %arg1[%c2, %c0_20, %c0_21] : memref<25x2x128xf32, #tpu.memory_space<vmem>>, vector<1x2x128xf32>
    %26 = vector.shape_cast %25 : vector<1x2x128xf32> to vector<2x128xf32>
    %cst_22 = arith.constant dense<0.000000e+00> : vector<2x64xf32>
    %27 = tpu.matmul %26, %0, %cst_22 {dimension_numbers = #tpu.dot_dimension_numbers<[1], [0], [0], [1], [0, 0, 1, 1], [], []>} : vector<2x128xf32>, vector<128x64xf32>, vector<2x64xf32> -> vector<2x64xf32>
    %28 = vector.broadcast %1 : vector<1x64xf32> to vector<2x64xf32>
    %29 = arith.addf %27, %28 : vector<2x64xf32>
    %cst_23 = arith.constant 0.000000e+00 : f32
    %30 = vector.broadcast %cst_23 : f32 to vector<2x64xf32>
    %31 = arith.maximumf %29, %30 : vector<2x64xf32>
    %c2_24 = arith.constant 2 : index
    %c0_25 = arith.constant 0 : index
    %c0_26 = arith.constant 0 : index
    %32 = vector.load %arg4[%c2_24, %c0_25, %c0_26] : memref<25x64x512xf32, #tpu.memory_space<vmem>>, vector<1x64x512xf32>
    %33 = vector.shape_cast %32 : vector<1x64x512xf32> to vector<64x512xf32>
    %cst_27 = arith.constant dense<0.000000e+00> : vector<2x512xf32>
    %34 = tpu.matmul %31, %33, %cst_27 {dimension_numbers = #tpu.dot_dimension_numbers<[1], [0], [0], [1], [0, 0, 1, 1], [], []>} : vector<2x64xf32>, vector<64x512xf32>, vector<2x512xf32> -> vector<2x512xf32>
    %35 = arith.addf %24, %34 : vector<2x512xf32>
    %c3 = arith.constant 3 : index
    %c0_28 = arith.constant 0 : index
    %c0_29 = arith.constant 0 : index
    %36 = vector.load %arg1[%c3, %c0_28, %c0_29] : memref<25x2x128xf32, #tpu.memory_space<vmem>>, vector<1x2x128xf32>
    %37 = vector.shape_cast %36 : vector<1x2x128xf32> to vector<2x128xf32>
    %cst_30 = arith.constant dense<0.000000e+00> : vector<2x64xf32>
    %38 = tpu.matmul %37, %0, %cst_30 {dimension_numbers = #tpu.dot_dimension_numbers<[1], [0], [0], [1], [0, 0, 1, 1], [], []>} : vector<2x128xf32>, vector<128x64xf32>, vector<2x64xf32> -> vector<2x64xf32>
    %39 = vector.broadcast %1 : vector<1x64xf32> to vector<2x64xf32>
    %40 = arith.addf %38, %39 : vector<2x64xf32>
    %cst_31 = arith.constant 0.000000e+00 : f32
    %41 = vector.broadcast %cst_31 : f32 to vector<2x64xf32>
    %42 = arith.maximumf %40, %41 : vector<2x64xf32>
    %c3_32 = arith.constant 3 : index
    %c0_33 = arith.constant 0 : index
    %c0_34 = arith.constant 0 : index
    %43 = vector.load %arg4[%c3_32, %c0_33, %c0_34] : memref<25x64x512xf32, #tpu.memory_space<vmem>>, vector<1x64x512xf32>
    %44 = vector.shape_cast %43 : vector<1x64x512xf32> to vector<64x512xf32>
    %cst_35 = arith.constant dense<0.000000e+00> : vector<2x512xf32>
    %45 = tpu.matmul %42, %44, %cst_35 {dimension_numbers = #tpu.dot_dimension_numbers<[1], [0], [0], [1], [0, 0, 1, 1], [], []>} : vector<2x64xf32>, vector<64x512xf32>, vector<2x512xf32> -> vector<2x512xf32>
    %46 = arith.addf %35, %45 : vector<2x512xf32>
    %c4 = arith.constant 4 : index
    %c0_36 = arith.constant 0 : index
    %c0_37 = arith.constant 0 : index
    %47 = vector.load %arg1[%c4, %c0_36, %c0_37] : memref<25x2x128xf32, #tpu.memory_space<vmem>>, vector<1x2x128xf32>
    %48 = vector.shape_cast %47 : vector<1x2x128xf32> to vector<2x128xf32>
    %cst_38 = arith.constant dense<0.000000e+00> : vector<2x64xf32>
    %49 = tpu.matmul %48, %0, %cst_38 {dimension_numbers = #tpu.dot_dimension_numbers<[1], [0], [0], [1], [0, 0, 1, 1], [], []>} : vector<2x128xf32>, vector<128x64xf32>, vector<2x64xf32> -> vector<2x64xf32>
    %50 = vector.broadcast %1 : vector<1x64xf32> to vector<2x64xf32>
    %51 = arith.addf %49, %50 : vector<2x64xf32>
    %cst_39 = arith.constant 0.000000e+00 : f32
    %52 = vector.broadcast %cst_39 : f32 to vector<2x64xf32>
    %53 = arith.maximumf %51, %52 : vector<2x64xf32>
    %c4_40 = arith.constant 4 : index
    %c0_41 = arith.constant 0 : index
    %c0_42 = arith.constant 0 : index
    %54 = vector.load %arg4[%c4_40, %c0_41, %c0_42] : memref<25x64x512xf32, #tpu.memory_space<vmem>>, vector<1x64x512xf32>
    %55 = vector.shape_cast %54 : vector<1x64x512xf32> to vector<64x512xf32>
    %cst_43 = arith.constant dense<0.000000e+00> : vector<2x512xf32>
    %56 = tpu.matmul %53, %55, %cst_43 {dimension_numbers = #tpu.dot_dimension_numbers<[1], [0], [0], [1], [0, 0, 1, 1], [], []>} : vector<2x64xf32>, vector<64x512xf32>, vector<2x512xf32> -> vector<2x512xf32>
    %57 = arith.addf %46, %56 : vector<2x512xf32>
    %c5 = arith.constant 5 : index
    %c0_44 = arith.constant 0 : index
    %c0_45 = arith.constant 0 : index
    %58 = vector.load %arg1[%c5, %c0_44, %c0_45] : memref<25x2x128xf32, #tpu.memory_space<vmem>>, vector<1x2x128xf32>
    %59 = vector.shape_cast %58 : vector<1x2x128xf32> to vector<2x128xf32>
    %cst_46 = arith.constant dense<0.000000e+00> : vector<2x64xf32>
    %60 = tpu.matmul %59, %0, %cst_46 {dimension_numbers = #tpu.dot_dimension_numbers<[1], [0], [0], [1], [0, 0, 1, 1], [], []>} : vector<2x128xf32>, vector<128x64xf32>, vector<2x64xf32> -> vector<2x64xf32>
    %61 = vector.broadcast %1 : vector<1x64xf32> to vector<2x64xf32>
    %62 = arith.addf %60, %61 : vector<2x64xf32>
    %cst_47 = arith.constant 0.000000e+00 : f32
    %63 = vector.broadcast %cst_47 : f32 to vector<2x64xf32>
    %64 = arith.maximumf %62, %63 : vector<2x64xf32>
    %c5_48 = arith.constant 5 : index
    %c0_49 = arith.constant 0 : index
    %c0_50 = arith.constant 0 : index
    %65 = vector.load %arg4[%c5_48, %c0_49, %c0_50] : memref<25x64x512xf32, #tpu.memory_space<vmem>>, vector<1x64x512xf32>
    %66 = vector.shape_cast %65 : vector<1x64x512xf32> to vector<64x512xf32>
    %cst_51 = arith.constant dense<0.000000e+00> : vector<2x512xf32>
    %67 = tpu.matmul %64, %66, %cst_51 {dimension_numbers = #tpu.dot_dimension_numbers<[1], [0], [0], [1], [0, 0, 1, 1], [], []>} : vector<2x64xf32>, vector<64x512xf32>, vector<2x512xf32> -> vector<2x512xf32>
    %68 = arith.addf %57, %67 : vector<2x512xf32>
    %c6 = arith.constant 6 : index
    %c0_52 = arith.constant 0 : index
    %c0_53 = arith.constant 0 : index
    %69 = vector.load %arg1[%c6, %c0_52, %c0_53] : memref<25x2x128xf32, #tpu.memory_space<vmem>>, vector<1x2x128xf32>
    %70 = vector.shape_cast %69 : vector<1x2x128xf32> to vector<2x128xf32>
    %cst_54 = arith.constant dense<0.000000e+00> : vector<2x64xf32>
    %71 = tpu.matmul %70, %0, %cst_54 {dimension_numbers = #tpu.dot_dimension_numbers<[1], [0], [0], [1], [0, 0, 1, 1], [], []>} : vector<2x128xf32>, vector<128x64xf32>, vector<2x64xf32> -> vector<2x64xf32>
    %72 = vector.broadcast %1 : vector<1x64xf32> to vector<2x64xf32>
    %73 = arith.addf %71, %72 : vector<2x64xf32>
    %cst_55 = arith.constant 0.000000e+00 : f32
    %74 = vector.broadcast %cst_55 : f32 to vector<2x64xf32>
    %75 = arith.maximumf %73, %74 : vector<2x64xf32>
    %c6_56 = arith.constant 6 : index
    %c0_57 = arith.constant 0 : index
    %c0_58 = arith.constant 0 : index
    %76 = vector.load %arg4[%c6_56, %c0_57, %c0_58] : memref<25x64x512xf32, #tpu.memory_space<vmem>>, vector<1x64x512xf32>
    %77 = vector.shape_cast %76 : vector<1x64x512xf32> to vector<64x512xf32>
    %cst_59 = arith.constant dense<0.000000e+00> : vector<2x512xf32>
    %78 = tpu.matmul %75, %77, %cst_59 {dimension_numbers = #tpu.dot_dimension_numbers<[1], [0], [0], [1], [0, 0, 1, 1], [], []>} : vector<2x64xf32>, vector<64x512xf32>, vector<2x512xf32> -> vector<2x512xf32>
    %79 = arith.addf %68, %78 : vector<2x512xf32>
    %c7 = arith.constant 7 : index
    %c0_60 = arith.constant 0 : index
    %c0_61 = arith.constant 0 : index
    %80 = vector.load %arg1[%c7, %c0_60, %c0_61] : memref<25x2x128xf32, #tpu.memory_space<vmem>>, vector<1x2x128xf32>
    %81 = vector.shape_cast %80 : vector<1x2x128xf32> to vector<2x128xf32>
    %cst_62 = arith.constant dense<0.000000e+00> : vector<2x64xf32>
    %82 = tpu.matmul %81, %0, %cst_62 {dimension_numbers = #tpu.dot_dimension_numbers<[1], [0], [0], [1], [0, 0, 1, 1], [], []>} : vector<2x128xf32>, vector<128x64xf32>, vector<2x64xf32> -> vector<2x64xf32>
    %83 = vector.broadcast %1 : vector<1x64xf32> to vector<2x64xf32>
    %84 = arith.addf %82, %83 : vector<2x64xf32>
    %cst_63 = arith.constant 0.000000e+00 : f32
    %85 = vector.broadcast %cst_63 : f32 to vector<2x64xf32>
    %86 = arith.maximumf %84, %85 : vector<2x64xf32>
    %c7_64 = arith.constant 7 : index
    %c0_65 = arith.constant 0 : index
    %c0_66 = arith.constant 0 : index
    %87 = vector.load %arg4[%c7_64, %c0_65, %c0_66] : memref<25x64x512xf32, #tpu.memory_space<vmem>>, vector<1x64x512xf32>
    %88 = vector.shape_cast %87 : vector<1x64x512xf32> to vector<64x512xf32>
    %cst_67 = arith.constant dense<0.000000e+00> : vector<2x512xf32>
    %89 = tpu.matmul %86, %88, %cst_67 {dimension_numbers = #tpu.dot_dimension_numbers<[1], [0], [0], [1], [0, 0, 1, 1], [], []>} : vector<2x64xf32>, vector<64x512xf32>, vector<2x512xf32> -> vector<2x512xf32>
    %90 = arith.addf %79, %89 : vector<2x512xf32>
    %c8 = arith.constant 8 : index
    %c0_68 = arith.constant 0 : index
    %c0_69 = arith.constant 0 : index
    %91 = vector.load %arg1[%c8, %c0_68, %c0_69] : memref<25x2x128xf32, #tpu.memory_space<vmem>>, vector<1x2x128xf32>
    %92 = vector.shape_cast %91 : vector<1x2x128xf32> to vector<2x128xf32>
    %cst_70 = arith.constant dense<0.000000e+00> : vector<2x64xf32>
    %93 = tpu.matmul %92, %0, %cst_70 {dimension_numbers = #tpu.dot_dimension_numbers<[1], [0], [0], [1], [0, 0, 1, 1], [], []>} : vector<2x128xf32>, vector<128x64xf32>, vector<2x64xf32> -> vector<2x64xf32>
    %94 = vector.broadcast %1 : vector<1x64xf32> to vector<2x64xf32>
    %95 = arith.addf %93, %94 : vector<2x64xf32>
    %cst_71 = arith.constant 0.000000e+00 : f32
    %96 = vector.broadcast %cst_71 : f32 to vector<2x64xf32>
    %97 = arith.maximumf %95, %96 : vector<2x64xf32>
    %c8_72 = arith.constant 8 : index
    %c0_73 = arith.constant 0 : index
    %c0_74 = arith.constant 0 : index
    %98 = vector.load %arg4[%c8_72, %c0_73, %c0_74] : memref<25x64x512xf32, #tpu.memory_space<vmem>>, vector<1x64x512xf32>
    %99 = vector.shape_cast %98 : vector<1x64x512xf32> to vector<64x512xf32>
    %cst_75 = arith.constant dense<0.000000e+00> : vector<2x512xf32>
    %100 = tpu.matmul %97, %99, %cst_75 {dimension_numbers = #tpu.dot_dimension_numbers<[1], [0], [0], [1], [0, 0, 1, 1], [], []>} : vector<2x64xf32>, vector<64x512xf32>, vector<2x512xf32> -> vector<2x512xf32>
    %101 = arith.addf %90, %100 : vector<2x512xf32>
    %c9 = arith.constant 9 : index
    %c0_76 = arith.constant 0 : index
    %c0_77 = arith.constant 0 : index
    %102 = vector.load %arg1[%c9, %c0_76, %c0_77] : memref<25x2x128xf32, #tpu.memory_space<vmem>>, vector<1x2x128xf32>
    %103 = vector.shape_cast %102 : vector<1x2x128xf32> to vector<2x128xf32>
    %cst_78 = arith.constant dense<0.000000e+00> : vector<2x64xf32>
    %104 = tpu.matmul %103, %0, %cst_78 {dimension_numbers = #tpu.dot_dimension_numbers<[1], [0], [0], [1], [0, 0, 1, 1], [], []>} : vector<2x128xf32>, vector<128x64xf32>, vector<2x64xf32> -> vector<2x64xf32>
    %105 = vector.broadcast %1 : vector<1x64xf32> to vector<2x64xf32>
    %106 = arith.addf %104, %105 : vector<2x64xf32>
    %cst_79 = arith.constant 0.000000e+00 : f32
    %107 = vector.broadcast %cst_79 : f32 to vector<2x64xf32>
    %108 = arith.maximumf %106, %107 : vector<2x64xf32>
    %c9_80 = arith.constant 9 : index
    %c0_81 = arith.constant 0 : index
    %c0_82 = arith.constant 0 : index
    %109 = vector.load %arg4[%c9_80, %c0_81, %c0_82] : memref<25x64x512xf32, #tpu.memory_space<vmem>>, vector<1x64x512xf32>
    %110 = vector.shape_cast %109 : vector<1x64x512xf32> to vector<64x512xf32>
    %cst_83 = arith.constant dense<0.000000e+00> : vector<2x512xf32>
    %111 = tpu.matmul %108, %110, %cst_83 {dimension_numbers = #tpu.dot_dimension_numbers<[1], [0], [0], [1], [0, 0, 1, 1], [], []>} : vector<2x64xf32>, vector<64x512xf32>, vector<2x512xf32> -> vector<2x512xf32>
    %112 = arith.addf %101, %111 : vector<2x512xf32>
    %c10 = arith.constant 10 : index
    %c0_84 = arith.constant 0 : index
    %c0_85 = arith.constant 0 : index
    %113 = vector.load %arg1[%c10, %c0_84, %c0_85] : memref<25x2x128xf32, #tpu.memory_space<vmem>>, vector<1x2x128xf32>
    %114 = vector.shape_cast %113 : vector<1x2x128xf32> to vector<2x128xf32>
    %cst_86 = arith.constant dense<0.000000e+00> : vector<2x64xf32>
    %115 = tpu.matmul %114, %0, %cst_86 {dimension_numbers = #tpu.dot_dimension_numbers<[1], [0], [0], [1], [0, 0, 1, 1], [], []>} : vector<2x128xf32>, vector<128x64xf32>, vector<2x64xf32> -> vector<2x64xf32>
    %116 = vector.broadcast %1 : vector<1x64xf32> to vector<2x64xf32>
    %117 = arith.addf %115, %116 : vector<2x64xf32>
    %cst_87 = arith.constant 0.000000e+00 : f32
    %118 = vector.broadcast %cst_87 : f32 to vector<2x64xf32>
    %119 = arith.maximumf %117, %118 : vector<2x64xf32>
    %c10_88 = arith.constant 10 : index
    %c0_89 = arith.constant 0 : index
    %c0_90 = arith.constant 0 : index
    %120 = vector.load %arg4[%c10_88, %c0_89, %c0_90] : memref<25x64x512xf32, #tpu.memory_space<vmem>>, vector<1x64x512xf32>
    %121 = vector.shape_cast %120 : vector<1x64x512xf32> to vector<64x512xf32>
    %cst_91 = arith.constant dense<0.000000e+00> : vector<2x512xf32>
    %122 = tpu.matmul %119, %121, %cst_91 {dimension_numbers = #tpu.dot_dimension_numbers<[1], [0], [0], [1], [0, 0, 1, 1], [], []>} : vector<2x64xf32>, vector<64x512xf32>, vector<2x512xf32> -> vector<2x512xf32>
    %123 = arith.addf %112, %122 : vector<2x512xf32>
    %c11 = arith.constant 11 : index
    %c0_92 = arith.constant 0 : index
    %c0_93 = arith.constant 0 : index
    %124 = vector.load %arg1[%c11, %c0_92, %c0_93] : memref<25x2x128xf32, #tpu.memory_space<vmem>>, vector<1x2x128xf32>
    %125 = vector.shape_cast %124 : vector<1x2x128xf32> to vector<2x128xf32>
    %cst_94 = arith.constant dense<0.000000e+00> : vector<2x64xf32>
    %126 = tpu.matmul %125, %0, %cst_94 {dimension_numbers = #tpu.dot_dimension_numbers<[1], [0], [0], [1], [0, 0, 1, 1], [], []>} : vector<2x128xf32>, vector<128x64xf32>, vector<2x64xf32> -> vector<2x64xf32>
    %127 = vector.broadcast %1 : vector<1x64xf32> to vector<2x64xf32>
    %128 = arith.addf %126, %127 : vector<2x64xf32>
    %cst_95 = arith.constant 0.000000e+00 : f32
    %129 = vector.broadcast %cst_95 : f32 to vector<2x64xf32>
    %130 = arith.maximumf %128, %129 : vector<2x64xf32>
    %c11_96 = arith.constant 11 : index
    %c0_97 = arith.constant 0 : index
    %c0_98 = arith.constant 0 : index
    %131 = vector.load %arg4[%c11_96, %c0_97, %c0_98] : memref<25x64x512xf32, #tpu.memory_space<vmem>>, vector<1x64x512xf32>
    %132 = vector.shape_cast %131 : vector<1x64x512xf32> to vector<64x512xf32>
    %cst_99 = arith.constant dense<0.000000e+00> : vector<2x512xf32>
    %133 = tpu.matmul %130, %132, %cst_99 {dimension_numbers = #tpu.dot_dimension_numbers<[1], [0], [0], [1], [0, 0, 1, 1], [], []>} : vector<2x64xf32>, vector<64x512xf32>, vector<2x512xf32> -> vector<2x512xf32>
    %134 = arith.addf %123, %133 : vector<2x512xf32>
    %c12 = arith.constant 12 : index
    %c0_100 = arith.constant 0 : index
    %c0_101 = arith.constant 0 : index
    %135 = vector.load %arg1[%c12, %c0_100, %c0_101] : memref<25x2x128xf32, #tpu.memory_space<vmem>>, vector<1x2x128xf32>
    %136 = vector.shape_cast %135 : vector<1x2x128xf32> to vector<2x128xf32>
    %cst_102 = arith.constant dense<0.000000e+00> : vector<2x64xf32>
    %137 = tpu.matmul %136, %0, %cst_102 {dimension_numbers = #tpu.dot_dimension_numbers<[1], [0], [0], [1], [0, 0, 1, 1], [], []>} : vector<2x128xf32>, vector<128x64xf32>, vector<2x64xf32> -> vector<2x64xf32>
    %138 = vector.broadcast %1 : vector<1x64xf32> to vector<2x64xf32>
    %139 = arith.addf %137, %138 : vector<2x64xf32>
    %cst_103 = arith.constant 0.000000e+00 : f32
    %140 = vector.broadcast %cst_103 : f32 to vector<2x64xf32>
    %141 = arith.maximumf %139, %140 : vector<2x64xf32>
    %c12_104 = arith.constant 12 : index
    %c0_105 = arith.constant 0 : index
    %c0_106 = arith.constant 0 : index
    %142 = vector.load %arg4[%c12_104, %c0_105, %c0_106] : memref<25x64x512xf32, #tpu.memory_space<vmem>>, vector<1x64x512xf32>
    %143 = vector.shape_cast %142 : vector<1x64x512xf32> to vector<64x512xf32>
    %cst_107 = arith.constant dense<0.000000e+00> : vector<2x512xf32>
    %144 = tpu.matmul %141, %143, %cst_107 {dimension_numbers = #tpu.dot_dimension_numbers<[1], [0], [0], [1], [0, 0, 1, 1], [], []>} : vector<2x64xf32>, vector<64x512xf32>, vector<2x512xf32> -> vector<2x512xf32>
    %145 = arith.addf %134, %144 : vector<2x512xf32>
    %c13 = arith.constant 13 : index
    %c0_108 = arith.constant 0 : index
    %c0_109 = arith.constant 0 : index
    %146 = vector.load %arg1[%c13, %c0_108, %c0_109] : memref<25x2x128xf32, #tpu.memory_space<vmem>>, vector<1x2x128xf32>
    %147 = vector.shape_cast %146 : vector<1x2x128xf32> to vector<2x128xf32>
    %cst_110 = arith.constant dense<0.000000e+00> : vector<2x64xf32>
    %148 = tpu.matmul %147, %0, %cst_110 {dimension_numbers = #tpu.dot_dimension_numbers<[1], [0], [0], [1], [0, 0, 1, 1], [], []>} : vector<2x128xf32>, vector<128x64xf32>, vector<2x64xf32> -> vector<2x64xf32>
    %149 = vector.broadcast %1 : vector<1x64xf32> to vector<2x64xf32>
    %150 = arith.addf %148, %149 : vector<2x64xf32>
    %cst_111 = arith.constant 0.000000e+00 : f32
    %151 = vector.broadcast %cst_111 : f32 to vector<2x64xf32>
    %152 = arith.maximumf %150, %151 : vector<2x64xf32>
    %c13_112 = arith.constant 13 : index
    %c0_113 = arith.constant 0 : index
    %c0_114 = arith.constant 0 : index
    %153 = vector.load %arg4[%c13_112, %c0_113, %c0_114] : memref<25x64x512xf32, #tpu.memory_space<vmem>>, vector<1x64x512xf32>
    %154 = vector.shape_cast %153 : vector<1x64x512xf32> to vector<64x512xf32>
    %cst_115 = arith.constant dense<0.000000e+00> : vector<2x512xf32>
    %155 = tpu.matmul %152, %154, %cst_115 {dimension_numbers = #tpu.dot_dimension_numbers<[1], [0], [0], [1], [0, 0, 1, 1], [], []>} : vector<2x64xf32>, vector<64x512xf32>, vector<2x512xf32> -> vector<2x512xf32>
    %156 = arith.addf %145, %155 : vector<2x512xf32>
    %c14 = arith.constant 14 : index
    %c0_116 = arith.constant 0 : index
    %c0_117 = arith.constant 0 : index
    %157 = vector.load %arg1[%c14, %c0_116, %c0_117] : memref<25x2x128xf32, #tpu.memory_space<vmem>>, vector<1x2x128xf32>
    %158 = vector.shape_cast %157 : vector<1x2x128xf32> to vector<2x128xf32>
    %cst_118 = arith.constant dense<0.000000e+00> : vector<2x64xf32>
    %159 = tpu.matmul %158, %0, %cst_118 {dimension_numbers = #tpu.dot_dimension_numbers<[1], [0], [0], [1], [0, 0, 1, 1], [], []>} : vector<2x128xf32>, vector<128x64xf32>, vector<2x64xf32> -> vector<2x64xf32>
    %160 = vector.broadcast %1 : vector<1x64xf32> to vector<2x64xf32>
    %161 = arith.addf %159, %160 : vector<2x64xf32>
    %cst_119 = arith.constant 0.000000e+00 : f32
    %162 = vector.broadcast %cst_119 : f32 to vector<2x64xf32>
    %163 = arith.maximumf %161, %162 : vector<2x64xf32>
    %c14_120 = arith.constant 14 : index
    %c0_121 = arith.constant 0 : index
    %c0_122 = arith.constant 0 : index
    %164 = vector.load %arg4[%c14_120, %c0_121, %c0_122] : memref<25x64x512xf32, #tpu.memory_space<vmem>>, vector<1x64x512xf32>
    %165 = vector.shape_cast %164 : vector<1x64x512xf32> to vector<64x512xf32>
    %cst_123 = arith.constant dense<0.000000e+00> : vector<2x512xf32>
    %166 = tpu.matmul %163, %165, %cst_123 {dimension_numbers = #tpu.dot_dimension_numbers<[1], [0], [0], [1], [0, 0, 1, 1], [], []>} : vector<2x64xf32>, vector<64x512xf32>, vector<2x512xf32> -> vector<2x512xf32>
    %167 = arith.addf %156, %166 : vector<2x512xf32>
    %c15 = arith.constant 15 : index
    %c0_124 = arith.constant 0 : index
    %c0_125 = arith.constant 0 : index
    %168 = vector.load %arg1[%c15, %c0_124, %c0_125] : memref<25x2x128xf32, #tpu.memory_space<vmem>>, vector<1x2x128xf32>
    %169 = vector.shape_cast %168 : vector<1x2x128xf32> to vector<2x128xf32>
    %cst_126 = arith.constant dense<0.000000e+00> : vector<2x64xf32>
    %170 = tpu.matmul %169, %0, %cst_126 {dimension_numbers = #tpu.dot_dimension_numbers<[1], [0], [0], [1], [0, 0, 1, 1], [], []>} : vector<2x128xf32>, vector<128x64xf32>, vector<2x64xf32> -> vector<2x64xf32>
    %171 = vector.broadcast %1 : vector<1x64xf32> to vector<2x64xf32>
    %172 = arith.addf %170, %171 : vector<2x64xf32>
    %cst_127 = arith.constant 0.000000e+00 : f32
    %173 = vector.broadcast %cst_127 : f32 to vector<2x64xf32>
    %174 = arith.maximumf %172, %173 : vector<2x64xf32>
    %c15_128 = arith.constant 15 : index
    %c0_129 = arith.constant 0 : index
    %c0_130 = arith.constant 0 : index
    %175 = vector.load %arg4[%c15_128, %c0_129, %c0_130] : memref<25x64x512xf32, #tpu.memory_space<vmem>>, vector<1x64x512xf32>
    %176 = vector.shape_cast %175 : vector<1x64x512xf32> to vector<64x512xf32>
    %cst_131 = arith.constant dense<0.000000e+00> : vector<2x512xf32>
    %177 = tpu.matmul %174, %176, %cst_131 {dimension_numbers = #tpu.dot_dimension_numbers<[1], [0], [0], [1], [0, 0, 1, 1], [], []>} : vector<2x64xf32>, vector<64x512xf32>, vector<2x512xf32> -> vector<2x512xf32>
    %178 = arith.addf %167, %177 : vector<2x512xf32>
    %c16 = arith.constant 16 : index
    %c0_132 = arith.constant 0 : index
    %c0_133 = arith.constant 0 : index
    %179 = vector.load %arg1[%c16, %c0_132, %c0_133] : memref<25x2x128xf32, #tpu.memory_space<vmem>>, vector<1x2x128xf32>
    %180 = vector.shape_cast %179 : vector<1x2x128xf32> to vector<2x128xf32>
    %cst_134 = arith.constant dense<0.000000e+00> : vector<2x64xf32>
    %181 = tpu.matmul %180, %0, %cst_134 {dimension_numbers = #tpu.dot_dimension_numbers<[1], [0], [0], [1], [0, 0, 1, 1], [], []>} : vector<2x128xf32>, vector<128x64xf32>, vector<2x64xf32> -> vector<2x64xf32>
    %182 = vector.broadcast %1 : vector<1x64xf32> to vector<2x64xf32>
    %183 = arith.addf %181, %182 : vector<2x64xf32>
    %cst_135 = arith.constant 0.000000e+00 : f32
    %184 = vector.broadcast %cst_135 : f32 to vector<2x64xf32>
    %185 = arith.maximumf %183, %184 : vector<2x64xf32>
    %c16_136 = arith.constant 16 : index
    %c0_137 = arith.constant 0 : index
    %c0_138 = arith.constant 0 : index
    %186 = vector.load %arg4[%c16_136, %c0_137, %c0_138] : memref<25x64x512xf32, #tpu.memory_space<vmem>>, vector<1x64x512xf32>
    %187 = vector.shape_cast %186 : vector<1x64x512xf32> to vector<64x512xf32>
    %cst_139 = arith.constant dense<0.000000e+00> : vector<2x512xf32>
    %188 = tpu.matmul %185, %187, %cst_139 {dimension_numbers = #tpu.dot_dimension_numbers<[1], [0], [0], [1], [0, 0, 1, 1], [], []>} : vector<2x64xf32>, vector<64x512xf32>, vector<2x512xf32> -> vector<2x512xf32>
    %189 = arith.addf %178, %188 : vector<2x512xf32>
    %c17 = arith.constant 17 : index
    %c0_140 = arith.constant 0 : index
    %c0_141 = arith.constant 0 : index
    %190 = vector.load %arg1[%c17, %c0_140, %c0_141] : memref<25x2x128xf32, #tpu.memory_space<vmem>>, vector<1x2x128xf32>
    %191 = vector.shape_cast %190 : vector<1x2x128xf32> to vector<2x128xf32>
    %cst_142 = arith.constant dense<0.000000e+00> : vector<2x64xf32>
    %192 = tpu.matmul %191, %0, %cst_142 {dimension_numbers = #tpu.dot_dimension_numbers<[1], [0], [0], [1], [0, 0, 1, 1], [], []>} : vector<2x128xf32>, vector<128x64xf32>, vector<2x64xf32> -> vector<2x64xf32>
    %193 = vector.broadcast %1 : vector<1x64xf32> to vector<2x64xf32>
    %194 = arith.addf %192, %193 : vector<2x64xf32>
    %cst_143 = arith.constant 0.000000e+00 : f32
    %195 = vector.broadcast %cst_143 : f32 to vector<2x64xf32>
    %196 = arith.maximumf %194, %195 : vector<2x64xf32>
    %c17_144 = arith.constant 17 : index
    %c0_145 = arith.constant 0 : index
    %c0_146 = arith.constant 0 : index
    %197 = vector.load %arg4[%c17_144, %c0_145, %c0_146] : memref<25x64x512xf32, #tpu.memory_space<vmem>>, vector<1x64x512xf32>
    %198 = vector.shape_cast %197 : vector<1x64x512xf32> to vector<64x512xf32>
    %cst_147 = arith.constant dense<0.000000e+00> : vector<2x512xf32>
    %199 = tpu.matmul %196, %198, %cst_147 {dimension_numbers = #tpu.dot_dimension_numbers<[1], [0], [0], [1], [0, 0, 1, 1], [], []>} : vector<2x64xf32>, vector<64x512xf32>, vector<2x512xf32> -> vector<2x512xf32>
    %200 = arith.addf %189, %199 : vector<2x512xf32>
    %c18 = arith.constant 18 : index
    %c0_148 = arith.constant 0 : index
    %c0_149 = arith.constant 0 : index
    %201 = vector.load %arg1[%c18, %c0_148, %c0_149] : memref<25x2x128xf32, #tpu.memory_space<vmem>>, vector<1x2x128xf32>
    %202 = vector.shape_cast %201 : vector<1x2x128xf32> to vector<2x128xf32>
    %cst_150 = arith.constant dense<0.000000e+00> : vector<2x64xf32>
    %203 = tpu.matmul %202, %0, %cst_150 {dimension_numbers = #tpu.dot_dimension_numbers<[1], [0], [0], [1], [0, 0, 1, 1], [], []>} : vector<2x128xf32>, vector<128x64xf32>, vector<2x64xf32> -> vector<2x64xf32>
    %204 = vector.broadcast %1 : vector<1x64xf32> to vector<2x64xf32>
    %205 = arith.addf %203, %204 : vector<2x64xf32>
    %cst_151 = arith.constant 0.000000e+00 : f32
    %206 = vector.broadcast %cst_151 : f32 to vector<2x64xf32>
    %207 = arith.maximumf %205, %206 : vector<2x64xf32>
    %c18_152 = arith.constant 18 : index
    %c0_153 = arith.constant 0 : index
    %c0_154 = arith.constant 0 : index
    %208 = vector.load %arg4[%c18_152, %c0_153, %c0_154] : memref<25x64x512xf32, #tpu.memory_space<vmem>>, vector<1x64x512xf32>
    %209 = vector.shape_cast %208 : vector<1x64x512xf32> to vector<64x512xf32>
    %cst_155 = arith.constant dense<0.000000e+00> : vector<2x512xf32>
    %210 = tpu.matmul %207, %209, %cst_155 {dimension_numbers = #tpu.dot_dimension_numbers<[1], [0], [0], [1], [0, 0, 1, 1], [], []>} : vector<2x64xf32>, vector<64x512xf32>, vector<2x512xf32> -> vector<2x512xf32>
    %211 = arith.addf %200, %210 : vector<2x512xf32>
    %c19 = arith.constant 19 : index
    %c0_156 = arith.constant 0 : index
    %c0_157 = arith.constant 0 : index
    %212 = vector.load %arg1[%c19, %c0_156, %c0_157] : memref<25x2x128xf32, #tpu.memory_space<vmem>>, vector<1x2x128xf32>
    %213 = vector.shape_cast %212 : vector<1x2x128xf32> to vector<2x128xf32>
    %cst_158 = arith.constant dense<0.000000e+00> : vector<2x64xf32>
    %214 = tpu.matmul %213, %0, %cst_158 {dimension_numbers = #tpu.dot_dimension_numbers<[1], [0], [0], [1], [0, 0, 1, 1], [], []>} : vector<2x128xf32>, vector<128x64xf32>, vector<2x64xf32> -> vector<2x64xf32>
    %215 = vector.broadcast %1 : vector<1x64xf32> to vector<2x64xf32>
    %216 = arith.addf %214, %215 : vector<2x64xf32>
    %cst_159 = arith.constant 0.000000e+00 : f32
    %217 = vector.broadcast %cst_159 : f32 to vector<2x64xf32>
    %218 = arith.maximumf %216, %217 : vector<2x64xf32>
    %c19_160 = arith.constant 19 : index
    %c0_161 = arith.constant 0 : index
    %c0_162 = arith.constant 0 : index
    %219 = vector.load %arg4[%c19_160, %c0_161, %c0_162] : memref<25x64x512xf32, #tpu.memory_space<vmem>>, vector<1x64x512xf32>
    %220 = vector.shape_cast %219 : vector<1x64x512xf32> to vector<64x512xf32>
    %cst_163 = arith.constant dense<0.000000e+00> : vector<2x512xf32>
    %221 = tpu.matmul %218, %220, %cst_163 {dimension_numbers = #tpu.dot_dimension_numbers<[1], [0], [0], [1], [0, 0, 1, 1], [], []>} : vector<2x64xf32>, vector<64x512xf32>, vector<2x512xf32> -> vector<2x512xf32>
    %222 = arith.addf %211, %221 : vector<2x512xf32>
    %c20 = arith.constant 20 : index
    %c0_164 = arith.constant 0 : index
    %c0_165 = arith.constant 0 : index
    %223 = vector.load %arg1[%c20, %c0_164, %c0_165] : memref<25x2x128xf32, #tpu.memory_space<vmem>>, vector<1x2x128xf32>
    %224 = vector.shape_cast %223 : vector<1x2x128xf32> to vector<2x128xf32>
    %cst_166 = arith.constant dense<0.000000e+00> : vector<2x64xf32>
    %225 = tpu.matmul %224, %0, %cst_166 {dimension_numbers = #tpu.dot_dimension_numbers<[1], [0], [0], [1], [0, 0, 1, 1], [], []>} : vector<2x128xf32>, vector<128x64xf32>, vector<2x64xf32> -> vector<2x64xf32>
    %226 = vector.broadcast %1 : vector<1x64xf32> to vector<2x64xf32>
    %227 = arith.addf %225, %226 : vector<2x64xf32>
    %cst_167 = arith.constant 0.000000e+00 : f32
    %228 = vector.broadcast %cst_167 : f32 to vector<2x64xf32>
    %229 = arith.maximumf %227, %228 : vector<2x64xf32>
    %c20_168 = arith.constant 20 : index
    %c0_169 = arith.constant 0 : index
    %c0_170 = arith.constant 0 : index
    %230 = vector.load %arg4[%c20_168, %c0_169, %c0_170] : memref<25x64x512xf32, #tpu.memory_space<vmem>>, vector<1x64x512xf32>
    %231 = vector.shape_cast %230 : vector<1x64x512xf32> to vector<64x512xf32>
    %cst_171 = arith.constant dense<0.000000e+00> : vector<2x512xf32>
    %232 = tpu.matmul %229, %231, %cst_171 {dimension_numbers = #tpu.dot_dimension_numbers<[1], [0], [0], [1], [0, 0, 1, 1], [], []>} : vector<2x64xf32>, vector<64x512xf32>, vector<2x512xf32> -> vector<2x512xf32>
    %233 = arith.addf %222, %232 : vector<2x512xf32>
    %c21 = arith.constant 21 : index
    %c0_172 = arith.constant 0 : index
    %c0_173 = arith.constant 0 : index
    %234 = vector.load %arg1[%c21, %c0_172, %c0_173] : memref<25x2x128xf32, #tpu.memory_space<vmem>>, vector<1x2x128xf32>
    %235 = vector.shape_cast %234 : vector<1x2x128xf32> to vector<2x128xf32>
    %cst_174 = arith.constant dense<0.000000e+00> : vector<2x64xf32>
    %236 = tpu.matmul %235, %0, %cst_174 {dimension_numbers = #tpu.dot_dimension_numbers<[1], [0], [0], [1], [0, 0, 1, 1], [], []>} : vector<2x128xf32>, vector<128x64xf32>, vector<2x64xf32> -> vector<2x64xf32>
    %237 = vector.broadcast %1 : vector<1x64xf32> to vector<2x64xf32>
    %238 = arith.addf %236, %237 : vector<2x64xf32>
    %cst_175 = arith.constant 0.000000e+00 : f32
    %239 = vector.broadcast %cst_175 : f32 to vector<2x64xf32>
    %240 = arith.maximumf %238, %239 : vector<2x64xf32>
    %c21_176 = arith.constant 21 : index
    %c0_177 = arith.constant 0 : index
    %c0_178 = arith.constant 0 : index
    %241 = vector.load %arg4[%c21_176, %c0_177, %c0_178] : memref<25x64x512xf32, #tpu.memory_space<vmem>>, vector<1x64x512xf32>
    %242 = vector.shape_cast %241 : vector<1x64x512xf32> to vector<64x512xf32>
    %cst_179 = arith.constant dense<0.000000e+00> : vector<2x512xf32>
    %243 = tpu.matmul %240, %242, %cst_179 {dimension_numbers = #tpu.dot_dimension_numbers<[1], [0], [0], [1], [0, 0, 1, 1], [], []>} : vector<2x64xf32>, vector<64x512xf32>, vector<2x512xf32> -> vector<2x512xf32>
    %244 = arith.addf %233, %243 : vector<2x512xf32>
    %c22 = arith.constant 22 : index
    %c0_180 = arith.constant 0 : index
    %c0_181 = arith.constant 0 : index
    %245 = vector.load %arg1[%c22, %c0_180, %c0_181] : memref<25x2x128xf32, #tpu.memory_space<vmem>>, vector<1x2x128xf32>
    %246 = vector.shape_cast %245 : vector<1x2x128xf32> to vector<2x128xf32>
    %cst_182 = arith.constant dense<0.000000e+00> : vector<2x64xf32>
    %247 = tpu.matmul %246, %0, %cst_182 {dimension_numbers = #tpu.dot_dimension_numbers<[1], [0], [0], [1], [0, 0, 1, 1], [], []>} : vector<2x128xf32>, vector<128x64xf32>, vector<2x64xf32> -> vector<2x64xf32>
    %248 = vector.broadcast %1 : vector<1x64xf32> to vector<2x64xf32>
    %249 = arith.addf %247, %248 : vector<2x64xf32>
    %cst_183 = arith.constant 0.000000e+00 : f32
    %250 = vector.broadcast %cst_183 : f32 to vector<2x64xf32>
    %251 = arith.maximumf %249, %250 : vector<2x64xf32>
    %c22_184 = arith.constant 22 : index
    %c0_185 = arith.constant 0 : index
    %c0_186 = arith.constant 0 : index
    %252 = vector.load %arg4[%c22_184, %c0_185, %c0_186] : memref<25x64x512xf32, #tpu.memory_space<vmem>>, vector<1x64x512xf32>
    %253 = vector.shape_cast %252 : vector<1x64x512xf32> to vector<64x512xf32>
    %cst_187 = arith.constant dense<0.000000e+00> : vector<2x512xf32>
    %254 = tpu.matmul %251, %253, %cst_187 {dimension_numbers = #tpu.dot_dimension_numbers<[1], [0], [0], [1], [0, 0, 1, 1], [], []>} : vector<2x64xf32>, vector<64x512xf32>, vector<2x512xf32> -> vector<2x512xf32>
    %255 = arith.addf %244, %254 : vector<2x512xf32>
    %c23 = arith.constant 23 : index
    %c0_188 = arith.constant 0 : index
    %c0_189 = arith.constant 0 : index
    %256 = vector.load %arg1[%c23, %c0_188, %c0_189] : memref<25x2x128xf32, #tpu.memory_space<vmem>>, vector<1x2x128xf32>
    %257 = vector.shape_cast %256 : vector<1x2x128xf32> to vector<2x128xf32>
    %cst_190 = arith.constant dense<0.000000e+00> : vector<2x64xf32>
    %258 = tpu.matmul %257, %0, %cst_190 {dimension_numbers = #tpu.dot_dimension_numbers<[1], [0], [0], [1], [0, 0, 1, 1], [], []>} : vector<2x128xf32>, vector<128x64xf32>, vector<2x64xf32> -> vector<2x64xf32>
    %259 = vector.broadcast %1 : vector<1x64xf32> to vector<2x64xf32>
    %260 = arith.addf %258, %259 : vector<2x64xf32>
    %cst_191 = arith.constant 0.000000e+00 : f32
    %261 = vector.broadcast %cst_191 : f32 to vector<2x64xf32>
    %262 = arith.maximumf %260, %261 : vector<2x64xf32>
    %c23_192 = arith.constant 23 : index
    %c0_193 = arith.constant 0 : index
    %c0_194 = arith.constant 0 : index
    %263 = vector.load %arg4[%c23_192, %c0_193, %c0_194] : memref<25x64x512xf32, #tpu.memory_space<vmem>>, vector<1x64x512xf32>
    %264 = vector.shape_cast %263 : vector<1x64x512xf32> to vector<64x512xf32>
    %cst_195 = arith.constant dense<0.000000e+00> : vector<2x512xf32>
    %265 = tpu.matmul %262, %264, %cst_195 {dimension_numbers = #tpu.dot_dimension_numbers<[1], [0], [0], [1], [0, 0, 1, 1], [], []>} : vector<2x64xf32>, vector<64x512xf32>, vector<2x512xf32> -> vector<2x512xf32>
    %266 = arith.addf %255, %265 : vector<2x512xf32>
    %c24 = arith.constant 24 : index
    %c0_196 = arith.constant 0 : index
    %c0_197 = arith.constant 0 : index
    %267 = vector.load %arg1[%c24, %c0_196, %c0_197] : memref<25x2x128xf32, #tpu.memory_space<vmem>>, vector<1x2x128xf32>
    %268 = vector.shape_cast %267 : vector<1x2x128xf32> to vector<2x128xf32>
    %cst_198 = arith.constant dense<0.000000e+00> : vector<2x64xf32>
    %269 = tpu.matmul %268, %0, %cst_198 {dimension_numbers = #tpu.dot_dimension_numbers<[1], [0], [0], [1], [0, 0, 1, 1], [], []>} : vector<2x128xf32>, vector<128x64xf32>, vector<2x64xf32> -> vector<2x64xf32>
    %270 = vector.broadcast %1 : vector<1x64xf32> to vector<2x64xf32>
    %271 = arith.addf %269, %270 : vector<2x64xf32>
    %cst_199 = arith.constant 0.000000e+00 : f32
    %272 = vector.broadcast %cst_199 : f32 to vector<2x64xf32>
    %273 = arith.maximumf %271, %272 : vector<2x64xf32>
    %c24_200 = arith.constant 24 : index
    %c0_201 = arith.constant 0 : index
    %c0_202 = arith.constant 0 : index
    %274 = vector.load %arg4[%c24_200, %c0_201, %c0_202] : memref<25x64x512xf32, #tpu.memory_space<vmem>>, vector<1x64x512xf32>
    %275 = vector.shape_cast %274 : vector<1x64x512xf32> to vector<64x512xf32>
    %cst_203 = arith.constant dense<0.000000e+00> : vector<2x512xf32>
    %276 = tpu.matmul %273, %275, %cst_203 {dimension_numbers = #tpu.dot_dimension_numbers<[1], [0], [0], [1], [0, 0, 1, 1], [], []>} : vector<2x64xf32>, vector<64x512xf32>, vector<2x512xf32> -> vector<2x512xf32>
    %277 = arith.addf %266, %276 : vector<2x512xf32>
    %c0_204 = arith.constant 0 : index
    %c0_205 = arith.constant 0 : index
    %278 = vector.load %arg5[%c0_204, %c0_205] : memref<1x512xf32, #tpu.memory_space<vmem>>, vector<1x512xf32>
    %279 = vector.broadcast %278 : vector<1x512xf32> to vector<2x512xf32>
    %280 = arith.addf %277, %279 : vector<2x512xf32>
    %cst_206 = arith.constant 0.000000e+00 : f32
    %281 = vector.broadcast %cst_206 : f32 to vector<2x512xf32>
    %282 = arith.maximumf %280, %281 : vector<2x512xf32>
    %c0_207 = arith.constant 0 : index
    %c0_208 = arith.constant 0 : index
    %283 = vector.load %arg6[%c0_207, %c0_208] : memref<512x256xf32, #tpu.memory_space<vmem>>, vector<512x256xf32>
    %cst_209 = arith.constant dense<0.000000e+00> : vector<2x256xf32>
    %284 = tpu.matmul %282, %283, %cst_209 {dimension_numbers = #tpu.dot_dimension_numbers<[1], [0], [0], [1], [0, 0, 1, 1], [], []>} : vector<2x512xf32>, vector<512x256xf32>, vector<2x256xf32> -> vector<2x256xf32>
    %c0_210 = arith.constant 0 : index
    %c0_211 = arith.constant 0 : index
    %285 = vector.load %arg7[%c0_210, %c0_211] : memref<1x256xf32, #tpu.memory_space<vmem>>, vector<1x256xf32>
    %286 = vector.broadcast %285 : vector<1x256xf32> to vector<2x256xf32>
    %287 = arith.addf %284, %286 : vector<2x256xf32>
    %cst_212 = arith.constant 0.000000e+00 : f32
    %288 = vector.broadcast %cst_212 : f32 to vector<2x256xf32>
    %289 = arith.maximumf %287, %288 : vector<2x256xf32>
    %c0_213 = arith.constant 0 : index
    %c0_214 = arith.constant 0 : index
    %290 = vector.load %arg8[%c0_213, %c0_214] : memref<256x128xf32, #tpu.memory_space<vmem>>, vector<256x128xf32>
    %cst_215 = arith.constant dense<0.000000e+00> : vector<2x128xf32>
    %291 = tpu.matmul %289, %290, %cst_215 {dimension_numbers = #tpu.dot_dimension_numbers<[1], [0], [0], [1], [0, 0, 1, 1], [], []>} : vector<2x256xf32>, vector<256x128xf32>, vector<2x128xf32> -> vector<2x128xf32>
    %c0_216 = arith.constant 0 : index
    %c0_217 = arith.constant 0 : index
    %292 = vector.load %arg9[%c0_216, %c0_217] : memref<1x128xf32, #tpu.memory_space<vmem>>, vector<1x128xf32>
    %293 = vector.broadcast %292 : vector<1x128xf32> to vector<2x128xf32>
    %294 = arith.addf %291, %293 : vector<2x128xf32>
    %cst_218 = arith.constant 0.000000e+00 : f32
    %295 = vector.broadcast %cst_218 : f32 to vector<2x128xf32>
    %296 = arith.maximumf %294, %295 : vector<2x128xf32>
    %c0_219 = arith.constant 0 : index
    %c0_220 = arith.constant 0 : index
    %297 = vector.load %arg10[%c0_219, %c0_220] : memref<128x8xf32, #tpu.memory_space<vmem>>, vector<128x8xf32>
    %cst_221 = arith.constant dense<0.000000e+00> : vector<2x8xf32>
    %298 = tpu.matmul %296, %297, %cst_221 {dimension_numbers = #tpu.dot_dimension_numbers<[1], [0], [0], [1], [0, 0, 1, 1], [], []>} : vector<2x128xf32>, vector<128x8xf32>, vector<2x8xf32> -> vector<2x8xf32>
    %c0_222 = arith.constant 0 : index
    %c0_223 = arith.constant 0 : index
    %299 = vector.load %arg11[%c0_222, %c0_223] : memref<1x8xf32, #tpu.memory_space<vmem>>, vector<1x8xf32>
    %300 = vector.broadcast %299 : vector<1x8xf32> to vector<2x8xf32>
    %301 = arith.addf %298, %300 : vector<2x8xf32>
    %c0_224 = arith.constant 0 : index
    %c0_225 = arith.constant 0 : index
    %302 = vector.load %arg12[%c0_224, %c0_225] : memref<2x8xf32, #tpu.memory_space<vmem>>, vector<2x8xf32>
    tpu.vector_store %arg12[%c0_224, %c0_225], %301 {strides = array<i32>} : memref<2x8xf32, #tpu.memory_space<vmem>>, vector<2x8xf32>,
    return
  }
  func.func @transform_0(%arg0: i32) -> (i32, i32, i32) {
    %c0_i32 = arith.constant 0 : i32
    %c0_i32_0 = arith.constant 0 : i32
    %c0_i32_1 = arith.constant 0 : i32
    return %c0_i32, %arg0, %c0_i32_0 : i32, i32, i32
  }
  func.func @transform_1(%arg0: i32) -> (i32, i32) {
    %c0_i32 = arith.constant 0 : i32
    %c0_i32_0 = arith.constant 0 : i32
    %c0_i32_1 = arith.constant 0 : i32
    return %c0_i32, %c0_i32_0 : i32, i32
  }
  func.func @transform_2(%arg0: i32) -> (i32, i32) {
    %c0_i32 = arith.constant 0 : i32
    %c0_i32_0 = arith.constant 0 : i32
    %c0_i32_1 = arith.constant 0 : i32
    return %c0_i32, %c0_i32_0 : i32, i32
  }
  func.func @transform_3(%arg0: i32) -> (i32, i32, i32) {
    %c0_i32 = arith.constant 0 : i32
    %c0_i32_0 = arith.constant 0 : i32
    %c0_i32_1 = arith.constant 0 : i32
    %c0_i32_2 = arith.constant 0 : i32
    return %c0_i32, %c0_i32_0, %c0_i32_1 : i32, i32, i32
  }
  func.func @transform_4(%arg0: i32) -> (i32, i32) {
    %c0_i32 = arith.constant 0 : i32
    %c0_i32_0 = arith.constant 0 : i32
    %c0_i32_1 = arith.constant 0 : i32
    return %c0_i32, %c0_i32_0 : i32, i32
  }
  func.func @transform_5(%arg0: i32) -> (i32, i32) {
    %c0_i32 = arith.constant 0 : i32
    %c0_i32_0 = arith.constant 0 : i32
    %c0_i32_1 = arith.constant 0 : i32
    return %c0_i32, %c0_i32_0 : i32, i32
  }
  func.func @transform_6(%arg0: i32) -> (i32, i32) {
    %c0_i32 = arith.constant 0 : i32
    %c0_i32_0 = arith.constant 0 : i32
    %c0_i32_1 = arith.constant 0 : i32
    return %c0_i32, %c0_i32_0 : i32, i32
  }
  func.func @transform_7(%arg0: i32) -> (i32, i32) {
    %c0_i32 = arith.constant 0 : i32
    %c0_i32_0 = arith.constant 0 : i32
    %c0_i32_1 = arith.constant 0 : i32
    return %c0_i32, %c0_i32_0 : i32, i32
  }
  func.func @transform_8(%arg0: i32) -> (i32, i32) {
    %c0_i32 = arith.constant 0 : i32
    %c0_i32_0 = arith.constant 0 : i32
    %c0_i32_1 = arith.constant 0 : i32
    return %c0_i32, %c0_i32_0 : i32, i32
  }
  func.func @transform_9(%arg0: i32) -> (i32, i32) {
    %c0_i32 = arith.constant 0 : i32
    %c0_i32_0 = arith.constant 0 : i32
    %c0_i32_1 = arith.constant 0 : i32
    return %c0_i32, %c0_i32_0 : i32, i32
  }
  func.func @transform_10(%arg0: i32) -> (i32, i32) {
    %c0_i32 = arith.constant 0 : i32
    %c0_i32_0 = arith.constant 0 : i32
    %c0_i32_1 = arith.constant 0 : i32
    return %c0_i32, %c0_i32_0 : i32, i32
  }
  func.func @transform_11(%arg0: i32) -> (i32, i32) {
    %c0_i32 = arith.constant 0 : i32
    %c0_i32_0 = arith.constant 0 : i32
    return %arg0, %c0_i32 : i32, i32
  }
}

</mosaic_0001>

<bundles_post_ra>
// kernel: cnn_forward.3
= control target key start
LH: loop header
LB: loop body
LE: loop exit
PB: predicated region body
PF: predicated region fallthrough
CT: control target
= control target key end

     0   :  { %vm189_vm0 = vcmask 1043456   ;;  %vm59_vm1 = vcmask 97280   ;;  %vm1515_vm2 = vcmask 130048   ;;  %vm1558_vm3 = vcmask 123904   ;;  %s2809_s1 = inlined_call_operand.vmem [shape: f32[12,16], index: 1, kind: input, shape index: {}]   ;;  %s2810_s0 = inlined_call_operand.vmem [shape: f32[4,338,12], index: 0, kind: input, shape index: {}]   ;;  %s2811_s2 = inlined_call_operand.vmem [shape: f32[1,16], index: 2, kind: input, shape index: {}]   ;;  %s2812_s3 = inlined_call_operand.vmem [shape: f32[338,16], index: 3, kind: output, shape index: {}]  }
   0x1   :  { %v15_v0 = vld [vmem:[%s2809_s1 + $0x8] sm:$0xf]  ;;  %v14_v1 = vld [vmem:[%s2809_s1] sm:$0xff]  ;;  %v1695_v2 = vld [vmem:[%s2810_s0 + $0x2b0] sm:$0xff] }
   0x2   :  { %1738 = vmatpush.msk.msra.mxu2 %vm189_vm0, %v15_v0  ;;  %1825 = vmatpush.msk.msra.mxu3 %vm189_vm0, %v15_v0  ;;  %v1782_v3 = vld [vmem:[%s2810_s0 + $0x408] sm:$0xff]  ;;  %v16_v4 = vld [vmem:[%s2810_s0] sm:$0xff]  ;;  %v1608_v5 = vld [vmem:[%s2810_s0 + $0x158] sm:$0xff] }
   0x3   :  { %1564 = vmatpush.msk.msra.mxu0 %vm189_vm0, %v15_v0  ;;  %1651 = vmatpush.msk.msra.mxu1 %vm189_vm0, %v15_v0  ;;  %v1696_v6 = vld [vmem:[%s2810_s0 + $0x2b8] sm:$0xff]  ;;  %v1783_v7 = vld [vmem:[%s2810_s0 + $0x410] sm:$0xff]  ;;  %v17_v8 = vld [vmem:[%s2810_s0 + $0x8] sm:$0xff] }
   0x4   :  { %889 = vmatpush.msra.mxu2 %v14_v1  ;;  %1251 = vmatpush.msra.mxu3 %v14_v1  ;;  %v1609_v9 = vld [vmem:[%s2810_s0 + $0x160] sm:$0xff]  ;;  %v1784_v11 = vld [vmem:[%s2810_s0 + $0x418] sm:$0xff]  ;;  %v18_v12 = vld [vmem:[%s2810_s0 + $0x10] sm:$0xff] }
   0x5   :  { %1739 = vmatmul.msk.f32.vlgmr.msra.gmra.mxu2 %vm59_vm1, %v1695_v2  ;;  %1826 = vmatmul.msk.f32.vlgmr.msra.gmra.mxu3 %vm59_vm1, %v1782_v3  ;;  %v1697_v10 = vld [vmem:[%s2810_s0 + $0x2c0] sm:$0xff]  ;;  %v1610_v13 = vld [vmem:[%s2810_s0 + $0x168] sm:$0xff]  ;;  %v19_v16 = vld [vmem:[%s2810_s0 + $0x18] sm:$0xff] }
   0x6   :  { %208 = vmatpush.msra.mxu0 %v14_v1  ;;  %527 = vmatpush.msra.mxu1 %v14_v1  ;;  %v1698_v14 = vld [vmem:[%s2810_s0 + $0x2c8] sm:$0xff]  ;;  %v1785_v15 = vld [vmem:[%s2810_s0 + $0x420] sm:$0xff]  ;;  %v1611_v17 = vld [vmem:[%s2810_s0 + $0x170] sm:$0xff] }
   0x7   :  { %1565 = vmatmul.msk.f32.vlgmr.msra.gmra.mxu0 %vm59_vm1, %v16_v4  ;;  %1652 = vmatmul.msk.f32.vlgmr.msra.gmra.mxu1 %vm59_vm1, %v1608_v5  ;;  %v1699_v18 = vld [vmem:[%s2810_s0 + $0x2d0] sm:$0xff]  ;;  %v1786_v19 = vld [vmem:[%s2810_s0 + $0x428] sm:$0xff]  ;;  %v20_v20 = vld [vmem:[%s2810_s0 + $0x20] sm:$0xff] }
   0x8   :  { %v1612_v21 = vld [vmem:[%s2810_s0 + $0x178] sm:$0xff]  ;;  %v1787_v23 = vld [vmem:[%s2810_s0 + $0x430] sm:$0xff]  ;;  %v21_v24 = vld [vmem:[%s2810_s0 + $0x28] sm:$0xff] }
   0x9   :  { %v1700_v22 = vld [vmem:[%s2810_s0 + $0x2d8] sm:$0xff]  ;;  %v1613_v25 = vld [vmem:[%s2810_s0 + $0x180] sm:$0xff]  ;;  %v22_v28 = vld [vmem:[%s2810_s0 + $0x30] sm:$0xff] }
   0xa   :  { %v1701_v26 = vld [vmem:[%s2810_s0 + $0x2e0] sm:$0xff]  ;;  %v1788_v27 = vld [vmem:[%s2810_s0 + $0x438] sm:$0xff]  ;;  %v1614_v29 = vld [vmem:[%s2810_s0 + $0x188] sm:$0xff] }
   0xb   :  { %v1702_v30 = vld [vmem:[%s2810_s0 + $0x2e8] sm:$0xff]  ;;  %v1789_v31 = vld [vmem:[%s2810_s0 + $0x440] sm:$0xff]  ;;  %v23_v32 = vld [vmem:[%s2810_s0 + $0x38] sm:$0xff] }
   0xc   :  { %v1615_v33 = vld [vmem:[%s2810_s0 + $0x190] sm:$0xff]  ;;  %v1790_v35 = vld [vmem:[%s2810_s0 + $0x448] sm:$0xff]  ;;  %v24_v36 = vld [vmem:[%s2810_s0 + $0x40] sm:$0xff] }
   0xd   :  { %1740 = vmatmul.msk.f32.gmra.mxu2 %vm59_vm1, %v1696_v6  ;;  %1827 = vmatmul.msk.f32.gmra.mxu3 %vm59_vm1, %v1783_v7  ;;  %v1703_v34 = vld [vmem:[%s2810_s0 + $0x2f0] sm:$0xff]  ;;  %v1616_v37 = vld [vmem:[%s2810_s0 + $0x198] sm:$0xff]  ;;  %v25_v40 = vld [vmem:[%s2810_s0 + $0x48] sm:$0xff] }
   0xe   :  { %v1704_v38 = vld [vmem:[%s2810_s0 + $0x2f8] sm:$0xff]  ;;  %v1791_v39 = vld [vmem:[%s2810_s0 + $0x450] sm:$0xff]  ;;  %v1617_v41 = vld [vmem:[%s2810_s0 + $0x1a0] sm:$0xff] }
   0xf   :  { %1566 = vmatmul.msk.f32.gmra.mxu0 %vm59_vm1, %v17_v8  ;;  %1653 = vmatmul.msk.f32.gmra.mxu1 %vm59_vm1, %v1609_v9  ;;  %v1705_v42 = vld [vmem:[%s2810_s0 + $0x300] sm:$0xff]  ;;  %v1792_v43 = vld [vmem:[%s2810_s0 + $0x458] sm:$0xff]  ;;  %v26_v44 = vld [vmem:[%s2810_s0 + $0x50] sm:$0xff] }
  0x10   :  { %v1618_v45 = vld [vmem:[%s2810_s0 + $0x1a8] sm:$0xff]  ;;  %v1793_v47 = vld [vmem:[%s2810_s0 + $0x460] sm:$0xff]  ;;  %v27_v48 = vld [vmem:[%s2810_s0 + $0x58] sm:$0xff] }
  0x11   :  { %v1706_v46 = vld [vmem:[%s2810_s0 + $0x308] sm:$0xff]  ;;  %v1619_v49 = vld [vmem:[%s2810_s0 + $0x1b0] sm:$0xff]  ;;  %v28_v52 = vld [vmem:[%s2810_s0 + $0x60] sm:$0xff] }
  0x12   :  { %v1707_v50 = vld [vmem:[%s2810_s0 + $0x310] sm:$0xff]  ;;  %v1794_v51 = vld [vmem:[%s2810_s0 + $0x468] sm:$0xff]  ;;  %v1620_v53 = vld [vmem:[%s2810_s0 + $0x1b8] sm:$0xff] }
  0x13   :  { %v1708_v54 = vld [vmem:[%s2810_s0 + $0x318] sm:$0xff]  ;;  %v1795_v55 = vld [vmem:[%s2810_s0 + $0x470] sm:$0xff]  ;;  %v29_v56 = vld [vmem:[%s2810_s0 + $0x68] sm:$0xff] }
  0x14   :  { %v1621_v57 = vld [vmem:[%s2810_s0 + $0x1c0] sm:$0xff]  ;;  %v1796_v59 = vld [vmem:[%s2810_s0 + $0x478] sm:$0xff]  ;;  %v30_v60 = vld [vmem:[%s2810_s0 + $0x70] sm:$0xff] }
  0x15   :  { %1741 = vmatmul.msk.f32.gmra.mxu2 %vm59_vm1, %v1697_v10  ;;  %1828 = vmatmul.msk.f32.gmra.mxu3 %vm59_vm1, %v1784_v11  ;;  %v1709_v58 = vld [vmem:[%s2810_s0 + $0x320] sm:$0xff]  ;;  %v1622_v61 = vld [vmem:[%s2810_s0 + $0x1c8] sm:$0xff]  ;;  %v31_v0 = vld [vmem:[%s2810_s0 + $0x78] sm:$0xff] }
  0x16   :  { %v1710_v62 = vld [vmem:[%s2810_s0 + $0x328] sm:$0xff]  ;;  %v1797_v63 = vld [vmem:[%s2810_s0 + $0x480] sm:$0xff]  ;;  %v1623_v1 = vld [vmem:[%s2810_s0 + $0x1d0] sm:$0xff] }
  0x17   :  { %1567 = vmatmul.msk.f32.gmra.mxu0 %vm59_vm1, %v18_v12  ;;  %1654 = vmatmul.msk.f32.gmra.mxu1 %vm59_vm1, %v1610_v13  ;;  %v1711_v2 = vld [vmem:[%s2810_s0 + $0x330] sm:$0xff]  ;;  %v1798_v3 = vld [vmem:[%s2810_s0 + $0x488] sm:$0xff]  ;;  %v32_v6 = vld [vmem:[%s2810_s0 + $0x80] sm:$0xff] }
  0x18   :  { %v1624_v7 = vld [vmem:[%s2810_s0 + $0x1d8] sm:$0xff]  ;;  %v2172_v12 = vld [vmem:[%s2811_s2] ss:$0 sm:$0xff] }
  0x19   :  { %v1712_v13 = vld [vmem:[%s2810_s0 + $0x338] sm:$0xff] }
  0x1d   :  { %1742 = vmatmul.msk.f32.gmra.mxu2 %vm59_vm1, %v1698_v14  ;;  %1829 = vmatmul.msk.f32.gmra.mxu3 %vm59_vm1, %v1785_v15  ;;  %v1799_v14 = vld [vmem:[%s2810_s0 + $0x490] sm:$0xff] }
  0x1f   :  { %1568 = vmatmul.msk.f32.gmra.mxu0 %vm59_vm1, %v19_v16  ;;  %1655 = vmatmul.msk.f32.gmra.mxu1 %vm59_vm1, %v1611_v17 }
  0x25   :  { %1743 = vmatmul.msk.f32.gmra.mxu2 %vm59_vm1, %v1699_v18  ;;  %1830 = vmatmul.msk.f32.gmra.mxu3 %vm59_vm1, %v1786_v19  ;;  %v33_v18 = vld [vmem:[%s2810_s0 + $0x88] sm:$0xff]  ;;  %v1625_v19 = vld [vmem:[%s2810_s0 + $0x1e0] sm:$0xff] }
  0x27   :  { %1569 = vmatmul.msk.f32.gmra.mxu0 %vm59_vm1, %v20_v20  ;;  %1656 = vmatmul.msk.f32.gmra.mxu1 %vm59_vm1, %v1612_v21 }
  0x2d   :  { %1744 = vmatmul.msk.f32.gmra.mxu2 %vm59_vm1, %v1700_v22  ;;  %1831 = vmatmul.msk.f32.gmra.mxu3 %vm59_vm1, %v1787_v23 }
  0x2f   :  { %1570 = vmatmul.msk.f32.gmra.mxu0 %vm59_vm1, %v21_v24  ;;  %1657 = vmatmul.msk.f32.gmra.mxu1 %vm59_vm1, %v1613_v25 }
  0x35   :  { %1745 = vmatmul.msk.f32.gmra.mxu2 %vm59_vm1, %v1701_v26  ;;  %1832 = vmatmul.msk.f32.gmra.mxu3 %vm59_vm1, %v1788_v27  ;;  %v1713_v26 = vld [vmem:[%s2810_s0 + $0x340] sm:$0xff]  ;;  %v1800_v27 = vld [vmem:[%s2810_s0 + $0x498] sm:$0xff] }
  0x37   :  { %1571 = vmatmul.msk.f32.gmra.mxu0 %vm59_vm1, %v22_v28  ;;  %1658 = vmatmul.msk.f32.gmra.mxu1 %vm59_vm1, %v1614_v29 }
  0x3d   :  { %1746 = vmatmul.msk.f32.gmra.mxu2 %vm59_vm1, %v1702_v30  ;;  %1833 = vmatmul.msk.f32.gmra.mxu3 %vm59_vm1, %v1789_v31  ;;  %v34_v31 = vld [vmem:[%s2810_s0 + $0x90] sm:$0xff] }
  0x3f   :  { %1572 = vmatmul.msk.f32.gmra.mxu0 %vm59_vm1, %v23_v32  ;;  %1659 = vmatmul.msk.f32.gmra.mxu1 %vm59_vm1, %v1615_v33  ;;  %v1626_v32 = vld [vmem:[%s2810_s0 + $0x1e8] sm:$0xff] }
  0x45   :  { %1747 = vmatmul.msk.f32.gmra.mxu2 %vm59_vm1, %v1703_v34  ;;  %1834 = vmatmul.msk.f32.gmra.mxu3 %vm59_vm1, %v1790_v35 }
  0x47   :  { %1573 = vmatmul.msk.f32.gmra.mxu0 %vm59_vm1, %v24_v36  ;;  %1660 = vmatmul.msk.f32.gmra.mxu1 %vm59_vm1, %v1616_v37 }
  0x4d   :  { %1748 = vmatmul.msk.f32.gmra.mxu2 %vm59_vm1, %v1704_v38  ;;  %1835 = vmatmul.msk.f32.gmra.mxu3 %vm59_vm1, %v1791_v39  ;;  %v1714_v39 = vld [vmem:[%s2810_s0 + $0x348] sm:$0xff] }
  0x4f   :  { %1574 = vmatmul.msk.f32.gmra.mxu0 %vm59_vm1, %v25_v40  ;;  %1661 = vmatmul.msk.f32.gmra.mxu1 %vm59_vm1, %v1617_v41  ;;  %v1801_v40 = vld [vmem:[%s2810_s0 + $0x4a0] sm:$0xff] }
  0x55   :  { %1749 = vmatmul.msk.f32.gmra.mxu2 %vm59_vm1, %v1705_v42  ;;  %1836 = vmatmul.msk.f32.gmra.mxu3 %vm59_vm1, %v1792_v43 }
  0x57   :  { %1575 = vmatmul.msk.f32.gmra.mxu0 %vm59_vm1, %v26_v44  ;;  %1662 = vmatmul.msk.f32.gmra.mxu1 %vm59_vm1, %v1618_v45  ;;  %v35_v44 = vld [vmem:[%s2810_s0 + $0x98] sm:$0xff]  ;;  %v1627_v45 = vld [vmem:[%s2810_s0 + $0x1f0] sm:$0xff] }
  0x5d   :  { %1750 = vmatmul.msk.f32.gmra.mxu2 %vm59_vm1, %v1706_v46  ;;  %1837 = vmatmul.msk.f32.gmra.mxu3 %vm59_vm1, %v1793_v47 }
  0x5f   :  { %1576 = vmatmul.msk.f32.gmra.mxu0 %vm59_vm1, %v27_v48  ;;  %1663 = vmatmul.msk.f32.gmra.mxu1 %vm59_vm1, %v1619_v49 }
  0x65   :  { %1751 = vmatmul.msk.f32.gmra.mxu2 %vm59_vm1, %v1707_v50  ;;  %1838 = vmatmul.msk.f32.gmra.mxu3 %vm59_vm1, %v1794_v51 }
  0x67   :  { %1577 = vmatmul.msk.f32.gmra.mxu0 %vm59_vm1, %v28_v52  ;;  %1664 = vmatmul.msk.f32.gmra.mxu1 %vm59_vm1, %v1620_v53  ;;  %v1715_v52 = vld [vmem:[%s2810_s0 + $0x350] sm:$0xff]  ;;  %v1802_v53 = vld [vmem:[%s2810_s0 + $0x4a8] sm:$0xff] }
  0x6d   :  { %1752 = vmatmul.msk.f32.gmra.mxu2 %vm59_vm1, %v1708_v54  ;;  %1839 = vmatmul.msk.f32.gmra.mxu3 %vm59_vm1, %v1795_v55 }
  0x6f   :  { %1578 = vmatmul.msk.f32.gmra.mxu0 %vm59_vm1, %v29_v56  ;;  %1665 = vmatmul.msk.f32.gmra.mxu1 %vm59_vm1, %v1621_v57  ;;  %v36_v57 = vld [vmem:[%s2810_s0 + $0xa0] sm:$0xff] }
  0x75   :  { %1753 = vmatmul.msk.f32.gmra.mxu2 %vm59_vm1, %v1709_v58  ;;  %1840 = vmatmul.msk.f32.gmra.mxu3 %vm59_vm1, %v1796_v59  ;;  %v1628_v58 = vld [vmem:[%s2810_s0 + $0x1f8] sm:$0xff] }
  0x77   :  { %1579 = vmatmul.msk.f32.gmra.mxu0 %vm59_vm1, %v30_v60  ;;  %1666 = vmatmul.msk.f32.gmra.mxu1 %vm59_vm1, %v1622_v61 }
  0x7d   :  { %1754 = vmatmul.msk.f32.gmra.mxu2 %vm59_vm1, %v1710_v62  ;;  %1841 = vmatmul.msk.f32.gmra.mxu3 %vm59_vm1, %v1797_v63 }
  0x7f   :  { %1580 = vmatmul.msk.f32.gmra.mxu0 %vm59_vm1, %v31_v0  ;;  %1667 = vmatmul.msk.f32.gmra.mxu1 %vm59_vm1, %v1623_v1  ;;  %v1716_v1 = vld [vmem:[%s2810_s0 + $0x358] sm:$0xff] }
  0x84   :  { %v210_v4 = vpop.f32.mrf.mxu0  ;;  %v529_v5 = vpop.f32.mrf.mxu1 }
  0x85   :  { %1755 = vmatmul.msk.f32.gmra.mxu2 %vm59_vm1, %v1711_v2  ;;  %v658_v8 = vmax.f32 %v210_v4, %v529_v5  ;;  %1842 = vmatmul.msk.f32.gmra.mxu3 %vm59_vm1, %v1798_v3  ;;  %v1803_v2 = vld [vmem:[%s2810_s0 + $0x4b0] sm:$0xff] }
  0x87   :  { %1581 = vmatmul.msk.f32.gmra.mxu0 %vm59_vm1, %v32_v6  ;;  %1668 = vmatmul.msk.f32.gmra.mxu1 %vm59_vm1, %v1624_v7  ;;  %v37_v6 = vld [vmem:[%s2810_s0 + $0xa8] sm:$0xff]  ;;  %v1629_v7 = vld [vmem:[%s2810_s0 + $0x200] sm:$0xff] }
  0x88   :  { %v891_v9 = vpop.f32.mrf.mxu2  ;;  %v1253_v10 = vpop.f32.mrf.mxu3 }
  0x89   :  { %v1020_v11 = vmax.f32 %v658_v8, %v891_v9 }
  0x8b   :  { %v1382_v15 = vmax.f32 %v1020_v11, %v1253_v10 }
  0x8c   :  { %v213_v16 = vpop.f32.mrf.mxu0  ;;  %v532_v17 = vpop.f32.mrf.mxu1 }
  0x8d   :  { %v1429_v20 = vadd.f32 %v2172_v12, %v1382_v15  ;;  %1756 = vmatmul.msk.f32.gmra.mxu2 %vm59_vm1, %v1712_v13  ;;  %v659_v21 = vmax.f32 %v213_v16, %v532_v17  ;;  %1843 = vmatmul.msk.f32.gmra.mxu3 %vm59_vm1, %v1799_v14  ;;  %v1717_v15 = vld [vmem:[%s2810_s0 + $0x360] sm:$0xff]  ;;  %v1804_v16 = vld [vmem:[%s2810_s0 + $0x4b8] sm:$0xff] }
  0x8f   :  { %v1472_v22 = vmax.f32 %v1429_v20, 0.0  ;;  %1582 = vmatmul.msk.f32.gmra.mxu0 %vm59_vm1, %v33_v18  ;;  %1669 = vmatmul.msk.f32.gmra.mxu1 %vm59_vm1, %v1625_v19  ;;  %v38_v20 = vld [vmem:[%s2810_s0 + $0xb0] sm:$0xff] }
  0x90   :  { %v894_v23 = vpop.f32.mrf.mxu2  ;;  %v1256_v24 = vpop.f32.mrf.mxu3 }
  0x91   :  { %1516 = vst.msk [vmem:[%s2812_s3] sm:$0xff] %vm1515_vm2, %v1472_v22  ;;  %v1021_v25 = vmax.f32 %v659_v21, %v894_v23  ;;  %v1630_v21 = vld [vmem:[%s2810_s0 + $0x208] sm:$0xff] }
  0x93   :  { %v1383_v28 = vmax.f32 %v1021_v25, %v1256_v24 }
  0x94   :  { %v216_v29 = vpop.f32.mrf.mxu0  ;;  %v535_v30 = vpop.f32.mrf.mxu1 }
  0x95   :  { %v1430_v33 = vadd.f32 %v2172_v12, %v1383_v28  ;;  %1757 = vmatmul.msk.f32.gmra.mxu2 %vm59_vm1, %v1713_v26  ;;  %v660_v34 = vmax.f32 %v216_v29, %v535_v30  ;;  %1844 = vmatmul.msk.f32.gmra.mxu3 %vm59_vm1, %v1800_v27  ;;  %v1718_v28 = vld [vmem:[%s2810_s0 + $0x368] sm:$0xff]  ;;  %v1805_v29 = vld [vmem:[%s2810_s0 + $0x4c0] sm:$0xff] }
  0x97   :  { %v1473_v35 = vmax.f32 %v1430_v33, 0.0  ;;  %1583 = vmatmul.msk.f32.gmra.mxu0 %vm59_vm1, %v34_v31  ;;  %1670 = vmatmul.msk.f32.gmra.mxu1 %vm59_vm1, %v1626_v32  ;;  %v39_v33 = vld [vmem:[%s2810_s0 + $0xb8] sm:$0xff] }
  0x98   :  { %v897_v36 = vpop.f32.mrf.mxu2  ;;  %v1259_v37 = vpop.f32.mrf.mxu3 }
  0x99   :  { %1517 = vst.msk [vmem:[%s2812_s3 + $0x8] sm:$0xff] %vm1515_vm2, %v1473_v35  ;;  %v1022_v38 = vmax.f32 %v660_v34, %v897_v36  ;;  %v1631_v34 = vld [vmem:[%s2810_s0 + $0x210] sm:$0xff] }
  0x9b   :  { %v1384_v41 = vmax.f32 %v1022_v38, %v1259_v37 }
  0x9c   :  { %v219_v42 = vpop.f32.mrf.mxu0  ;;  %v538_v43 = vpop.f32.mrf.mxu1 }
  0x9d   :  { %v1431_v46 = vadd.f32 %v2172_v12, %v1384_v41  ;;  %1758 = vmatmul.msk.f32.gmra.mxu2 %vm59_vm1, %v1714_v39  ;;  %v661_v47 = vmax.f32 %v219_v42, %v538_v43  ;;  %1845 = vmatmul.msk.f32.gmra.mxu3 %vm59_vm1, %v1801_v40  ;;  %v1719_v41 = vld [vmem:[%s2810_s0 + $0x370] sm:$0xff]  ;;  %v1806_v42 = vld [vmem:[%s2810_s0 + $0x4c8] sm:$0xff] }
  0x9f   :  { %v1474_v48 = vmax.f32 %v1431_v46, 0.0  ;;  %1584 = vmatmul.msk.f32.gmra.mxu0 %vm59_vm1, %v35_v44  ;;  %1671 = vmatmul.msk.f32.gmra.mxu1 %vm59_vm1, %v1627_v45  ;;  %v40_v46 = vld [vmem:[%s2810_s0 + $0xc0] sm:$0xff] }
  0xa0   :  { %v900_v49 = vpop.f32.mrf.mxu2  ;;  %v1262_v50 = vpop.f32.mrf.mxu3 }
  0xa1   :  { %1518 = vst.msk [vmem:[%s2812_s3 + $0x10] sm:$0xff] %vm1515_vm2, %v1474_v48  ;;  %v1023_v51 = vmax.f32 %v661_v47, %v900_v49  ;;  %v1632_v47 = vld [vmem:[%s2810_s0 + $0x218] sm:$0xff] }
  0xa3   :  { %v1385_v54 = vmax.f32 %v1023_v51, %v1262_v50 }
  0xa4   :  { %v222_v55 = vpop.f32.mrf.mxu0  ;;  %v541_v56 = vpop.f32.mrf.mxu1 }
  0xa5   :  { %v1432_v59 = vadd.f32 %v2172_v12, %v1385_v54  ;;  %1759 = vmatmul.msk.f32.gmra.mxu2 %vm59_vm1, %v1715_v52  ;;  %v662_v60 = vmax.f32 %v222_v55, %v541_v56  ;;  %1846 = vmatmul.msk.f32.gmra.mxu3 %vm59_vm1, %v1802_v53  ;;  %v1720_v54 = vld [vmem:[%s2810_s0 + $0x378] sm:$0xff]  ;;  %v1807_v55 = vld [vmem:[%s2810_s0 + $0x4d0] sm:$0xff] }
  0xa7   :  { %v1475_v61 = vmax.f32 %v1432_v59, 0.0  ;;  %1585 = vmatmul.msk.f32.gmra.mxu0 %vm59_vm1, %v36_v57  ;;  %1672 = vmatmul.msk.f32.gmra.mxu1 %vm59_vm1, %v1628_v58  ;;  %v41_v59 = vld [vmem:[%s2810_s0 + $0xc8] sm:$0xff] }
  0xa8   :  { %v903_v62 = vpop.f32.mrf.mxu2  ;;  %v1265_v63 = vpop.f32.mrf.mxu3 }
  0xa9   :  { %1519 = vst.msk [vmem:[%s2812_s3 + $0x18] sm:$0xff] %vm1515_vm2, %v1475_v61  ;;  %v1024_v0 = vmax.f32 %v662_v60, %v903_v62  ;;  %v1633_v60 = vld [vmem:[%s2810_s0 + $0x220] sm:$0xff] }
  0xab   :  { %v1386_v3 = vmax.f32 %v1024_v0, %v1265_v63 }
  0xac   :  { %v225_v4 = vpop.f32.mrf.mxu0  ;;  %v544_v5 = vpop.f32.mrf.mxu1 }
  0xad   :  { %v1433_v8 = vadd.f32 %v2172_v12, %v1386_v3  ;;  %1760 = vmatmul.msk.f32.gmra.mxu2 %vm59_vm1, %v1716_v1  ;;  %v663_v9 = vmax.f32 %v225_v4, %v544_v5  ;;  %1847 = vmatmul.msk.f32.gmra.mxu3 %vm59_vm1, %v1803_v2  ;;  %v1721_v3 = vld [vmem:[%s2810_s0 + $0x380] sm:$0xff]  ;;  %v1808_v4 = vld [vmem:[%s2810_s0 + $0x4d8] sm:$0xff] }
  0xaf   :  { %v1476_v10 = vmax.f32 %v1433_v8, 0.0  ;;  %1586 = vmatmul.msk.f32.gmra.mxu0 %vm59_vm1, %v37_v6  ;;  %1673 = vmatmul.msk.f32.gmra.mxu1 %vm59_vm1, %v1629_v7  ;;  %v42_v8 = vld [vmem:[%s2810_s0 + $0xd0] sm:$0xff] }
  0xb0   :  { %v906_v11 = vpop.f32.mrf.mxu2  ;;  %v1268_v13 = vpop.f32.mrf.mxu3 }
  0xb1   :  { %1520 = vst.msk [vmem:[%s2812_s3 + $0x20] sm:$0xff] %vm1515_vm2, %v1476_v10  ;;  %v1025_v14 = vmax.f32 %v663_v9, %v906_v11  ;;  %v1634_v9 = vld [vmem:[%s2810_s0 + $0x228] sm:$0xff] }
  0xb3   :  { %v1387_v17 = vmax.f32 %v1025_v14, %v1268_v13 }
  0xb4   :  { %v228_v18 = vpop.f32.mrf.mxu0  ;;  %v547_v19 = vpop.f32.mrf.mxu1 }
  0xb5   :  { %v1434_v22 = vadd.f32 %v2172_v12, %v1387_v17  ;;  %1761 = vmatmul.msk.f32.gmra.mxu2 %vm59_vm1, %v1717_v15  ;;  %v664_v23 = vmax.f32 %v228_v18, %v547_v19  ;;  %1848 = vmatmul.msk.f32.gmra.mxu3 %vm59_vm1, %v1804_v16  ;;  %v1722_v17 = vld [vmem:[%s2810_s0 + $0x388] sm:$0xff]  ;;  %v1809_v18 = vld [vmem:[%s2810_s0 + $0x4e0] sm:$0xff] }
  0xb7   :  { %v1477_v24 = vmax.f32 %v1434_v22, 0.0  ;;  %1587 = vmatmul.msk.f32.gmra.mxu0 %vm59_vm1, %v38_v20  ;;  %1674 = vmatmul.msk.f32.gmra.mxu1 %vm59_vm1, %v1630_v21  ;;  %v43_v22 = vld [vmem:[%s2810_s0 + $0xd8] sm:$0xff] }
  0xb8   :  { %v909_v25 = vpop.f32.mrf.mxu2  ;;  %v1271_v26 = vpop.f32.mrf.mxu3 }
  0xb9   :  { %1521 = vst.msk [vmem:[%s2812_s3 + $0x28] sm:$0xff] %vm1515_vm2, %v1477_v24  ;;  %v1026_v27 = vmax.f32 %v664_v23, %v909_v25  ;;  %v1635_v23 = vld [vmem:[%s2810_s0 + $0x230] sm:$0xff] }
  0xbb   :  { %v1388_v30 = vmax.f32 %v1026_v27, %v1271_v26 }
  0xbc   :  { %v231_v31 = vpop.f32.mrf.mxu0  ;;  %v550_v32 = vpop.f32.mrf.mxu1 }
  0xbd   :  { %v1435_v35 = vadd.f32 %v2172_v12, %v1388_v30  ;;  %1762 = vmatmul.msk.f32.gmra.mxu2 %vm59_vm1, %v1718_v28  ;;  %v665_v36 = vmax.f32 %v231_v31, %v550_v32  ;;  %1849 = vmatmul.msk.f32.gmra.mxu3 %vm59_vm1, %v1805_v29  ;;  %v1723_v30 = vld [vmem:[%s2810_s0 + $0x390] sm:$0xff]  ;;  %v1810_v31 = vld [vmem:[%s2810_s0 + $0x4e8] sm:$0xff] }
  0xbf   :  { %v1478_v37 = vmax.f32 %v1435_v35, 0.0  ;;  %1588 = vmatmul.msk.f32.gmra.mxu0 %vm59_vm1, %v39_v33  ;;  %1675 = vmatmul.msk.f32.gmra.mxu1 %vm59_vm1, %v1631_v34  ;;  %v44_v35 = vld [vmem:[%s2810_s0 + $0xe0] sm:$0xff] }
  0xc0   :  { %v912_v38 = vpop.f32.mrf.mxu2  ;;  %v1274_v39 = vpop.f32.mrf.mxu3 }
  0xc1   :  { %1522 = vst.msk [vmem:[%s2812_s3 + $0x30] sm:$0xff] %vm1515_vm2, %v1478_v37  ;;  %v1027_v40 = vmax.f32 %v665_v36, %v912_v38  ;;  %v1636_v36 = vld [vmem:[%s2810_s0 + $0x238] sm:$0xff] }
  0xc3   :  { %v1389_v43 = vmax.f32 %v1027_v40, %v1274_v39 }
  0xc4   :  { %v234_v44 = vpop.f32.mrf.mxu0  ;;  %v553_v45 = vpop.f32.mrf.mxu1 }
  0xc5   :  { %v1436_v48 = vadd.f32 %v2172_v12, %v1389_v43  ;;  %1763 = vmatmul.msk.f32.gmra.mxu2 %vm59_vm1, %v1719_v41  ;;  %v666_v49 = vmax.f32 %v234_v44, %v553_v45  ;;  %1850 = vmatmul.msk.f32.gmra.mxu3 %vm59_vm1, %v1806_v42  ;;  %v1724_v43 = vld [vmem:[%s2810_s0 + $0x398] sm:$0xff]  ;;  %v1811_v44 = vld [vmem:[%s2810_s0 + $0x4f0] sm:$0xff] }
  0xc7   :  { %v1479_v50 = vmax.f32 %v1436_v48, 0.0  ;;  %1589 = vmatmul.msk.f32.gmra.mxu0 %vm59_vm1, %v40_v46  ;;  %1676 = vmatmul.msk.f32.gmra.mxu1 %vm59_vm1, %v1632_v47  ;;  %v45_v48 = vld [vmem:[%s2810_s0 + $0xe8] sm:$0xff] }
  0xc8   :  { %v915_v51 = vpop.f32.mrf.mxu2  ;;  %v1277_v52 = vpop.f32.mrf.mxu3 }
  0xc9   :  { %1523 = vst.msk [vmem:[%s2812_s3 + $0x38] sm:$0xff] %vm1515_vm2, %v1479_v50  ;;  %v1028_v53 = vmax.f32 %v666_v49, %v915_v51  ;;  %v1637_v49 = vld [vmem:[%s2810_s0 + $0x240] sm:$0xff] }
  0xcb   :  { %v1390_v56 = vmax.f32 %v1028_v53, %v1277_v52 }
  0xcc   :  { %v237_v57 = vpop.f32.mrf.mxu0  ;;  %v556_v58 = vpop.f32.mrf.mxu1 }
  0xcd   :  { %v1437_v61 = vadd.f32 %v2172_v12, %v1390_v56  ;;  %1764 = vmatmul.msk.f32.gmra.mxu2 %vm59_vm1, %v1720_v54  ;;  %v667_v62 = vmax.f32 %v237_v57, %v556_v58  ;;  %1851 = vmatmul.msk.f32.gmra.mxu3 %vm59_vm1, %v1807_v55  ;;  %v1725_v56 = vld [vmem:[%s2810_s0 + $0x3a0] sm:$0xff]  ;;  %v1812_v57 = vld [vmem:[%s2810_s0 + $0x4f8] sm:$0xff] }
  0xcf   :  { %v1480_v63 = vmax.f32 %v1437_v61, 0.0  ;;  %1590 = vmatmul.msk.f32.gmra.mxu0 %vm59_vm1, %v41_v59  ;;  %1677 = vmatmul.msk.f32.gmra.mxu1 %vm59_vm1, %v1633_v60  ;;  %v46_v61 = vld [vmem:[%s2810_s0 + $0xf0] sm:$0xff] }
  0xd0   :  { %v918_v0 = vpop.f32.mrf.mxu2  ;;  %v1280_v1 = vpop.f32.mrf.mxu3 }
  0xd1   :  { %1524 = vst.msk [vmem:[%s2812_s3 + $0x40] sm:$0xff] %vm1515_vm2, %v1480_v63  ;;  %v1029_v2 = vmax.f32 %v667_v62, %v918_v0  ;;  %v1638_v62 = vld [vmem:[%s2810_s0 + $0x248] sm:$0xff] }
  0xd3   :  { %v1391_v5 = vmax.f32 %v1029_v2, %v1280_v1 }
  0xd4   :  { %v240_v6 = vpop.f32.mrf.mxu0  ;;  %v559_v7 = vpop.f32.mrf.mxu1 }
  0xd5   :  { %v1438_v10 = vadd.f32 %v2172_v12, %v1391_v5  ;;  %1765 = vmatmul.msk.f32.gmra.mxu2 %vm59_vm1, %v1721_v3  ;;  %v668_v11 = vmax.f32 %v240_v6, %v559_v7  ;;  %1852 = vmatmul.msk.f32.gmra.mxu3 %vm59_vm1, %v1808_v4  ;;  %v1726_v5 = vld [vmem:[%s2810_s0 + $0x3a8] sm:$0xff]  ;;  %v1813_v6 = vld [vmem:[%s2810_s0 + $0x500] sm:$0xff] }
  0xd7   :  { %v1481_v13 = vmax.f32 %v1438_v10, 0.0  ;;  %1591 = vmatmul.msk.f32.gmra.mxu0 %vm59_vm1, %v42_v8  ;;  %1678 = vmatmul.msk.f32.gmra.mxu1 %vm59_vm1, %v1634_v9  ;;  %v47_v10 = vld [vmem:[%s2810_s0 + $0xf8] sm:$0xff] }
  0xd8   :  { %v921_v14 = vpop.f32.mrf.mxu2  ;;  %v1283_v15 = vpop.f32.mrf.mxu3 }
  0xd9   :  { %1525 = vst.msk [vmem:[%s2812_s3 + $0x48] sm:$0xff] %vm1515_vm2, %v1481_v13  ;;  %v1030_v16 = vmax.f32 %v668_v11, %v921_v14  ;;  %v1639_v11 = vld [vmem:[%s2810_s0 + $0x250] sm:$0xff] }
  0xdb   :  { %v1392_v19 = vmax.f32 %v1030_v16, %v1283_v15 }
  0xdc   :  { %v243_v20 = vpop.f32.mrf.mxu0  ;;  %v562_v21 = vpop.f32.mrf.mxu1 }
  0xdd   :  { %v1439_v24 = vadd.f32 %v2172_v12, %v1392_v19  ;;  %1766 = vmatmul.msk.f32.gmra.mxu2 %vm59_vm1, %v1722_v17  ;;  %v669_v25 = vmax.f32 %v243_v20, %v562_v21  ;;  %1853 = vmatmul.msk.f32.gmra.mxu3 %vm59_vm1, %v1809_v18  ;;  %v1727_v19 = vld [vmem:[%s2810_s0 + $0x3b0] sm:$0xff]  ;;  %v1814_v20 = vld [vmem:[%s2810_s0 + $0x508] sm:$0xff] }
  0xdf   :  { %v1482_v26 = vmax.f32 %v1439_v24, 0.0  ;;  %1592 = vmatmul.msk.f32.gmra.mxu0 %vm59_vm1, %v43_v22  ;;  %1679 = vmatmul.msk.f32.gmra.mxu1 %vm59_vm1, %v1635_v23  ;;  %v48_v24 = vld [vmem:[%s2810_s0 + $0x100] sm:$0xff] }
  0xe0   :  { %v924_v27 = vpop.f32.mrf.mxu2  ;;  %v1286_v28 = vpop.f32.mrf.mxu3 }
  0xe1   :  { %1526 = vst.msk [vmem:[%s2812_s3 + $0x50] sm:$0xff] %vm1515_vm2, %v1482_v26  ;;  %v1031_v29 = vmax.f32 %v669_v25, %v924_v27  ;;  %v1640_v25 = vld [vmem:[%s2810_s0 + $0x258] sm:$0xff] }
  0xe3   :  { %v1393_v32 = vmax.f32 %v1031_v29, %v1286_v28 }
  0xe4   :  { %v246_v33 = vpop.f32.mrf.mxu0  ;;  %v565_v34 = vpop.f32.mrf.mxu1 }
  0xe5   :  { %v1440_v37 = vadd.f32 %v2172_v12, %v1393_v32  ;;  %1767 = vmatmul.msk.f32.gmra.mxu2 %vm59_vm1, %v1723_v30  ;;  %v670_v38 = vmax.f32 %v246_v33, %v565_v34  ;;  %1854 = vmatmul.msk.f32.gmra.mxu3 %vm59_vm1, %v1810_v31  ;;  %v1728_v32 = vld [vmem:[%s2810_s0 + $0x3b8] sm:$0xff]  ;;  %v1815_v33 = vld [vmem:[%s2810_s0 + $0x510] sm:$0xff] }
  0xe7   :  { %v1483_v39 = vmax.f32 %v1440_v37, 0.0  ;;  %1593 = vmatmul.msk.f32.gmra.mxu0 %vm59_vm1, %v44_v35  ;;  %1680 = vmatmul.msk.f32.gmra.mxu1 %vm59_vm1, %v1636_v36  ;;  %v49_v37 = vld [vmem:[%s2810_s0 + $0x108] sm:$0xff] }
  0xe8   :  { %v927_v40 = vpop.f32.mrf.mxu2  ;;  %v1289_v41 = vpop.f32.mrf.mxu3 }
  0xe9   :  { %1527 = vst.msk [vmem:[%s2812_s3 + $0x58] sm:$0xff] %vm1515_vm2, %v1483_v39  ;;  %v1032_v42 = vmax.f32 %v670_v38, %v927_v40  ;;  %v1641_v38 = vld [vmem:[%s2810_s0 + $0x260] sm:$0xff] }
  0xeb   :  { %v1394_v45 = vmax.f32 %v1032_v42, %v1289_v41 }
  0xec   :  { %v249_v46 = vpop.f32.mrf.mxu0  ;;  %v568_v47 = vpop.f32.mrf.mxu1 }
  0xed   :  { %v1441_v50 = vadd.f32 %v2172_v12, %v1394_v45  ;;  %1768 = vmatmul.msk.f32.gmra.mxu2 %vm59_vm1, %v1724_v43  ;;  %v671_v51 = vmax.f32 %v249_v46, %v568_v47  ;;  %1855 = vmatmul.msk.f32.gmra.mxu3 %vm59_vm1, %v1811_v44  ;;  %v1729_v45 = vld [vmem:[%s2810_s0 + $0x3c0] sm:$0xff]  ;;  %v1816_v46 = vld [vmem:[%s2810_s0 + $0x518] sm:$0xff] }
  0xef   :  { %v1484_v52 = vmax.f32 %v1441_v50, 0.0  ;;  %1594 = vmatmul.msk.f32.gmra.mxu0 %vm59_vm1, %v45_v48  ;;  %1681 = vmatmul.msk.f32.gmra.mxu1 %vm59_vm1, %v1637_v49  ;;  %v50_v50 = vld [vmem:[%s2810_s0 + $0x110] sm:$0xff] }
  0xf0   :  { %v930_v53 = vpop.f32.mrf.mxu2  ;;  %v1292_v54 = vpop.f32.mrf.mxu3 }
  0xf1   :  { %1528 = vst.msk [vmem:[%s2812_s3 + $0x60] sm:$0xff] %vm1515_vm2, %v1484_v52  ;;  %v1033_v55 = vmax.f32 %v671_v51, %v930_v53  ;;  %v1642_v51 = vld [vmem:[%s2810_s0 + $0x268] sm:$0xff] }
  0xf3   :  { %v1395_v58 = vmax.f32 %v1033_v55, %v1292_v54 }
  0xf4   :  { %v252_v59 = vpop.f32.mrf.mxu0  ;;  %v571_v60 = vpop.f32.mrf.mxu1 }
  0xf5   :  { %v1442_v63 = vadd.f32 %v2172_v12, %v1395_v58  ;;  %1769 = vmatmul.msk.f32.gmra.mxu2 %vm59_vm1, %v1725_v56  ;;  %v672_v0 = vmax.f32 %v252_v59, %v571_v60  ;;  %1856 = vmatmul.msk.f32.gmra.mxu3 %vm59_vm1, %v1812_v57  ;;  %v1730_v58 = vld [vmem:[%s2810_s0 + $0x3c8] sm:$0xff]  ;;  %v1817_v59 = vld [vmem:[%s2810_s0 + $0x520] sm:$0xff] }
  0xf7   :  { %v1485_v1 = vmax.f32 %v1442_v63, 0.0  ;;  %1595 = vmatmul.msk.f32.gmra.mxu0 %vm59_vm1, %v46_v61  ;;  %1682 = vmatmul.msk.f32.gmra.mxu1 %vm59_vm1, %v1638_v62  ;;  %v51_v63 = vld [vmem:[%s2810_s0 + $0x118] sm:$0xff] }
  0xf8   :  { %v933_v2 = vpop.f32.mrf.mxu2  ;;  %v1295_v3 = vpop.f32.mrf.mxu3 }
  0xf9   :  { %1529 = vst.msk [vmem:[%s2812_s3 + $0x68] sm:$0xff] %vm1515_vm2, %v1485_v1  ;;  %v1034_v4 = vmax.f32 %v672_v0, %v933_v2  ;;  %v1643_v0 = vld [vmem:[%s2810_s0 + $0x270] sm:$0xff] }
  0xfb   :  { %v1396_v7 = vmax.f32 %v1034_v4, %v1295_v3 }
  0xfc   :  { %v255_v8 = vpop.f32.mrf.mxu0  ;;  %v574_v9 = vpop.f32.mrf.mxu1 }
  0xfd   :  { %v1443_v13 = vadd.f32 %v2172_v12, %v1396_v7  ;;  %1770 = vmatmul.msk.f32.gmra.mxu2 %vm59_vm1, %v1726_v5  ;;  %v673_v14 = vmax.f32 %v255_v8, %v574_v9  ;;  %1857 = vmatmul.msk.f32.gmra.mxu3 %vm59_vm1, %v1813_v6  ;;  %v1731_v7 = vld [vmem:[%s2810_s0 + $0x3d0] sm:$0xff]  ;;  %v1818_v8 = vld [vmem:[%s2810_s0 + $0x528] sm:$0xff] }
  0xff   :  { %v1486_v15 = vmax.f32 %v1443_v13, 0.0  ;;  %1596 = vmatmul.msk.f32.gmra.mxu0 %vm59_vm1, %v47_v10  ;;  %1683 = vmatmul.msk.f32.gmra.mxu1 %vm59_vm1, %v1639_v11  ;;  %v52_v13 = vld [vmem:[%s2810_s0 + $0x120] sm:$0xff] }
 0x100   :  { %v936_v16 = vpop.f32.mrf.mxu2  ;;  %v1298_v17 = vpop.f32.mrf.mxu3 }
 0x101   :  { %1530 = vst.msk [vmem:[%s2812_s3 + $0x70] sm:$0xff] %vm1515_vm2, %v1486_v15  ;;  %v1035_v18 = vmax.f32 %v673_v14, %v936_v16  ;;  %v1644_v14 = vld [vmem:[%s2810_s0 + $0x278] sm:$0xff] }
 0x103   :  { %v1397_v21 = vmax.f32 %v1035_v18, %v1298_v17 }
 0x104   :  { %v258_v22 = vpop.f32.mrf.mxu0  ;;  %v577_v23 = vpop.f32.mrf.mxu1 }
 0x105   :  { %v1444_v26 = vadd.f32 %v2172_v12, %v1397_v21  ;;  %1771 = vmatmul.msk.f32.gmra.mxu2 %vm59_vm1, %v1727_v19  ;;  %v674_v27 = vmax.f32 %v258_v22, %v577_v23  ;;  %1858 = vmatmul.msk.f32.gmra.mxu3 %vm59_vm1, %v1814_v20  ;;  %v1732_v21 = vld [vmem:[%s2810_s0 + $0x3d8] sm:$0xff]  ;;  %v1819_v22 = vld [vmem:[%s2810_s0 + $0x530] sm:$0xff] }
 0x107   :  { %v1487_v28 = vmax.f32 %v1444_v26, 0.0  ;;  %1597 = vmatmul.msk.f32.gmra.mxu0 %vm59_vm1, %v48_v24  ;;  %1684 = vmatmul.msk.f32.gmra.mxu1 %vm59_vm1, %v1640_v25  ;;  %v53_v26 = vld [vmem:[%s2810_s0 + $0x128] sm:$0xff] }
 0x108   :  { %v939_v29 = vpop.f32.mrf.mxu2  ;;  %v1301_v30 = vpop.f32.mrf.mxu3 }
 0x109   :  { %1531 = vst.msk [vmem:[%s2812_s3 + $0x78] sm:$0xff] %vm1515_vm2, %v1487_v28  ;;  %v1036_v31 = vmax.f32 %v674_v27, %v939_v29  ;;  %v1645_v27 = vld [vmem:[%s2810_s0 + $0x280] sm:$0xff] }
 0x10b   :  { %v1398_v34 = vmax.f32 %v1036_v31, %v1301_v30 }
 0x10c   :  { %v261_v35 = vpop.f32.mrf.mxu0  ;;  %v580_v36 = vpop.f32.mrf.mxu1 }
 0x10d   :  { %v1445_v39 = vadd.f32 %v2172_v12, %v1398_v34  ;;  %1772 = vmatmul.msk.f32.gmra.mxu2 %vm59_vm1, %v1728_v32  ;;  %v675_v40 = vmax.f32 %v261_v35, %v580_v36  ;;  %1859 = vmatmul.msk.f32.gmra.mxu3 %vm59_vm1, %v1815_v33  ;;  %v1733_v34 = vld [vmem:[%s2810_s0 + $0x3e0] sm:$0xff]  ;;  %v1820_v35 = vld [vmem:[%s2810_s0 + $0x538] sm:$0xff] }
 0x10f   :  { %v1488_v41 = vmax.f32 %v1445_v39, 0.0  ;;  %1598 = vmatmul.msk.f32.gmra.mxu0 %vm59_vm1, %v49_v37  ;;  %1685 = vmatmul.msk.f32.gmra.mxu1 %vm59_vm1, %v1641_v38  ;;  %v54_v39 = vld [vmem:[%s2810_s0 + $0x130] sm:$0xff] }
 0x110   :  { %v942_v42 = vpop.f32.mrf.mxu2  ;;  %v1304_v43 = vpop.f32.mrf.mxu3 }
 0x111   :  { %1532 = vst.msk [vmem:[%s2812_s3 + $0x80] sm:$0xff] %vm1515_vm2, %v1488_v41  ;;  %v1037_v44 = vmax.f32 %v675_v40, %v942_v42  ;;  %v1646_v40 = vld [vmem:[%s2810_s0 + $0x288] sm:$0xff] }
 0x113   :  { %v1399_v47 = vmax.f32 %v1037_v44, %v1304_v43 }
 0x114   :  { %v264_v48 = vpop.f32.mrf.mxu0  ;;  %v583_v49 = vpop.f32.mrf.mxu1 }
 0x115   :  { %v1446_v52 = vadd.f32 %v2172_v12, %v1399_v47  ;;  %1773 = vmatmul.msk.f32.gmra.mxu2 %vm59_vm1, %v1729_v45  ;;  %v676_v53 = vmax.f32 %v264_v48, %v583_v49  ;;  %1860 = vmatmul.msk.f32.gmra.mxu3 %vm59_vm1, %v1816_v46  ;;  %v1734_v47 = vld [vmem:[%s2810_s0 + $0x3e8] sm:$0xff]  ;;  %v1821_v48 = vld [vmem:[%s2810_s0 + $0x540] sm:$0xff] }
 0x117   :  { %v1489_v54 = vmax.f32 %v1446_v52, 0.0  ;;  %1599 = vmatmul.msk.f32.gmra.mxu0 %vm59_vm1, %v50_v50  ;;  %1686 = vmatmul.msk.f32.gmra.mxu1 %vm59_vm1, %v1642_v51  ;;  %v55_v52 = vld [vmem:[%s2810_s0 + $0x138] sm:$0xff] }
 0x118   :  { %v945_v55 = vpop.f32.mrf.mxu2  ;;  %v1307_v56 = vpop.f32.mrf.mxu3 }
 0x119   :  { %1533 = vst.msk [vmem:[%s2812_s3 + $0x88] sm:$0xff] %vm1515_vm2, %v1489_v54  ;;  %v1038_v57 = vmax.f32 %v676_v53, %v945_v55  ;;  %v1647_v53 = vld [vmem:[%s2810_s0 + $0x290] sm:$0xff] }
 0x11b   :  { %v1400_v60 = vmax.f32 %v1038_v57, %v1307_v56 }
 0x11c   :  { %v267_v61 = vpop.f32.mrf.mxu0  ;;  %v586_v62 = vpop.f32.mrf.mxu1 }
 0x11d   :  { %v1447_v1 = vadd.f32 %v2172_v12, %v1400_v60  ;;  %1774 = vmatmul.msk.f32.gmra.mxu2 %vm59_vm1, %v1730_v58  ;;  %v677_v2 = vmax.f32 %v267_v61, %v586_v62  ;;  %1861 = vmatmul.msk.f32.gmra.mxu3 %vm59_vm1, %v1817_v59  ;;  %v1735_v60 = vld [vmem:[%s2810_s0 + $0x3f0] sm:$0xff]  ;;  %v1822_v61 = vld [vmem:[%s2810_s0 + $0x548] sm:$0xff] }
 0x11f   :  { %v1490_v3 = vmax.f32 %v1447_v1, 0.0  ;;  %1600 = vmatmul.msk.f32.gmra.mxu0 %vm59_vm1, %v51_v63  ;;  %1687 = vmatmul.msk.f32.gmra.mxu1 %vm59_vm1, %v1643_v0  ;;  %v56_v1 = vld [vmem:[%s2810_s0 + $0x140] sm:$0xff] }
 0x120   :  { %v948_v4 = vpop.f32.mrf.mxu2  ;;  %v1310_v5 = vpop.f32.mrf.mxu3 }
 0x121   :  { %1534 = vst.msk [vmem:[%s2812_s3 + $0x90] sm:$0xff] %vm1515_vm2, %v1490_v3  ;;  %v1039_v6 = vmax.f32 %v677_v2, %v948_v4  ;;  %v1648_v2 = vld [vmem:[%s2810_s0 + $0x298] sm:$0xff] }
 0x123   :  { %v1401_v9 = vmax.f32 %v1039_v6, %v1310_v5 }
 0x124   :  { %v270_v10 = vpop.f32.mrf.mxu0  ;;  %v589_v11 = vpop.f32.mrf.mxu1 }
 0x125   :  { %v1448_v15 = vadd.f32 %v2172_v12, %v1401_v9  ;;  %1775 = vmatmul.msk.f32.gmra.mxu2 %vm59_vm1, %v1731_v7  ;;  %v678_v16 = vmax.f32 %v270_v10, %v589_v11  ;;  %1862 = vmatmul.msk.f32.gmra.mxu3 %vm59_vm1, %v1818_v8  ;;  %v1736_v9 = vld [vmem:[%s2810_s0 + $0x3f8] sm:$0xff]  ;;  %v1823_v10 = vld [vmem:[%s2810_s0 + $0x550] sm:$0xff] }
 0x127   :  { %v1491_v17 = vmax.f32 %v1448_v15, 0.0  ;;  %1601 = vmatmul.msk.f32.gmra.mxu0 %vm59_vm1, %v52_v13  ;;  %1688 = vmatmul.msk.f32.gmra.mxu1 %vm59_vm1, %v1644_v14  ;;  %v57_v15 = vld [vmem:[%s2810_s0 + $0x148] sm:$0xff] }
 0x128   :  { %v951_v18 = vpop.f32.mrf.mxu2  ;;  %v1313_v19 = vpop.f32.mrf.mxu3 }
 0x129   :  { %1535 = vst.msk [vmem:[%s2812_s3 + $0x98] sm:$0xff] %vm1515_vm2, %v1491_v17  ;;  %v1040_v20 = vmax.f32 %v678_v16, %v951_v18  ;;  %v1649_v16 = vld [vmem:[%s2810_s0 + $0x2a0] sm:$0xff] }
 0x12b   :  { %v1402_v23 = vmax.f32 %v1040_v20, %v1313_v19 }
 0x12c   :  { %v273_v24 = vpop.f32.mrf.mxu0  ;;  %v592_v25 = vpop.f32.mrf.mxu1 }
 0x12d   :  { %v1449_v28 = vadd.f32 %v2172_v12, %v1402_v23  ;;  %1776 = vmatmul.msk.f32.gmra.mxu2 %vm59_vm1, %v1732_v21  ;;  %v679_v29 = vmax.f32 %v273_v24, %v592_v25  ;;  %1863 = vmatmul.msk.f32.gmra.mxu3 %vm59_vm1, %v1819_v22  ;;  %v1737_v23 = vld [vmem:[%s2810_s0 + $0x400] sm:$0x3]  ;;  %v1824_v24 = vld [vmem:[%s2810_s0 + $0x558] sm:$0x3] }
 0x12f   :  { %v1492_v30 = vmax.f32 %v1449_v28, 0.0  ;;  %1602 = vmatmul.msk.f32.gmra.mxu0 %vm59_vm1, %v53_v26  ;;  %1689 = vmatmul.msk.f32.gmra.mxu1 %vm59_vm1, %v1645_v27  ;;  %v58_v28 = vld [vmem:[%s2810_s0 + $0x150] sm:$0x3] }
 0x130   :  { %v954_v31 = vpop.f32.mrf.mxu2  ;;  %v1316_v32 = vpop.f32.mrf.mxu3 }
 0x131   :  { %1536 = vst.msk [vmem:[%s2812_s3 + $0xa0] sm:$0xff] %vm1515_vm2, %v1492_v30  ;;  %v1041_v33 = vmax.f32 %v679_v29, %v954_v31  ;;  %v1650_v29 = vld [vmem:[%s2810_s0 + $0x2a8] sm:$0x3] }
 0x133   :  { %v1403_v36 = vmax.f32 %v1041_v33, %v1316_v32 }
 0x134   :  { %v276_v37 = vpop.f32.mrf.mxu0  ;;  %v595_v38 = vpop.f32.mrf.mxu1 }
 0x135   :  { %v1450_v41 = vadd.f32 %v2172_v12, %v1403_v36  ;;  %1777 = vmatmul.msk.f32.gmra.mxu2 %vm59_vm1, %v1733_v34  ;;  %v680_v42 = vmax.f32 %v276_v37, %v595_v38  ;;  %1864 = vmatmul.msk.f32.gmra.mxu3 %vm59_vm1, %v1820_v35 }
 0x137   :  { %v1493_v43 = vmax.f32 %v1450_v41, 0.0  ;;  %1603 = vmatmul.msk.f32.gmra.mxu0 %vm59_vm1, %v54_v39  ;;  %1690 = vmatmul.msk.f32.gmra.mxu1 %vm59_vm1, %v1646_v40 }
 0x138   :  { %v957_v44 = vpop.f32.mrf.mxu2  ;;  %v1319_v45 = vpop.f32.mrf.mxu3 }
 0x139   :  { %1537 = vst.msk [vmem:[%s2812_s3 + $0xa8] sm:$0xff] %vm1515_vm2, %v1493_v43  ;;  %v1042_v46 = vmax.f32 %v680_v42, %v957_v44 }
 0x13b   :  { %v1404_v49 = vmax.f32 %v1042_v46, %v1319_v45 }
 0x13c   :  { %v279_v50 = vpop.f32.mrf.mxu0  ;;  %v598_v51 = vpop.f32.mrf.mxu1 }
 0x13d   :  { %v1451_v54 = vadd.f32 %v2172_v12, %v1404_v49  ;;  %1778 = vmatmul.msk.f32.gmra.mxu2 %vm59_vm1, %v1734_v47  ;;  %v681_v55 = vmax.f32 %v279_v50, %v598_v51  ;;  %1865 = vmatmul.msk.f32.gmra.mxu3 %vm59_vm1, %v1821_v48 }
 0x13f   :  { %v1494_v56 = vmax.f32 %v1451_v54, 0.0  ;;  %1604 = vmatmul.msk.f32.gmra.mxu0 %vm59_vm1, %v55_v52  ;;  %1691 = vmatmul.msk.f32.gmra.mxu1 %vm59_vm1, %v1647_v53 }
 0x140   :  { %v960_v57 = vpop.f32.mrf.mxu2  ;;  %v1322_v58 = vpop.f32.mrf.mxu3 }
 0x141   :  { %1538 = vst.msk [vmem:[%s2812_s3 + $0xb0] sm:$0xff] %vm1515_vm2, %v1494_v56  ;;  %v1043_v59 = vmax.f32 %v681_v55, %v960_v57 }
 0x143   :  { %v1405_v62 = vmax.f32 %v1043_v59, %v1322_v58 }
 0x144   :  { %v282_v63 = vpop.f32.mrf.mxu0  ;;  %v601_v0 = vpop.f32.mrf.mxu1 }
 0x145   :  { %v1452_v3 = vadd.f32 %v2172_v12, %v1405_v62  ;;  %1779 = vmatmul.msk.f32.gmra.mxu2 %vm59_vm1, %v1735_v60  ;;  %v682_v4 = vmax.f32 %v282_v63, %v601_v0  ;;  %1866 = vmatmul.msk.f32.gmra.mxu3 %vm59_vm1, %v1822_v61 }
 0x147   :  { %v1495_v5 = vmax.f32 %v1452_v3, 0.0  ;;  %1605 = vmatmul.msk.f32.gmra.mxu0 %vm59_vm1, %v56_v1  ;;  %1692 = vmatmul.msk.f32.gmra.mxu1 %vm59_vm1, %v1648_v2 }
 0x148   :  { %v963_v6 = vpop.f32.mrf.mxu2  ;;  %v1325_v7 = vpop.f32.mrf.mxu3 }
 0x149   :  { %1539 = vst.msk [vmem:[%s2812_s3 + $0xb8] sm:$0xff] %vm1515_vm2, %v1495_v5  ;;  %v1044_v8 = vmax.f32 %v682_v4, %v963_v6 }
 0x14b   :  { %v1406_v11 = vmax.f32 %v1044_v8, %v1325_v7 }
 0x14c   :  { %v285_v13 = vpop.f32.mrf.mxu0  ;;  %v604_v14 = vpop.f32.mrf.mxu1 }
 0x14d   :  { %v1453_v17 = vadd.f32 %v2172_v12, %v1406_v11  ;;  %1780 = vmatmul.msk.f32.gmra.mxu2 %vm59_vm1, %v1736_v9  ;;  %v683_v18 = vmax.f32 %v285_v13, %v604_v14  ;;  %1867 = vmatmul.msk.f32.gmra.mxu3 %vm59_vm1, %v1823_v10  ;;  %v2743_v11 = vld [vmem:[%s2811_s2] ss:$0 sm:$0xff] }
 0x14f   :  { %v1496_v19 = vmax.f32 %v1453_v17, 0.0  ;;  %1606 = vmatmul.msk.f32.gmra.mxu0 %vm59_vm1, %v57_v15  ;;  %1693 = vmatmul.msk.f32.gmra.mxu1 %vm59_vm1, %v1649_v16 }
 0x150   :  { %v966_v20 = vpop.f32.mrf.mxu2  ;;  %v1328_v21 = vpop.f32.mrf.mxu3 }
 0x151   :  { %1540 = vst.msk [vmem:[%s2812_s3 + $0xc0] sm:$0xff] %vm1515_vm2, %v1496_v19  ;;  %v1045_v22 = vmax.f32 %v683_v18, %v966_v20 }
 0x153   :  { %v1407_v25 = vmax.f32 %v1045_v22, %v1328_v21 }
 0x154   :  { %v288_v26 = vpop.f32.mrf.mxu0  ;;  %v607_v27 = vpop.f32.mrf.mxu1 }
 0x155   :  { %v1454_v30 = vadd.f32 %v2172_v12, %v1407_v25  ;;  %1781 = vmatmul.msk.f32.gmra.mxu2 %vm59_vm1, %v1737_v23  ;;  %v684_v31 = vmax.f32 %v288_v26, %v607_v27  ;;  %1868 = vmatmul.msk.f32.gmra.mxu3 %vm59_vm1, %v1824_v24 }
 0x157   :  { %v1497_v32 = vmax.f32 %v1454_v30, 0.0  ;;  %1607 = vmatmul.msk.f32.gmra.mxu0 %vm59_vm1, %v58_v28  ;;  %1694 = vmatmul.msk.f32.gmra.mxu1 %vm59_vm1, %v1650_v29 }
 0x158   :  { %v969_v33 = vpop.f32.mrf.mxu2  ;;  %v1331_v34 = vpop.f32.mrf.mxu3 }
 0x159   :  { %1541 = vst.msk [vmem:[%s2812_s3 + $0xc8] sm:$0xff] %vm1515_vm2, %v1497_v32  ;;  %v1046_v35 = vmax.f32 %v684_v31, %v969_v33 }
 0x15b   :  { %v1408_v36 = vmax.f32 %v1046_v35, %v1331_v34 }
 0x15c   :  { %v291_v37 = vpop.f32.mrf.mxu0  ;;  %v610_v38 = vpop.f32.mrf.mxu1 }
 0x15d   :  { %v1455_v39 = vadd.f32 %v2172_v12, %v1408_v36  ;;  %v685_v40 = vmax.f32 %v291_v37, %v610_v38 }
 0x15f   :  { %v1498_v41 = vmax.f32 %v1455_v39, 0.0 }
 0x160   :  { %v972_v42 = vpop.f32.mrf.mxu2  ;;  %v1334_v43 = vpop.f32.mrf.mxu3 }
 0x161   :  { %1542 = vst.msk [vmem:[%s2812_s3 + $0xd0] sm:$0xff] %vm1515_vm2, %v1498_v41  ;;  %v1047_v44 = vmax.f32 %v685_v40, %v972_v42 }
 0x163   :  { %v1409_v45 = vmax.f32 %v1047_v44, %v1334_v43 }
 0x164   :  { %v294_v46 = vpop.f32.mrf.mxu0  ;;  %v613_v47 = vpop.f32.mrf.mxu1 }
 0x165   :  { %v1456_v48 = vadd.f32 %v2172_v12, %v1409_v45  ;;  %v686_v49 = vmax.f32 %v294_v46, %v613_v47 }
 0x167   :  { %v1499_v50 = vmax.f32 %v1456_v48, 0.0 }
 0x168   :  { %v975_v51 = vpop.f32.mrf.mxu2  ;;  %v1337_v52 = vpop.f32.mrf.mxu3 }
 0x169   :  { %1543 = vst.msk [vmem:[%s2812_s3 + $0xd8] sm:$0xff] %vm1515_vm2, %v1499_v50  ;;  %v1048_v53 = vmax.f32 %v686_v49, %v975_v51 }
 0x16b   :  { %v1410_v54 = vmax.f32 %v1048_v53, %v1337_v52 }
 0x16c   :  { %v297_v55 = vpop.f32.mrf.mxu0  ;;  %v616_v56 = vpop.f32.mrf.mxu1 }
 0x16d   :  { %v1457_v57 = vadd.f32 %v2172_v12, %v1410_v54  ;;  %v687_v58 = vmax.f32 %v297_v55, %v616_v56 }
 0x16f   :  { %v1500_v59 = vmax.f32 %v1457_v57, 0.0 }
 0x170   :  { %v978_v60 = vpop.f32.mrf.mxu2  ;;  %v1340_v61 = vpop.f32.mrf.mxu3 }
 0x171   :  { %1544 = vst.msk [vmem:[%s2812_s3 + $0xe0] sm:$0xff] %vm1515_vm2, %v1500_v59  ;;  %v1049_v62 = vmax.f32 %v687_v58, %v978_v60 }
 0x173   :  { %v1411_v63 = vmax.f32 %v1049_v62, %v1340_v61 }
 0x174   :  { %v300_v0 = vpop.f32.mrf.mxu0  ;;  %v619_v1 = vpop.f32.mrf.mxu1 }
 0x175   :  { %v1458_v2 = vadd.f32 %v2172_v12, %v1411_v63  ;;  %v688_v3 = vmax.f32 %v300_v0, %v619_v1 }
 0x177   :  { %v1501_v4 = vmax.f32 %v1458_v2, 0.0 }
 0x178   :  { %v981_v5 = vpop.f32.mrf.mxu2  ;;  %v1343_v6 = vpop.f32.mrf.mxu3 }
 0x179   :  { %1545 = vst.msk [vmem:[%s2812_s3 + $0xe8] sm:$0xff] %vm1515_vm2, %v1501_v4  ;;  %v1050_v7 = vmax.f32 %v688_v3, %v981_v5 }
 0x17b   :  { %v1412_v8 = vmax.f32 %v1050_v7, %v1343_v6 }
 0x17c   :  { %v303_v9 = vpop.f32.mrf.mxu0  ;;  %v622_v10 = vpop.f32.mrf.mxu1 }
 0x17d   :  { %v1459_v12 = vadd.f32 %v2743_v11, %v1412_v8  ;;  %v689_v13 = vmax.f32 %v303_v9, %v622_v10 }
 0x17f   :  { %v1502_v14 = vmax.f32 %v1459_v12, 0.0 }
 0x180   :  { %v984_v15 = vpop.f32.mrf.mxu2  ;;  %v1346_v16 = vpop.f32.mrf.mxu3 }
 0x181   :  { %1546 = vst.msk [vmem:[%s2812_s3 + $0xf0] sm:$0xff] %vm1515_vm2, %v1502_v14  ;;  %v1051_v17 = vmax.f32 %v689_v13, %v984_v15 }
 0x183   :  { %v1413_v18 = vmax.f32 %v1051_v17, %v1346_v16 }
 0x184   :  { %v306_v19 = vpop.f32.mrf.mxu0  ;;  %v625_v20 = vpop.f32.mrf.mxu1 }
 0x185   :  { %v1460_v21 = vadd.f32 %v2743_v11, %v1413_v18  ;;  %v690_v22 = vmax.f32 %v306_v19, %v625_v20 }
 0x187   :  { %v1503_v23 = vmax.f32 %v1460_v21, 0.0 }
 0x188   :  { %v987_v24 = vpop.f32.mrf.mxu2  ;;  %v1349_v25 = vpop.f32.mrf.mxu3 }
 0x189   :  { %1547 = vst.msk [vmem:[%s2812_s3 + $0xf8] sm:$0xff] %vm1515_vm2, %v1503_v23  ;;  %v1052_v26 = vmax.f32 %v690_v22, %v987_v24 }
 0x18b   :  { %v1414_v27 = vmax.f32 %v1052_v26, %v1349_v25 }
 0x18c   :  { %v309_v28 = vpop.f32.mrf.mxu0  ;;  %v628_v29 = vpop.f32.mrf.mxu1 }
 0x18d   :  { %v1461_v30 = vadd.f32 %v2743_v11, %v1414_v27  ;;  %v691_v31 = vmax.f32 %v309_v28, %v628_v29 }
 0x18f   :  { %v1504_v32 = vmax.f32 %v1461_v30, 0.0 }
 0x190   :  { %v990_v33 = vpop.f32.mrf.mxu2  ;;  %v1352_v34 = vpop.f32.mrf.mxu3 }
 0x191   :  { %1548 = vst.msk [vmem:[%s2812_s3 + $0x100] sm:$0xff] %vm1515_vm2, %v1504_v32  ;;  %v1053_v35 = vmax.f32 %v691_v31, %v990_v33 }
 0x193   :  { %v1415_v36 = vmax.f32 %v1053_v35, %v1352_v34 }
 0x194   :  { %v312_v37 = vpop.f32.mrf.mxu0  ;;  %v631_v38 = vpop.f32.mrf.mxu1 }
 0x195   :  { %v1462_v39 = vadd.f32 %v2743_v11, %v1415_v36  ;;  %v692_v40 = vmax.f32 %v312_v37, %v631_v38 }
 0x197   :  { %v1505_v41 = vmax.f32 %v1462_v39, 0.0 }
 0x198   :  { %v993_v42 = vpop.f32.mrf.mxu2  ;;  %v1355_v43 = vpop.f32.mrf.mxu3 }
 0x199   :  { %1549 = vst.msk [vmem:[%s2812_s3 + $0x108] sm:$0xff] %vm1515_vm2, %v1505_v41  ;;  %v1054_v44 = vmax.f32 %v692_v40, %v993_v42 }
 0x19b   :  { %v1416_v45 = vmax.f32 %v1054_v44, %v1355_v43 }
 0x19c   :  { %v315_v46 = vpop.f32.mrf.mxu0  ;;  %v634_v47 = vpop.f32.mrf.mxu1 }
 0x19d   :  { %v1463_v48 = vadd.f32 %v2743_v11, %v1416_v45  ;;  %v693_v49 = vmax.f32 %v315_v46, %v634_v47 }
 0x19f   :  { %v1506_v50 = vmax.f32 %v1463_v48, 0.0 }
 0x1a0   :  { %v996_v51 = vpop.f32.mrf.mxu2  ;;  %v1358_v52 = vpop.f32.mrf.mxu3 }
 0x1a1   :  { %1550 = vst.msk [vmem:[%s2812_s3 + $0x110] sm:$0xff] %vm1515_vm2, %v1506_v50  ;;  %v1055_v53 = vmax.f32 %v693_v49, %v996_v51 }
 0x1a3   :  { %v1417_v54 = vmax.f32 %v1055_v53, %v1358_v52 }
 0x1a4   :  { %v318_v55 = vpop.f32.mrf.mxu0  ;;  %v637_v56 = vpop.f32.mrf.mxu1 }
 0x1a5   :  { %v1464_v57 = vadd.f32 %v2743_v11, %v1417_v54  ;;  %v694_v58 = vmax.f32 %v318_v55, %v637_v56 }
 0x1a7   :  { %v1507_v59 = vmax.f32 %v1464_v57, 0.0 }
 0x1a8   :  { %v999_v60 = vpop.f32.mrf.mxu2  ;;  %v1361_v61 = vpop.f32.mrf.mxu3 }
 0x1a9   :  { %1551 = vst.msk [vmem:[%s2812_s3 + $0x118] sm:$0xff] %vm1515_vm2, %v1507_v59  ;;  %v1056_v62 = vmax.f32 %v694_v58, %v999_v60 }
 0x1ab   :  { %v1418_v63 = vmax.f32 %v1056_v62, %v1361_v61 }
 0x1ac   :  { %v321_v0 = vpop.f32.mrf.mxu0  ;;  %v640_v1 = vpop.f32.mrf.mxu1 }
 0x1ad   :  { %v1465_v2 = vadd.f32 %v2743_v11, %v1418_v63  ;;  %v695_v3 = vmax.f32 %v321_v0, %v640_v1 }
 0x1af   :  { %v1508_v4 = vmax.f32 %v1465_v2, 0.0 }
 0x1b0   :  { %v1002_v5 = vpop.f32.mrf.mxu2  ;;  %v1364_v6 = vpop.f32.mrf.mxu3 }
 0x1b1   :  { %1552 = vst.msk [vmem:[%s2812_s3 + $0x120] sm:$0xff] %vm1515_vm2, %v1508_v4  ;;  %v1057_v7 = vmax.f32 %v695_v3, %v1002_v5 }
 0x1b3   :  { %v1419_v8 = vmax.f32 %v1057_v7, %v1364_v6 }
 0x1b4   :  { %v324_v9 = vpop.f32.mrf.mxu0  ;;  %v643_v10 = vpop.f32.mrf.mxu1 }
 0x1b5   :  { %v1466_v12 = vadd.f32 %v2743_v11, %v1419_v8  ;;  %v696_v13 = vmax.f32 %v324_v9, %v643_v10 }
 0x1b7   :  { %v1509_v14 = vmax.f32 %v1466_v12, 0.0 }
 0x1b8   :  { %v1005_v15 = vpop.f32.mrf.mxu2  ;;  %v1367_v16 = vpop.f32.mrf.mxu3 }
 0x1b9   :  { %1553 = vst.msk [vmem:[%s2812_s3 + $0x128] sm:$0xff] %vm1515_vm2, %v1509_v14  ;;  %v1058_v17 = vmax.f32 %v696_v13, %v1005_v15 }
 0x1bb   :  { %v1420_v18 = vmax.f32 %v1058_v17, %v1367_v16 }
 0x1bc   :  { %v327_v19 = vpop.f32.mrf.mxu0  ;;  %v646_v20 = vpop.f32.mrf.mxu1 }
 0x1bd   :  { %v1467_v21 = vadd.f32 %v2743_v11, %v1420_v18  ;;  %v697_v22 = vmax.f32 %v327_v19, %v646_v20 }
 0x1bf   :  { %v1510_v23 = vmax.f32 %v1467_v21, 0.0 }
 0x1c0   :  { %v1008_v24 = vpop.f32.mrf.mxu2  ;;  %v1370_v25 = vpop.f32.mrf.mxu3 }
 0x1c1   :  { %1554 = vst.msk [vmem:[%s2812_s3 + $0x130] sm:$0xff] %vm1515_vm2, %v1510_v23  ;;  %v1059_v26 = vmax.f32 %v697_v22, %v1008_v24 }
 0x1c3   :  { %v1421_v27 = vmax.f32 %v1059_v26, %v1370_v25 }
 0x1c4   :  { %v330_v28 = vpop.f32.mrf.mxu0  ;;  %v649_v29 = vpop.f32.mrf.mxu1 }
 0x1c5   :  { %v1468_v30 = vadd.f32 %v2743_v11, %v1421_v27  ;;  %v698_v31 = vmax.f32 %v330_v28, %v649_v29 }
 0x1c7   :  { %v1511_v32 = vmax.f32 %v1468_v30, 0.0 }
 0x1c8   :  { %v1011_v33 = vpop.f32.mrf.mxu2  ;;  %v1373_v34 = vpop.f32.mrf.mxu3 }
 0x1c9   :  { %1555 = vst.msk [vmem:[%s2812_s3 + $0x138] sm:$0xff] %vm1515_vm2, %v1511_v32  ;;  %v1060_v35 = vmax.f32 %v698_v31, %v1011_v33 }
 0x1cb   :  { %v1422_v36 = vmax.f32 %v1060_v35, %v1373_v34 }
 0x1cc   :  { %v333_v37 = vpop.f32.mrf.mxu0  ;;  %v652_v38 = vpop.f32.mrf.mxu1 }
 0x1cd   :  { %v1469_v39 = vadd.f32 %v2743_v11, %v1422_v36  ;;  %v699_v40 = vmax.f32 %v333_v37, %v652_v38 }
 0x1cf   :  { %v1512_v41 = vmax.f32 %v1469_v39, 0.0 }
 0x1d0   :  { %v1014_v42 = vpop.f32.mrf.mxu2  ;;  %v1376_v43 = vpop.f32.mrf.mxu3 }
 0x1d1   :  { %1556 = vst.msk [vmem:[%s2812_s3 + $0x140] sm:$0xff] %vm1515_vm2, %v1512_v41  ;;  %v1061_v44 = vmax.f32 %v699_v40, %v1014_v42 }
 0x1d3   :  { %v1423_v45 = vmax.f32 %v1061_v44, %v1376_v43 }
 0x1d4   :  { %v336_v46 = vpop.f32.mrf.mxu0  ;;  %v655_v47 = vpop.f32.mrf.mxu1 }
 0x1d5   :  { %v1470_v48 = vadd.f32 %v2743_v11, %v1423_v45  ;;  %v700_v49 = vmax.f32 %v336_v46, %v655_v47 }
 0x1d7   :  { %v1513_v50 = vmax.f32 %v1470_v48, 0.0 }
 0x1d8   :  { %v1017_v51 = vpop.f32.mrf.mxu2  ;;  %v1379_v52 = vpop.f32.mrf.mxu3 }
 0x1d9   :  { %1557 = vst.msk [vmem:[%s2812_s3 + $0x148] sm:$0xff] %vm1515_vm2, %v1513_v50  ;;  %v1062_v53 = vmax.f32 %v700_v49, %v1017_v51 }
 0x1db   :  { %v1424_v54 = vmax.f32 %v1062_v53, %v1379_v52 }
 0x1dd   :  { %v1471_v55 = vadd.f32 %v2743_v11, %v1424_v54 }
 0x1df   :  { %v1514_v56 = vmax.f32 %v1471_v55, 0.0 }
 0x1e1   :  { %1559 = vst.msk [vmem:[%s2812_s3 + $0x150] sm:$0x3] %vm1558_vm3, %v1514_v56 }

// kernel: cnn_forward.4
= control target key start
LH: loop header
LB: loop body
LE: loop exit
PB: predicated region body
PF: predicated region fallthrough
CT: control target
= control target key end

     0   :  { %vm31_vm0 = vcmask 523264   ;;  %vm395_vm1 = vcmask 261120   ;;  %s711_s1 = inlined_call_operand.vmem [shape: f32[64,32], index: 1, kind: input, shape index: {}]   ;;  %s712_s0 = inlined_call_operand.vmem [shape: f32[4,72,64], index: 0, kind: input, shape index: {}]   ;;  %s713_s2 = inlined_call_operand.vmem [shape: f32[1,32], index: 2, kind: input, shape index: {}]   ;;  %s714_s3 = inlined_call_operand.vmem [shape: f32[72,32], index: 3, kind: output, shape index: {}]  }
   0x1   :  { %v21_v0 = vld [vmem:[%s711_s1 + $0x38] sm:$0xff]  ;;  %v20_v1 = vld [vmem:[%s711_s1 + $0x30] sm:$0xff]  ;;  %v19_v2 = vld [vmem:[%s711_s1 + $0x28] sm:$0xff] }
   0x2   :  { %238 = vmatpush.msra.mxu2 %v21_v0  ;;  %328 = vmatpush.msra.mxu3 %v21_v0  ;;  %v18_v3 = vld [vmem:[%s711_s1 + $0x20] sm:$0xff]  ;;  %v17_v4 = vld [vmem:[%s711_s1 + $0x18] sm:$0xff]  ;;  %v16_v5 = vld [vmem:[%s711_s1 + $0x10] sm:$0xff] }
   0x3   :  { %67 = vmatpush.msra.mxu0 %v21_v0  ;;  %148 = vmatpush.msra.mxu1 %v21_v0  ;;  %v15_v6 = vld [vmem:[%s711_s1 + $0x8] sm:$0xff]  ;;  %v14_v7 = vld [vmem:[%s711_s1] sm:$0xff]  ;;  %v436_v8 = vld [vmem:[%s712_s0 + $0x90] sm:$0xff] }
   0x4   :  { %239 = vmatpush.msra.mxu2 %v20_v1  ;;  %329 = vmatpush.msra.mxu3 %v20_v1  ;;  %v454_v9 = vld [vmem:[%s712_s0 + $0xd8] sm:$0xff]  ;;  %v22_v10 = vld [vmem:[%s712_s0] sm:$0xff]  ;;  %v418_v11 = vld [vmem:[%s712_s0 + $0x48] sm:$0xff] }
   0x5   :  { %68 = vmatpush.msra.mxu0 %v20_v1  ;;  %149 = vmatpush.msra.mxu1 %v20_v1  ;;  %v437_v12 = vld [vmem:[%s712_s0 + $0x98] sm:$0xff]  ;;  %v455_v13 = vld [vmem:[%s712_s0 + $0xe0] sm:$0xff]  ;;  %v23_v14 = vld [vmem:[%s712_s0 + $0x8] sm:$0xff] }
   0x6   :  { %240 = vmatpush.msra.mxu2 %v19_v2  ;;  %330 = vmatpush.msra.mxu3 %v19_v2  ;;  %v419_v15 = vld [vmem:[%s712_s0 + $0x50] sm:$0xff]  ;;  %v438_v16 = vld [vmem:[%s712_s0 + $0xa0] sm:$0xff]  ;;  %v456_v17 = vld [vmem:[%s712_s0 + $0xe8] sm:$0xff] }
   0x7   :  { %69 = vmatpush.msra.mxu0 %v19_v2  ;;  %150 = vmatpush.msra.mxu1 %v19_v2  ;;  %v24_v18 = vld [vmem:[%s712_s0 + $0x10] sm:$0xff]  ;;  %v420_v19 = vld [vmem:[%s712_s0 + $0x58] sm:$0xff]  ;;  %v439_v20 = vld [vmem:[%s712_s0 + $0xa8] sm:$0xff] }
   0x8   :  { %241 = vmatpush.msra.mxu2 %v18_v3  ;;  %331 = vmatpush.msra.mxu3 %v18_v3  ;;  %v457_v21 = vld [vmem:[%s712_s0 + $0xf0] sm:$0xff]  ;;  %v25_v22 = vld [vmem:[%s712_s0 + $0x18] sm:$0xff]  ;;  %v421_v23 = vld [vmem:[%s712_s0 + $0x60] sm:$0xff] }
   0x9   :  { %70 = vmatpush.msra.mxu0 %v18_v3  ;;  %151 = vmatpush.msra.mxu1 %v18_v3  ;;  %v440_v24 = vld [vmem:[%s712_s0 + $0xb0] sm:$0xff]  ;;  %v458_v25 = vld [vmem:[%s712_s0 + $0xf8] sm:$0xff]  ;;  %v26_v26 = vld [vmem:[%s712_s0 + $0x20] sm:$0xff] }
   0xa   :  { %242 = vmatpush.msra.mxu2 %v17_v4  ;;  %332 = vmatpush.msra.mxu3 %v17_v4  ;;  %v422_v27 = vld [vmem:[%s712_s0 + $0x68] sm:$0xff]  ;;  %v441_v28 = vld [vmem:[%s712_s0 + $0xb8] sm:$0xff]  ;;  %v459_v29 = vld [vmem:[%s712_s0 + $0x100] sm:$0xff] }
   0xb   :  { %71 = vmatpush.msra.mxu0 %v17_v4  ;;  %152 = vmatpush.msra.mxu1 %v17_v4  ;;  %v27_v30 = vld [vmem:[%s712_s0 + $0x28] sm:$0xff]  ;;  %v423_v31 = vld [vmem:[%s712_s0 + $0x70] sm:$0xff]  ;;  %v442_v32 = vld [vmem:[%s712_s0 + $0xc0] sm:$0xff] }
   0xc   :  { %243 = vmatpush.msra.mxu2 %v16_v5  ;;  %333 = vmatpush.msra.mxu3 %v16_v5  ;;  %v460_v33 = vld [vmem:[%s712_s0 + $0x108] sm:$0xff]  ;;  %v28_v34 = vld [vmem:[%s712_s0 + $0x30] sm:$0xff]  ;;  %v424_v35 = vld [vmem:[%s712_s0 + $0x78] sm:$0xff] }
   0xd   :  { %72 = vmatpush.msra.mxu0 %v16_v5  ;;  %153 = vmatpush.msra.mxu1 %v16_v5  ;;  %v443_v36 = vld [vmem:[%s712_s0 + $0xc8] sm:$0xff]  ;;  %v461_v37 = vld [vmem:[%s712_s0 + $0x110] sm:$0xff]  ;;  %v29_v38 = vld [vmem:[%s712_s0 + $0x38] sm:$0xff] }
   0xe   :  { %244 = vmatpush.msra.mxu2 %v15_v6  ;;  %334 = vmatpush.msra.mxu3 %v15_v6  ;;  %v425_v39 = vld [vmem:[%s712_s0 + $0x80] sm:$0xff]  ;;  %v444_v40 = vld [vmem:[%s712_s0 + $0xd0] sm:$0xff]  ;;  %v462_v41 = vld [vmem:[%s712_s0 + $0x118] sm:$0xff] }
   0xf   :  { %73 = vmatpush.msra.mxu0 %v15_v6  ;;  %154 = vmatpush.msra.mxu1 %v15_v6  ;;  %v30_v42 = vld [vmem:[%s712_s0 + $0x40] sm:$0xff]  ;;  %v426_v43 = vld [vmem:[%s712_s0 + $0x88] sm:$0xff] }
  0x10   :  { %245 = vmatpush.msra.mxu2 %v14_v7  ;;  %335 = vmatpush.msra.mxu3 %v14_v7  ;;  %v664_v50 = vld [vmem:[%s713_s2] ss:$0 sm:$0xff] }
  0x11   :  { %445 = vmatmul.msk.f32.vlgmr.msra.gmra.mxu2 %vm31_vm0, %v436_v8  ;;  %463 = vmatmul.msk.f32.vlgmr.msra.gmra.mxu3 %vm31_vm0, %v454_v9 }
  0x12   :  { %74 = vmatpush.msra.mxu0 %v14_v7  ;;  %155 = vmatpush.msra.mxu1 %v14_v7 }
  0x13   :  { %409 = vmatmul.msk.f32.vlgmr.msra.gmra.mxu0 %vm31_vm0, %v22_v10  ;;  %427 = vmatmul.msk.f32.vlgmr.msra.gmra.mxu1 %vm31_vm0, %v418_v11 }
  0x19   :  { %446 = vmatmul.msk.f32.gmra.mxu2 %vm31_vm0, %v437_v12  ;;  %464 = vmatmul.msk.f32.gmra.mxu3 %vm31_vm0, %v455_v13 }
  0x1b   :  { %410 = vmatmul.msk.f32.gmra.mxu0 %vm31_vm0, %v23_v14  ;;  %428 = vmatmul.msk.f32.gmra.mxu1 %vm31_vm0, %v419_v15 }
  0x21   :  { %447 = vmatmul.msk.f32.gmra.mxu2 %vm31_vm0, %v438_v16  ;;  %465 = vmatmul.msk.f32.gmra.mxu3 %vm31_vm0, %v456_v17 }
  0x23   :  { %411 = vmatmul.msk.f32.gmra.mxu0 %vm31_vm0, %v24_v18  ;;  %429 = vmatmul.msk.f32.gmra.mxu1 %vm31_vm0, %v420_v19 }
  0x29   :  { %448 = vmatmul.msk.f32.gmra.mxu2 %vm31_vm0, %v439_v20  ;;  %466 = vmatmul.msk.f32.gmra.mxu3 %vm31_vm0, %v457_v21 }
  0x2b   :  { %412 = vmatmul.msk.f32.gmra.mxu0 %vm31_vm0, %v25_v22  ;;  %430 = vmatmul.msk.f32.gmra.mxu1 %vm31_vm0, %v421_v23 }
  0x31   :  { %449 = vmatmul.msk.f32.gmra.mxu2 %vm31_vm0, %v440_v24  ;;  %467 = vmatmul.msk.f32.gmra.mxu3 %vm31_vm0, %v458_v25 }
  0x33   :  { %413 = vmatmul.msk.f32.gmra.mxu0 %vm31_vm0, %v26_v26  ;;  %431 = vmatmul.msk.f32.gmra.mxu1 %vm31_vm0, %v422_v27 }
  0x39   :  { %450 = vmatmul.msk.f32.gmra.mxu2 %vm31_vm0, %v441_v28  ;;  %468 = vmatmul.msk.f32.gmra.mxu3 %vm31_vm0, %v459_v29 }
  0x3b   :  { %414 = vmatmul.msk.f32.gmra.mxu0 %vm31_vm0, %v27_v30  ;;  %432 = vmatmul.msk.f32.gmra.mxu1 %vm31_vm0, %v423_v31 }
  0x41   :  { %451 = vmatmul.msk.f32.gmra.mxu2 %vm31_vm0, %v442_v32  ;;  %469 = vmatmul.msk.f32.gmra.mxu3 %vm31_vm0, %v460_v33 }
  0x43   :  { %415 = vmatmul.msk.f32.gmra.mxu0 %vm31_vm0, %v28_v34  ;;  %433 = vmatmul.msk.f32.gmra.mxu1 %vm31_vm0, %v424_v35 }
  0x49   :  { %452 = vmatmul.msk.f32.gmra.mxu2 %vm31_vm0, %v443_v36  ;;  %470 = vmatmul.msk.f32.gmra.mxu3 %vm31_vm0, %v461_v37 }
  0x4b   :  { %416 = vmatmul.msk.f32.gmra.mxu0 %vm31_vm0, %v29_v38  ;;  %434 = vmatmul.msk.f32.gmra.mxu1 %vm31_vm0, %v425_v39 }
  0x51   :  { %453 = vmatmul.msk.f32.gmra.mxu2 %vm31_vm0, %v444_v40  ;;  %471 = vmatmul.msk.f32.gmra.mxu3 %vm31_vm0, %v462_v41 }
  0x53   :  { %417 = vmatmul.msk.f32.gmra.mxu0 %vm31_vm0, %v30_v42  ;;  %435 = vmatmul.msk.f32.gmra.mxu1 %vm31_vm0, %v426_v43 }
  0x90   :  { %v76_v44 = vpop.f32.mrf.mxu0  ;;  %v157_v45 = vpop.f32.mrf.mxu1 }
  0x91   :  { %v184_v46 = vmax.f32 %v76_v44, %v157_v45 }
  0x94   :  { %v247_v47 = vpop.f32.mrf.mxu2  ;;  %v337_v48 = vpop.f32.mrf.mxu3 }
  0x95   :  { %v274_v49 = vmax.f32 %v184_v46, %v247_v47 }
  0x97   :  { %v364_v51 = vmax.f32 %v274_v49, %v337_v48 }
  0x98   :  { %v79_v52 = vpop.f32.mrf.mxu0  ;;  %v160_v53 = vpop.f32.mrf.mxu1 }
  0x99   :  { %v377_v54 = vadd.f32 %v664_v50, %v364_v51  ;;  %v185_v55 = vmax.f32 %v79_v52, %v160_v53 }
  0x9b   :  { %v386_v56 = vmax.f32 %v377_v54, 0.0 }
  0x9c   :  { %v250_v57 = vpop.f32.mrf.mxu2  ;;  %v340_v58 = vpop.f32.mrf.mxu3 }
  0x9d   :  { %396 = vst.msk [vmem:[%s714_s3] sm:$0xff] %vm395_vm1, %v386_v56  ;;  %v275_v59 = vmax.f32 %v185_v55, %v250_v57 }
  0x9f   :  { %v365_v60 = vmax.f32 %v275_v59, %v340_v58 }
  0xa0   :  { %v82_v61 = vpop.f32.mrf.mxu0  ;;  %v163_v62 = vpop.f32.mrf.mxu1 }
  0xa1   :  { %v378_v63 = vadd.f32 %v664_v50, %v365_v60  ;;  %v186_v0 = vmax.f32 %v82_v61, %v163_v62 }
  0xa3   :  { %v387_v1 = vmax.f32 %v378_v63, 0.0 }
  0xa4   :  { %v253_v2 = vpop.f32.mrf.mxu2  ;;  %v343_v3 = vpop.f32.mrf.mxu3 }
  0xa5   :  { %397 = vst.msk [vmem:[%s714_s3 + $0x8] sm:$0xff] %vm395_vm1, %v387_v1  ;;  %v276_v4 = vmax.f32 %v186_v0, %v253_v2 }
  0xa7   :  { %v366_v5 = vmax.f32 %v276_v4, %v343_v3 }
  0xa8   :  { %v85_v6 = vpop.f32.mrf.mxu0  ;;  %v166_v7 = vpop.f32.mrf.mxu1 }
  0xa9   :  { %v379_v8 = vadd.f32 %v664_v50, %v366_v5  ;;  %v187_v9 = vmax.f32 %v85_v6, %v166_v7 }
  0xab   :  { %v388_v10 = vmax.f32 %v379_v8, 0.0 }
  0xac   :  { %v256_v11 = vpop.f32.mrf.mxu2  ;;  %v346_v12 = vpop.f32.mrf.mxu3 }
  0xad   :  { %398 = vst.msk [vmem:[%s714_s3 + $0x10] sm:$0xff] %vm395_vm1, %v388_v10  ;;  %v277_v13 = vmax.f32 %v187_v9, %v256_v11 }
  0xaf   :  { %v367_v14 = vmax.f32 %v277_v13, %v346_v12 }
  0xb0   :  { %v88_v15 = vpop.f32.mrf.mxu0  ;;  %v169_v16 = vpop.f32.mrf.mxu1 }
  0xb1   :  { %v380_v17 = vadd.f32 %v664_v50, %v367_v14  ;;  %v188_v18 = vmax.f32 %v88_v15, %v169_v16 }
  0xb3   :  { %v389_v19 = vmax.f32 %v380_v17, 0.0 }
  0xb4   :  { %v259_v20 = vpop.f32.mrf.mxu2  ;;  %v349_v21 = vpop.f32.mrf.mxu3 }
  0xb5   :  { %399 = vst.msk [vmem:[%s714_s3 + $0x18] sm:$0xff] %vm395_vm1, %v389_v19  ;;  %v278_v22 = vmax.f32 %v188_v18, %v259_v20 }
  0xb7   :  { %v368_v23 = vmax.f32 %v278_v22, %v349_v21 }
  0xb8   :  { %v91_v24 = vpop.f32.mrf.mxu0  ;;  %v172_v25 = vpop.f32.mrf.mxu1 }
  0xb9   :  { %v381_v26 = vadd.f32 %v664_v50, %v368_v23  ;;  %v189_v27 = vmax.f32 %v91_v24, %v172_v25 }
  0xbb   :  { %v390_v28 = vmax.f32 %v381_v26, 0.0 }
  0xbc   :  { %v262_v29 = vpop.f32.mrf.mxu2  ;;  %v352_v30 = vpop.f32.mrf.mxu3 }
  0xbd   :  { %400 = vst.msk [vmem:[%s714_s3 + $0x20] sm:$0xff] %vm395_vm1, %v390_v28  ;;  %v279_v31 = vmax.f32 %v189_v27, %v262_v29 }
  0xbf   :  { %v369_v32 = vmax.f32 %v279_v31, %v352_v30 }
  0xc0   :  { %v94_v33 = vpop.f32.mrf.mxu0  ;;  %v175_v34 = vpop.f32.mrf.mxu1 }
  0xc1   :  { %v382_v35 = vadd.f32 %v664_v50, %v369_v32  ;;  %v190_v36 = vmax.f32 %v94_v33, %v175_v34 }
  0xc3   :  { %v391_v37 = vmax.f32 %v382_v35, 0.0 }
  0xc4   :  { %v265_v38 = vpop.f32.mrf.mxu2  ;;  %v355_v39 = vpop.f32.mrf.mxu3 }
  0xc5   :  { %401 = vst.msk [vmem:[%s714_s3 + $0x28] sm:$0xff] %vm395_vm1, %v391_v37  ;;  %v280_v40 = vmax.f32 %v190_v36, %v265_v38 }
  0xc7   :  { %v370_v41 = vmax.f32 %v280_v40, %v355_v39 }
  0xc8   :  { %v97_v42 = vpop.f32.mrf.mxu0  ;;  %v178_v43 = vpop.f32.mrf.mxu1 }
  0xc9   :  { %v383_v44 = vadd.f32 %v664_v50, %v370_v41  ;;  %v191_v45 = vmax.f32 %v97_v42, %v178_v43 }
  0xcb   :  { %v392_v46 = vmax.f32 %v383_v44, 0.0 }
  0xcc   :  { %v268_v47 = vpop.f32.mrf.mxu2  ;;  %v358_v48 = vpop.f32.mrf.mxu3 }
  0xcd   :  { %402 = vst.msk [vmem:[%s714_s3 + $0x30] sm:$0xff] %vm395_vm1, %v392_v46  ;;  %v281_v49 = vmax.f32 %v191_v45, %v268_v47 }
  0xcf   :  { %v371_v51 = vmax.f32 %v281_v49, %v358_v48 }
  0xd0   :  { %v100_v52 = vpop.f32.mrf.mxu0  ;;  %v181_v53 = vpop.f32.mrf.mxu1 }
  0xd1   :  { %v384_v54 = vadd.f32 %v664_v50, %v371_v51  ;;  %v192_v55 = vmax.f32 %v100_v52, %v181_v53 }
  0xd3   :  { %v393_v56 = vmax.f32 %v384_v54, 0.0 }
  0xd4   :  { %v271_v57 = vpop.f32.mrf.mxu2  ;;  %v361_v58 = vpop.f32.mrf.mxu3 }
  0xd5   :  { %403 = vst.msk [vmem:[%s714_s3 + $0x38] sm:$0xff] %vm395_vm1, %v393_v56  ;;  %v282_v59 = vmax.f32 %v192_v55, %v271_v57 }
  0xd7   :  { %v372_v60 = vmax.f32 %v282_v59, %v361_v58 }
  0xd9   :  { %v385_v61 = vadd.f32 %v664_v50, %v372_v60 }
  0xdb   :  { %v394_v62 = vmax.f32 %v385_v61, 0.0 }
  0xdd   :  { %404 = vst.msk [vmem:[%s714_s3 + $0x40] sm:$0xff] %vm395_vm1, %v394_v62 }

// kernel: cnn_forward.5
= control target key start
LH: loop header
LB: loop body
LE: loop exit
PB: predicated region body
PF: predicated region fallthrough
CT: control target
= control target key end

     0   :  { %s9240_s0 = inlined_call_operand.vmem [shape: f32[25,2,128], index: 0, kind: input, shape index: {}]   ;;  %s9241_s1 = inlined_call_operand.vmem [shape: f32[128,64], index: 1, kind: input, shape index: {}]   ;;  %s9242_s2 = inlined_call_operand.vmem [shape: f32[1,64], index: 2, kind: input, shape index: {}]   ;;  %s9243_s3 = inlined_call_operand.vmem [shape: f32[25,64,512], index: 3, kind: input, shape index: {}]   ;;  %s9244_s4 = inlined_call_operand.vmem [shape: f32[1,512], index: 4, kind: input, shape index: {}]   ;;  %s9245_s5 = inlined_call_operand.vmem [shape: f32[512,256], index: 5, kind: input, shape index: {}]   ;;  %s9246_s6 = inlined_call_operand.vmem [shape: f32[1,256], index: 6, kind: input, shape index: {}]   ;;  %s9247_s7 = inlined_call_operand.vmem [shape: f32[256,128], index: 7, kind: input, shape index: {}]   ;;  %s9248_s8 = inlined_call_operand.vmem [shape: f32[1,128], index: 8, kind: input, shape index: {}]   ;;  %s9249_s9 = inlined_call_operand.vmem [shape: f32[128,8], index: 9, kind: input, shape index: {}]   ;;  %s9250_s10 = inlined_call_operand.vmem [shape: f32[1,8], index: 10, kind: input, shape index: {}]   ;;  %s9251_s11 = inlined_call_operand.hbm [shape: f32[2,8], index: 11, kind: output, shape index: {}]  }
   0x1   :  { %v5112_v0 = vld [vmem:[%s9241_s1 + $0x78] sm:$0xff]  ;;  %v5117_v1 = vld [vmem:[%s9241_s1 + $0x70] sm:$0xff]  ;;  %v5124_v2 = vld [vmem:[%s9241_s1 + $0x68] sm:$0xff] }
   0x2   :  { %60 = vmatpush.msra.mxu0 %v5112_v0  ;;  %115 = vmatpush.msra.mxu1 %v5112_v0  ;;  %v5131_v3 = vld [vmem:[%s9241_s1 + $0x60] sm:$0xff]  ;;  %v5138_v4 = vld [vmem:[%s9241_s1 + $0x58] sm:$0xff] }
   0x4   :  { %61 = vmatpush.msra.mxu0 %v5117_v1  ;;  %116 = vmatpush.msra.mxu1 %v5117_v1 }
   0x6   :  { %62 = vmatpush.msra.mxu0 %v5124_v2  ;;  %117 = vmatpush.msra.mxu1 %v5124_v2 }
   0x8   :  { %63 = vmatpush.msra.mxu0 %v5131_v3  ;;  %118 = vmatpush.msra.mxu1 %v5131_v3 }
   0x9   :  { %16 = vsyncpa [#allocation3], 0  ;;  %v5145_v5 = vld [vmem:[%s9241_s1 + $0x50] sm:$0xff]  ;;  %v5152_v6 = vld [vmem:[%s9241_s1 + $0x48] sm:$0xff]  ;;  %vm169_vm0 = vcmask 523264   ;;  %s5048_s13 = smov [#allocation2]  }
   0xa   :  { %64 = vmatpush.msra.mxu0 %v5138_v4  ;;  %119 = vmatpush.msra.mxu1 %v5138_v4  ;;  %v5159_v7 = vld [vmem:[%s9241_s1 + $0x40] sm:$0xff]  ;;  %v5166_v8 = vld [vmem:[%s9241_s1 + $0x38] sm:$0xff]  ;;  %v5173_v9 = vld [vmem:[%s9241_s1 + $0x30] sm:$0xff]  ;;  %vm4056_vm1 = vcmask 58368  }
   0xb   :  { %v5180_v10 = vld [vmem:[%s9241_s1 + $0x28] sm:$0xff]  ;;  %v5187_v11 = vld [vmem:[%s9241_s1 + $0x20] sm:$0xff]  ;;  %v5194_v12 = vld [vmem:[%s9241_s1 + $0x18] sm:$0xff] }
   0xc   :  { %65 = vmatpush.msra.mxu0 %v5145_v5  ;;  %120 = vmatpush.msra.mxu1 %v5145_v5  ;;  %v5201_v13 = vld [vmem:[%s9241_s1 + $0x10] sm:$0xff]  ;;  %v5208_v14 = vld [vmem:[%s9241_s1 + $0x8] sm:$0xff]  ;;  %v5215_v15 = vld [vmem:[%s9241_s1] sm:$0xff] }
   0xd   :  { %v56_v16 = vld [vmem:[%s9240_s0] sm:$0x3]  ;;  %v4074_v17 = vld [vmem:[%s9240_s0 + $0x2] sm:$0x3]  ;;  %v4104_v19 = vld [vmem:[%s9243_s3 + $0x1e8] sm:$0xff] }
   0xe   :  { %66 = vmatpush.msra.mxu0 %v5152_v6  ;;  %121 = vmatpush.msra.mxu1 %v5152_v6  ;;  %v4103_v18 = vld [vmem:[%s9243_s3 + $0x1e0] sm:$0xff]  ;;  %v4100_v21 = vld [vmem:[%s9243_s3 + $0x1c8] sm:$0xff]  ;;  %v4105_v40 = vld [vmem:[%s9243_s3 + $0x1f0] sm:$0xff] }
   0xf   :  { %v4099_v20 = vld [vmem:[%s9243_s3 + $0x1c0] sm:$0xff]  ;;  %181 = vmatpush.msra.mxu2 %v4103_v18  ;;  %201 = vmatpush.msra.mxu3 %v4104_v19  ;;  %v4096_v23 = vld [vmem:[%s9243_s3 + $0x1a8] sm:$0xff]  ;;  %v4106_v41 = vld [vmem:[%s9243_s3 + $0x1f8] sm:$0xff] }
  0x10   :  { %67 = vmatpush.msra.mxu0 %v5159_v7  ;;  %122 = vmatpush.msra.mxu1 %v5159_v7  ;;  %v4095_v22 = vld [vmem:[%s9243_s3 + $0x1a0] sm:$0xff]  ;;  %v4092_v27 = vld [vmem:[%s9243_s3 + $0x188] sm:$0xff]  ;;  %v4101_v42 = vld [vmem:[%s9243_s3 + $0x1d0] sm:$0xff] }
  0x11   :  { %182 = vmatpush.msra.mxu2 %v4099_v20  ;;  %v109_v24 = vld [vmem:[%s9243_s3 + $0xe0] sm:$0xff]  ;;  %202 = vmatpush.msra.mxu3 %v4100_v21  ;;  %v4088_v30 = vld [vmem:[%s9243_s3 + $0x168] sm:$0xff]  ;;  %v4102_v44 = vld [vmem:[%s9243_s3 + $0x1d8] sm:$0xff] }
  0x12   :  { %68 = vmatpush.msra.mxu0 %v5166_v8  ;;  %123 = vmatpush.msra.mxu1 %v5166_v8  ;;  %v4091_v25 = vld [vmem:[%s9243_s3 + $0x180] sm:$0xff]  ;;  %v4084_v33 = vld [vmem:[%s9243_s3 + $0x148] sm:$0xff]  ;;  %v4097_v45 = vld [vmem:[%s9243_s3 + $0x1b0] sm:$0xff] }
  0x13   :  { %v105_v26 = vld [vmem:[%s9243_s3 + $0xc0] sm:$0xff]  ;;  %183 = vmatpush.msra.mxu2 %v4095_v22  ;;  %203 = vmatpush.msra.mxu3 %v4096_v23  ;;  %v4080_v36 = vld [vmem:[%s9243_s3 + $0x128] sm:$0xff]  ;;  %v4098_v47 = vld [vmem:[%s9243_s3 + $0x1b8] sm:$0xff] }
  0x14   :  { %69 = vmatpush.msra.mxu0 %v5173_v9  ;;  %124 = vmatpush.msra.mxu1 %v5173_v9  ;;  %v101_v28 = vld [vmem:[%s9243_s3 + $0xa0] sm:$0xff]  ;;  %v4076_v39 = vld [vmem:[%s9243_s3 + $0x108] sm:$0xff]  ;;  %v4093_v48 = vld [vmem:[%s9243_s3 + $0x190] sm:$0xff] }
  0x15   :  { %v4087_v29 = vld [vmem:[%s9243_s3 + $0x160] sm:$0xff]  ;;  %184 = vmatpush.msra.mxu2 %v4091_v25  ;;  %204 = vmatpush.msra.mxu3 %v4092_v27  ;;  %v110_v49 = vld [vmem:[%s9243_s3 + $0xe8] sm:$0xff]  ;;  %v4094_v50 = vld [vmem:[%s9243_s3 + $0x198] sm:$0xff] }
  0x16   :  { %70 = vmatpush.msra.mxu0 %v5180_v10  ;;  %125 = vmatpush.msra.mxu1 %v5180_v10  ;;  %v97_v31 = vld [vmem:[%s9243_s3 + $0x80] sm:$0xff]  ;;  %v4089_v51 = vld [vmem:[%s9243_s3 + $0x170] sm:$0xff]  ;;  %v4090_v52 = vld [vmem:[%s9243_s3 + $0x178] sm:$0xff] }
  0x17   :  { %v4083_v32 = vld [vmem:[%s9243_s3 + $0x140] sm:$0xff]  ;;  %185 = vmatpush.msra.mxu2 %v4087_v29  ;;  %205 = vmatpush.msra.mxu3 %v4088_v30  ;;  %v4085_v54 = vld [vmem:[%s9243_s3 + $0x150] sm:$0xff]  ;;  %v106_v55 = vld [vmem:[%s9243_s3 + $0xc8] sm:$0xff] }
  0x18   :  { %71 = vmatpush.msra.mxu0 %v5187_v11  ;;  %126 = vmatpush.msra.mxu1 %v5187_v11  ;;  %v93_v34 = vld [vmem:[%s9243_s3 + $0x60] sm:$0xff]  ;;  %v4086_v56 = vld [vmem:[%s9243_s3 + $0x158] sm:$0xff]  ;;  %v4081_v57 = vld [vmem:[%s9243_s3 + $0x130] sm:$0xff] }
  0x19   :  { %v4079_v35 = vld [vmem:[%s9243_s3 + $0x120] sm:$0xff]  ;;  %186 = vmatpush.msra.mxu2 %v4083_v32  ;;  %206 = vmatpush.msra.mxu3 %v4084_v33  ;;  %v102_v58 = vld [vmem:[%s9243_s3 + $0xa8] sm:$0xff]  ;;  %v4082_v59 = vld [vmem:[%s9243_s3 + $0x138] sm:$0xff] }
  0x1a   :  { %72 = vmatpush.msra.mxu0 %v5194_v12  ;;  %127 = vmatpush.msra.mxu1 %v5194_v12  ;;  %v89_v37 = vld [vmem:[%s9243_s3 + $0x40] sm:$0xff]  ;;  %v4077_v60 = vld [vmem:[%s9243_s3 + $0x110] sm:$0xff]  ;;  %v98_v61 = vld [vmem:[%s9243_s3 + $0x88] sm:$0xff] }
  0x1b   :  { %v4075_v38 = vld [vmem:[%s9243_s3 + $0x100] sm:$0xff]  ;;  %187 = vmatpush.msra.mxu2 %v4079_v35  ;;  %207 = vmatpush.msra.mxu3 %v4080_v36  ;;  %v4078_v62 = vld [vmem:[%s9243_s3 + $0x118] sm:$0xff]  ;;  %v94_v63 = vld [vmem:[%s9243_s3 + $0x68] sm:$0xff] }
  0x1c   :  { %73 = vmatpush.msra.mxu0 %v5201_v13  ;;  %128 = vmatpush.msra.mxu1 %v5201_v13  ;;  %v85_v43 = vld [vmem:[%s9243_s3 + $0x20] sm:$0xff]  ;;  %v82_v18 = vld [vmem:[%s9243_s3 + $0x8] sm:$0xff]  ;;  %v112_v27 = vld [vmem:[%s9243_s3 + $0xf8] sm:$0xff] }
  0x1d   :  { %188 = vmatpush.msra.mxu2 %v4075_v38  ;;  %208 = vmatpush.msra.mxu3 %v4076_v39  ;;  %v81_v46 = vld [vmem:[%s9243_s3] sm:$0xff]  ;;  %v107_v29 = vld [vmem:[%s9243_s3 + $0xd0] sm:$0xff]  ;;  %v108_v30 = vld [vmem:[%s9243_s3 + $0xd8] sm:$0xff] }
  0x1e   :  { %74 = vmatpush.msra.mxu0 %v5208_v14  ;;  %129 = vmatpush.msra.mxu1 %v5208_v14  ;;  %v4115_v53 = vld [vmem:[%s9240_s0 + $0x4] sm:$0x3]  ;;  %v5393_v19 = vld [vmem:[%s9242_s2] ss:$0 sm:$0xff]  ;;  %v103_v32 = vld [vmem:[%s9243_s3 + $0xb0] sm:$0xff] }
  0x1f   :  { %221 = vmatpush.msrb.mxu2 %v4105_v40  ;;  %241 = vmatpush.msrb.mxu3 %v4106_v41  ;;  %v104_v33 = vld [vmem:[%s9243_s3 + $0xb8] sm:$0xff]  ;;  %v99_v35 = vld [vmem:[%s9243_s3 + $0x90] sm:$0xff]  ;;  %v4132_v39 = vld [vmem:[%s9243_s3 + $0x280] sm:$0xff] }
  0x20   :  { %75 = vmatpush.msra.mxu0 %v5215_v15  ;;  %130 = vmatpush.msra.mxu1 %v5215_v15  ;;  %v100_v36 = vld [vmem:[%s9243_s3 + $0x98] sm:$0xff]  ;;  %v91_v40 = vld [vmem:[%s9243_s3 + $0x50] sm:$0xff] }
  0x21   :  { %76 = vmatmul.f32.vlgmr.msra.gmra.mxu0 %v56_v16  ;;  %131 = vmatmul.f32.vlgmr.msra.gmra.mxu1 %v4074_v17  ;;  %v90_v16 = vld [vmem:[%s9243_s3 + $0x48] sm:$0xff]  ;;  %v96_v38 = vld [vmem:[%s9243_s3 + $0x78] sm:$0xff] }
  0x22   :  { %338 = vmatpush.msrb.mxu0 %v5112_v0  ;;  %264 = vmatpush.msrb.mxu1 %v109_v24  ;;  %v86_v17 = vld [vmem:[%s9243_s3 + $0x28] sm:$0xff]  ;;  %v92_v41 = vld [vmem:[%s9243_s3 + $0x58] sm:$0xff] }
  0x23   :  { %222 = vmatpush.msrb.mxu2 %v4101_v42  ;;  %242 = vmatpush.msrb.mxu3 %v4102_v44  ;;  %v4128_v42 = vld [vmem:[%s9243_s3 + $0x260] sm:$0xff]  ;;  %v88_v44 = vld [vmem:[%s9243_s3 + $0x38] sm:$0xff] }
  0x24   :  { %339 = vmatpush.msrb.mxu0 %v5117_v1  ;;  %265 = vmatpush.msrb.mxu1 %v105_v26  ;;  %v111_v26 = vld [vmem:[%s9243_s3 + $0xf0] sm:$0xff] }
  0x25   :  { %223 = vmatpush.msrb.mxu2 %v4097_v45  ;;  %243 = vmatpush.msrb.mxu3 %v4098_v47  ;;  %v4124_v45 = vld [vmem:[%s9243_s3 + $0x240] sm:$0xff]  ;;  %v84_v47 = vld [vmem:[%s9243_s3 + $0x18] sm:$0xff] }
  0x26   :  { %340 = vmatpush.msrb.mxu0 %v5124_v2  ;;  %266 = vmatpush.msrb.mxu1 %v101_v28  ;;  %v4144_v28 = vld [vmem:[%s9243_s3 + $0x2e0] sm:$0xff] }
  0x27   :  { %224 = vmatpush.msrb.mxu2 %v4093_v48  ;;  %244 = vmatpush.msrb.mxu3 %v4094_v50  ;;  %v4145_v48 = vld [vmem:[%s9243_s3 + $0x2e8] sm:$0xff] }
  0x28   :  { %341 = vmatpush.msrb.mxu0 %v5131_v3  ;;  %267 = vmatpush.msrb.mxu1 %v97_v31  ;;  %v4140_v31 = vld [vmem:[%s9243_s3 + $0x2c0] sm:$0xff]  ;;  %v4141_v50 = vld [vmem:[%s9243_s3 + $0x2c8] sm:$0xff] }
  0x29   :  { %225 = vmatpush.msrb.mxu2 %v4089_v51  ;;  %245 = vmatpush.msrb.mxu3 %v4090_v52  ;;  %v4120_v51 = vld [vmem:[%s9243_s3 + $0x220] sm:$0xff]  ;;  %v4142_v52 = vld [vmem:[%s9243_s3 + $0x2d0] sm:$0xff] }
  0x2a   :  { %342 = vmatpush.msrb.mxu0 %v5138_v4  ;;  %268 = vmatpush.msrb.mxu1 %v93_v34  ;;  %v4136_v34 = vld [vmem:[%s9243_s3 + $0x2a0] sm:$0xff] }
  0x2b   :  { %226 = vmatpush.msrb.mxu2 %v4085_v54  ;;  %246 = vmatpush.msrb.mxu3 %v4086_v56  ;;  %v4116_v54 = vld [vmem:[%s9243_s3 + $0x200] sm:$0xff]  ;;  %v4147_v56 = vld [vmem:[%s9243_s3 + $0x2f8] sm:$0xff] }
  0x2c   :  { %343 = vmatpush.msrb.mxu0 %v5145_v5  ;;  %269 = vmatpush.msrb.mxu1 %v89_v37  ;;  %v95_v37 = vld [vmem:[%s9243_s3 + $0x70] sm:$0xff] }
  0x2d   :  { %227 = vmatpush.msrb.mxu2 %v4081_v57  ;;  %247 = vmatpush.msrb.mxu3 %v4082_v59  ;;  %v4133_v57 = vld [vmem:[%s9243_s3 + $0x288] sm:$0xff]  ;;  %v4143_v59 = vld [vmem:[%s9243_s3 + $0x2d8] sm:$0xff] }
  0x2e   :  { %344 = vmatpush.msrb.mxu0 %v5152_v6  ;;  %270 = vmatpush.msrb.mxu1 %v85_v43  ;;  %v87_v43 = vld [vmem:[%s9243_s3 + $0x30] sm:$0xff] }
  0x2f   :  { %228 = vmatpush.msrb.mxu2 %v4077_v60  ;;  %248 = vmatpush.msrb.mxu3 %v4078_v62  ;;  %v4129_v60 = vld [vmem:[%s9243_s3 + $0x268] sm:$0xff]  ;;  %v4139_v62 = vld [vmem:[%s9243_s3 + $0x2b8] sm:$0xff] }
  0x30   :  { %345 = vmatpush.msrb.mxu0 %v5159_v7  ;;  %271 = vmatpush.msrb.mxu1 %v81_v46  ;;  %v83_v46 = vld [vmem:[%s9243_s3 + $0x10] sm:$0xff] }
  0x32   :  { %346 = vmatpush.msrb.mxu0 %v5166_v8  ;;  %284 = vmatpush.msra.mxu1 %v110_v49  ;;  %v4146_v49 = vld [vmem:[%s9243_s3 + $0x2f0] sm:$0xff] }
  0x34   :  { %347 = vmatpush.msrb.mxu0 %v5173_v9  ;;  %285 = vmatpush.msra.mxu1 %v106_v55  ;;  %v4138_v55 = vld [vmem:[%s9243_s3 + $0x2b0] sm:$0xff] }
  0x36   :  { %348 = vmatpush.msrb.mxu0 %v5180_v10  ;;  %286 = vmatpush.msra.mxu1 %v102_v58  ;;  %v4134_v58 = vld [vmem:[%s9243_s3 + $0x290] sm:$0xff] }
  0x38   :  { %349 = vmatpush.msrb.mxu0 %v5187_v11  ;;  %287 = vmatpush.msra.mxu1 %v98_v61  ;;  %v4130_v61 = vld [vmem:[%s9243_s3 + $0x270] sm:$0xff] }
  0x3a   :  { %350 = vmatpush.msrb.mxu0 %v5194_v12  ;;  %288 = vmatpush.msra.mxu1 %v94_v63  ;;  %v4125_v63 = vld [vmem:[%s9243_s3 + $0x248] sm:$0xff] }
  0x3c   :  { %351 = vmatpush.msrb.mxu0 %v5201_v13  ;;  %289 = vmatpush.msra.mxu1 %v90_v16  ;;  %v4126_v16 = vld [vmem:[%s9243_s3 + $0x250] sm:$0xff] }
  0x3e   :  { %352 = vmatpush.msrb.mxu0 %v5208_v14  ;;  %290 = vmatpush.msra.mxu1 %v86_v17  ;;  %v4135_v17 = vld [vmem:[%s9243_s3 + $0x298] sm:$0xff] }
  0x40   :  { %353 = vmatpush.msrb.mxu0 %v5215_v15  ;;  %291 = vmatpush.msra.mxu1 %v82_v18  ;;  %v4121_v18 = vld [vmem:[%s9243_s3 + $0x228] sm:$0xff] }
  0x41   :  { %354 = vmatmul.f32.vlgmr.msrb.gmra.mxu0 %v4115_v53  ;;  %v4137_v53 = vld [vmem:[%s9243_s3 + $0x2a8] sm:$0xff] }
  0x9e   :  { %v77_v20 = vpop.f32.mrf.mxu0  ;;  %v132_v21 = vpop.f32.mrf.mxu1 }
  0x9f   :  { %v78_v22 = vadd.f32 %v5393_v19, %v77_v20  ;;  %v133_v23 = vadd.f32 %v5393_v19, %v132_v21  ;;  %v4122_v21 = vld [vmem:[%s9243_s3 + $0x230] sm:$0xff] }
  0xa1   :  { %v80_v24 = vmax.f32 %v78_v22, 0.0  ;;  %v135_v25 = vmax.f32 %v133_v23, 0.0  ;;  %v4131_v22 = vld [vmem:[%s9243_s3 + $0x278] sm:$0xff] }
  0xa3   :  { %4107 = vmatmul.msk.f32.vlgmr.msra.gmra.mxu2 %vm169_vm0, %v135_v25  ;;  %4108 = vmatmul.msk.f32.vlgmr.msra.gmra.mxu3 %vm169_vm0, %v135_v25 }
  0xa4   :  { %4111 = vmatmul.msk.f32.vlgmr.msrb.gmra.mxu1 %vm169_vm0, %v80_v24  ;;  %304 = vmatpush.msra.mxu2 %v111_v26 }
  0xa5   :  { %324 = vmatpush.msra.mxu3 %v112_v27  ;;  %403 = vmatpush.msrb.mxu1 %v4144_v28  ;;  %v4127_v27 = vld [vmem:[%s9243_s3 + $0x258] sm:$0xff] }
  0xa6   :  { %305 = vmatpush.msra.mxu2 %v107_v29  ;;  %v4123_v28 = vld [vmem:[%s9243_s3 + $0x238] sm:$0xff] }
  0xa7   :  { %325 = vmatpush.msra.mxu3 %v108_v30  ;;  %404 = vmatpush.msrb.mxu1 %v4140_v31  ;;  %v4119_v29 = vld [vmem:[%s9243_s3 + $0x218] sm:$0xff]  ;;  %v4152_v30 = vld [vmem:[%s9240_s0 + $0x6] sm:$0x3]  ;;  %v4182_v31 = vld [vmem:[%s9243_s3 + $0x3e8] sm:$0xff] }
  0xa8   :  { %306 = vmatpush.msra.mxu2 %v103_v32  ;;  %v4178_v32 = vld [vmem:[%s9243_s3 + $0x3c8] sm:$0xff]  ;;  %566 = vmatpush.msra.mxu0 %v4182_v31 }
  0xa9   :  { %326 = vmatpush.msra.mxu3 %v104_v33  ;;  %405 = vmatpush.msrb.mxu1 %v4136_v34  ;;  %v4174_v33 = vld [vmem:[%s9243_s3 + $0x3a8] sm:$0xff] }
  0xaa   :  { %307 = vmatpush.msra.mxu2 %v99_v35  ;;  %567 = vmatpush.msra.mxu0 %v4178_v32  ;;  %v4170_v34 = vld [vmem:[%s9243_s3 + $0x388] sm:$0xff] }
  0xab   :  { %327 = vmatpush.msra.mxu3 %v100_v36  ;;  %4109 = vmatmul.msk.f32.vlgmr.msrb.gmra.mxu2 %vm169_vm0, %v135_v25  ;;  %v4166_v35 = vld [vmem:[%s9243_s3 + $0x368] sm:$0xff]  ;;  %v4181_v36 = vld [vmem:[%s9243_s3 + $0x3e0] sm:$0xff] }
  0xac   :  { %4110 = vmatmul.msk.f32.vlgmr.msrb.gmra.mxu3 %vm169_vm0, %v135_v25  ;;  %4112 = vmatmul.msk.f32.vlgmr.msra.gmra.mxu1 %vm169_vm0, %v80_v24  ;;  %v4118_v25 = vld [vmem:[%s9243_s3 + $0x210] sm:$0xff]  ;;  %v4191_v32 = vld [vmem:[%s9243_s3 + $0x408] sm:$0xff] }
  0xad   :  { %308 = vmatpush.msra.mxu2 %v95_v37  ;;  %328 = vmatpush.msra.mxu3 %v96_v38  ;;  %v4162_v37 = vld [vmem:[%s9243_s3 + $0x348] sm:$0xff]  ;;  %v4177_v38 = vld [vmem:[%s9243_s3 + $0x3c0] sm:$0xff] }
  0xae   :  { %406 = vmatpush.msrb.mxu1 %v4132_v39  ;;  %568 = vmatpush.msra.mxu0 %v4174_v33  ;;  %v4173_v39 = vld [vmem:[%s9243_s3 + $0x3a0] sm:$0xff] }
  0xaf   :  { %309 = vmatpush.msra.mxu2 %v91_v40  ;;  %329 = vmatpush.msra.mxu3 %v92_v41  ;;  %v4183_v40 = vld [vmem:[%s9243_s3 + $0x3f0] sm:$0xff] }
  0xb0   :  { %407 = vmatpush.msrb.mxu1 %v4128_v42  ;;  %569 = vmatpush.msra.mxu0 %v4170_v34  ;;  %v4179_v41 = vld [vmem:[%s9243_s3 + $0x3d0] sm:$0xff]  ;;  %v4158_v42 = vld [vmem:[%s9243_s3 + $0x328] sm:$0xff] }
  0xb1   :  { %310 = vmatpush.msra.mxu2 %v87_v43  ;;  %330 = vmatpush.msra.mxu3 %v88_v44  ;;  %v4169_v43 = vld [vmem:[%s9243_s3 + $0x380] sm:$0xff]  ;;  %v4175_v44 = vld [vmem:[%s9243_s3 + $0x3b0] sm:$0xff] }
  0xb2   :  { %408 = vmatpush.msrb.mxu1 %v4124_v45  ;;  %570 = vmatpush.msra.mxu0 %v4166_v35  ;;  %v4154_v45 = vld [vmem:[%s9243_s3 + $0x308] sm:$0xff] }
  0xb3   :  { %311 = vmatpush.msra.mxu2 %v83_v46  ;;  %331 = vmatpush.msra.mxu3 %v84_v47  ;;  %v4165_v46 = vld [vmem:[%s9243_s3 + $0x360] sm:$0xff]  ;;  %v4171_v47 = vld [vmem:[%s9243_s3 + $0x390] sm:$0xff] }
  0xb4   :  { %4114 = vmatmul.msk.f32.vlgmr.msra.gmra.mxu3 %vm169_vm0, %v80_v24  ;;  %4113 = vmatmul.msk.f32.vlgmr.msra.gmra.mxu2 %vm169_vm0, %v80_v24  ;;  %v4117_v24 = vld [vmem:[%s9243_s3 + $0x208] sm:$0xff] }
  0xb5   :  { %423 = vmatpush.msrb.mxu2 %v4145_v48  ;;  %443 = vmatpush.msrb.mxu3 %v4146_v49  ;;  %v4161_v48 = vld [vmem:[%s9243_s3 + $0x340] sm:$0xff]  ;;  %v4167_v49 = vld [vmem:[%s9243_s3 + $0x370] sm:$0xff] }
  0xb6   :  { %409 = vmatpush.msrb.mxu1 %v4120_v51  ;;  %571 = vmatpush.msra.mxu0 %v4162_v37  ;;  %v4153_v51 = vld [vmem:[%s9243_s3 + $0x300] sm:$0xff]  ;;  %v4189_v37 = vld [vmem:[%s9240_s0 + $0x8] sm:$0x3] }
  0xb7   :  { %424 = vmatpush.msrb.mxu2 %v4141_v50  ;;  %444 = vmatpush.msrb.mxu3 %v4142_v52  ;;  %v4157_v50 = vld [vmem:[%s9243_s3 + $0x320] sm:$0xff]  ;;  %v4184_v52 = vld [vmem:[%s9243_s3 + $0x3f8] sm:$0xff] }
  0xb8   :  { %410 = vmatpush.msrb.mxu1 %v4116_v54  ;;  %572 = vmatpush.msra.mxu0 %v4158_v42  ;;  %v4163_v54 = vld [vmem:[%s9243_s3 + $0x350] sm:$0xff] }
  0xb9   :  { %425 = vmatpush.msrb.mxu2 %v4137_v53  ;;  %445 = vmatpush.msrb.mxu3 %v4138_v55  ;;  %v4180_v55 = vld [vmem:[%s9243_s3 + $0x3d8] sm:$0xff]  ;;  %v4208_v42 = vld [vmem:[%s9243_s3 + $0x490] sm:$0xff] }
  0xba   :  { %463 = vmatpush.msra.mxu1 %v4147_v56  ;;  %573 = vmatpush.msra.mxu0 %v4154_v45  ;;  %v4159_v56 = vld [vmem:[%s9243_s3 + $0x330] sm:$0xff]  ;;  %v4221_v45 = vld [vmem:[%s9243_s3 + $0x4f8] sm:$0xff] }
  0xbb   :  { %426 = vmatpush.msrb.mxu2 %v4133_v57  ;;  %446 = vmatpush.msrb.mxu3 %v4134_v58  ;;  %v4176_v57 = vld [vmem:[%s9243_s3 + $0x3b8] sm:$0xff]  ;;  %v4155_v58 = vld [vmem:[%s9243_s3 + $0x310] sm:$0xff] }
  0xbc   :  { %464 = vmatpush.msra.mxu1 %v4143_v59  ;;  %624 = vmatpush.msrb.mxu0 %v5112_v0  ;;  %v4172_v59 = vld [vmem:[%s9243_s3 + $0x398] sm:$0xff] }
  0xbd   :  { %427 = vmatpush.msrb.mxu2 %v4129_v60  ;;  %447 = vmatpush.msrb.mxu3 %v4130_v61  ;;  %v4168_v61 = vld [vmem:[%s9243_s3 + $0x378] sm:$0xff] }
  0xbe   :  { %465 = vmatpush.msra.mxu1 %v4139_v62  ;;  %v355_v20 = vpop.f32.mrf.mxu0  ;;  %625 = vmatpush.msrb.mxu0 %v5117_v1  ;;  %v4164_v62 = vld [vmem:[%s9243_s3 + $0x358] sm:$0xff] }
  0xbf   :  { %428 = vmatpush.msrb.mxu2 %v4125_v63  ;;  %v356_v23 = vadd.f32 %v5393_v19, %v355_v20  ;;  %448 = vmatpush.msrb.mxu3 %v4126_v16  ;;  %v4160_v63 = vld [vmem:[%s9243_s3 + $0x338] sm:$0xff]  ;;  %v4211_v20 = vld [vmem:[%s9243_s3 + $0x4a8] sm:$0xff] }
  0xc0   :  { %466 = vmatpush.msra.mxu1 %v4135_v17  ;;  %626 = vmatpush.msrb.mxu0 %v5124_v2  ;;  %v4156_v16 = vld [vmem:[%s9243_s3 + $0x318] sm:$0xff]  ;;  %v4219_v17 = vld [vmem:[%s9243_s3 + $0x4e8] sm:$0xff] }
  0xc1   :  { %429 = vmatpush.msrb.mxu2 %v4121_v18  ;;  %v358_v26 = vmax.f32 %v356_v23, 0.0  ;;  %449 = vmatpush.msrb.mxu3 %v4122_v21  ;;  %v4215_v18 = vld [vmem:[%s9243_s3 + $0x4c8] sm:$0xff]  ;;  %v4214_v23 = vld [vmem:[%s9243_s3 + $0x4c0] sm:$0xff] }
  0xc2   :  { %467 = vmatpush.msra.mxu1 %v4131_v22  ;;  %627 = vmatpush.msrb.mxu0 %v5131_v3  ;;  %v4218_v22 = vld [vmem:[%s9243_s3 + $0x4e0] sm:$0xff] }
  0xc3   :  { %430 = vmatpush.msrb.mxu2 %v4117_v24  ;;  %450 = vmatpush.msrb.mxu3 %v4118_v25  ;;  %v4207_v24 = vld [vmem:[%s9243_s3 + $0x488] sm:$0xff]  ;;  %v4210_v25 = vld [vmem:[%s9243_s3 + $0x4a0] sm:$0xff] }
  0xc4   :  { %4148 = vmatmul.msk.f32.vlgmr.msrb.gmra.mxu1 %vm169_vm0, %v358_v26  ;;  %4149 = vmatmul.msk.f32.vlgmr.msrb.gmra.mxu2 %vm169_vm0, %v358_v26 }
  0xc5   :  { %481 = vmatpush.msra.mxu2 %v5112_v0  ;;  %4150 = vmatmul.msk.f32.vlgmr.msrb.gmra.mxu3 %vm169_vm0, %v358_v26 }
  0xc6   :  { %468 = vmatpush.msra.mxu1 %v4127_v27  ;;  %546 = vmatpush.msra.mxu3 %v4181_v36  ;;  %v4206_v27 = vld [vmem:[%s9243_s3 + $0x480] sm:$0xff]  ;;  %v4220_v36 = vld [vmem:[%s9243_s3 + $0x4f0] sm:$0xff] }
  0xc7   :  { %482 = vmatpush.msra.mxu2 %v5117_v1  ;;  %628 = vmatpush.msrb.mxu0 %v5138_v4 }
  0xc8   :  { %469 = vmatpush.msra.mxu1 %v4123_v28  ;;  %547 = vmatpush.msra.mxu3 %v4177_v38  ;;  %v4199_v28 = vld [vmem:[%s9243_s3 + $0x448] sm:$0xff]  ;;  %v4216_v38 = vld [vmem:[%s9243_s3 + $0x4d0] sm:$0xff] }
  0xc9   :  { %483 = vmatpush.msra.mxu2 %v5124_v2  ;;  %629 = vmatpush.msrb.mxu0 %v5145_v5 }
  0xca   :  { %470 = vmatpush.msra.mxu1 %v4119_v29  ;;  %548 = vmatpush.msra.mxu3 %v4173_v39  ;;  %v4202_v29 = vld [vmem:[%s9243_s3 + $0x460] sm:$0xff] }
  0xcb   :  { %484 = vmatpush.msra.mxu2 %v5131_v3  ;;  %630 = vmatpush.msrb.mxu0 %v5152_v6  ;;  %v4198_v39 = vld [vmem:[%s9243_s3 + $0x440] sm:$0xff] }
  0xcc   :  { %4151 = vmatmul.msk.f32.vlgmr.msra.gmra.mxu1 %vm169_vm0, %v358_v26  ;;  %549 = vmatpush.msra.mxu3 %v4169_v43  ;;  %v4203_v26 = vld [vmem:[%s9243_s3 + $0x468] sm:$0xff]  ;;  %v4190_v43 = vld [vmem:[%s9243_s3 + $0x400] sm:$0xff] }
  0xcd   :  { %485 = vmatpush.msra.mxu2 %v5138_v4  ;;  %586 = vmatpush.msrb.mxu1 %v4183_v40  ;;  %v4212_v40 = vld [vmem:[%s9243_s3 + $0x4b0] sm:$0xff] }
  0xce   :  { %550 = vmatpush.msra.mxu3 %v4165_v46  ;;  %631 = vmatpush.msrb.mxu0 %v5159_v7  ;;  %v4200_v46 = vld [vmem:[%s9243_s3 + $0x450] sm:$0xff] }
  0xcf   :  { %486 = vmatpush.msra.mxu2 %v5145_v5  ;;  %587 = vmatpush.msrb.mxu1 %v4179_v41  ;;  %v4194_v41 = vld [vmem:[%s9243_s3 + $0x420] sm:$0xff] }
  0xd0   :  { %551 = vmatpush.msra.mxu3 %v4161_v48  ;;  %632 = vmatpush.msrb.mxu0 %v5166_v8  ;;  %v4196_v48 = vld [vmem:[%s9243_s3 + $0x430] sm:$0xff] }
  0xd1   :  { %487 = vmatpush.msra.mxu2 %v5152_v6  ;;  %588 = vmatpush.msrb.mxu1 %v4175_v44  ;;  %v4204_v44 = vld [vmem:[%s9243_s3 + $0x470] sm:$0xff] }
  0xd2   :  { %552 = vmatpush.msra.mxu3 %v4157_v50  ;;  %633 = vmatpush.msrb.mxu0 %v5173_v9  ;;  %v4192_v50 = vld [vmem:[%s9243_s3 + $0x410] sm:$0xff] }
  0xd3   :  { %488 = vmatpush.msra.mxu2 %v5159_v7  ;;  %589 = vmatpush.msrb.mxu1 %v4171_v47  ;;  %v4217_v47 = vld [vmem:[%s9243_s3 + $0x4d8] sm:$0xff] }
  0xd4   :  { %553 = vmatpush.msra.mxu3 %v4153_v51  ;;  %634 = vmatpush.msrb.mxu0 %v5180_v10  ;;  %v4209_v51 = vld [vmem:[%s9243_s3 + $0x498] sm:$0xff] }
  0xd5   :  { %489 = vmatpush.msra.mxu2 %v5166_v8  ;;  %590 = vmatpush.msrb.mxu1 %v4167_v49  ;;  %v4213_v49 = vld [vmem:[%s9243_s3 + $0x4b8] sm:$0xff] }
  0xd6   :  { %606 = vmatpush.msrb.mxu3 %v4184_v52  ;;  %635 = vmatpush.msrb.mxu0 %v5187_v11  ;;  %v4205_v52 = vld [vmem:[%s9243_s3 + $0x478] sm:$0xff] }
  0xd7   :  { %490 = vmatpush.msra.mxu2 %v5173_v9  ;;  %591 = vmatpush.msrb.mxu1 %v4163_v54  ;;  %v4201_v54 = vld [vmem:[%s9243_s3 + $0x458] sm:$0xff] }
  0xd8   :  { %607 = vmatpush.msrb.mxu3 %v4180_v55  ;;  %636 = vmatpush.msrb.mxu0 %v5194_v12  ;;  %v4197_v55 = vld [vmem:[%s9243_s3 + $0x438] sm:$0xff] }
  0xd9   :  { %491 = vmatpush.msra.mxu2 %v5180_v10  ;;  %592 = vmatpush.msrb.mxu1 %v4159_v56  ;;  %v4193_v56 = vld [vmem:[%s9243_s3 + $0x418] sm:$0xff] }
  0xda   :  { %608 = vmatpush.msrb.mxu3 %v4176_v57  ;;  %637 = vmatpush.msrb.mxu0 %v5201_v13  ;;  %v4256_v57 = vld [vmem:[%s9243_s3 + $0x5e8] sm:$0xff] }
  0xdb   :  { %492 = vmatpush.msra.mxu2 %v5187_v11  ;;  %593 = vmatpush.msrb.mxu1 %v4155_v58  ;;  %v4252_v58 = vld [vmem:[%s9243_s3 + $0x5c8] sm:$0xff] }
  0xdc   :  { %609 = vmatpush.msrb.mxu3 %v4172_v59  ;;  %638 = vmatpush.msrb.mxu0 %v5208_v14  ;;  %v4248_v59 = vld [vmem:[%s9243_s3 + $0x5a8] sm:$0xff] }
  0xdd   :  { %493 = vmatpush.msra.mxu2 %v5194_v12  ;;  %689 = vmatpush.msra.mxu1 %v4218_v22  ;;  %v4228_v22 = vld [vmem:[%s9243_s3 + $0x508] sm:$0xff] }
  0xde   :  { %610 = vmatpush.msrb.mxu3 %v4168_v61  ;;  %639 = vmatpush.msrb.mxu0 %v5215_v15  ;;  %v4255_v61 = vld [vmem:[%s9243_s3 + $0x5e0] sm:$0xff] }
  0xdf   :  { %494 = vmatpush.msra.mxu2 %v5201_v13  ;;  %690 = vmatpush.msra.mxu1 %v4214_v23 }
  0xe0   :  { %611 = vmatpush.msrb.mxu3 %v4164_v62  ;;  %v4251_v62 = vld [vmem:[%s9243_s3 + $0x5c0] sm:$0xff] }
  0xe1   :  { %495 = vmatpush.msra.mxu2 %v5208_v14  ;;  %691 = vmatpush.msra.mxu1 %v4210_v25 }
  0xe2   :  { %612 = vmatpush.msrb.mxu3 %v4160_v63  ;;  %v4244_v63 = vld [vmem:[%s9243_s3 + $0x588] sm:$0xff] }
  0xe3   :  { %496 = vmatpush.msra.mxu2 %v5215_v15  ;;  %692 = vmatpush.msra.mxu1 %v4206_v27  ;;  %v4229_v27 = vld [vmem:[%s9243_s3 + $0x510] sm:$0xff] }
  0xe4   :  { %497 = vmatmul.f32.vlgmr.msra.gmra.mxu2 %v4152_v30  ;;  %613 = vmatpush.msrb.mxu3 %v4156_v16  ;;  %v4195_v30 = vld [vmem:[%s9243_s3 + $0x428] sm:$0xff] }
  0xe5   :  { %709 = vmatpush.msrb.mxu2 %v4219_v17  ;;  %693 = vmatpush.msra.mxu1 %v4202_v29  ;;  %v4240_v16 = vld [vmem:[%s9243_s3 + $0x568] sm:$0xff]  ;;  %v4242_v29 = vld [vmem:[%s9243_s3 + $0x578] sm:$0xff] }
  0xe6   :  { %v4236_v17 = vld [vmem:[%s9243_s3 + $0x548] sm:$0xff] }
  0xe7   :  { %710 = vmatpush.msrb.mxu2 %v4215_v18  ;;  %694 = vmatpush.msra.mxu1 %v4198_v39  ;;  %v4232_v18 = vld [vmem:[%s9243_s3 + $0x528] sm:$0xff] }
  0xe8   :  { %v4281_v39 = vld [vmem:[%s9243_s3 + $0x688] sm:$0xff] }
  0xe9   :  { %711 = vmatpush.msrb.mxu2 %v4211_v20  ;;  %695 = vmatpush.msra.mxu1 %v4194_v41  ;;  %v4277_v41 = vld [vmem:[%s9243_s3 + $0x668] sm:$0xff] }
  0xeb   :  { %712 = vmatpush.msrb.mxu2 %v4207_v24  ;;  %696 = vmatpush.msra.mxu1 %v4190_v43  ;;  %v4273_v43 = vld [vmem:[%s9243_s3 + $0x648] sm:$0xff] }
  0xed   :  { %713 = vmatpush.msrb.mxu2 %v4203_v26  ;;  %v4250_v26 = vld [vmem:[%s9243_s3 + $0x5b8] sm:$0xff] }
  0xef   :  { %714 = vmatpush.msrb.mxu2 %v4199_v28  ;;  %v4246_v28 = vld [vmem:[%s9243_s3 + $0x598] sm:$0xff] }
  0xf1   :  { %715 = vmatpush.msrb.mxu2 %v4195_v30  ;;  %v4238_v30 = vld [vmem:[%s9243_s3 + $0x558] sm:$0xff] }
  0xf3   :  { %716 = vmatpush.msrb.mxu2 %v4191_v32  ;;  %v4234_v32 = vld [vmem:[%s9243_s3 + $0x538] sm:$0xff] }
  0xf5   :  { %767 = vmatpush.msra.mxu2 %v5112_v0 }
  0xf7   :  { %768 = vmatpush.msra.mxu2 %v5117_v1 }
  0xf9   :  { %769 = vmatpush.msra.mxu2 %v5124_v2 }
  0xfb   :  { %770 = vmatpush.msra.mxu2 %v5131_v3 }
  0xfd   :  { %771 = vmatpush.msra.mxu2 %v5138_v4 }
  0xff   :  { %772 = vmatpush.msra.mxu2 %v5145_v5 }
 0x101   :  { %773 = vmatpush.msra.mxu2 %v5152_v6 }
 0x103   :  { %774 = vmatpush.msra.mxu2 %v5159_v7 }
 0x105   :  { %775 = vmatpush.msra.mxu2 %v5166_v8 }
 0x107   :  { %776 = vmatpush.msra.mxu2 %v5173_v9 }
 0x109   :  { %777 = vmatpush.msra.mxu2 %v5180_v10 }
 0x10b   :  { %778 = vmatpush.msra.mxu2 %v5187_v11 }
 0x10d   :  { %779 = vmatpush.msra.mxu2 %v5194_v12 }
 0x10f   :  { %780 = vmatpush.msra.mxu2 %v5201_v13 }
 0x111   :  { %781 = vmatpush.msra.mxu2 %v5208_v14 }
 0x113   :  { %782 = vmatpush.msra.mxu2 %v5215_v15 }
 0x126   :  { %v5646_v53 = vpop.f32.mrf.mxu2 }
 0x12e   :  { %v5670_v60 = vpop.f32.mrf.mxu2 }
 0x137   :  { %v5698_v21 = vpop.f32.mrf.mxu2 }
 0x147   :  { %v5727_v31 = vpop.f32.mrf.mxu2 }
 0x167   :  { %v498_v33 = vpop.f32.mrf.mxu2 }
 0x168   :  { %v499_v34 = vadd.f32 %v5393_v19, %v498_v33  ;;  %v4230_v33 = vld [vmem:[%s9243_s3 + $0x518] sm:$0xff] }
 0x16a   :  { %v501_v35 = vmax.f32 %v499_v34, 0.0  ;;  %v4293_v34 = vld [vmem:[%s9243_s3 + $0x6e8] sm:$0xff] }
 0x16c   :  { %4185 = vmatmul.msk.f32.vlgmr.msra.gmra.mxu3 %vm169_vm0, %v501_v35  ;;  %4186 = vmatmul.msk.f32.vlgmr.msra.gmra.mxu0 %vm169_vm0, %v501_v35 }
 0x16d   :  { %4187 = vmatmul.msk.f32.vlgmr.msrb.gmra.mxu1 %vm169_vm0, %v501_v35  ;;  %729 = vmatpush.msra.mxu3 %v4220_v36  ;;  %v4285_v36 = vld [vmem:[%s9243_s3 + $0x6a8] sm:$0xff] }
 0x16e   :  { %749 = vmatpush.msrb.mxu1 %v4221_v45  ;;  %852 = vmatpush.msra.mxu0 %v4256_v57  ;;  %v4269_v45 = vld [vmem:[%s9243_s3 + $0x628] sm:$0xff]  ;;  %v6016_v57 = vld [vmem:[%s9241_s1 + $0x50] sm:$0xff] }
 0x16f   :  { %730 = vmatpush.msra.mxu3 %v4216_v38  ;;  %v4288_v38 = vld [vmem:[%s9243_s3 + $0x6c0] sm:$0xff] }
 0x170   :  { %750 = vmatpush.msrb.mxu1 %v4217_v47  ;;  %853 = vmatpush.msra.mxu0 %v4252_v58  ;;  %v4265_v47 = vld [vmem:[%s9243_s3 + $0x608] sm:$0xff] }
 0x171   :  { %731 = vmatpush.msra.mxu3 %v4212_v40  ;;  %v4284_v40 = vld [vmem:[%s9243_s3 + $0x6a0] sm:$0xff]  ;;  %v4263_v58 = vld [vmem:[%s9240_s0 + $0xc] sm:$0x3] }
 0x172   :  { %751 = vmatpush.msrb.mxu1 %v4213_v49  ;;  %854 = vmatpush.msra.mxu0 %v4248_v59  ;;  %v5985_v49 = vld [vmem:[%s9241_s1 + $0x70] sm:$0xff]  ;;  %v6025_v59 = vld [vmem:[%s9241_s1 + $0x48] sm:$0xff] }
 0x173   :  { %732 = vmatpush.msra.mxu3 %v4208_v42  ;;  %v4280_v42 = vld [vmem:[%s9243_s3 + $0x680] sm:$0xff] }
 0x174   :  { %4188 = vmatmul.msk.f32.vlgmr.msrb.gmra.mxu3 %vm169_vm0, %v501_v35  ;;  %640 = vmatmul.f32.vlgmr.msrb.gmra.mxu0 %v4189_v37  ;;  %v4289_v35 = vld [vmem:[%s9243_s3 + $0x6c8] sm:$0xff]  ;;  %v4292_v37 = vld [vmem:[%s9243_s3 + $0x6e0] sm:$0xff] }
 0x175   :  { %733 = vmatpush.msra.mxu3 %v4204_v44  ;;  %752 = vmatpush.msrb.mxu1 %v4209_v51  ;;  %v4276_v44 = vld [vmem:[%s9243_s3 + $0x660] sm:$0xff] }
 0x176   :  { %855 = vmatpush.msra.mxu0 %v4244_v63  ;;  %v6044_v63 = vld [vmem:[%s9241_s1 + $0x30] sm:$0xff] }
 0x177   :  { %734 = vmatpush.msra.mxu3 %v4200_v46  ;;  %753 = vmatpush.msrb.mxu1 %v4205_v52  ;;  %v5992_v52 = vld [vmem:[%s9241_s1 + $0x68] sm:$0xff] }
 0x178   :  { %856 = vmatpush.msra.mxu0 %v4240_v16  ;;  %v6050_v16 = vld [vmem:[%s9241_s1 + $0x28] sm:$0xff] }
 0x179   :  { %735 = vmatpush.msra.mxu3 %v4196_v48  ;;  %754 = vmatpush.msrb.mxu1 %v4201_v54  ;;  %v5979_v48 = vld [vmem:[%s9241_s1 + $0x78] sm:$0xff] }
 0x17a   :  { %857 = vmatpush.msra.mxu0 %v4236_v17  ;;  %v6056_v17 = vld [vmem:[%s9241_s1 + $0x20] sm:$0xff] }
 0x17b   :  { %736 = vmatpush.msra.mxu3 %v4192_v50  ;;  %755 = vmatpush.msrb.mxu1 %v4197_v55  ;;  %v5998_v55 = vld [vmem:[%s9241_s1 + $0x60] sm:$0xff] }
 0x17c   :  { %858 = vmatpush.msra.mxu0 %v4232_v18  ;;  %v6062_v18 = vld [vmem:[%s9241_s1 + $0x18] sm:$0xff] }
 0x17d   :  { %756 = vmatpush.msrb.mxu1 %v4193_v56  ;;  %832 = vmatpush.msrb.mxu3 %v4255_v61  ;;  %v4294_v56 = vld [vmem:[%s9243_s3 + $0x6f0] sm:$0xff]  ;;  %v6032_v61 = vld [vmem:[%s9241_s1 + $0x40] sm:$0xff] }
 0x17e   :  { %859 = vmatpush.msra.mxu0 %v4228_v22  ;;  %v6068_v22 = vld [vmem:[%s9241_s1 + $0x10] sm:$0xff] }
 0x17f   :  { %833 = vmatpush.msrb.mxu3 %v4251_v62  ;;  %v6038_v62 = vld [vmem:[%s9241_s1 + $0x38] sm:$0xff] }
 0x180   :  { %910 = vmatpush.msrb.mxu0 %v5112_v0  ;;  %v4226_v0 = vld [vmem:[%s9240_s0 + $0xa] sm:$0x3] }
 0x182   :  { %911 = vmatpush.msrb.mxu0 %v5117_v1  ;;  %v4247_v1 = vld [vmem:[%s9243_s3 + $0x5a0] sm:$0xff] }
 0x183   :  { %834 = vmatpush.msrb.mxu3 %v4247_v1  ;;  %v4286_v1 = vld [vmem:[%s9243_s3 + $0x6b0] sm:$0xff] }
 0x184   :  { %912 = vmatpush.msrb.mxu0 %v5124_v2  ;;  %v4243_v2 = vld [vmem:[%s9243_s3 + $0x580] sm:$0xff] }
 0x185   :  { %835 = vmatpush.msrb.mxu3 %v4243_v2  ;;  %v4268_v2 = vld [vmem:[%s9243_s3 + $0x620] sm:$0xff] }
 0x186   :  { %913 = vmatpush.msrb.mxu0 %v5131_v3  ;;  %v4257_v3 = vld [vmem:[%s9243_s3 + $0x5f0] sm:$0xff] }
 0x188   :  { %914 = vmatpush.msrb.mxu0 %v5138_v4  ;;  %v4239_v4 = vld [vmem:[%s9243_s3 + $0x560] sm:$0xff] }
 0x189   :  { %836 = vmatpush.msrb.mxu3 %v4239_v4  ;;  %v4264_v4 = vld [vmem:[%s9243_s3 + $0x600] sm:$0xff] }
 0x18a   :  { %915 = vmatpush.msrb.mxu0 %v5145_v5  ;;  %v4253_v5 = vld [vmem:[%s9243_s3 + $0x5d0] sm:$0xff] }
 0x18c   :  { %916 = vmatpush.msrb.mxu0 %v5152_v6  ;;  %v4235_v6 = vld [vmem:[%s9243_s3 + $0x540] sm:$0xff] }
 0x18d   :  { %837 = vmatpush.msrb.mxu3 %v4235_v6  ;;  %v4295_v6 = vld [vmem:[%s9243_s3 + $0x6f8] sm:$0xff] }
 0x18e   :  { %917 = vmatpush.msrb.mxu0 %v5159_v7  ;;  %v4249_v7 = vld [vmem:[%s9243_s3 + $0x5b0] sm:$0xff] }
 0x190   :  { %918 = vmatpush.msrb.mxu0 %v5166_v8  ;;  %v4231_v8 = vld [vmem:[%s9243_s3 + $0x520] sm:$0xff] }
 0x191   :  { %838 = vmatpush.msrb.mxu3 %v4231_v8  ;;  %v4291_v8 = vld [vmem:[%s9243_s3 + $0x6d8] sm:$0xff] }
 0x192   :  { %919 = vmatpush.msrb.mxu0 %v5173_v9  ;;  %v4245_v9 = vld [vmem:[%s9243_s3 + $0x590] sm:$0xff] }
 0x194   :  { %920 = vmatpush.msrb.mxu0 %v5180_v10  ;;  %v4227_v10 = vld [vmem:[%s9243_s3 + $0x500] sm:$0xff] }
 0x195   :  { %839 = vmatpush.msrb.mxu3 %v4227_v10  ;;  %v4287_v10 = vld [vmem:[%s9243_s3 + $0x6b8] sm:$0xff] }
 0x196   :  { %921 = vmatpush.msrb.mxu0 %v5187_v11  ;;  %v4241_v11 = vld [vmem:[%s9243_s3 + $0x570] sm:$0xff] }
 0x198   :  { %922 = vmatpush.msrb.mxu0 %v5194_v12  ;;  %v4258_v12 = vld [vmem:[%s9243_s3 + $0x5f8] sm:$0xff] }
 0x19a   :  { %923 = vmatpush.msrb.mxu0 %v5201_v13  ;;  %v4237_v13 = vld [vmem:[%s9243_s3 + $0x550] sm:$0xff] }
 0x19c   :  { %924 = vmatpush.msrb.mxu0 %v5208_v14  ;;  %v4254_v14 = vld [vmem:[%s9243_s3 + $0x5d8] sm:$0xff] }
 0x19e   :  { %925 = vmatpush.msrb.mxu0 %v5215_v15  ;;  %v4233_v15 = vld [vmem:[%s9243_s3 + $0x530] sm:$0xff] }
 0x1e9   :  { %v5840_v20 = vpop.f32.mrf.mxu0 }
 0x1f1   :  { %v641_v23 = vpop.f32.mrf.mxu0 }
 0x1f2   :  { %v642_v24 = vadd.f32 %v5393_v19, %v641_v23  ;;  %v6074_v23 = vld [vmem:[%s9241_s1 + $0x8] sm:$0xff] }
 0x1f4   :  { %v644_v25 = vmax.f32 %v642_v24, 0.0  ;;  %v6080_v24 = vld [vmem:[%s9241_s1] sm:$0xff] }
 0x1f6   :  { %4222 = vmatmul.msk.f32.vlgmr.msra.gmra.mxu1 %vm169_vm0, %v644_v25  ;;  %4223 = vmatmul.msk.f32.vlgmr.msrb.gmra.mxu2 %vm169_vm0, %v644_v25 }
 0x1f7   :  { %4224 = vmatmul.msk.f32.vlgmr.msra.gmra.mxu3 %vm169_vm0, %v644_v25  ;;  %872 = vmatpush.msra.mxu1 %v4257_v3  ;;  %v4282_v3 = vld [vmem:[%s9243_s3 + $0x690] sm:$0xff] }
 0x1f8   :  { %892 = vmatpush.msra.mxu3 %v4258_v12  ;;  %995 = vmatpush.msrb.mxu2 %v4293_v34  ;;  %v4283_v12 = vld [vmem:[%s9243_s3 + $0x698] sm:$0xff]  ;;  %v4329_v34 = vld [vmem:[%s9243_s3 + $0x7e0] sm:$0xff] }
 0x1f9   :  { %873 = vmatpush.msra.mxu1 %v4253_v5  ;;  %v4278_v5 = vld [vmem:[%s9243_s3 + $0x670] sm:$0xff] }
 0x1fa   :  { %893 = vmatpush.msra.mxu3 %v4254_v14  ;;  %996 = vmatpush.msrb.mxu2 %v4289_v35  ;;  %v4279_v14 = vld [vmem:[%s9243_s3 + $0x678] sm:$0xff]  ;;  %v4325_v35 = vld [vmem:[%s9243_s3 + $0x7c0] sm:$0xff] }
 0x1fb   :  { %874 = vmatpush.msra.mxu1 %v4249_v7  ;;  %v4274_v7 = vld [vmem:[%s9243_s3 + $0x650] sm:$0xff] }
 0x1fc   :  { %894 = vmatpush.msra.mxu3 %v4250_v26  ;;  %997 = vmatpush.msrb.mxu2 %v4285_v36  ;;  %v4271_v26 = vld [vmem:[%s9243_s3 + $0x638] sm:$0xff] }
 0x1fd   :  { %875 = vmatpush.msra.mxu1 %v4245_v9  ;;  %v4270_v9 = vld [vmem:[%s9243_s3 + $0x630] sm:$0xff] }
 0x1fe   :  { %4225 = vmatmul.msk.f32.vlgmr.msrb.gmra.mxu1 %vm169_vm0, %v644_v25  ;;  %783 = vmatmul.f32.vlgmr.msra.gmra.mxu2 %v4226_v0  ;;  %v4290_v25 = vld [vmem:[%s9243_s3 + $0x6d0] sm:$0xff]  ;;  %v4272_v0 = vld [vmem:[%s9243_s3 + $0x640] sm:$0xff] }
 0x1ff   :  { %876 = vmatpush.msra.mxu1 %v4241_v11  ;;  %895 = vmatpush.msra.mxu3 %v4246_v28  ;;  %v4266_v11 = vld [vmem:[%s9243_s3 + $0x610] sm:$0xff]  ;;  %v4330_v28 = vld [vmem:[%s9243_s3 + $0x7e8] sm:$0xff] }
 0x200   :  { %998 = vmatpush.msrb.mxu2 %v4281_v39  ;;  %v4314_v39 = vld [vmem:[%s9243_s3 + $0x768] sm:$0xff] }
 0x201   :  { %877 = vmatpush.msra.mxu1 %v4237_v13  ;;  %896 = vmatpush.msra.mxu3 %v4242_v29  ;;  %v6125_v13 = vpop.f32.mrf.mxu1  ;;  %v4326_v29 = vld [vmem:[%s9243_s3 + $0x7c8] sm:$0xff] }
 0x202   :  { %999 = vmatpush.msrb.mxu2 %v4277_v41  ;;  %v4310_v41 = vld [vmem:[%s9243_s3 + $0x748] sm:$0xff] }
 0x203   :  { %878 = vmatpush.msra.mxu1 %v4233_v15  ;;  %897 = vmatpush.msra.mxu3 %v4238_v30  ;;  %v4275_v15 = vld [vmem:[%s9243_s3 + $0x658] sm:$0xff] }
 0x204   :  { %1000 = vmatpush.msrb.mxu2 %v4273_v43  ;;  %v4306_v43 = vld [vmem:[%s9243_s3 + $0x728] sm:$0xff] }
 0x205   :  { %879 = vmatpush.msra.mxu1 %v4229_v27  ;;  %898 = vmatpush.msra.mxu3 %v4234_v32  ;;  %v4267_v27 = vld [vmem:[%s9243_s3 + $0x618] sm:$0xff]  ;;  %v4322_v32 = vld [vmem:[%s9243_s3 + $0x7a8] sm:$0xff] }
 0x206   :  { %1001 = vmatpush.msrb.mxu2 %v4269_v45  ;;  %v4302_v45 = vld [vmem:[%s9243_s3 + $0x708] sm:$0xff] }
 0x207   :  { %899 = vmatpush.msra.mxu3 %v4230_v33  ;;  %975 = vmatpush.msrb.mxu1 %v4292_v37  ;;  %v210_v33 = vpop.f32.mrf.mxu3  ;;  %v4318_v37 = vld [vmem:[%s9243_s3 + $0x788] sm:$0xff] }
 0x208   :  { %1002 = vmatpush.msrb.mxu2 %v4265_v47 }
 0x209   :  { %976 = vmatpush.msrb.mxu1 %v4288_v38  ;;  %v293_v30 = vpop.f32.mrf.mxu1 }
 0x20a   :  { %1053 = vmatpush.msra.mxu2 %v5979_v48  ;;  %v294_v36 = vadd.f32 %v293_v30, %v210_v33  ;;  %v4363_v30 = vld [vmem:[%s9243_s3 + $0x8c8] sm:$0xff]  ;;  %v4366_v33 = vld [vmem:[%s9243_s3 + $0x8e0] sm:$0xff] }
 0x20b   :  { %977 = vmatpush.msrb.mxu1 %v4284_v40 }
 0x20c   :  { %1054 = vmatpush.msra.mxu2 %v5985_v49  ;;  %v476_v38 = vadd.f32 %v5727_v31, %v294_v36  ;;  %v4358_v36 = vld [vmem:[%s9243_s3 + $0x8a0] sm:$0xff] }
 0x20d   :  { %978 = vmatpush.msrb.mxu1 %v4280_v42 }
 0x20e   :  { %1055 = vmatpush.msra.mxu2 %v5992_v52  ;;  %v619_v40 = vadd.f32 %v5840_v20, %v476_v38  ;;  %v4354_v38 = vld [vmem:[%s9243_s3 + $0x880] sm:$0xff] }
 0x20f   :  { %979 = vmatpush.msrb.mxu1 %v4276_v44 }
 0x210   :  { %1056 = vmatpush.msra.mxu2 %v5998_v55 }
 0x211   :  { %980 = vmatpush.msrb.mxu1 %v4272_v0  ;;  %v4327_v0 = vld [vmem:[%s9243_s3 + $0x7d0] sm:$0xff] }
 0x213   :  { %981 = vmatpush.msrb.mxu1 %v4268_v2  ;;  %v4323_v2 = vld [vmem:[%s9243_s3 + $0x7b0] sm:$0xff] }
 0x215   :  { %982 = vmatpush.msrb.mxu1 %v4264_v4  ;;  %v4319_v4 = vld [vmem:[%s9243_s3 + $0x790] sm:$0xff] }
 0x279   :  { %v5971_v46 = vpop.f32.mrf.mxu2 }
 0x27a   :  { %v762_v42 = vadd.f32 %v5971_v46, %v619_v40  ;;  %v6179_v46 = vld [vmem:[%s9242_s2] ss:$0 sm:$0xff] }
 0x27b   :  { %v4350_v40 = vld [vmem:[%s9243_s3 + $0x860] sm:$0xff] }
 0x281   :  { %v784_v50 = vpop.f32.mrf.mxu2 }
 0x282   :  { %v785_v51 = vadd.f32 %v5393_v19, %v784_v50  ;;  %v6010_v19 = vld [vmem:[%s9241_s1 + $0x58] sm:$0xff] }
 0x283   :  { %1057 = vmatpush.msra.mxu2 %v6010_v19 }
 0x284   :  { %v787_v54 = vmax.f32 %v785_v51, 0.0  ;;  %v4300_v51 = vld [vmem:[%s9240_s0 + $0xe] sm:$0x3] }
 0x285   :  { %1058 = vmatpush.msra.mxu2 %v6016_v57 }
 0x286   :  { %4259 = vmatmul.msk.f32.vlgmr.msrb.gmra.mxu3 %vm169_vm0, %v787_v54  ;;  %4260 = vmatmul.msk.f32.vlgmr.msra.gmra.mxu0 %vm169_vm0, %v787_v54 }
 0x287   :  { %4261 = vmatmul.msk.f32.vlgmr.msra.gmra.mxu1 %vm169_vm0, %v787_v54  ;;  %1015 = vmatpush.msrb.mxu3 %v4294_v56  ;;  %v4317_v56 = vld [vmem:[%s9243_s3 + $0x780] sm:$0xff] }
 0x288   :  { %1059 = vmatpush.msra.mxu2 %v6025_v59  ;;  %1035 = vmatpush.msra.mxu1 %v4295_v6  ;;  %v4315_v6 = vld [vmem:[%s9243_s3 + $0x770] sm:$0xff] }
 0x289   :  { %1016 = vmatpush.msrb.mxu3 %v4290_v25  ;;  %1138 = vmatpush.msra.mxu0 %v4330_v28  ;;  %v4313_v25 = vld [vmem:[%s9243_s3 + $0x760] sm:$0xff]  ;;  %v4304_v28 = vld [vmem:[%s9243_s3 + $0x718] sm:$0xff] }
 0x28a   :  { %1060 = vmatpush.msra.mxu2 %v6032_v61  ;;  %1036 = vmatpush.msra.mxu1 %v4291_v8  ;;  %v4311_v8 = vld [vmem:[%s9243_s3 + $0x750] sm:$0xff] }
 0x28b   :  { %1017 = vmatpush.msrb.mxu3 %v4286_v1  ;;  %1139 = vmatpush.msra.mxu0 %v4326_v29  ;;  %v4309_v1 = vld [vmem:[%s9243_s3 + $0x740] sm:$0xff]  ;;  %v4367_v29 = vld [vmem:[%s9243_s3 + $0x8e8] sm:$0xff] }
 0x28c   :  { %1061 = vmatpush.msra.mxu2 %v6038_v62  ;;  %1037 = vmatpush.msra.mxu1 %v4287_v10  ;;  %v4307_v10 = vld [vmem:[%s9243_s3 + $0x730] sm:$0xff] }
 0x28d   :  { %1018 = vmatpush.msrb.mxu3 %v4282_v3  ;;  %1140 = vmatpush.msra.mxu0 %v4322_v32  ;;  %v4305_v3 = vld [vmem:[%s9243_s3 + $0x720] sm:$0xff]  ;;  %v4359_v32 = vld [vmem:[%s9243_s3 + $0x8a8] sm:$0xff] }
 0x28e   :  { %4262 = vmatmul.msk.f32.vlgmr.msra.gmra.mxu3 %vm169_vm0, %v787_v54  ;;  %926 = vmatmul.f32.vlgmr.msrb.gmra.mxu0 %v4263_v58  ;;  %v4321_v54 = vld [vmem:[%s9243_s3 + $0x7a0] sm:$0xff]  ;;  %v4331_v58 = vld [vmem:[%s9243_s3 + $0x7f0] sm:$0xff] }
 0x28f   :  { %1062 = vmatpush.msra.mxu2 %v6044_v63  ;;  %1019 = vmatpush.msrb.mxu3 %v4278_v5  ;;  %v4301_v5 = vld [vmem:[%s9243_s3 + $0x700] sm:$0xff] }
 0x290   :  { %1038 = vmatpush.msra.mxu1 %v4283_v12  ;;  %1141 = vmatpush.msra.mxu0 %v4318_v37  ;;  %v4303_v12 = vld [vmem:[%s9243_s3 + $0x710] sm:$0xff]  ;;  %v4351_v37 = vld [vmem:[%s9243_s3 + $0x868] sm:$0xff] }
 0x291   :  { %1063 = vmatpush.msra.mxu2 %v6050_v16  ;;  %1020 = vmatpush.msrb.mxu3 %v4274_v7  ;;  %v4332_v7 = vld [vmem:[%s9243_s3 + $0x7f8] sm:$0xff] }
 0x292   :  { %1039 = vmatpush.msra.mxu1 %v4279_v14  ;;  %1142 = vmatpush.msra.mxu0 %v4314_v39  ;;  %v4320_v14 = vld [vmem:[%s9243_s3 + $0x798] sm:$0xff]  ;;  %v4347_v39 = vld [vmem:[%s9243_s3 + $0x848] sm:$0xff] }
 0x293   :  { %1064 = vmatpush.msra.mxu2 %v6056_v17  ;;  %1021 = vmatpush.msrb.mxu3 %v4270_v9  ;;  %v4328_v9 = vld [vmem:[%s9243_s3 + $0x7d8] sm:$0xff] }
 0x294   :  { %1040 = vmatpush.msra.mxu1 %v4275_v15  ;;  %1143 = vmatpush.msra.mxu0 %v4310_v41  ;;  %v4316_v15 = vld [vmem:[%s9243_s3 + $0x778] sm:$0xff]  ;;  %v4343_v41 = vld [vmem:[%s9243_s3 + $0x828] sm:$0xff] }
 0x295   :  { %1065 = vmatpush.msra.mxu2 %v6062_v18  ;;  %1022 = vmatpush.msrb.mxu3 %v4266_v11  ;;  %v4324_v11 = vld [vmem:[%s9243_s3 + $0x7b8] sm:$0xff] }
 0x296   :  { %1041 = vmatpush.msra.mxu1 %v4271_v26  ;;  %1144 = vmatpush.msra.mxu0 %v4306_v43  ;;  %v4312_v26 = vld [vmem:[%s9243_s3 + $0x758] sm:$0xff] }
 0x297   :  { %1066 = vmatpush.msra.mxu2 %v6068_v22  ;;  %1118 = vmatpush.msra.mxu3 %v4329_v34  ;;  %v4362_v34 = vld [vmem:[%s9243_s3 + $0x8c0] sm:$0xff] }
 0x298   :  { %1042 = vmatpush.msra.mxu1 %v4267_v27  ;;  %1145 = vmatpush.msra.mxu0 %v4302_v45  ;;  %v4308_v27 = vld [vmem:[%s9243_s3 + $0x738] sm:$0xff] }
 0x299   :  { %1067 = vmatpush.msra.mxu2 %v6074_v23  ;;  %1119 = vmatpush.msra.mxu3 %v4325_v35  ;;  %v4355_v35 = vld [vmem:[%s9243_s3 + $0x888] sm:$0xff] }
 0x29a   :  { %1196 = vmatpush.msrb.mxu0 %v5979_v48 }
 0x29b   :  { %1068 = vmatpush.msra.mxu2 %v6080_v24  ;;  %1120 = vmatpush.msra.mxu3 %v4321_v54  ;;  %v4346_v54 = vld [vmem:[%s9243_s3 + $0x840] sm:$0xff] }
 0x29c   :  { %1197 = vmatpush.msrb.mxu0 %v5985_v49 }
 0x29d   :  { %1121 = vmatpush.msra.mxu3 %v4317_v56  ;;  %v4360_v56 = vld [vmem:[%s9243_s3 + $0x8b0] sm:$0xff] }
 0x29e   :  { %1198 = vmatpush.msrb.mxu0 %v5992_v52 }
 0x29f   :  { %1122 = vmatpush.msra.mxu3 %v4313_v25  ;;  %v4356_v25 = vld [vmem:[%s9243_s3 + $0x890] sm:$0xff] }
 0x2a0   :  { %1199 = vmatpush.msrb.mxu0 %v5998_v55 }
 0x2a1   :  { %1123 = vmatpush.msra.mxu3 %v4309_v1  ;;  %v4352_v1 = vld [vmem:[%s9243_s3 + $0x870] sm:$0xff] }
 0x2a2   :  { %1200 = vmatpush.msrb.mxu0 %v6010_v19 }
 0x2a3   :  { %1124 = vmatpush.msra.mxu3 %v4305_v3  ;;  %v4348_v3 = vld [vmem:[%s9243_s3 + $0x850] sm:$0xff] }
 0x2a4   :  { %1201 = vmatpush.msrb.mxu0 %v6016_v57 }
 0x2a5   :  { %1125 = vmatpush.msra.mxu3 %v4301_v5  ;;  %v4344_v5 = vld [vmem:[%s9243_s3 + $0x830] sm:$0xff] }
 0x2a6   :  { %1202 = vmatpush.msrb.mxu0 %v6025_v59 }
 0x2a8   :  { %1203 = vmatpush.msrb.mxu0 %v6032_v61 }
 0x2aa   :  { %1204 = vmatpush.msrb.mxu0 %v6038_v62 }
 0x2ac   :  { %1205 = vmatpush.msrb.mxu0 %v6044_v63 }
 0x2ae   :  { %1206 = vmatpush.msrb.mxu0 %v6050_v16 }
 0x2b0   :  { %1207 = vmatpush.msrb.mxu0 %v6056_v17 }
 0x2b2   :  { %1208 = vmatpush.msrb.mxu0 %v6062_v18 }
 0x2b4   :  { %1209 = vmatpush.msrb.mxu0 %v6068_v22 }
 0x2b6   :  { %1210 = vmatpush.msrb.mxu0 %v6074_v23 }
 0x2b8   :  { %1211 = vmatpush.msrb.mxu0 %v6080_v24 }
 0x303   :  { %v861_v31 = vpop.f32.mrf.mxu0 }
 0x304   :  { %v6169_v44 = vadd.f32 %v861_v31, %v762_v42  ;;  %v4339_v31 = vld [vmem:[%s9243_s3 + $0x808] sm:$0xff] }
 0x30b   :  { %v927_v20 = vpop.f32.mrf.mxu0 }
 0x30c   :  { %v928_v47 = vadd.f32 %v6179_v46, %v927_v20 }
 0x30e   :  { %v930_v50 = vmax.f32 %v928_v47, 0.0 }
 0x310   :  { %4296 = vmatmul.msk.f32.vlgmr.msrb.gmra.mxu1 %vm169_vm0, %v930_v50  ;;  %4297 = vmatmul.msk.f32.vlgmr.msrb.gmra.mxu2 %vm169_vm0, %v930_v50 }
 0x311   :  { %4298 = vmatmul.msk.f32.vlgmr.msrb.gmra.mxu3 %vm169_vm0, %v930_v50  ;;  %1158 = vmatpush.msrb.mxu1 %v4331_v58  ;;  %v4342_v58 = vld [vmem:[%s9243_s3 + $0x820] sm:$0xff] }
 0x312   :  { %1178 = vmatpush.msrb.mxu3 %v4332_v7  ;;  %1281 = vmatpush.msrb.mxu2 %v4367_v29  ;;  %v4340_v7 = vld [vmem:[%s9243_s3 + $0x810] sm:$0xff]  ;;  %v4392_v29 = vld [vmem:[%s9243_s3 + $0x988] sm:$0xff] }
 0x313   :  { %1159 = vmatpush.msrb.mxu1 %v4327_v0  ;;  %v4338_v0 = vld [vmem:[%s9243_s3 + $0x800] sm:$0xff] }
 0x314   :  { %1179 = vmatpush.msrb.mxu3 %v4328_v9  ;;  %1282 = vmatpush.msrb.mxu2 %v4363_v30  ;;  %v4353_v9 = vld [vmem:[%s9243_s3 + $0x878] sm:$0xff]  ;;  %v4388_v30 = vld [vmem:[%s9243_s3 + $0x968] sm:$0xff] }
 0x315   :  { %1160 = vmatpush.msrb.mxu1 %v4323_v2  ;;  %v4369_v2 = vld [vmem:[%s9243_s3 + $0x8f8] sm:$0xff] }
 0x316   :  { %1180 = vmatpush.msrb.mxu3 %v4324_v11  ;;  %1283 = vmatpush.msrb.mxu2 %v4359_v32  ;;  %v4345_v11 = vld [vmem:[%s9243_s3 + $0x838] sm:$0xff]  ;;  %v4384_v32 = vld [vmem:[%s9243_s3 + $0x948] sm:$0xff] }
 0x317   :  { %1161 = vmatpush.msrb.mxu1 %v4319_v4  ;;  %v4365_v4 = vld [vmem:[%s9243_s3 + $0x8d8] sm:$0xff] }
 0x318   :  { %4299 = vmatmul.msk.f32.vlgmr.msra.gmra.mxu1 %vm169_vm0, %v930_v50  ;;  %1069 = vmatmul.f32.vlgmr.msra.gmra.mxu2 %v4300_v51  ;;  %v4337_v50 = vld [vmem:[%s9240_s0 + $0x10] sm:$0x3] }
 0x319   :  { %1162 = vmatpush.msrb.mxu1 %v4315_v6  ;;  %1181 = vmatpush.msrb.mxu3 %v4320_v14  ;;  %v4364_v51 = vld [vmem:[%s9243_s3 + $0x8d0] sm:$0xff]  ;;  %v4361_v6 = vld [vmem:[%s9243_s3 + $0x8b8] sm:$0xff]  ;;  %v4404_v14 = vld [vmem:[%s9243_s3 + $0x9e8] sm:$0xff] }
 0x31a   :  { %1284 = vmatpush.msrb.mxu2 %v4355_v35 }
 0x31b   :  { %1163 = vmatpush.msrb.mxu1 %v4311_v8  ;;  %1182 = vmatpush.msrb.mxu3 %v4316_v15  ;;  %v4357_v8 = vld [vmem:[%s9243_s3 + $0x898] sm:$0xff]  ;;  %v4400_v15 = vld [vmem:[%s9243_s3 + $0x9c8] sm:$0xff] }
 0x31c   :  { %1285 = vmatpush.msrb.mxu2 %v4351_v37 }
 0x31d   :  { %1164 = vmatpush.msrb.mxu1 %v4307_v10  ;;  %1183 = vmatpush.msrb.mxu3 %v4312_v26  ;;  %v4349_v10 = vld [vmem:[%s9243_s3 + $0x858] sm:$0xff]  ;;  %v4396_v26 = vld [vmem:[%s9243_s3 + $0x9a8] sm:$0xff] }
 0x31e   :  { %1286 = vmatpush.msrb.mxu2 %v4347_v39 }
 0x31f   :  { %1165 = vmatpush.msrb.mxu1 %v4303_v12  ;;  %1184 = vmatpush.msrb.mxu3 %v4308_v27  ;;  %v4341_v12 = vld [vmem:[%s9243_s3 + $0x818] sm:$0xff]  ;;  %v4403_v27 = vld [vmem:[%s9243_s3 + $0x9e0] sm:$0xff] }
 0x320   :  { %1287 = vmatpush.msrb.mxu2 %v4343_v41  ;;  %v4395_v41 = vld [vmem:[%s9243_s3 + $0x9a0] sm:$0xff] }
 0x321   :  { %1185 = vmatpush.msrb.mxu3 %v4304_v28  ;;  %1261 = vmatpush.msra.mxu1 %v4366_v33  ;;  %v4399_v28 = vld [vmem:[%s9243_s3 + $0x9c0] sm:$0xff]  ;;  %v4380_v33 = vld [vmem:[%s9243_s3 + $0x928] sm:$0xff] }
 0x322   :  { %1288 = vmatpush.msrb.mxu2 %v4339_v31  ;;  %v4387_v31 = vld [vmem:[%s9243_s3 + $0x960] sm:$0xff] }
 0x323   :  { %1262 = vmatpush.msra.mxu1 %v4362_v34 }
 0x324   :  { %1339 = vmatpush.msra.mxu2 %v5979_v48 }
 0x325   :  { %1263 = vmatpush.msra.mxu1 %v4358_v36  ;;  %v4376_v36 = vld [vmem:[%s9243_s3 + $0x908] sm:$0xff] }
 0x326   :  { %1340 = vmatpush.msra.mxu2 %v5985_v49 }
 0x327   :  { %1264 = vmatpush.msra.mxu1 %v4354_v38 }
 0x328   :  { %1341 = vmatpush.msra.mxu2 %v5992_v52 }
 0x329   :  { %1265 = vmatpush.msra.mxu1 %v4350_v40  ;;  %v4374_v40 = vld [vmem:[%s9240_s0 + $0x12] sm:$0x3] }
 0x32a   :  { %1342 = vmatpush.msra.mxu2 %v5998_v55 }
 0x32b   :  { %1266 = vmatpush.msra.mxu1 %v4346_v54  ;;  %v4389_v54 = vld [vmem:[%s9243_s3 + $0x970] sm:$0xff] }
 0x32c   :  { %1343 = vmatpush.msra.mxu2 %v6010_v19 }
 0x32d   :  { %1267 = vmatpush.msra.mxu1 %v4342_v58  ;;  %v4385_v58 = vld [vmem:[%s9243_s3 + $0x950] sm:$0xff] }
 0x32e   :  { %1344 = vmatpush.msra.mxu2 %v6016_v57 }
 0x32f   :  { %1268 = vmatpush.msra.mxu1 %v4338_v0  ;;  %v4381_v0 = vld [vmem:[%s9243_s3 + $0x930] sm:$0xff] }
 0x330   :  { %1345 = vmatpush.msra.mxu2 %v6025_v59 }
 0x332   :  { %1346 = vmatpush.msra.mxu2 %v6032_v61 }
 0x334   :  { %1347 = vmatpush.msra.mxu2 %v6038_v62 }
 0x336   :  { %1348 = vmatpush.msra.mxu2 %v6044_v63 }
 0x338   :  { %1349 = vmatpush.msra.mxu2 %v6050_v16 }
 0x33a   :  { %1350 = vmatpush.msra.mxu2 %v6056_v17 }
 0x33c   :  { %1351 = vmatpush.msra.mxu2 %v6062_v18 }
 0x33e   :  { %1352 = vmatpush.msra.mxu2 %v6068_v22 }
 0x340   :  { %1353 = vmatpush.msra.mxu2 %v6074_v23 }
 0x342   :  { %1354 = vmatpush.msra.mxu2 %v6080_v24 }
 0x393   :  { %v1004_v42 = vpop.f32.mrf.mxu2 }
 0x394   :  { %v6306_v43 = vadd.f32 %v1004_v42, %v6169_v44  ;;  %v4368_v44 = vld [vmem:[%s9243_s3 + $0x8f0] sm:$0xff]  ;;  %v4391_v42 = vld [vmem:[%s9243_s3 + $0x980] sm:$0xff] }
 0x39b   :  { %v1070_v45 = vpop.f32.mrf.mxu2 }
 0x39c   :  { %v1071_v20 = vadd.f32 %v6179_v46, %v1070_v45  ;;  %v4401_v45 = vld [vmem:[%s9243_s3 + $0x9d0] sm:$0xff] }
 0x39e   :  { %v1073_v47 = vmax.f32 %v1071_v20, 0.0  ;;  %v4383_v20 = vld [vmem:[%s9243_s3 + $0x940] sm:$0xff] }
 0x3a0   :  { %4333 = vmatmul.msk.f32.vlgmr.msra.gmra.mxu3 %vm169_vm0, %v1073_v47  ;;  %4334 = vmatmul.msk.f32.vlgmr.msra.gmra.mxu0 %vm169_vm0, %v1073_v47 }
 0x3a1   :  { %4335 = vmatmul.msk.f32.vlgmr.msrb.gmra.mxu1 %vm169_vm0, %v1073_v47  ;;  %1301 = vmatpush.msra.mxu3 %v4368_v44  ;;  %v4379_v44 = vld [vmem:[%s9243_s3 + $0x920] sm:$0xff] }
 0x3a2   :  { %1321 = vmatpush.msrb.mxu1 %v4369_v2  ;;  %1424 = vmatpush.msra.mxu0 %v4404_v14  ;;  %v4377_v2 = vld [vmem:[%s9243_s3 + $0x910] sm:$0xff]  ;;  %v4429_v14 = vld [vmem:[%s9243_s3 + $0xa88] sm:$0xff] }
 0x3a3   :  { %1302 = vmatpush.msra.mxu3 %v4364_v51  ;;  %v4375_v51 = vld [vmem:[%s9243_s3 + $0x900] sm:$0xff] }
 0x3a4   :  { %1322 = vmatpush.msrb.mxu1 %v4365_v4  ;;  %1425 = vmatpush.msra.mxu0 %v4400_v15  ;;  %v4390_v4 = vld [vmem:[%s9243_s3 + $0x978] sm:$0xff]  ;;  %v4432_v15 = vld [vmem:[%s9243_s3 + $0xaa0] sm:$0xff] }
 0x3a5   :  { %1303 = vmatpush.msra.mxu3 %v4360_v56  ;;  %v4406_v56 = vld [vmem:[%s9243_s3 + $0x9f8] sm:$0xff] }
 0x3a6   :  { %1323 = vmatpush.msrb.mxu1 %v4361_v6  ;;  %1426 = vmatpush.msra.mxu0 %v4396_v26  ;;  %v4382_v6 = vld [vmem:[%s9243_s3 + $0x938] sm:$0xff]  ;;  %v4425_v26 = vld [vmem:[%s9243_s3 + $0xa68] sm:$0xff] }
 0x3a7   :  { %1304 = vmatpush.msra.mxu3 %v4356_v25  ;;  %v4402_v25 = vld [vmem:[%s9243_s3 + $0x9d8] sm:$0xff] }
 0x3a8   :  { %4336 = vmatmul.msk.f32.vlgmr.msrb.gmra.mxu3 %vm169_vm0, %v1073_v47  ;;  %1212 = vmatmul.f32.vlgmr.msrb.gmra.mxu0 %v4337_v50  ;;  %v4397_v47 = vld [vmem:[%s9243_s3 + $0x9b0] sm:$0xff] }
 0x3a9   :  { %1305 = vmatpush.msra.mxu3 %v4352_v1  ;;  %1324 = vmatpush.msrb.mxu1 %v4357_v8  ;;  %v4393_v50 = vld [vmem:[%s9243_s3 + $0x990] sm:$0xff]  ;;  %v4398_v1 = vld [vmem:[%s9243_s3 + $0x9b8] sm:$0xff]  ;;  %v4441_v8 = vld [vmem:[%s9243_s3 + $0xae8] sm:$0xff] }
 0x3aa   :  { %1427 = vmatpush.msra.mxu0 %v4392_v29  ;;  %v4424_v29 = vld [vmem:[%s9243_s3 + $0xa60] sm:$0xff] }
 0x3ab   :  { %1306 = vmatpush.msra.mxu3 %v4348_v3  ;;  %1325 = vmatpush.msrb.mxu1 %v4353_v9  ;;  %v4394_v3 = vld [vmem:[%s9243_s3 + $0x998] sm:$0xff]  ;;  %v4437_v9 = vld [vmem:[%s9243_s3 + $0xac8] sm:$0xff] }
 0x3ac   :  { %1428 = vmatpush.msra.mxu0 %v4388_v30  ;;  %v4417_v30 = vld [vmem:[%s9243_s3 + $0xa28] sm:$0xff] }
 0x3ad   :  { %1307 = vmatpush.msra.mxu3 %v4344_v5  ;;  %1326 = vmatpush.msrb.mxu1 %v4349_v10  ;;  %v4386_v5 = vld [vmem:[%s9243_s3 + $0x958] sm:$0xff]  ;;  %v4433_v10 = vld [vmem:[%s9243_s3 + $0xaa8] sm:$0xff] }
 0x3ae   :  { %1429 = vmatpush.msra.mxu0 %v4384_v32 }
 0x3af   :  { %1308 = vmatpush.msra.mxu3 %v4340_v7  ;;  %1327 = vmatpush.msrb.mxu1 %v4345_v11  ;;  %v4378_v7 = vld [vmem:[%s9243_s3 + $0x918] sm:$0xff]  ;;  %v4440_v11 = vld [vmem:[%s9243_s3 + $0xae0] sm:$0xff] }
 0x3b0   :  { %1430 = vmatpush.msra.mxu0 %v4380_v33 }
 0x3b1   :  { %1328 = vmatpush.msrb.mxu1 %v4341_v12  ;;  %1404 = vmatpush.msrb.mxu3 %v4403_v27  ;;  %v4436_v12 = vld [vmem:[%s9243_s3 + $0xac0] sm:$0xff] }
 0x3b2   :  { %1431 = vmatpush.msra.mxu0 %v4376_v36  ;;  %v4428_v27 = vld [vmem:[%s9243_s3 + $0xa80] sm:$0xff] }
 0x3b3   :  { %1405 = vmatpush.msrb.mxu3 %v4399_v28  ;;  %v4421_v28 = vld [vmem:[%s9243_s3 + $0xa48] sm:$0xff] }
 0x3b4   :  { %1482 = vmatpush.msrb.mxu0 %v5979_v48 }
 0x3b5   :  { %1406 = vmatpush.msrb.mxu3 %v4395_v41  ;;  %v4420_v41 = vld [vmem:[%s9243_s3 + $0xa40] sm:$0xff] }
 0x3b6   :  { %1483 = vmatpush.msrb.mxu0 %v5985_v49 }
 0x3b7   :  { %1407 = vmatpush.msrb.mxu3 %v4391_v42  ;;  %v4434_v42 = vld [vmem:[%s9243_s3 + $0xab0] sm:$0xff] }
 0x3b8   :  { %1484 = vmatpush.msrb.mxu0 %v5992_v52 }
 0x3b9   :  { %1408 = vmatpush.msrb.mxu3 %v4387_v31  ;;  %v4430_v31 = vld [vmem:[%s9243_s3 + $0xa90] sm:$0xff] }
 0x3ba   :  { %1485 = vmatpush.msrb.mxu0 %v5998_v55 }
 0x3bb   :  { %1409 = vmatpush.msrb.mxu3 %v4383_v20  ;;  %v4426_v20 = vld [vmem:[%s9243_s3 + $0xa70] sm:$0xff] }
 0x3bc   :  { %1486 = vmatpush.msrb.mxu0 %v6010_v19 }
 0x3bd   :  { %1410 = vmatpush.msrb.mxu3 %v4379_v44  ;;  %v4422_v44 = vld [vmem:[%s9243_s3 + $0xa50] sm:$0xff] }
 0x3be   :  { %1487 = vmatpush.msrb.mxu0 %v6016_v57 }
 0x3bf   :  { %1411 = vmatpush.msrb.mxu3 %v4375_v51  ;;  %v4418_v51 = vld [vmem:[%s9243_s3 + $0xa30] sm:$0xff] }
 0x3c0   :  { %1488 = vmatpush.msrb.mxu0 %v6025_v59 }
 0x3c2   :  { %1489 = vmatpush.msrb.mxu0 %v6032_v61 }
 0x3c4   :  { %1490 = vmatpush.msrb.mxu0 %v6038_v62 }
 0x3c6   :  { %1491 = vmatpush.msrb.mxu0 %v6044_v63 }
 0x3c8   :  { %1492 = vmatpush.msrb.mxu0 %v6050_v16 }
 0x3ca   :  { %1493 = vmatpush.msrb.mxu0 %v6056_v17 }
 0x3cc   :  { %1494 = vmatpush.msrb.mxu0 %v6062_v18 }
 0x3ce   :  { %1495 = vmatpush.msrb.mxu0 %v6068_v22 }
 0x3d0   :  { %1496 = vmatpush.msrb.mxu0 %v6074_v23 }
 0x3d2   :  { %1497 = vmatpush.msrb.mxu0 %v6080_v24 }
 0x41d   :  { %v1147_v34 = vpop.f32.mrf.mxu0 }
 0x41e   :  { %v6420_v35 = vadd.f32 %v1147_v34, %v6306_v43  ;;  %v4405_v43 = vld [vmem:[%s9243_s3 + $0x9f0] sm:$0xff]  ;;  %v4413_v34 = vld [vmem:[%s9243_s3 + $0xa08] sm:$0xff] }
 0x425   :  { %v1213_v37 = vpop.f32.mrf.mxu0 }
 0x426   :  { %v1214_v38 = vadd.f32 %v6179_v46, %v1213_v37 }
 0x428   :  { %v1216_v39 = vmax.f32 %v1214_v38, 0.0 }
 0x42a   :  { %4370 = vmatmul.msk.f32.vlgmr.msra.gmra.mxu1 %vm169_vm0, %v1216_v39  ;;  %4371 = vmatmul.msk.f32.vlgmr.msrb.gmra.mxu2 %vm169_vm0, %v1216_v39 }
 0x42b   :  { %4372 = vmatmul.msk.f32.vlgmr.msra.gmra.mxu3 %vm169_vm0, %v1216_v39  ;;  %1444 = vmatpush.msra.mxu1 %v4405_v43  ;;  %v4416_v43 = vld [vmem:[%s9243_s3 + $0xa20] sm:$0xff] }
 0x42c   :  { %1464 = vmatpush.msra.mxu3 %v4406_v56  ;;  %1567 = vmatpush.msrb.mxu2 %v4441_v8  ;;  %v4414_v56 = vld [vmem:[%s9243_s3 + $0xa10] sm:$0xff]  ;;  %v4466_v8 = vld [vmem:[%s9243_s3 + $0xb88] sm:$0xff] }
 0x42d   :  { %1445 = vmatpush.msra.mxu1 %v4401_v45  ;;  %v4412_v45 = vld [vmem:[%s9243_s3 + $0xa00] sm:$0xff] }
 0x42e   :  { %1465 = vmatpush.msra.mxu3 %v4402_v25  ;;  %1568 = vmatpush.msrb.mxu2 %v4437_v9  ;;  %v4427_v25 = vld [vmem:[%s9243_s3 + $0xa78] sm:$0xff]  ;;  %v4462_v9 = vld [vmem:[%s9243_s3 + $0xb68] sm:$0xff] }
 0x42f   :  { %1446 = vmatpush.msra.mxu1 %v4397_v47  ;;  %v4443_v47 = vld [vmem:[%s9243_s3 + $0xaf8] sm:$0xff] }
 0x430   :  { %1466 = vmatpush.msra.mxu3 %v4398_v1  ;;  %1569 = vmatpush.msrb.mxu2 %v4433_v10  ;;  %v4419_v1 = vld [vmem:[%s9243_s3 + $0xa38] sm:$0xff]  ;;  %v4458_v10 = vld [vmem:[%s9243_s3 + $0xb48] sm:$0xff] }
 0x431   :  { %1447 = vmatpush.msra.mxu1 %v4393_v50  ;;  %v4439_v50 = vld [vmem:[%s9243_s3 + $0xad8] sm:$0xff] }
 0x432   :  { %4373 = vmatmul.msk.f32.vlgmr.msrb.gmra.mxu1 %vm169_vm0, %v1216_v39  ;;  %1355 = vmatmul.f32.vlgmr.msra.gmra.mxu2 %v4374_v40  ;;  %v4411_v39 = vld [vmem:[%s9240_s0 + $0x14] sm:$0x3] }
 0x433   :  { %1448 = vmatpush.msra.mxu1 %v4389_v54  ;;  %1467 = vmatpush.msra.mxu3 %v4394_v3  ;;  %v4438_v40 = vld [vmem:[%s9243_s3 + $0xad0] sm:$0xff]  ;;  %v4435_v54 = vld [vmem:[%s9243_s3 + $0xab8] sm:$0xff]  ;;  %v4478_v3 = vld [vmem:[%s9243_s3 + $0xbe8] sm:$0xff] }
 0x434   :  { %1570 = vmatpush.msrb.mxu2 %v4429_v14 }
 0x435   :  { %1449 = vmatpush.msra.mxu1 %v4385_v58  ;;  %1468 = vmatpush.msra.mxu3 %v4390_v4  ;;  %v4431_v58 = vld [vmem:[%s9243_s3 + $0xa98] sm:$0xff]  ;;  %v4474_v4 = vld [vmem:[%s9243_s3 + $0xbc8] sm:$0xff] }
 0x436   :  { %1571 = vmatpush.msrb.mxu2 %v4425_v26 }
 0x437   :  { %1450 = vmatpush.msra.mxu1 %v4381_v0  ;;  %1469 = vmatpush.msra.mxu3 %v4386_v5  ;;  %v4423_v0 = vld [vmem:[%s9243_s3 + $0xa58] sm:$0xff]  ;;  %v4470_v5 = vld [vmem:[%s9243_s3 + $0xba8] sm:$0xff] }
 0x438   :  { %1572 = vmatpush.msrb.mxu2 %v4421_v28 }
 0x439   :  { %1451 = vmatpush.msra.mxu1 %v4377_v2  ;;  %1470 = vmatpush.msra.mxu3 %v4382_v6  ;;  %v4415_v2 = vld [vmem:[%s9243_s3 + $0xa18] sm:$0xff]  ;;  %v4477_v6 = vld [vmem:[%s9243_s3 + $0xbe0] sm:$0xff] }
 0x43a   :  { %1573 = vmatpush.msrb.mxu2 %v4417_v30  ;;  %v4451_v30 = vld [vmem:[%s9243_s3 + $0xb10] sm:$0xff] }
 0x43b   :  { %1471 = vmatpush.msra.mxu3 %v4378_v7  ;;  %1547 = vmatpush.msrb.mxu1 %v4440_v11  ;;  %v4473_v7 = vld [vmem:[%s9243_s3 + $0xbc0] sm:$0xff]  ;;  %v4454_v11 = vld [vmem:[%s9243_s3 + $0xb28] sm:$0xff] }
 0x43c   :  { %1574 = vmatpush.msrb.mxu2 %v4413_v34  ;;  %v4460_v34 = vld [vmem:[%s9243_s3 + $0xb58] sm:$0xff] }
 0x43d   :  { %1548 = vmatpush.msrb.mxu1 %v4436_v12 }
 0x43e   :  { %1625 = vmatpush.msra.mxu2 %v5979_v48 }
 0x43f   :  { %1549 = vmatpush.msrb.mxu1 %v4432_v15  ;;  %v4450_v15 = vld [vmem:[%s9243_s3 + $0xb08] sm:$0xff] }
 0x440   :  { %1626 = vmatpush.msra.mxu2 %v5985_v49 }
 0x441   :  { %1550 = vmatpush.msrb.mxu1 %v4428_v27 }
 0x442   :  { %1627 = vmatpush.msra.mxu2 %v5992_v52 }
 0x443   :  { %1551 = vmatpush.msrb.mxu1 %v4424_v29  ;;  %v4472_v29 = vld [vmem:[%s9243_s3 + $0xbb8] sm:$0xff] }
 0x444   :  { %1628 = vmatpush.msra.mxu2 %v5998_v55 }
 0x445   :  { %1552 = vmatpush.msrb.mxu1 %v4420_v41  ;;  %v4510_v41 = vld [vmem:[%s9243_s3 + $0xcc0] sm:$0xff] }
 0x446   :  { %1629 = vmatpush.msra.mxu2 %v6010_v19 }
 0x447   :  { %1553 = vmatpush.msrb.mxu1 %v4416_v43  ;;  %v4506_v43 = vld [vmem:[%s9243_s3 + $0xca0] sm:$0xff] }
 0x448   :  { %1630 = vmatpush.msra.mxu2 %v6016_v57 }
 0x449   :  { %1554 = vmatpush.msrb.mxu1 %v4412_v45  ;;  %v4502_v45 = vld [vmem:[%s9243_s3 + $0xc80] sm:$0xff] }
 0x44a   :  { %1631 = vmatpush.msra.mxu2 %v6025_v59 }
 0x44c   :  { %1632 = vmatpush.msra.mxu2 %v6032_v61 }
 0x44e   :  { %1633 = vmatpush.msra.mxu2 %v6038_v62 }
 0x450   :  { %1634 = vmatpush.msra.mxu2 %v6044_v63 }
 0x452   :  { %1635 = vmatpush.msra.mxu2 %v6050_v16 }
 0x454   :  { %1636 = vmatpush.msra.mxu2 %v6056_v17 }
 0x456   :  { %1637 = vmatpush.msra.mxu2 %v6062_v18 }
 0x458   :  { %1638 = vmatpush.msra.mxu2 %v6068_v22 }
 0x45a   :  { %1639 = vmatpush.msra.mxu2 %v6074_v23 }
 0x45c   :  { %1640 = vmatpush.msra.mxu2 %v6080_v24 }
 0x4ad   :  { %v1290_v32 = vpop.f32.mrf.mxu2 }
 0x4ae   :  { %v6552_v33 = vadd.f32 %v1290_v32, %v6420_v35  ;;  %v4442_v35 = vld [vmem:[%s9243_s3 + $0xaf0] sm:$0xff]  ;;  %v4468_v32 = vld [vmem:[%s9243_s3 + $0xb98] sm:$0xff] }
 0x4b5   :  { %v1356_v36 = vpop.f32.mrf.mxu2 }
 0x4b6   :  { %v1357_v37 = vadd.f32 %v6179_v46, %v1356_v36  ;;  %v4456_v36 = vld [vmem:[%s9243_s3 + $0xb38] sm:$0xff] }
 0x4b8   :  { %v1359_v38 = vmax.f32 %v1357_v37, 0.0  ;;  %v4452_v37 = vld [vmem:[%s9243_s3 + $0xb18] sm:$0xff] }
 0x4ba   :  { %4407 = vmatmul.msk.f32.vlgmr.msrb.gmra.mxu3 %vm169_vm0, %v1359_v38  ;;  %4408 = vmatmul.msk.f32.vlgmr.msra.gmra.mxu0 %vm169_vm0, %v1359_v38 }
 0x4bb   :  { %4409 = vmatmul.msk.f32.vlgmr.msra.gmra.mxu1 %vm169_vm0, %v1359_v38  ;;  %1587 = vmatpush.msrb.mxu3 %v4442_v35  ;;  %v4511_v35 = vld [vmem:[%s9243_s3 + $0xcc8] sm:$0xff] }
 0x4bc   :  { %1607 = vmatpush.msra.mxu1 %v4443_v47  ;;  %1710 = vmatpush.msra.mxu0 %v4478_v3  ;;  %v4498_v47 = vld [vmem:[%s9243_s3 + $0xc60] sm:$0xff] }
 0x4bd   :  { %1588 = vmatpush.msrb.mxu3 %v4438_v40  ;;  %v4514_v40 = vld [vmem:[%s9243_s3 + $0xce0] sm:$0xff] }
 0x4be   :  { %1608 = vmatpush.msra.mxu1 %v4439_v50  ;;  %1711 = vmatpush.msra.mxu0 %v4474_v4  ;;  %v6825_v3 = vld [vmem:[%s9241_s1 + $0x60] sm:$0xff]  ;;  %v4516_v4 = vld [vmem:[%s9243_s3 + $0xcf0] sm:$0xff] }
 0x4bf   :  { %1589 = vmatpush.msrb.mxu3 %v4434_v42  ;;  %v4503_v42 = vld [vmem:[%s9243_s3 + $0xc88] sm:$0xff] }
 0x4c0   :  { %1609 = vmatpush.msra.mxu1 %v4435_v54  ;;  %1712 = vmatpush.msra.mxu0 %v4470_v5  ;;  %v4487_v54 = vld [vmem:[%s9243_s3 + $0xc08] sm:$0xff]  ;;  %v6843_v5 = vld [vmem:[%s9241_s1 + $0x50] sm:$0xff] }
 0x4c1   :  { %1590 = vmatpush.msrb.mxu3 %v4430_v31  ;;  %v4499_v31 = vld [vmem:[%s9243_s3 + $0xc68] sm:$0xff] }
 0x4c2   :  { %4410 = vmatmul.msk.f32.vlgmr.msra.gmra.mxu3 %vm169_vm0, %v1359_v38  ;;  %1498 = vmatmul.f32.vlgmr.msrb.gmra.mxu0 %v4411_v39  ;;  %v4515_v38 = vld [vmem:[%s9243_s3 + $0xce8] sm:$0xff] }
 0x4c3   :  { %1591 = vmatpush.msrb.mxu3 %v4426_v20  ;;  %1610 = vmatpush.msra.mxu1 %v4431_v58  ;;  %v4507_v39 = vld [vmem:[%s9243_s3 + $0xca8] sm:$0xff]  ;;  %v6812_v58 = vld [vmem:[%s9241_s1 + $0x70] sm:$0xff] }
 0x4c4   :  { %1713 = vmatpush.msra.mxu0 %v4466_v8  ;;  %v4495_v20 = vld [vmem:[%s9243_s3 + $0xc48] sm:$0xff]  ;;  %v6859_v8 = vld [vmem:[%s9241_s1 + $0x40] sm:$0xff] }
 0x4c5   :  { %1592 = vmatpush.msrb.mxu3 %v4422_v44  ;;  %1611 = vmatpush.msra.mxu1 %v4427_v25  ;;  %v4491_v44 = vld [vmem:[%s9243_s3 + $0xc28] sm:$0xff] }
 0x4c6   :  { %1714 = vmatpush.msra.mxu0 %v4462_v9  ;;  %v6865_v9 = vld [vmem:[%s9241_s1 + $0x38] sm:$0xff] }
 0x4c7   :  { %1593 = vmatpush.msrb.mxu3 %v4418_v51  ;;  %1612 = vmatpush.msra.mxu1 %v4423_v0 }
 0x4c8   :  { %1715 = vmatpush.msra.mxu0 %v4458_v10  ;;  %v6871_v10 = vld [vmem:[%s9241_s1 + $0x30] sm:$0xff] }
 0x4c9   :  { %1594 = vmatpush.msrb.mxu3 %v4414_v56  ;;  %1613 = vmatpush.msra.mxu1 %v4419_v1  ;;  %v6806_v56 = vld [vmem:[%s9241_s1 + $0x78] sm:$0xff]  ;;  %v6819_v1 = vld [vmem:[%s9241_s1 + $0x68] sm:$0xff] }
 0x4ca   :  { %1716 = vmatpush.msra.mxu0 %v4454_v11  ;;  %v6877_v11 = vld [vmem:[%s9241_s1 + $0x28] sm:$0xff] }
 0x4cb   :  { %1614 = vmatpush.msra.mxu1 %v4415_v2  ;;  %1690 = vmatpush.msra.mxu3 %v4477_v6  ;;  %v4485_v6 = vld [vmem:[%s9240_s0 + $0x18] sm:$0x3] }
 0x4cc   :  { %1717 = vmatpush.msra.mxu0 %v4450_v15  ;;  %v6895_v15 = vld [vmem:[%s9241_s1 + $0x10] sm:$0xff] }
 0x4cd   :  { %1691 = vmatpush.msra.mxu3 %v4473_v7  ;;  %v6852_v7 = vld [vmem:[%s9241_s1 + $0x48] sm:$0xff] }
 0x4ce   :  { %1768 = vmatpush.msrb.mxu0 %v5979_v48  ;;  %v4448_v48 = vld [vmem:[%s9240_s0 + $0x16] sm:$0x3] }
 0x4d0   :  { %1769 = vmatpush.msrb.mxu0 %v5985_v49  ;;  %v4469_v49 = vld [vmem:[%s9243_s3 + $0xba0] sm:$0xff] }
 0x4d1   :  { %1692 = vmatpush.msra.mxu3 %v4469_v49  ;;  %v4508_v49 = vld [vmem:[%s9243_s3 + $0xcb0] sm:$0xff] }
 0x4d2   :  { %1770 = vmatpush.msrb.mxu0 %v5992_v52  ;;  %v4465_v52 = vld [vmem:[%s9243_s3 + $0xb80] sm:$0xff] }
 0x4d3   :  { %1693 = vmatpush.msra.mxu3 %v4465_v52  ;;  %v4490_v52 = vld [vmem:[%s9243_s3 + $0xc20] sm:$0xff] }
 0x4d4   :  { %1771 = vmatpush.msrb.mxu0 %v5998_v55  ;;  %v4479_v55 = vld [vmem:[%s9243_s3 + $0xbf0] sm:$0xff] }
 0x4d6   :  { %1772 = vmatpush.msrb.mxu0 %v6010_v19  ;;  %v4461_v19 = vld [vmem:[%s9243_s3 + $0xb60] sm:$0xff] }
 0x4d7   :  { %1694 = vmatpush.msra.mxu3 %v4461_v19  ;;  %v4486_v19 = vld [vmem:[%s9243_s3 + $0xc00] sm:$0xff] }
 0x4d8   :  { %1773 = vmatpush.msrb.mxu0 %v6016_v57  ;;  %v4475_v57 = vld [vmem:[%s9243_s3 + $0xbd0] sm:$0xff] }
 0x4da   :  { %1774 = vmatpush.msrb.mxu0 %v6025_v59  ;;  %v4457_v59 = vld [vmem:[%s9243_s3 + $0xb40] sm:$0xff] }
 0x4db   :  { %1695 = vmatpush.msra.mxu3 %v4457_v59  ;;  %v4517_v59 = vld [vmem:[%s9243_s3 + $0xcf8] sm:$0xff] }
 0x4dc   :  { %1775 = vmatpush.msrb.mxu0 %v6032_v61  ;;  %v4471_v61 = vld [vmem:[%s9243_s3 + $0xbb0] sm:$0xff] }
 0x4de   :  { %1776 = vmatpush.msrb.mxu0 %v6038_v62  ;;  %v4453_v62 = vld [vmem:[%s9243_s3 + $0xb20] sm:$0xff] }
 0x4df   :  { %1696 = vmatpush.msra.mxu3 %v4453_v62  ;;  %v4513_v62 = vld [vmem:[%s9243_s3 + $0xcd8] sm:$0xff] }
 0x4e0   :  { %1777 = vmatpush.msrb.mxu0 %v6044_v63  ;;  %v4467_v63 = vld [vmem:[%s9243_s3 + $0xb90] sm:$0xff] }
 0x4e2   :  { %1778 = vmatpush.msrb.mxu0 %v6050_v16  ;;  %v4449_v16 = vld [vmem:[%s9243_s3 + $0xb00] sm:$0xff] }
 0x4e3   :  { %1697 = vmatpush.msra.mxu3 %v4449_v16  ;;  %v4509_v16 = vld [vmem:[%s9243_s3 + $0xcb8] sm:$0xff] }
 0x4e4   :  { %1779 = vmatpush.msrb.mxu0 %v6056_v17  ;;  %v4463_v17 = vld [vmem:[%s9243_s3 + $0xb70] sm:$0xff] }
 0x4e6   :  { %1780 = vmatpush.msrb.mxu0 %v6062_v18  ;;  %v4480_v18 = vld [vmem:[%s9243_s3 + $0xbf8] sm:$0xff] }
 0x4e8   :  { %1781 = vmatpush.msrb.mxu0 %v6068_v22  ;;  %v4459_v22 = vld [vmem:[%s9243_s3 + $0xb50] sm:$0xff] }
 0x4ea   :  { %1782 = vmatpush.msrb.mxu0 %v6074_v23  ;;  %v4476_v23 = vld [vmem:[%s9243_s3 + $0xbd8] sm:$0xff] }
 0x4ec   :  { %1783 = vmatpush.msrb.mxu0 %v6080_v24  ;;  %v4455_v24 = vld [vmem:[%s9243_s3 + $0xb30] sm:$0xff] }
 0x537   :  { %v1433_v12 = vpop.f32.mrf.mxu0 }
 0x538   :  { %v6666_v14 = vadd.f32 %v1433_v12, %v6552_v33  ;;  %v4464_v33 = vld [vmem:[%s9243_s3 + $0xb78] sm:$0xff]  ;;  %v6883_v12 = vld [vmem:[%s9241_s1 + $0x20] sm:$0xff] }
 0x53f   :  { %v1499_v26 = vpop.f32.mrf.mxu0 }
 0x540   :  { %v1500_v27 = vadd.f32 %v6179_v46, %v1499_v26  ;;  %v6901_v26 = vld [vmem:[%s9241_s1 + $0x8] sm:$0xff] }
 0x542   :  { %v1502_v28 = vmax.f32 %v1500_v27, 0.0  ;;  %v6907_v27 = vld [vmem:[%s9241_s1] sm:$0xff] }
 0x544   :  { %4444 = vmatmul.msk.f32.vlgmr.msrb.gmra.mxu1 %vm169_vm0, %v1502_v28  ;;  %4445 = vmatmul.msk.f32.vlgmr.msrb.gmra.mxu2 %vm169_vm0, %v1502_v28 }
 0x545   :  { %4446 = vmatmul.msk.f32.vlgmr.msrb.gmra.mxu3 %vm169_vm0, %v1502_v28  ;;  %1730 = vmatpush.msrb.mxu1 %v4479_v55  ;;  %v4504_v55 = vld [vmem:[%s9243_s3 + $0xc90] sm:$0xff] }
 0x546   :  { %1750 = vmatpush.msrb.mxu3 %v4480_v18  ;;  %1853 = vmatpush.msrb.mxu2 %v4515_v38  ;;  %v4505_v18 = vld [vmem:[%s9243_s3 + $0xc98] sm:$0xff]  ;;  %v4536_v38 = vld [vmem:[%s9243_s3 + $0xd68] sm:$0xff] }
 0x547   :  { %1731 = vmatpush.msrb.mxu1 %v4475_v57  ;;  %v4500_v57 = vld [vmem:[%s9243_s3 + $0xc70] sm:$0xff] }
 0x548   :  { %1751 = vmatpush.msrb.mxu3 %v4476_v23  ;;  %1854 = vmatpush.msrb.mxu2 %v4511_v35  ;;  %v4497_v23 = vld [vmem:[%s9243_s3 + $0xc58] sm:$0xff]  ;;  %v4532_v35 = vld [vmem:[%s9243_s3 + $0xd48] sm:$0xff] }
 0x549   :  { %1732 = vmatpush.msrb.mxu1 %v4471_v61  ;;  %v4496_v61 = vld [vmem:[%s9243_s3 + $0xc50] sm:$0xff] }
 0x54a   :  { %1752 = vmatpush.msrb.mxu3 %v4472_v29  ;;  %1855 = vmatpush.msrb.mxu2 %v4507_v39  ;;  %v4489_v29 = vld [vmem:[%s9243_s3 + $0xc18] sm:$0xff]  ;;  %v4528_v39 = vld [vmem:[%s9243_s3 + $0xd28] sm:$0xff] }
 0x54b   :  { %1733 = vmatpush.msrb.mxu1 %v4467_v63  ;;  %v4492_v63 = vld [vmem:[%s9243_s3 + $0xc30] sm:$0xff] }
 0x54c   :  { %4447 = vmatmul.msk.f32.vlgmr.msra.gmra.mxu1 %vm169_vm0, %v1502_v28  ;;  %1641 = vmatmul.f32.vlgmr.msra.gmra.mxu2 %v4448_v48  ;;  %v4512_v28 = vld [vmem:[%s9243_s3 + $0xcd0] sm:$0xff]  ;;  %v4494_v48 = vld [vmem:[%s9243_s3 + $0xc40] sm:$0xff] }
 0x54d   :  { %1734 = vmatpush.msrb.mxu1 %v4463_v17  ;;  %1753 = vmatpush.msrb.mxu3 %v4468_v32  ;;  %v4488_v17 = vld [vmem:[%s9243_s3 + $0xc10] sm:$0xff]  ;;  %v4548_v32 = vld [vmem:[%s9243_s3 + $0xdc8] sm:$0xff] }
 0x54e   :  { %1856 = vmatpush.msrb.mxu2 %v4503_v42  ;;  %v4524_v42 = vld [vmem:[%s9243_s3 + $0xd08] sm:$0xff] }
 0x54f   :  { %1735 = vmatpush.msrb.mxu1 %v4459_v22  ;;  %1754 = vmatpush.msrb.mxu3 %v4464_v33  ;;  %v4501_v22 = vld [vmem:[%s9243_s3 + $0xc78] sm:$0xff]  ;;  %v4544_v33 = vld [vmem:[%s9243_s3 + $0xda8] sm:$0xff] }
 0x550   :  { %1857 = vmatpush.msrb.mxu2 %v4499_v31  ;;  %v7001_v31 = vpop.f32.mrf.mxu1 }
 0x551   :  { %1736 = vmatpush.msrb.mxu1 %v4455_v24  ;;  %1755 = vmatpush.msrb.mxu3 %v4460_v34  ;;  %v4493_v24 = vld [vmem:[%s9243_s3 + $0xc38] sm:$0xff]  ;;  %v4551_v34 = vld [vmem:[%s9243_s3 + $0xde0] sm:$0xff] }
 0x552   :  { %1858 = vmatpush.msrb.mxu2 %v4495_v20  ;;  %v7006_v20 = vld [vmem:[%s9242_s2] ss:$0 sm:$0xff] }
 0x553   :  { %1737 = vmatpush.msrb.mxu1 %v4451_v30  ;;  %1756 = vmatpush.msrb.mxu3 %v4456_v36  ;;  %v4552_v30 = vld [vmem:[%s9243_s3 + $0xde8] sm:$0xff]  ;;  %v4547_v36 = vld [vmem:[%s9243_s3 + $0xdc0] sm:$0xff] }
 0x554   :  { %1859 = vmatpush.msrb.mxu2 %v4491_v44 }
 0x555   :  { %1757 = vmatpush.msrb.mxu3 %v4452_v37  ;;  %1833 = vmatpush.msra.mxu1 %v4514_v40  ;;  %v4540_v37 = vld [vmem:[%s9243_s3 + $0xd88] sm:$0xff] }
 0x556   :  { %1860 = vmatpush.msrb.mxu2 %v4487_v54  ;;  %v4522_v54 = vld [vmem:[%s9240_s0 + $0x1a] sm:$0x3] }
 0x557   :  { %1834 = vmatpush.msra.mxu1 %v4510_v41 }
 0x558   :  { %1911 = vmatpush.msra.mxu2 %v6806_v56 }
 0x559   :  { %1835 = vmatpush.msra.mxu1 %v4506_v43  ;;  %v6997_v43 = vpop.f32.mrf.mxu3 }
 0x55a   :  { %1912 = vmatpush.msra.mxu2 %v6812_v58 }
 0x55b   :  { %1836 = vmatpush.msra.mxu1 %v4502_v45 }
 0x55c   :  { %1913 = vmatpush.msra.mxu2 %v6819_v1 }
 0x55d   :  { %1837 = vmatpush.msra.mxu1 %v4498_v47 }
 0x55e   :  { %1914 = vmatpush.msra.mxu2 %v6825_v3 }
 0x55f   :  { %1838 = vmatpush.msra.mxu1 %v4494_v48 }
 0x561   :  { %1839 = vmatpush.msra.mxu1 %v4490_v52 }
 0x563   :  { %1840 = vmatpush.msra.mxu1 %v4486_v19 }
 0x5c7   :  { %v1576_v50 = vpop.f32.mrf.mxu2 }
 0x5c8   :  { %v6798_v51 = vadd.f32 %v1576_v50, %v6666_v14  ;;  %v6889_v14 = vld [vmem:[%s9241_s1 + $0x18] sm:$0xff]  ;;  %v7013_v50 = vpop.f32.mrf.mxu3 }
 0x5cf   :  { %v1642_v25 = vpop.f32.mrf.mxu2 }
 0x5d0   :  { %v1643_v0 = vadd.f32 %v6179_v46, %v1642_v25  ;;  %v6837_v46 = vld [vmem:[%s9241_s1 + $0x58] sm:$0xff]  ;;  %v7026_v25 = vpop.f32.mrf.mxu3 }
 0x5d1   :  { %1915 = vmatpush.msra.mxu2 %v6837_v46 }
 0x5d2   :  { %v1645_v2 = vmax.f32 %v1643_v0, 0.0 }
 0x5d3   :  { %1916 = vmatpush.msra.mxu2 %v6843_v5 }
 0x5d4   :  { %4481 = vmatmul.msk.f32.vlgmr.msra.gmra.mxu3 %vm169_vm0, %v1645_v2  ;;  %4482 = vmatmul.msk.f32.vlgmr.msra.gmra.mxu0 %vm169_vm0, %v1645_v2 }
 0x5d5   :  { %4483 = vmatmul.msk.f32.vlgmr.msrb.gmra.mxu1 %vm169_vm0, %v1645_v2  ;;  %1873 = vmatpush.msra.mxu3 %v4516_v4 }
 0x5d6   :  { %1917 = vmatpush.msra.mxu2 %v6852_v7  ;;  %1893 = vmatpush.msrb.mxu1 %v4517_v59 }
 0x5d7   :  { %1874 = vmatpush.msra.mxu3 %v4512_v28  ;;  %1996 = vmatpush.msra.mxu0 %v4552_v30 }
 0x5d8   :  { %1918 = vmatpush.msra.mxu2 %v6859_v8  ;;  %1894 = vmatpush.msrb.mxu1 %v4513_v62 }
 0x5d9   :  { %1875 = vmatpush.msra.mxu3 %v4508_v49  ;;  %1997 = vmatpush.msra.mxu0 %v4548_v32  ;;  %v4535_v32 = vld [vmem:[%s9243_s3 + $0xd60] sm:$0xff] }
 0x5da   :  { %1919 = vmatpush.msra.mxu2 %v6865_v9  ;;  %1895 = vmatpush.msrb.mxu1 %v4509_v16 }
 0x5db   :  { %1876 = vmatpush.msra.mxu3 %v4504_v55  ;;  %1998 = vmatpush.msra.mxu0 %v4544_v33 }
 0x5dc   :  { %4484 = vmatmul.msk.f32.vlgmr.msrb.gmra.mxu3 %vm169_vm0, %v1645_v2  ;;  %1784 = vmatmul.f32.vlgmr.msrb.gmra.mxu0 %v4485_v6  ;;  %v555_v2 = vpop.f32.mrf.mxu3 }
 0x5dd   :  { %1920 = vmatpush.msra.mxu2 %v6871_v10  ;;  %1877 = vmatpush.msra.mxu3 %v4500_v57 }
 0x5de   :  { %1896 = vmatpush.msrb.mxu1 %v4505_v18  ;;  %1999 = vmatpush.msra.mxu0 %v4540_v37  ;;  %v4545_v37 = vld [vmem:[%s9243_s3 + $0xdb0] sm:$0xff] }
 0x5df   :  { %1921 = vmatpush.msra.mxu2 %v6877_v11  ;;  %1878 = vmatpush.msra.mxu3 %v4496_v61 }
 0x5e0   :  { %1897 = vmatpush.msrb.mxu1 %v4501_v22  ;;  %2000 = vmatpush.msra.mxu0 %v4536_v38  ;;  %v4527_v38 = vld [vmem:[%s9243_s3 + $0xd20] sm:$0xff] }
 0x5e1   :  { %1922 = vmatpush.msra.mxu2 %v6883_v12  ;;  %1879 = vmatpush.msra.mxu3 %v4492_v63 }
 0x5e2   :  { %1898 = vmatpush.msrb.mxu1 %v4497_v23  ;;  %2001 = vmatpush.msra.mxu0 %v4532_v35  ;;  %v4543_v23 = vld [vmem:[%s9243_s3 + $0xda0] sm:$0xff]  ;;  %v4541_v35 = vld [vmem:[%s9243_s3 + $0xd90] sm:$0xff] }
 0x5e3   :  { %1923 = vmatpush.msra.mxu2 %v6889_v14  ;;  %1880 = vmatpush.msra.mxu3 %v4488_v17 }
 0x5e4   :  { %1899 = vmatpush.msrb.mxu1 %v4493_v24  ;;  %2002 = vmatpush.msra.mxu0 %v4528_v39  ;;  %v7038_v6 = vpop.f32.mrf.mxu3  ;;  %v4539_v24 = vld [vmem:[%s9243_s3 + $0xd80] sm:$0xff] }
 0x5e5   :  { %1924 = vmatpush.msra.mxu2 %v6895_v15  ;;  %1976 = vmatpush.msrb.mxu3 %v4551_v34  ;;  %v4549_v34 = vld [vmem:[%s9243_s3 + $0xdd0] sm:$0xff]  ;;  %v4523_v39 = vld [vmem:[%s9243_s3 + $0xd00] sm:$0xff] }
 0x5e6   :  { %1900 = vmatpush.msrb.mxu1 %v4489_v29  ;;  %2003 = vmatpush.msra.mxu0 %v4524_v42  ;;  %v4553_v29 = vld [vmem:[%s9243_s3 + $0xdf0] sm:$0xff]  ;;  %v4554_v42 = vld [vmem:[%s9243_s3 + $0xdf8] sm:$0xff] }
 0x5e7   :  { %1925 = vmatpush.msra.mxu2 %v6901_v26  ;;  %1977 = vmatpush.msrb.mxu3 %v4547_v36  ;;  %v4531_v36 = vld [vmem:[%s9243_s3 + $0xd40] sm:$0xff] }
 0x5e8   :  { %2054 = vmatpush.msrb.mxu0 %v6806_v56 }
 0x5e9   :  { %1926 = vmatpush.msra.mxu2 %v6907_v27  ;;  %1978 = vmatpush.msrb.mxu3 %v4543_v23  ;;  %v4550_v23 = vld [vmem:[%s9243_s3 + $0xdd8] sm:$0xff] }
 0x5ea   :  { %2055 = vmatpush.msrb.mxu0 %v6812_v58 }
 0x5eb   :  { %1979 = vmatpush.msrb.mxu3 %v4539_v24 }
 0x5ec   :  { %2056 = vmatpush.msrb.mxu0 %v6819_v1  ;;  %v7042_v48 = vpop.f32.mrf.mxu3 }
 0x5ed   :  { %1980 = vmatpush.msrb.mxu3 %v4535_v32  ;;  %v4525_v32 = vld [vmem:[%s9243_s3 + $0xd10] sm:$0xff] }
 0x5ee   :  { %2057 = vmatpush.msrb.mxu0 %v6825_v3 }
 0x5ef   :  { %1981 = vmatpush.msrb.mxu3 %v4531_v36 }
 0x5f0   :  { %2058 = vmatpush.msrb.mxu0 %v6837_v46 }
 0x5f1   :  { %1982 = vmatpush.msrb.mxu3 %v4527_v38 }
 0x5f2   :  { %2059 = vmatpush.msrb.mxu0 %v6843_v5 }
 0x5f3   :  { %1983 = vmatpush.msrb.mxu3 %v4523_v39 }
 0x5f4   :  { %2060 = vmatpush.msrb.mxu0 %v6852_v7  ;;  %v841_v52 = vpop.f32.mrf.mxu3 }
 0x5f6   :  { %2061 = vmatpush.msrb.mxu0 %v6859_v8 }
 0x5f8   :  { %2062 = vmatpush.msrb.mxu0 %v6865_v9 }
 0x5fa   :  { %2063 = vmatpush.msrb.mxu0 %v6871_v10 }
 0x5fc   :  { %2064 = vmatpush.msrb.mxu0 %v6877_v11  ;;  %v7046_v19 = vpop.f32.mrf.mxu3 }
 0x5fe   :  { %2065 = vmatpush.msrb.mxu0 %v6883_v12 }
 0x600   :  { %2066 = vmatpush.msrb.mxu0 %v6889_v14 }
 0x602   :  { %2067 = vmatpush.msrb.mxu0 %v6895_v15 }
 0x604   :  { %2068 = vmatpush.msrb.mxu0 %v6901_v26  ;;  %v7050_v59 = vpop.f32.mrf.mxu3 }
 0x606   :  { %2069 = vmatpush.msrb.mxu0 %v6907_v27 }
 0x60c   :  { %v1127_v62 = vpop.f32.mrf.mxu3 }
 0x614   :  { %v7054_v16 = vpop.f32.mrf.mxu3 }
 0x61c   :  { %v7058_v18 = vpop.f32.mrf.mxu3 }
 0x624   :  { %v1413_v30 = vpop.f32.mrf.mxu3 }
 0x651   :  { %v1719_v40 = vpop.f32.mrf.mxu0 }
 0x652   :  { %v6992_v41 = vadd.f32 %v1719_v40, %v6798_v51  ;;  %v7018_v51 = vpop.f32.mrf.mxu1  ;;  %v4537_v40 = vld [vmem:[%s9243_s3 + $0xd70] sm:$0xff] }
 0x659   :  { %v1785_v45 = vpop.f32.mrf.mxu0 }
 0x65a   :  { %v1786_v47 = vadd.f32 %v7006_v20, %v1785_v45  ;;  %v7030_v0 = vpop.f32.mrf.mxu1  ;;  %v274_v45 = vadd.f32 %v6125_v13, %v5646_v53  ;;  %v4529_v13 = vld [vmem:[%s9243_s3 + $0xd30] sm:$0xff] }
 0x65c   :  { %v1788_v44 = vmax.f32 %v1786_v47, 0.0  ;;  %v7100_v47 = vpop.f32.mrf.mxu3 }
 0x65e   :  { %4518 = vmatmul.msk.f32.vlgmr.msra.gmra.mxu1 %vm169_vm0, %v1788_v44  ;;  %4519 = vmatmul.msk.f32.vlgmr.msrb.gmra.mxu2 %vm169_vm0, %v1788_v44 }
 0x65f   :  { %4520 = vmatmul.msk.f32.vlgmr.msra.gmra.mxu3 %vm169_vm0, %v1788_v44  ;;  %2016 = vmatpush.msra.mxu1 %v4553_v29 }
 0x660   :  { %2036 = vmatpush.msra.mxu3 %v4554_v42 }
 0x661   :  { %2017 = vmatpush.msra.mxu1 %v4549_v34 }
 0x662   :  { %v698_v4 = vpop.f32.mrf.mxu1  ;;  %2037 = vmatpush.msra.mxu3 %v4550_v23  ;;  %v4581_v23 = vld [vmem:[%s9243_s3 + $0xea8] sm:$0xff] }
 0x663   :  { %2018 = vmatpush.msra.mxu1 %v4545_v37  ;;  %v4538_v37 = vld [vmem:[%s9243_s3 + $0xd78] sm:$0xff] }
 0x664   :  { %v7123_v36 = vpop.f32.mrf.mxu3 }
 0x665   :  { %2019 = vmatpush.msra.mxu1 %v4541_v35  ;;  %v4530_v35 = vld [vmem:[%s9243_s3 + $0xd38] sm:$0xff] }
 0x666   :  { %4521 = vmatmul.msk.f32.vlgmr.msrb.gmra.mxu1 %vm169_vm0, %v1788_v44  ;;  %1927 = vmatmul.f32.vlgmr.msra.gmra.mxu2 %v4522_v54  ;;  %v475_v44 = vadd.f32 %v7001_v31, %v274_v45  ;;  %v4533_v54 = vld [vmem:[%s9243_s3 + $0xd50] sm:$0xff]  ;;  %v4546_v31 = vld [vmem:[%s9243_s3 + $0xdb8] sm:$0xff] }
 0x667   :  { %2020 = vmatpush.msra.mxu1 %v4537_v40  ;;  %2038 = vmatpush.msra.mxu3 %v4546_v31  ;;  %v4526_v40 = vld [vmem:[%s9243_s3 + $0xd18] sm:$0xff]  ;;  %v4580_v31 = vld [vmem:[%s9243_s3 + $0xea0] sm:$0xff] }
 0x668   :  { %v618_v24 = vadd.f32 %v555_v2, %v475_v44  ;;  %v4542_v2 = vld [vmem:[%s9243_s3 + $0xd98] sm:$0xff]  ;;  %v4585_v44 = vld [vmem:[%s9243_s3 + $0xec8] sm:$0xff] }
 0x669   :  { %2021 = vmatpush.msra.mxu1 %v4533_v54  ;;  %2039 = vmatpush.msra.mxu3 %v4542_v2  ;;  %v4576_v2 = vld [vmem:[%s9243_s3 + $0xe80] sm:$0xff] }
 0x66a   :  { %v7040_v28 = vpop.f32.mrf.mxu1  ;;  %v761_v29 = vadd.f32 %v698_v4, %v618_v24  ;;  %v4534_v4 = vld [vmem:[%s9243_s3 + $0xd58] sm:$0xff] }
 0x66b   :  { %2022 = vmatpush.msra.mxu1 %v4529_v13  ;;  %2040 = vmatpush.msra.mxu3 %v4538_v37  ;;  %v4577_v13 = vld [vmem:[%s9243_s3 + $0xe88] sm:$0xff]  ;;  %v4572_v37 = vld [vmem:[%s9243_s3 + $0xe60] sm:$0xff] }
 0x66c   :  { %v904_v34 = vadd.f32 %v841_v52, %v761_v29 }
 0x66d   :  { %2023 = vmatpush.msra.mxu1 %v4525_v32  ;;  %2041 = vmatpush.msra.mxu3 %v4534_v4  ;;  %v4573_v32 = vld [vmem:[%s9243_s3 + $0xe68] sm:$0xff] }
 0x66e   :  { %v4565_v4 = vld [vmem:[%s9243_s3 + $0xe28] sm:$0xff] }
 0x66f   :  { %2042 = vmatpush.msra.mxu3 %v4530_v35 }
 0x671   :  { %2043 = vmatpush.msra.mxu3 %v4526_v40 }
 0x672   :  { %v7044_v49 = vpop.f32.mrf.mxu1 }
 0x67a   :  { %v984_v55 = vpop.f32.mrf.mxu1 }
 0x67b   :  { %v1047_v38 = vadd.f32 %v984_v55, %v904_v34  ;;  %v4589_v55 = vld [vmem:[%s9243_s3 + $0xee8] sm:$0xff] }
 0x67c   :  { %2139 = vmatpush.msrb.mxu2 %v4589_v55  ;;  %v4569_v34 = vld [vmem:[%s9243_s3 + $0xe48] sm:$0xff]  ;;  %v4559_v55 = vld [vmem:[%s9240_s0 + $0x1c] sm:$0x3] }
 0x67d   :  { %v1190_v39 = vadd.f32 %v1127_v62, %v1047_v38  ;;  %v1699_v62 = vpop.f32.mrf.mxu3 }
 0x67e   :  { %2140 = vmatpush.msrb.mxu2 %v4585_v44  ;;  %v4586_v44 = vld [vmem:[%s9243_s3 + $0xed0] sm:$0xff] }
 0x680   :  { %2141 = vmatpush.msrb.mxu2 %v4581_v23  ;;  %v4564_v23 = vld [vmem:[%s9243_s3 + $0xe20] sm:$0xff] }
 0x682   :  { %v7048_v57 = vpop.f32.mrf.mxu1  ;;  %2142 = vmatpush.msrb.mxu2 %v4577_v13  ;;  %v4591_v13 = vld [vmem:[%s9243_s3 + $0xef8] sm:$0xff] }
 0x684   :  { %2143 = vmatpush.msrb.mxu2 %v4573_v32  ;;  %v4566_v32 = vld [vmem:[%s9243_s3 + $0xe30] sm:$0xff] }
 0x686   :  { %2144 = vmatpush.msrb.mxu2 %v4569_v34  ;;  %v4562_v34 = vld [vmem:[%s9243_s3 + $0xe10] sm:$0xff] }
 0x688   :  { %2145 = vmatpush.msrb.mxu2 %v4565_v4  ;;  %v4575_v4 = vld [vmem:[%s9243_s3 + $0xe78] sm:$0xff] }
 0x68a   :  { %v7052_v61 = vpop.f32.mrf.mxu1 }
 0x692   :  { %v1270_v63 = vpop.f32.mrf.mxu1 }
 0x693   :  { %v1333_v42 = vadd.f32 %v1270_v63, %v1190_v39  ;;  %v4588_v63 = vld [vmem:[%s9243_s3 + $0xee0] sm:$0xff]  ;;  %v4561_v39 = vld [vmem:[%s9243_s3 + $0xe08] sm:$0xff] }
 0x694   :  { %2119 = vmatpush.msrb.mxu1 %v4588_v63  ;;  %2146 = vmatpush.msrb.mxu2 %v4561_v39  ;;  %v4578_v63 = vld [vmem:[%s9243_s3 + $0xe90] sm:$0xff]  ;;  %v4567_v39 = vld [vmem:[%s9243_s3 + $0xe38] sm:$0xff] }
 0x695   :  { %v1476_v45 = vadd.f32 %v1413_v30, %v1333_v42  ;;  %v4584_v30 = vld [vmem:[%s9243_s3 + $0xec0] sm:$0xff] }
 0x696   :  { %2120 = vmatpush.msrb.mxu1 %v4584_v30  ;;  %2197 = vmatpush.msra.mxu2 %v6806_v56  ;;  %v4560_v30 = vld [vmem:[%s9243_s3 + $0xe00] sm:$0xff] }
 0x698   :  { %2121 = vmatpush.msrb.mxu1 %v4580_v31  ;;  %2198 = vmatpush.msra.mxu2 %v6812_v58  ;;  %v4587_v31 = vld [vmem:[%s9243_s3 + $0xed8] sm:$0xff] }
 0x69a   :  { %v7056_v17 = vpop.f32.mrf.mxu1  ;;  %2122 = vmatpush.msrb.mxu1 %v4576_v2  ;;  %2199 = vmatpush.msra.mxu2 %v6819_v1  ;;  %v4583_v2 = vld [vmem:[%s9243_s3 + $0xeb8] sm:$0xff] }
 0x69c   :  { %2123 = vmatpush.msrb.mxu1 %v4572_v37  ;;  %2200 = vmatpush.msra.mxu2 %v6825_v3  ;;  %v4579_v37 = vld [vmem:[%s9243_s3 + $0xe98] sm:$0xff] }
 0x69e   :  { %2201 = vmatpush.msra.mxu2 %v6837_v46 }
 0x6a0   :  { %2202 = vmatpush.msra.mxu2 %v6843_v5 }
 0x6a2   :  { %v7060_v22 = vpop.f32.mrf.mxu1  ;;  %2203 = vmatpush.msra.mxu2 %v6852_v7 }
 0x6a4   :  { %2204 = vmatpush.msra.mxu2 %v6859_v8 }
 0x6a6   :  { %2205 = vmatpush.msra.mxu2 %v6865_v9 }
 0x6a8   :  { %2206 = vmatpush.msra.mxu2 %v6871_v10 }
 0x6aa   :  { %v1556_v33 = vpop.f32.mrf.mxu1  ;;  %2207 = vmatpush.msra.mxu2 %v6877_v11 }
 0x6ab   :  { %v1619_v54 = vadd.f32 %v1556_v33, %v1476_v45 }
 0x6ac   :  { %2208 = vmatpush.msra.mxu2 %v6883_v12 }
 0x6ad   :  { %v1762_v24 = vadd.f32 %v1699_v62, %v1619_v54  ;;  %v4568_v62 = vld [vmem:[%s9243_s3 + $0xe40] sm:$0xff]  ;;  %v4582_v54 = vld [vmem:[%s9243_s3 + $0xeb0] sm:$0xff] }
 0x6ae   :  { %2209 = vmatpush.msra.mxu2 %v6889_v14  ;;  %2124 = vmatpush.msrb.mxu1 %v4568_v62  ;;  %v4621_v62 = vld [vmem:[%s9243_s3 + $0xfc0] sm:$0xff] }
 0x6b0   :  { %2210 = vmatpush.msra.mxu2 %v6895_v15  ;;  %2125 = vmatpush.msrb.mxu1 %v4564_v23  ;;  %v4610_v23 = vld [vmem:[%s9243_s3 + $0xf68] sm:$0xff] }
 0x6b2   :  { %v7109_v53 = vpop.f32.mrf.mxu1  ;;  %2211 = vmatpush.msra.mxu2 %v6901_v26  ;;  %2126 = vmatpush.msrb.mxu1 %v4560_v30 }
 0x6b4   :  { %2212 = vmatpush.msra.mxu2 %v6907_v27 }
 0x6ba   :  { %v7134_v52 = vpop.f32.mrf.mxu1 }
 0x6db   :  { %v1842_v33 = vpop.f32.mrf.mxu1 }
 0x6dc   :  { %v7160_v29 = vadd.f32 %v1842_v33, %v1762_v24  ;;  %v4574_v24 = vld [vmem:[%s9243_s3 + $0xe70] sm:$0xff] }
 0x6dd   :  { %v4570_v33 = vld [vmem:[%s9243_s3 + $0xe50] sm:$0xff] }
 0x6e1   :  { %v1862_v38 = vpop.f32.mrf.mxu2 }
 0x6e2   :  { %v7178_v35 = vadd.f32 %v1862_v38, %v6992_v41  ;;  %v4590_v41 = vld [vmem:[%s9243_s3 + $0xef0] sm:$0xff]  ;;  %v4571_v38 = vld [vmem:[%s9243_s3 + $0xe58] sm:$0xff] }
 0x6e9   :  { %v1928_v40 = vpop.f32.mrf.mxu2 }
 0x6ea   :  { %v1929_v42 = vadd.f32 %v7006_v20, %v1928_v40  ;;  %v4563_v40 = vld [vmem:[%s9243_s3 + $0xe18] sm:$0xff] }
 0x6ec   :  { %v1931_v45 = vmax.f32 %v1929_v42, 0.0  ;;  %v4626_v42 = vld [vmem:[%s9243_s3 + $0xfe8] sm:$0xff] }
 0x6ee   :  { %4555 = vmatmul.msk.f32.vlgmr.msrb.gmra.mxu3 %vm169_vm0, %v1931_v45  ;;  %4556 = vmatmul.msk.f32.vlgmr.msra.gmra.mxu0 %vm169_vm0, %v1931_v45 }
 0x6ef   :  { %4557 = vmatmul.msk.f32.vlgmr.msra.gmra.mxu1 %vm169_vm0, %v1931_v45  ;;  %2159 = vmatpush.msrb.mxu3 %v4590_v41  ;;  %v7270_v41 = vpop.f32.mrf.mxu3 }
 0x6f0   :  { %2179 = vmatpush.msra.mxu1 %v4591_v13  ;;  %2282 = vmatpush.msra.mxu0 %v4626_v42  ;;  %v4623_v42 = vld [vmem:[%s9243_s3 + $0xfd0] sm:$0xff] }
 0x6f1   :  { %2160 = vmatpush.msrb.mxu3 %v4586_v44  ;;  %v4625_v44 = vld [vmem:[%s9243_s3 + $0xfe0] sm:$0xff] }
 0x6f2   :  { %2180 = vmatpush.msra.mxu1 %v4587_v31  ;;  %v4598_v31 = vld [vmem:[%s9243_s3 + $0xf08] sm:$0xff] }
 0x6f3   :  { %2161 = vmatpush.msrb.mxu3 %v4582_v54  ;;  %v4614_v54 = vld [vmem:[%s9243_s3 + $0xf88] sm:$0xff] }
 0x6f4   :  { %2181 = vmatpush.msra.mxu1 %v4583_v2 }
 0x6f5   :  { %2162 = vmatpush.msrb.mxu3 %v4578_v63  ;;  %v4606_v63 = vld [vmem:[%s9243_s3 + $0xf48] sm:$0xff] }
 0x6f6   :  { %4558 = vmatmul.msk.f32.vlgmr.msra.gmra.mxu3 %vm169_vm0, %v1931_v45  ;;  %2070 = vmatmul.f32.vlgmr.msrb.gmra.mxu0 %v4559_v55  ;;  %v4622_v45 = vld [vmem:[%s9243_s3 + $0xfc8] sm:$0xff] }
 0x6f7   :  { %2163 = vmatpush.msrb.mxu3 %v4574_v24  ;;  %2182 = vmatpush.msra.mxu1 %v4579_v37  ;;  %v4618_v55 = vld [vmem:[%s9243_s3 + $0xfa8] sm:$0xff]  ;;  %v7290_v30 = vpop.f32.mrf.mxu3 }
 0x6f8   :  { %2283 = vmatpush.msra.mxu0 %v4622_v45  ;;  %v4602_v24 = vld [vmem:[%s9243_s3 + $0xf28] sm:$0xff]  ;;  %v4605_v45 = vld [vmem:[%s9243_s3 + $0xf40] sm:$0xff] }
 0x6f9   :  { %2164 = vmatpush.msrb.mxu3 %v4570_v33  ;;  %2183 = vmatpush.msra.mxu1 %v4575_v4  ;;  %v4617_v4 = vld [vmem:[%s9243_s3 + $0xfa0] sm:$0xff] }
 0x6fa   :  { %2284 = vmatpush.msra.mxu0 %v4618_v55  ;;  %v4619_v55 = vld [vmem:[%s9243_s3 + $0xfb0] sm:$0xff] }
 0x6fb   :  { %2165 = vmatpush.msrb.mxu3 %v4566_v32  ;;  %2184 = vmatpush.msra.mxu1 %v4571_v38  ;;  %v4613_v38 = vld [vmem:[%s9243_s3 + $0xf80] sm:$0xff] }
 0x6fc   :  { %2285 = vmatpush.msra.mxu0 %v4614_v54  ;;  %v4597_v54 = vld [vmem:[%s9243_s3 + $0xf00] sm:$0xff] }
 0x6fd   :  { %2166 = vmatpush.msrb.mxu3 %v4562_v34  ;;  %2185 = vmatpush.msra.mxu1 %v4567_v39  ;;  %v4627_v39 = vld [vmem:[%s9243_s3 + $0xff0] sm:$0xff] }
 0x6fe   :  { %2286 = vmatpush.msra.mxu0 %v4610_v23  ;;  %v4611_v23 = vld [vmem:[%s9243_s3 + $0xf70] sm:$0xff] }
 0x6ff   :  { %2186 = vmatpush.msra.mxu1 %v4563_v40  ;;  %2262 = vmatpush.msra.mxu3 %v4625_v44  ;;  %v4609_v40 = vld [vmem:[%s9243_s3 + $0xf60] sm:$0xff] }
 0x700   :  { %2287 = vmatpush.msra.mxu0 %v4606_v63  ;;  %v4601_v44 = vld [vmem:[%s9243_s3 + $0xf20] sm:$0xff]  ;;  %v4628_v63 = vld [vmem:[%s9243_s3 + $0xff8] sm:$0xff] }
 0x701   :  { %2263 = vmatpush.msra.mxu3 %v4621_v62  ;;  %v4615_v62 = vld [vmem:[%s9243_s3 + $0xf90] sm:$0xff] }
 0x702   :  { %2288 = vmatpush.msra.mxu0 %v4602_v24  ;;  %v4607_v24 = vld [vmem:[%s9243_s3 + $0xf50] sm:$0xff] }
 0x703   :  { %2264 = vmatpush.msra.mxu3 %v4617_v4  ;;  %v4608_v4 = vld [vmem:[%s9243_s3 + $0xf58] sm:$0xff] }
 0x704   :  { %2289 = vmatpush.msra.mxu0 %v4598_v31  ;;  %v7370_v31 = vpop.f32.mrf.mxu1 }
 0x705   :  { %2265 = vmatpush.msra.mxu3 %v4613_v38  ;;  %v4604_v38 = vld [vmem:[%s9243_s3 + $0xf38] sm:$0xff] }
 0x706   :  { %2340 = vmatpush.msrb.mxu0 %v6806_v56 }
 0x707   :  { %2266 = vmatpush.msra.mxu3 %v4609_v40  ;;  %v4600_v40 = vld [vmem:[%s9243_s3 + $0xf18] sm:$0xff] }
 0x708   :  { %2341 = vmatpush.msrb.mxu0 %v6812_v58 }
 0x709   :  { %2267 = vmatpush.msra.mxu3 %v4605_v45  ;;  %v4659_v45 = vld [vmem:[%s9243_s3 + $0x10c8] sm:$0xff] }
 0x70a   :  { %2342 = vmatpush.msrb.mxu0 %v6819_v1 }
 0x70b   :  { %2268 = vmatpush.msra.mxu3 %v4601_v44  ;;  %v4662_v44 = vld [vmem:[%s9243_s3 + $0x10e0] sm:$0xff] }
 0x70c   :  { %2343 = vmatpush.msrb.mxu0 %v6825_v3 }
 0x70d   :  { %2269 = vmatpush.msra.mxu3 %v4597_v54  ;;  %v4651_v54 = vld [vmem:[%s9243_s3 + $0x1088] sm:$0xff] }
 0x70e   :  { %2344 = vmatpush.msrb.mxu0 %v6837_v46 }
 0x710   :  { %2345 = vmatpush.msrb.mxu0 %v6843_v5 }
 0x712   :  { %2346 = vmatpush.msrb.mxu0 %v6852_v7 }
 0x714   :  { %2347 = vmatpush.msrb.mxu0 %v6859_v8 }
 0x716   :  { %2348 = vmatpush.msrb.mxu0 %v6865_v9 }
 0x718   :  { %2349 = vmatpush.msrb.mxu0 %v6871_v10 }
 0x71a   :  { %2350 = vmatpush.msrb.mxu0 %v6877_v11 }
 0x71c   :  { %2351 = vmatpush.msrb.mxu0 %v6883_v12 }
 0x71e   :  { %2352 = vmatpush.msrb.mxu0 %v6889_v14 }
 0x720   :  { %2353 = vmatpush.msrb.mxu0 %v6895_v15 }
 0x722   :  { %2354 = vmatpush.msrb.mxu0 %v6901_v26 }
 0x724   :  { %2355 = vmatpush.msrb.mxu0 %v6907_v27 }
 0x76b   :  { %v2005_v13 = vpop.f32.mrf.mxu0 }
 0x76c   :  { %v7296_v33 = vadd.f32 %v2005_v13, %v7178_v35  ;;  %v4624_v13 = vld [vmem:[%s9243_s3 + $0xfd8] sm:$0xff] }
 0x771   :  { %v1985_v32 = vpop.f32.mrf.mxu3 }
 0x772   :  { %v7303_v2 = vadd.f32 %v1985_v32, %v7160_v29  ;;  %v4596_v29 = vld [vmem:[%s9240_s0 + $0x1e] sm:$0x3]  ;;  %v4603_v32 = vld [vmem:[%s9243_s3 + $0xf30] sm:$0xff] }
 0x773   :  { %v2071_v34 = vpop.f32.mrf.mxu0 }
 0x774   :  { %v2072_v37 = vadd.f32 %v7006_v20, %v2071_v34  ;;  %v4620_v34 = vld [vmem:[%s9243_s3 + $0xfb8] sm:$0xff] }
 0x776   :  { %v2074_v35 = vmax.f32 %v2072_v37, 0.0  ;;  %v4599_v37 = vld [vmem:[%s9243_s3 + $0xf10] sm:$0xff] }
 0x778   :  { %4592 = vmatmul.msk.f32.vlgmr.msrb.gmra.mxu1 %vm169_vm0, %v2074_v35  ;;  %4593 = vmatmul.msk.f32.vlgmr.msrb.gmra.mxu2 %vm169_vm0, %v2074_v35 }
 0x779   :  { %4594 = vmatmul.msk.f32.vlgmr.msrb.gmra.mxu3 %vm169_vm0, %v2074_v35  ;;  %2302 = vmatpush.msrb.mxu1 %v4627_v39  ;;  %v7393_v39 = vpop.f32.mrf.mxu1 }
 0x77a   :  { %2322 = vmatpush.msrb.mxu3 %v4628_v63  ;;  %v4654_v63 = vld [vmem:[%s9243_s3 + $0x10a0] sm:$0xff] }
 0x77b   :  { %2303 = vmatpush.msrb.mxu1 %v4623_v42  ;;  %v4663_v42 = vld [vmem:[%s9243_s3 + $0x10e8] sm:$0xff] }
 0x77c   :  { %2323 = vmatpush.msrb.mxu3 %v4624_v13  ;;  %2425 = vmatpush.msrb.mxu2 %v4663_v42  ;;  %v4647_v13 = vld [vmem:[%s9243_s3 + $0x1068] sm:$0xff] }
 0x77d   :  { %2304 = vmatpush.msrb.mxu1 %v4619_v55  ;;  %v4655_v55 = vld [vmem:[%s9243_s3 + $0x10a8] sm:$0xff] }
 0x77e   :  { %2324 = vmatpush.msrb.mxu3 %v4620_v34  ;;  %2426 = vmatpush.msrb.mxu2 %v4659_v45  ;;  %v4643_v34 = vld [vmem:[%s9243_s3 + $0x1048] sm:$0xff]  ;;  %v4633_v45 = vld [vmem:[%s9240_s0 + $0x20] sm:$0x3] }
 0x77f   :  { %2305 = vmatpush.msrb.mxu1 %v4615_v62  ;;  %v4658_v62 = vld [vmem:[%s9243_s3 + $0x10c0] sm:$0xff] }
 0x780   :  { %4595 = vmatmul.msk.f32.vlgmr.msra.gmra.mxu1 %vm169_vm0, %v2074_v35  ;;  %2213 = vmatmul.f32.vlgmr.msra.gmra.mxu2 %v4596_v29  ;;  %v4616_v35 = vld [vmem:[%s9243_s3 + $0xf98] sm:$0xff] }
 0x781   :  { %2306 = vmatpush.msrb.mxu1 %v4611_v23  ;;  %2325 = vmatpush.msrb.mxu3 %v4616_v35  ;;  %v4612_v29 = vld [vmem:[%s9243_s3 + $0xf78] sm:$0xff] }
 0x782   :  { %2427 = vmatpush.msrb.mxu2 %v4655_v55  ;;  %v4660_v55 = vld [vmem:[%s9243_s3 + $0x10d0] sm:$0xff] }
 0x783   :  { %2307 = vmatpush.msrb.mxu1 %v4607_v24  ;;  %2326 = vmatpush.msrb.mxu3 %v4612_v29 }
 0x784   :  { %2428 = vmatpush.msrb.mxu2 %v4651_v54  ;;  %v4638_v54 = vld [vmem:[%s9243_s3 + $0x1020] sm:$0xff] }
 0x785   :  { %2308 = vmatpush.msrb.mxu1 %v4603_v32  ;;  %2327 = vmatpush.msrb.mxu3 %v4608_v4  ;;  %v4650_v32 = vld [vmem:[%s9243_s3 + $0x1080] sm:$0xff]  ;;  %v4635_v4 = vld [vmem:[%s9243_s3 + $0x1008] sm:$0xff] }
 0x786   :  { %2429 = vmatpush.msrb.mxu2 %v4647_v13  ;;  %v4648_v13 = vld [vmem:[%s9243_s3 + $0x1070] sm:$0xff] }
 0x787   :  { %2309 = vmatpush.msrb.mxu1 %v4599_v37  ;;  %2328 = vmatpush.msrb.mxu3 %v4604_v38  ;;  %v4639_v37 = vld [vmem:[%s9243_s3 + $0x1028] sm:$0xff] }
 0x788   :  { %2430 = vmatpush.msrb.mxu2 %v4643_v34  ;;  %v4644_v34 = vld [vmem:[%s9243_s3 + $0x1050] sm:$0xff] }
 0x789   :  { %2329 = vmatpush.msrb.mxu3 %v4600_v40  ;;  %2405 = vmatpush.msra.mxu1 %v4662_v44  ;;  %v4642_v44 = vld [vmem:[%s9243_s3 + $0x1040] sm:$0xff] }
 0x78a   :  { %2431 = vmatpush.msrb.mxu2 %v4639_v37  ;;  %v4640_v37 = vld [vmem:[%s9243_s3 + $0x1030] sm:$0xff] }
 0x78b   :  { %2406 = vmatpush.msra.mxu1 %v4658_v62  ;;  %v4656_v62 = vld [vmem:[%s9243_s3 + $0x10b0] sm:$0xff] }
 0x78c   :  { %2432 = vmatpush.msrb.mxu2 %v4635_v4  ;;  %v4636_v4 = vld [vmem:[%s9243_s3 + $0x1010] sm:$0xff] }
 0x78d   :  { %2407 = vmatpush.msra.mxu1 %v4654_v63  ;;  %v4634_v63 = vld [vmem:[%s9243_s3 + $0x1000] sm:$0xff] }
 0x78e   :  { %2483 = vmatpush.msra.mxu2 %v6806_v56 }
 0x78f   :  { %2408 = vmatpush.msra.mxu1 %v4650_v32  ;;  %v4665_v32 = vld [vmem:[%s9243_s3 + $0x10f8] sm:$0xff] }
 0x790   :  { %2484 = vmatpush.msra.mxu2 %v6812_v58 }
 0x792   :  { %2485 = vmatpush.msra.mxu2 %v6819_v1 }
 0x794   :  { %2486 = vmatpush.msra.mxu2 %v6825_v3 }
 0x796   :  { %2487 = vmatpush.msra.mxu2 %v6837_v46 }
 0x798   :  { %2488 = vmatpush.msra.mxu2 %v6843_v5 }
 0x79a   :  { %2489 = vmatpush.msra.mxu2 %v6852_v7 }
 0x79c   :  { %2490 = vmatpush.msra.mxu2 %v6859_v8 }
 0x79e   :  { %2491 = vmatpush.msra.mxu2 %v6865_v9 }
 0x7a0   :  { %2492 = vmatpush.msra.mxu2 %v6871_v10 }
 0x7a2   :  { %2493 = vmatpush.msra.mxu2 %v6877_v11 }
 0x7a4   :  { %2494 = vmatpush.msra.mxu2 %v6883_v12 }
 0x7a6   :  { %2495 = vmatpush.msra.mxu2 %v6889_v14 }
 0x7a8   :  { %2496 = vmatpush.msra.mxu2 %v6895_v15 }
 0x7aa   :  { %2497 = vmatpush.msra.mxu2 %v6901_v26 }
 0x7ac   :  { %2498 = vmatpush.msra.mxu2 %v6907_v27 }
 0x7f5   :  { %v2128_v23 = vpop.f32.mrf.mxu1 }
 0x7f6   :  { %v7420_v24 = vadd.f32 %v2128_v23, %v7303_v2  ;;  %v4646_v2 = vld [vmem:[%s9243_s3 + $0x1060] sm:$0xff]  ;;  %v4652_v23 = vld [vmem:[%s9243_s3 + $0x1090] sm:$0xff] }
 0x7f7   :  { %2409 = vmatpush.msra.mxu1 %v4646_v2  ;;  %v4661_v2 = vld [vmem:[%s9243_s3 + $0x10d8] sm:$0xff] }
 0x7f9   :  { %2410 = vmatpush.msra.mxu1 %v4642_v44  ;;  %v4696_v44 = vld [vmem:[%s9243_s3 + $0x11c8] sm:$0xff] }
 0x7fb   :  { %v2148_v35 = vpop.f32.mrf.mxu2  ;;  %2411 = vmatpush.msra.mxu1 %v4638_v54  ;;  %v4692_v54 = vld [vmem:[%s9243_s3 + $0x11a8] sm:$0xff] }
 0x7fc   :  { %v7438_v29 = vadd.f32 %v2148_v35, %v7296_v33  ;;  %v4664_v33 = vld [vmem:[%s9243_s3 + $0x10f0] sm:$0xff]  ;;  %v4657_v35 = vld [vmem:[%s9243_s3 + $0x10b8] sm:$0xff] }
 0x7fd   :  { %2412 = vmatpush.msra.mxu1 %v4634_v63  ;;  %v4695_v63 = vld [vmem:[%s9243_s3 + $0x11c0] sm:$0xff] }
 0x803   :  { %v2214_v38 = vpop.f32.mrf.mxu2 }
 0x804   :  { %v2215_v40 = vadd.f32 %v7006_v20, %v2214_v38  ;;  %v4653_v38 = vld [vmem:[%s9243_s3 + $0x1098] sm:$0xff] }
 0x806   :  { %v2217_v42 = vmax.f32 %v2215_v40, 0.0  ;;  %v4649_v40 = vld [vmem:[%s9243_s3 + $0x1078] sm:$0xff] }
 0x808   :  { %4629 = vmatmul.msk.f32.vlgmr.msra.gmra.mxu3 %vm169_vm0, %v2217_v42  ;;  %4630 = vmatmul.msk.f32.vlgmr.msra.gmra.mxu0 %vm169_vm0, %v2217_v42 }
 0x809   :  { %4631 = vmatmul.msk.f32.vlgmr.msrb.gmra.mxu1 %vm169_vm0, %v2217_v42  ;;  %2445 = vmatpush.msra.mxu3 %v4664_v33  ;;  %v4641_v33 = vld [vmem:[%s9243_s3 + $0x1038] sm:$0xff] }
 0x80a   :  { %2465 = vmatpush.msrb.mxu1 %v4665_v32  ;;  %v4684_v32 = vld [vmem:[%s9243_s3 + $0x1168] sm:$0xff] }
 0x80b   :  { %2446 = vmatpush.msra.mxu3 %v4660_v55  ;;  %v4700_v55 = vld [vmem:[%s9243_s3 + $0x11e8] sm:$0xff] }
 0x80c   :  { %2466 = vmatpush.msrb.mxu1 %v4661_v2  ;;  %2568 = vmatpush.msra.mxu0 %v4700_v55  ;;  %v4673_v55 = vld [vmem:[%s9243_s3 + $0x1110] sm:$0xff] }
 0x80d   :  { %2447 = vmatpush.msra.mxu3 %v4656_v62  ;;  %v7530_v62 = vpop.f32.mrf.mxu3 }
 0x80e   :  { %2467 = vmatpush.msrb.mxu1 %v4657_v35  ;;  %2569 = vmatpush.msra.mxu0 %v4696_v44  ;;  %v4690_v44 = vld [vmem:[%s9243_s3 + $0x1198] sm:$0xff] }
 0x80f   :  { %2448 = vmatpush.msra.mxu3 %v4652_v23  ;;  %v4699_v23 = vld [vmem:[%s9243_s3 + $0x11e0] sm:$0xff] }
 0x810   :  { %4632 = vmatmul.msk.f32.vlgmr.msrb.gmra.mxu3 %vm169_vm0, %v2217_v42  ;;  %2356 = vmatmul.f32.vlgmr.msrb.gmra.mxu0 %v4633_v45  ;;  %v4645_v42 = vld [vmem:[%s9243_s3 + $0x1058] sm:$0xff] }
 0x811   :  { %2449 = vmatpush.msra.mxu3 %v4648_v13  ;;  %2468 = vmatpush.msrb.mxu1 %v4653_v38  ;;  %v4637_v45 = vld [vmem:[%s9243_s3 + $0x1018] sm:$0xff]  ;;  %v4688_v13 = vld [vmem:[%s9243_s3 + $0x1188] sm:$0xff] }
 0x812   :  { %2570 = vmatpush.msra.mxu0 %v4692_v54  ;;  %v4672_v38 = vld [vmem:[%s9243_s3 + $0x1108] sm:$0xff]  ;;  %v4686_v54 = vld [vmem:[%s9243_s3 + $0x1178] sm:$0xff] }
 0x813   :  { %2450 = vmatpush.msra.mxu3 %v4644_v34  ;;  %2469 = vmatpush.msrb.mxu1 %v4649_v40  ;;  %v4680_v34 = vld [vmem:[%s9243_s3 + $0x1148] sm:$0xff] }
 0x814   :  { %2571 = vmatpush.msra.mxu0 %v4688_v13 }
 0x815   :  { %2451 = vmatpush.msra.mxu3 %v4640_v37  ;;  %2470 = vmatpush.msrb.mxu1 %v4645_v42  ;;  %v7550_v2 = vpop.f32.mrf.mxu3  ;;  %v4676_v37 = vld [vmem:[%s9243_s3 + $0x1128] sm:$0xff] }
 0x816   :  { %2572 = vmatpush.msra.mxu0 %v4684_v32  ;;  %v4674_v32 = vld [vmem:[%s9243_s3 + $0x1118] sm:$0xff] }
 0x817   :  { %2452 = vmatpush.msra.mxu3 %v4636_v4  ;;  %2471 = vmatpush.msrb.mxu1 %v4641_v33 }
 0x818   :  { %2573 = vmatpush.msra.mxu0 %v4680_v34  ;;  %v4737_v34 = vld [vmem:[%s9243_s3 + $0x12e8] sm:$0xff] }
 0x819   :  { %2472 = vmatpush.msrb.mxu1 %v4637_v45  ;;  %2548 = vmatpush.msrb.mxu3 %v4699_v23  ;;  %v4682_v23 = vld [vmem:[%s9243_s3 + $0x1158] sm:$0xff] }
 0x81a   :  { %2574 = vmatpush.msra.mxu0 %v4676_v37  ;;  %v4733_v37 = vld [vmem:[%s9243_s3 + $0x12c8] sm:$0xff] }
 0x81b   :  { %2549 = vmatpush.msrb.mxu3 %v4695_v63  ;;  %v4678_v63 = vld [vmem:[%s9243_s3 + $0x1138] sm:$0xff] }
 0x81c   :  { %2575 = vmatpush.msra.mxu0 %v4672_v38  ;;  %v4736_v38 = vld [vmem:[%s9243_s3 + $0x12e0] sm:$0xff] }
 0x81e   :  { %2626 = vmatpush.msrb.mxu0 %v6806_v56  ;;  %v4670_v56 = vld [vmem:[%s9240_s0 + $0x22] sm:$0x3] }
 0x820   :  { %2627 = vmatpush.msrb.mxu0 %v6812_v58  ;;  %v4691_v58 = vld [vmem:[%s9243_s3 + $0x11a0] sm:$0xff] }
 0x821   :  { %2550 = vmatpush.msrb.mxu3 %v4691_v58  ;;  %v4721_v58 = vld [vmem:[%s9243_s3 + $0x1268] sm:$0xff] }
 0x822   :  { %2628 = vmatpush.msrb.mxu0 %v6819_v1  ;;  %v4687_v1 = vld [vmem:[%s9243_s3 + $0x1180] sm:$0xff] }
 0x823   :  { %2551 = vmatpush.msrb.mxu3 %v4687_v1  ;;  %v4724_v1 = vld [vmem:[%s9243_s3 + $0x1280] sm:$0xff] }
 0x824   :  { %2629 = vmatpush.msrb.mxu0 %v6825_v3  ;;  %v4701_v3 = vld [vmem:[%s9243_s3 + $0x11f0] sm:$0xff] }
 0x826   :  { %2630 = vmatpush.msrb.mxu0 %v6837_v46  ;;  %v4683_v46 = vld [vmem:[%s9243_s3 + $0x1160] sm:$0xff] }
 0x827   :  { %2552 = vmatpush.msrb.mxu3 %v4683_v46  ;;  %v4713_v46 = vld [vmem:[%s9243_s3 + $0x1228] sm:$0xff] }
 0x828   :  { %2631 = vmatpush.msrb.mxu0 %v6843_v5  ;;  %v4697_v5 = vld [vmem:[%s9243_s3 + $0x11d0] sm:$0xff] }
 0x82a   :  { %2632 = vmatpush.msrb.mxu0 %v6852_v7  ;;  %v4679_v7 = vld [vmem:[%s9243_s3 + $0x1140] sm:$0xff] }
 0x82b   :  { %2553 = vmatpush.msrb.mxu3 %v4679_v7 }
 0x82c   :  { %2633 = vmatpush.msrb.mxu0 %v6859_v8  ;;  %v4693_v8 = vld [vmem:[%s9243_s3 + $0x11b0] sm:$0xff] }
 0x82e   :  { %2634 = vmatpush.msrb.mxu0 %v6865_v9  ;;  %v4675_v9 = vld [vmem:[%s9243_s3 + $0x1120] sm:$0xff] }
 0x82f   :  { %2554 = vmatpush.msrb.mxu3 %v4675_v9  ;;  %v7706_v9 = vld [vmem:[%s9241_s1 + $0x78] sm:$0xff] }
 0x830   :  { %2635 = vmatpush.msrb.mxu0 %v6871_v10  ;;  %v4689_v10 = vld [vmem:[%s9243_s3 + $0x1190] sm:$0xff] }
 0x832   :  { %2636 = vmatpush.msrb.mxu0 %v6877_v11  ;;  %v4671_v11 = vld [vmem:[%s9243_s3 + $0x1100] sm:$0xff] }
 0x833   :  { %2555 = vmatpush.msrb.mxu3 %v4671_v11  ;;  %v7718_v11 = vld [vmem:[%s9242_s2] ss:$0 sm:$0xff] }
 0x834   :  { %2637 = vmatpush.msrb.mxu0 %v6883_v12  ;;  %v4685_v12 = vld [vmem:[%s9243_s3 + $0x1170] sm:$0xff] }
 0x836   :  { %2638 = vmatpush.msrb.mxu0 %v6889_v14  ;;  %v4702_v14 = vld [vmem:[%s9243_s3 + $0x11f8] sm:$0xff] }
 0x838   :  { %2639 = vmatpush.msrb.mxu0 %v6895_v15  ;;  %v4681_v15 = vld [vmem:[%s9243_s3 + $0x1150] sm:$0xff] }
 0x83a   :  { %2640 = vmatpush.msrb.mxu0 %v6901_v26  ;;  %v4698_v26 = vld [vmem:[%s9243_s3 + $0x11d8] sm:$0xff] }
 0x83c   :  { %2641 = vmatpush.msrb.mxu0 %v6907_v27  ;;  %v7630_v27 = vpop.f32.mrf.mxu1 }
 0x885   :  { %v2291_v35 = vpop.f32.mrf.mxu0 }
 0x886   :  { %v7556_v4 = vadd.f32 %v2291_v35, %v7438_v29  ;;  %v7653_v13 = vpop.f32.mrf.mxu1  ;;  %v4729_v35 = vld [vmem:[%s9243_s3 + $0x12a8] sm:$0xff] }
 0x88b   :  { %v2271_v40 = vpop.f32.mrf.mxu3 }
 0x88c   :  { %v7563_v42 = vadd.f32 %v2271_v40, %v7420_v24  ;;  %v4694_v24 = vld [vmem:[%s9243_s3 + $0x11b8] sm:$0xff]  ;;  %v4732_v40 = vld [vmem:[%s9243_s3 + $0x12c0] sm:$0xff] }
 0x88d   :  { %v2357_v33 = vpop.f32.mrf.mxu0 }
 0x88e   :  { %v2358_v45 = vadd.f32 %v7006_v20, %v2357_v33  ;;  %v4677_v20 = vld [vmem:[%s9243_s3 + $0x1130] sm:$0xff]  ;;  %v4725_v33 = vld [vmem:[%s9243_s3 + $0x1288] sm:$0xff] }
 0x890   :  { %v2360_v29 = vmax.f32 %v2358_v45, 0.0 }
 0x892   :  { %4666 = vmatmul.msk.f32.vlgmr.msra.gmra.mxu1 %vm169_vm0, %v2360_v29  ;;  %4667 = vmatmul.msk.f32.vlgmr.msrb.gmra.mxu2 %vm169_vm0, %v2360_v29 }
 0x893   :  { %4668 = vmatmul.msk.f32.vlgmr.msra.gmra.mxu3 %vm169_vm0, %v2360_v29  ;;  %2588 = vmatpush.msra.mxu1 %v4701_v3  ;;  %v4717_v3 = vld [vmem:[%s9243_s3 + $0x1248] sm:$0xff] }
 0x894   :  { %2608 = vmatpush.msra.mxu3 %v4702_v14  ;;  %2711 = vmatpush.msrb.mxu2 %v4737_v34  ;;  %v7724_v14 = vld [vmem:[%s9241_s1 + $0x68] sm:$0xff] }
 0x895   :  { %2589 = vmatpush.msra.mxu1 %v4697_v5  ;;  %v7782_v34 = vld [vmem:[%s9241_s1 + $0x28] sm:$0xff] }
 0x896   :  { %2609 = vmatpush.msra.mxu3 %v4698_v26  ;;  %2712 = vmatpush.msrb.mxu2 %v4733_v37  ;;  %v7730_v26 = vld [vmem:[%s9241_s1 + $0x60] sm:$0xff] }
 0x897   :  { %2590 = vmatpush.msra.mxu1 %v4693_v8  ;;  %v4709_v8 = vld [vmem:[%s9243_s3 + $0x1208] sm:$0xff]  ;;  %v7788_v37 = vld [vmem:[%s9241_s1 + $0x20] sm:$0xff] }
 0x898   :  { %2610 = vmatpush.msra.mxu3 %v4694_v24  ;;  %2713 = vmatpush.msrb.mxu2 %v4729_v35  ;;  %v7742_v24 = vld [vmem:[%s9241_s1 + $0x58] sm:$0xff] }
 0x899   :  { %2591 = vmatpush.msra.mxu1 %v4689_v10  ;;  %v7712_v10 = vld [vmem:[%s9241_s1 + $0x70] sm:$0xff]  ;;  %v7794_v35 = vld [vmem:[%s9241_s1 + $0x18] sm:$0xff] }
 0x89a   :  { %4669 = vmatmul.msk.f32.vlgmr.msrb.gmra.mxu1 %vm169_vm0, %v2360_v29  ;;  %2499 = vmatmul.f32.vlgmr.msra.gmra.mxu2 %v4670_v56  ;;  %v4728_v29 = vld [vmem:[%s9243_s3 + $0x12a0] sm:$0xff] }
 0x89b   :  { %2592 = vmatpush.msra.mxu1 %v4685_v12  ;;  %2611 = vmatpush.msra.mxu3 %v4690_v44  ;;  %v4707_v44 = vld [vmem:[%s9240_s0 + $0x24] sm:$0x3] }
 0x89c   :  { %2714 = vmatpush.msrb.mxu2 %v4725_v33  ;;  %v7812_v33 = vld [vmem:[%s9241_s1] sm:$0xff] }
 0x89d   :  { %2593 = vmatpush.msra.mxu1 %v4681_v15  ;;  %2612 = vmatpush.msra.mxu3 %v4686_v54  ;;  %v7757_v54 = vld [vmem:[%s9241_s1 + $0x48] sm:$0xff] }
 0x89e   :  { %2715 = vmatpush.msrb.mxu2 %v4721_v58  ;;  %v4730_v58 = vld [vmem:[%s9243_s3 + $0x12b0] sm:$0xff] }
 0x89f   :  { %2594 = vmatpush.msra.mxu1 %v4677_v20  ;;  %2613 = vmatpush.msra.mxu3 %v4682_v23  ;;  %v4738_v20 = vld [vmem:[%s9243_s3 + $0x12f0] sm:$0xff]  ;;  %v7764_v23 = vld [vmem:[%s9241_s1 + $0x40] sm:$0xff] }
 0x8a0   :  { %2716 = vmatpush.msrb.mxu2 %v4717_v3  ;;  %v4726_v3 = vld [vmem:[%s9243_s3 + $0x1290] sm:$0xff] }
 0x8a1   :  { %2595 = vmatpush.msra.mxu1 %v4673_v55  ;;  %2614 = vmatpush.msra.mxu3 %v4678_v63  ;;  %v7748_v55 = vld [vmem:[%s9241_s1 + $0x50] sm:$0xff]  ;;  %v7770_v63 = vld [vmem:[%s9241_s1 + $0x38] sm:$0xff] }
 0x8a2   :  { %2717 = vmatpush.msrb.mxu2 %v4713_v46  ;;  %v4722_v46 = vld [vmem:[%s9243_s3 + $0x1270] sm:$0xff] }
 0x8a3   :  { %2615 = vmatpush.msra.mxu3 %v4674_v32  ;;  %2691 = vmatpush.msrb.mxu1 %v4736_v38  ;;  %v7776_v32 = vld [vmem:[%s9241_s1 + $0x30] sm:$0xff] }
 0x8a4   :  { %2718 = vmatpush.msrb.mxu2 %v4709_v8  ;;  %v7800_v38 = vld [vmem:[%s9241_s1 + $0x10] sm:$0xff] }
 0x8a5   :  { %2692 = vmatpush.msrb.mxu1 %v4732_v40  ;;  %v7806_v40 = vld [vmem:[%s9241_s1 + $0x8] sm:$0xff]  ;;  %v4718_v8 = vld [vmem:[%s9243_s3 + $0x1250] sm:$0xff] }
 0x8a6   :  { %2769 = vmatpush.msra.mxu2 %v7706_v9 }
 0x8a7   :  { %2693 = vmatpush.msrb.mxu1 %v4728_v29  ;;  %v4716_v29 = vld [vmem:[%s9243_s3 + $0x1240] sm:$0xff] }
 0x8a8   :  { %2770 = vmatpush.msra.mxu2 %v7712_v10 }
 0x8a9   :  { %2694 = vmatpush.msrb.mxu1 %v4724_v1  ;;  %v4712_v1 = vld [vmem:[%s9243_s3 + $0x1220] sm:$0xff] }
 0x8aa   :  { %2771 = vmatpush.msra.mxu2 %v7724_v14 }
 0x8ac   :  { %2772 = vmatpush.msra.mxu2 %v7730_v26 }
 0x8ae   :  { %2773 = vmatpush.msra.mxu2 %v7742_v24 }
 0x8b0   :  { %2774 = vmatpush.msra.mxu2 %v7748_v55 }
 0x8b2   :  { %2775 = vmatpush.msra.mxu2 %v7757_v54 }
 0x8b4   :  { %2776 = vmatpush.msra.mxu2 %v7764_v23 }
 0x8b6   :  { %2777 = vmatpush.msra.mxu2 %v7770_v63 }
 0x8b8   :  { %2778 = vmatpush.msra.mxu2 %v7776_v32 }
 0x8ba   :  { %2779 = vmatpush.msra.mxu2 %v7782_v34 }
 0x8bc   :  { %2780 = vmatpush.msra.mxu2 %v7788_v37 }
 0x8be   :  { %2781 = vmatpush.msra.mxu2 %v7794_v35 }
 0x8c0   :  { %2782 = vmatpush.msra.mxu2 %v7800_v38 }
 0x8c2   :  { %2783 = vmatpush.msra.mxu2 %v7806_v40 }
 0x8c4   :  { %2784 = vmatpush.msra.mxu2 %v7812_v33 }
 0x90f   :  { %v2414_v45 = vpop.f32.mrf.mxu1 }
 0x910   :  { %v7680_v56 = vadd.f32 %v2414_v45, %v7563_v42  ;;  %v4720_v42 = vld [vmem:[%s9243_s3 + $0x1260] sm:$0xff]  ;;  %v4734_v45 = vld [vmem:[%s9243_s3 + $0x12d0] sm:$0xff] }
 0x911   :  { %2695 = vmatpush.msrb.mxu1 %v4720_v42  ;;  %v4708_v42 = vld [vmem:[%s9243_s3 + $0x1200] sm:$0xff] }
 0x913   :  { %2696 = vmatpush.msrb.mxu1 %v4716_v29  ;;  %v4719_v29 = vld [vmem:[%s9243_s3 + $0x1258] sm:$0xff] }
 0x915   :  { %v2434_v5 = vpop.f32.mrf.mxu2  ;;  %2697 = vmatpush.msrb.mxu1 %v4712_v1  ;;  %v4711_v1 = vld [vmem:[%s9243_s3 + $0x1218] sm:$0xff] }
 0x916   :  { %v7698_v7 = vadd.f32 %v2434_v5, %v7556_v4  ;;  %v4739_v5 = vld [vmem:[%s9243_s3 + $0x12f8] sm:$0xff] }
 0x917   :  { %2698 = vmatpush.msrb.mxu1 %v4708_v42  ;;  %v4770_v42 = vld [vmem:[%s9243_s3 + $0x13c8] sm:$0xff] }
 0x91d   :  { %v2500_v4 = vpop.f32.mrf.mxu2 }
 0x91e   :  { %v2501_v12 = vadd.f32 %v7718_v11, %v2500_v4  ;;  %v4735_v4 = vld [vmem:[%s9243_s3 + $0x12d8] sm:$0xff] }
 0x920   :  { %v2503_v15 = vmax.f32 %v2501_v12, 0.0  ;;  %v4714_v12 = vld [vmem:[%s9243_s3 + $0x1230] sm:$0xff] }
 0x922   :  { %4703 = vmatmul.msk.f32.vlgmr.msrb.gmra.mxu3 %vm169_vm0, %v2503_v15  ;;  %4704 = vmatmul.msk.f32.vlgmr.msra.gmra.mxu0 %vm169_vm0, %v2503_v15 }
 0x923   :  { %4705 = vmatmul.msk.f32.vlgmr.msra.gmra.mxu1 %vm169_vm0, %v2503_v15  ;;  %2731 = vmatpush.msrb.mxu3 %v4738_v20  ;;  %v4710_v20 = vld [vmem:[%s9243_s3 + $0x1210] sm:$0xff] }
 0x924   :  { %2751 = vmatpush.msra.mxu1 %v4739_v5  ;;  %v4766_v5 = vld [vmem:[%s9243_s3 + $0x13a8] sm:$0xff] }
 0x925   :  { %2732 = vmatpush.msrb.mxu3 %v4734_v45  ;;  %v4723_v45 = vld [vmem:[%s9243_s3 + $0x1278] sm:$0xff] }
 0x926   :  { %2752 = vmatpush.msra.mxu1 %v4735_v4  ;;  %v4769_v4 = vld [vmem:[%s9243_s3 + $0x13c0] sm:$0xff] }
 0x927   :  { %2733 = vmatpush.msrb.mxu3 %v4730_v58  ;;  %v4715_v58 = vld [vmem:[%s9243_s3 + $0x1238] sm:$0xff] }
 0x929   :  { %2734 = vmatpush.msrb.mxu3 %v4726_v3  ;;  %v4774_v3 = vld [vmem:[%s9243_s3 + $0x13e8] sm:$0xff] }
 0x92a   :  { %4706 = vmatmul.msk.f32.vlgmr.msra.gmra.mxu3 %vm169_vm0, %v2503_v15  ;;  %2642 = vmatmul.f32.vlgmr.msrb.gmra.mxu0 %v4707_v44  ;;  %v4731_v15 = vld [vmem:[%s9243_s3 + $0x12b8] sm:$0xff] }
 0x92b   :  { %2735 = vmatpush.msrb.mxu3 %v4722_v46  ;;  %2753 = vmatpush.msra.mxu1 %v4731_v15  ;;  %v4727_v44 = vld [vmem:[%s9243_s3 + $0x1298] sm:$0xff]  ;;  %v7875_v46 = vpop.f32.mrf.mxu3  ;;  %v4758_v15 = vld [vmem:[%s9243_s3 + $0x1368] sm:$0xff] }
 0x92c   :  { %2854 = vmatpush.msra.mxu0 %v4774_v3 }
 0x92d   :  { %2736 = vmatpush.msrb.mxu3 %v4718_v8  ;;  %2754 = vmatpush.msra.mxu1 %v4727_v44  ;;  %v4773_v8 = vld [vmem:[%s9243_s3 + $0x13e0] sm:$0xff] }
 0x92e   :  { %2855 = vmatpush.msra.mxu0 %v4770_v42 }
 0x92f   :  { %2737 = vmatpush.msrb.mxu3 %v4714_v12  ;;  %2755 = vmatpush.msra.mxu1 %v4723_v45  ;;  %v4762_v12 = vld [vmem:[%s9243_s3 + $0x1388] sm:$0xff] }
 0x930   :  { %2856 = vmatpush.msra.mxu0 %v4766_v5  ;;  %v4750_v45 = vld [vmem:[%s9243_s3 + $0x1328] sm:$0xff] }
 0x931   :  { %2738 = vmatpush.msrb.mxu3 %v4710_v20  ;;  %2756 = vmatpush.msra.mxu1 %v4719_v29  ;;  %v4754_v20 = vld [vmem:[%s9243_s3 + $0x1348] sm:$0xff] }
 0x932   :  { %2857 = vmatpush.msra.mxu0 %v4762_v12  ;;  %v4761_v12 = vld [vmem:[%s9243_s3 + $0x1380] sm:$0xff] }
 0x933   :  { %2757 = vmatpush.msra.mxu1 %v4715_v58  ;;  %2834 = vmatpush.msra.mxu3 %v4773_v8  ;;  %v7895_v44 = vpop.f32.mrf.mxu3 }
 0x934   :  { %2858 = vmatpush.msra.mxu0 %v4758_v15  ;;  %v4775_v15 = vld [vmem:[%s9243_s3 + $0x13f0] sm:$0xff] }
 0x935   :  { %2758 = vmatpush.msra.mxu1 %v4711_v1  ;;  %2835 = vmatpush.msra.mxu3 %v4769_v4  ;;  %v4746_v1 = vld [vmem:[%s9243_s3 + $0x1308] sm:$0xff]  ;;  %v4765_v4 = vld [vmem:[%s9243_s3 + $0x13a0] sm:$0xff] }
 0x936   :  { %2859 = vmatpush.msra.mxu0 %v4754_v20  ;;  %v4757_v20 = vld [vmem:[%s9243_s3 + $0x1360] sm:$0xff] }
 0x937   :  { %2836 = vmatpush.msra.mxu3 %v4765_v4  ;;  %v4755_v4 = vld [vmem:[%s9243_s3 + $0x1350] sm:$0xff] }
 0x938   :  { %2860 = vmatpush.msra.mxu0 %v4750_v45  ;;  %v4771_v45 = vld [vmem:[%s9243_s3 + $0x13d0] sm:$0xff] }
 0x939   :  { %2837 = vmatpush.msra.mxu3 %v4761_v12  ;;  %v4772_v12 = vld [vmem:[%s9243_s3 + $0x13d8] sm:$0xff] }
 0x93a   :  { %2861 = vmatpush.msra.mxu0 %v4746_v1  ;;  %v4767_v1 = vld [vmem:[%s9243_s3 + $0x13b0] sm:$0xff] }
 0x93b   :  { %2838 = vmatpush.msra.mxu3 %v4757_v20  ;;  %v4768_v20 = vld [vmem:[%s9243_s3 + $0x13b8] sm:$0xff] }
 0x93c   :  { %2912 = vmatpush.msrb.mxu0 %v7706_v9 }
 0x93e   :  { %2913 = vmatpush.msrb.mxu0 %v7712_v10 }
 0x940   :  { %2914 = vmatpush.msrb.mxu0 %v7724_v14 }
 0x942   :  { %2915 = vmatpush.msrb.mxu0 %v7730_v26 }
 0x944   :  { %2916 = vmatpush.msrb.mxu0 %v7742_v24 }
 0x946   :  { %2917 = vmatpush.msrb.mxu0 %v7748_v55 }
 0x948   :  { %2918 = vmatpush.msrb.mxu0 %v7757_v54 }
 0x94a   :  { %2919 = vmatpush.msrb.mxu0 %v7764_v23 }
 0x94c   :  { %2920 = vmatpush.msrb.mxu0 %v7770_v63 }
 0x94e   :  { %2921 = vmatpush.msrb.mxu0 %v7776_v32 }
 0x950   :  { %2922 = vmatpush.msrb.mxu0 %v7782_v34 }
 0x952   :  { %2923 = vmatpush.msrb.mxu0 %v7788_v37 }
 0x954   :  { %2924 = vmatpush.msrb.mxu0 %v7794_v35 }
 0x956   :  { %2925 = vmatpush.msrb.mxu0 %v7800_v38 }
 0x958   :  { %2926 = vmatpush.msrb.mxu0 %v7806_v40 }
 0x95a   :  { %2927 = vmatpush.msrb.mxu0 %v7812_v33 }
 0x99f   :  { %v2577_v29 = vpop.f32.mrf.mxu0 }
 0x9a0   :  { %v7901_v58 = vadd.f32 %v2577_v29, %v7698_v7  ;;  %v4753_v29 = vld [vmem:[%s9243_s3 + $0x1340] sm:$0xff] }
 0x9a1   :  { %2839 = vmatpush.msra.mxu3 %v4753_v29  ;;  %v4764_v29 = vld [vmem:[%s9243_s3 + $0x1398] sm:$0xff] }
 0x9a5   :  { %v2557_v3 = vpop.f32.mrf.mxu3 }
 0x9a6   :  { %v7908_v42 = vadd.f32 %v2557_v3, %v7680_v56  ;;  %v4744_v56 = vld [vmem:[%s9240_s0 + $0x26] sm:$0x3] }
 0x9a7   :  { %v2643_v5 = vpop.f32.mrf.mxu0  ;;  %v4749_v3 = vld [vmem:[%s9243_s3 + $0x1320] sm:$0xff] }
 0x9a8   :  { %v2644_v8 = vadd.f32 %v7718_v11, %v2643_v5  ;;  %v4763_v5 = vld [vmem:[%s9243_s3 + $0x1390] sm:$0xff]  ;;  %2840 = vmatpush.msra.mxu3 %v4749_v3  ;;  %v4756_v3 = vld [vmem:[%s9243_s3 + $0x1358] sm:$0xff] }
 0x9aa   :  { %v2646_v7 = vmax.f32 %v2644_v8, 0.0  ;;  %v4745_v8 = vld [vmem:[%s9243_s3 + $0x1300] sm:$0xff] }
 0x9ab   :  { %2841 = vmatpush.msra.mxu3 %v4745_v8  ;;  %v4748_v8 = vld [vmem:[%s9243_s3 + $0x1318] sm:$0xff] }
 0x9ac   :  { %4740 = vmatmul.msk.f32.vlgmr.msrb.gmra.mxu1 %vm169_vm0, %v2646_v7  ;;  %4741 = vmatmul.msk.f32.vlgmr.msrb.gmra.mxu2 %vm169_vm0, %v2646_v7 }
 0x9ad   :  { %4742 = vmatmul.msk.f32.vlgmr.msrb.gmra.mxu3 %vm169_vm0, %v2646_v7  ;;  %2874 = vmatpush.msrb.mxu1 %v4775_v15  ;;  %v4751_v15 = vld [vmem:[%s9243_s3 + $0x1330] sm:$0xff] }
 0x9af   :  { %2875 = vmatpush.msrb.mxu1 %v4771_v45  ;;  %v4747_v45 = vld [vmem:[%s9243_s3 + $0x1310] sm:$0xff] }
 0x9b1   :  { %2876 = vmatpush.msrb.mxu1 %v4767_v1  ;;  %v4760_v1 = vld [vmem:[%s9243_s3 + $0x1378] sm:$0xff] }
 0x9b3   :  { %2877 = vmatpush.msrb.mxu1 %v4763_v5  ;;  %v4752_v5 = vld [vmem:[%s9243_s3 + $0x1338] sm:$0xff] }
 0x9b4   :  { %4743 = vmatmul.msk.f32.vlgmr.msra.gmra.mxu1 %vm169_vm0, %v2646_v7  ;;  %2785 = vmatmul.f32.vlgmr.msra.gmra.mxu2 %v4744_v56  ;;  %v4759_v7 = vld [vmem:[%s9243_s3 + $0x1370] sm:$0xff]  ;;  %v4776_v56 = vld [vmem:[%s9243_s3 + $0x13f8] sm:$0xff] }
 0x9b5   :  { %2878 = vmatpush.msrb.mxu1 %v4759_v7  ;;  %2894 = vmatpush.msrb.mxu3 %v4776_v56  ;;  %v4811_v7 = vld [vmem:[%s9243_s3 + $0x14e8] sm:$0xff] }
 0x9b6   :  { %v4807_v56 = vld [vmem:[%s9243_s3 + $0x14c8] sm:$0xff]  ;;  %2997 = vmatpush.msrb.mxu2 %v4811_v7 }
 0x9b7   :  { %2879 = vmatpush.msrb.mxu1 %v4755_v4  ;;  %2895 = vmatpush.msrb.mxu3 %v4772_v12  ;;  %v4803_v4 = vld [vmem:[%s9243_s3 + $0x14a8] sm:$0xff]  ;;  %v4810_v12 = vld [vmem:[%s9243_s3 + $0x14e0] sm:$0xff] }
 0x9b8   :  { %2998 = vmatpush.msrb.mxu2 %v4807_v56 }
 0x9b9   :  { %2880 = vmatpush.msrb.mxu1 %v4751_v15  ;;  %2896 = vmatpush.msrb.mxu3 %v4768_v20  ;;  %v4806_v15 = vld [vmem:[%s9243_s3 + $0x14c0] sm:$0xff]  ;;  %v4799_v20 = vld [vmem:[%s9243_s3 + $0x1488] sm:$0xff] }
 0x9ba   :  { %2999 = vmatpush.msrb.mxu2 %v4803_v4  ;;  %v4783_v4 = vld [vmem:[%s9243_s3 + $0x1408] sm:$0xff] }
 0x9bb   :  { %2881 = vmatpush.msrb.mxu1 %v4747_v45  ;;  %2897 = vmatpush.msrb.mxu3 %v4764_v29  ;;  %v4802_v45 = vld [vmem:[%s9243_s3 + $0x14a0] sm:$0xff]  ;;  %v4795_v29 = vld [vmem:[%s9243_s3 + $0x1468] sm:$0xff] }
 0x9bc   :  { %3000 = vmatpush.msrb.mxu2 %v4799_v20 }
 0x9bd   :  { %2898 = vmatpush.msrb.mxu3 %v4760_v1  ;;  %2977 = vmatpush.msra.mxu1 %v4810_v12  ;;  %v4798_v1 = vld [vmem:[%s9243_s3 + $0x1480] sm:$0xff] }
 0x9be   :  { %3001 = vmatpush.msrb.mxu2 %v4795_v29  ;;  %v4808_v29 = vld [vmem:[%s9243_s3 + $0x14d0] sm:$0xff] }
 0x9bf   :  { %2899 = vmatpush.msrb.mxu3 %v4756_v3  ;;  %2978 = vmatpush.msra.mxu1 %v4806_v15  ;;  %v4791_v3 = vld [vmem:[%s9243_s3 + $0x1448] sm:$0xff] }
 0x9c0   :  { %3002 = vmatpush.msrb.mxu2 %v4791_v3  ;;  %v4804_v3 = vld [vmem:[%s9243_s3 + $0x14b0] sm:$0xff] }
 0x9c1   :  { %2900 = vmatpush.msrb.mxu3 %v4752_v5  ;;  %2979 = vmatpush.msra.mxu1 %v4802_v45  ;;  %v4794_v5 = vld [vmem:[%s9243_s3 + $0x1460] sm:$0xff]  ;;  %v4781_v45 = vld [vmem:[%s9240_s0 + $0x28] sm:$0x3] }
 0x9c3   :  { %2901 = vmatpush.msrb.mxu3 %v4748_v8  ;;  %v4787_v8 = vld [vmem:[%s9243_s3 + $0x1428] sm:$0xff]  ;;  %2980 = vmatpush.msra.mxu1 %v4798_v1  ;;  %v4790_v1 = vld [vmem:[%s9243_s3 + $0x1440] sm:$0xff] }
 0x9c4   :  { %3003 = vmatpush.msrb.mxu2 %v4787_v8  ;;  %v4800_v8 = vld [vmem:[%s9243_s3 + $0x1490] sm:$0xff] }
 0x9c5   :  { %2981 = vmatpush.msra.mxu1 %v4794_v5  ;;  %v4786_v5 = vld [vmem:[%s9243_s3 + $0x1420] sm:$0xff] }
 0x9c6   :  { %3004 = vmatpush.msrb.mxu2 %v4783_v4  ;;  %v4796_v4 = vld [vmem:[%s9243_s3 + $0x1470] sm:$0xff] }
 0x9c7   :  { %2982 = vmatpush.msra.mxu1 %v4790_v1  ;;  %v4801_v1 = vld [vmem:[%s9243_s3 + $0x1498] sm:$0xff] }
 0x9c8   :  { %3055 = vmatpush.msra.mxu2 %v7706_v9 }
 0x9c9   :  { %2983 = vmatpush.msra.mxu1 %v4786_v5  ;;  %v4793_v5 = vld [vmem:[%s9243_s3 + $0x1458] sm:$0xff] }
 0x9ca   :  { %3056 = vmatpush.msra.mxu2 %v7712_v10 }
 0x9cc   :  { %3057 = vmatpush.msra.mxu2 %v7724_v14 }
 0x9ce   :  { %3058 = vmatpush.msra.mxu2 %v7730_v26 }
 0x9d0   :  { %3059 = vmatpush.msra.mxu2 %v7742_v24 }
 0x9d2   :  { %3060 = vmatpush.msra.mxu2 %v7748_v55 }
 0x9d4   :  { %3061 = vmatpush.msra.mxu2 %v7757_v54 }
 0x9d6   :  { %3062 = vmatpush.msra.mxu2 %v7764_v23 }
 0x9d8   :  { %3063 = vmatpush.msra.mxu2 %v7770_v63 }
 0x9da   :  { %3064 = vmatpush.msra.mxu2 %v7776_v32 }
 0x9dc   :  { %3065 = vmatpush.msra.mxu2 %v7782_v34 }
 0x9de   :  { %3066 = vmatpush.msra.mxu2 %v7788_v37 }
 0x9e0   :  { %3067 = vmatpush.msra.mxu2 %v7794_v35 }
 0x9e2   :  { %3068 = vmatpush.msra.mxu2 %v7800_v38 }
 0x9e4   :  { %3069 = vmatpush.msra.mxu2 %v7806_v40 }
 0x9e6   :  { %3070 = vmatpush.msra.mxu2 %v7812_v33 }
 0xa2f   :  { %v2720_v7 = vpop.f32.mrf.mxu2 }
 0xa30   :  { %v8036_v56 = vadd.f32 %v2720_v7, %v7901_v58  ;;  %v4812_v58 = vld [vmem:[%s9243_s3 + $0x14f0] sm:$0xff]  ;;  %v4782_v7 = vld [vmem:[%s9243_s3 + $0x1400] sm:$0xff] }
 0xa31   :  { %2984 = vmatpush.msra.mxu1 %v4782_v7  ;;  %v4785_v7 = vld [vmem:[%s9243_s3 + $0x1418] sm:$0xff] }
 0xa37   :  { %v2786_v12 = vpop.f32.mrf.mxu2 }
 0xa38   :  { %v2787_v15 = vadd.f32 %v7718_v11, %v2786_v12  ;;  %v4813_v12 = vld [vmem:[%s9243_s3 + $0x14f8] sm:$0xff] }
 0xa3a   :  { %v2789_v20 = vmax.f32 %v2787_v15, 0.0  ;;  %v4792_v15 = vld [vmem:[%s9243_s3 + $0x1450] sm:$0xff] }
 0xa3c   :  { %4777 = vmatmul.msk.f32.vlgmr.msra.gmra.mxu3 %vm169_vm0, %v2789_v20  ;;  %4778 = vmatmul.msk.f32.vlgmr.msra.gmra.mxu0 %vm169_vm0, %v2789_v20 }
 0xa3d   :  { %4779 = vmatmul.msk.f32.vlgmr.msrb.gmra.mxu1 %vm169_vm0, %v2789_v20  ;;  %3017 = vmatpush.msra.mxu3 %v4812_v58  ;;  %v4788_v58 = vld [vmem:[%s9243_s3 + $0x1430] sm:$0xff] }
 0xa3e   :  { %3037 = vmatpush.msrb.mxu1 %v4813_v12  ;;  %v4844_v12 = vld [vmem:[%s9243_s3 + $0x15c8] sm:$0xff] }
 0xa3f   :  { %3018 = vmatpush.msra.mxu3 %v4808_v29  ;;  %v4784_v29 = vld [vmem:[%s9243_s3 + $0x1410] sm:$0xff] }
 0xa41   :  { %3019 = vmatpush.msra.mxu3 %v4804_v3  ;;  %v4797_v3 = vld [vmem:[%s9243_s3 + $0x1478] sm:$0xff] }
 0xa43   :  { %3020 = vmatpush.msra.mxu3 %v4800_v8  ;;  %v4789_v8 = vld [vmem:[%s9243_s3 + $0x1438] sm:$0xff] }
 0xa44   :  { %4780 = vmatmul.msk.f32.vlgmr.msrb.gmra.mxu3 %vm169_vm0, %v2789_v20  ;;  %2928 = vmatmul.f32.vlgmr.msrb.gmra.mxu0 %v4781_v45  ;;  %v4809_v20 = vld [vmem:[%s9243_s3 + $0x14d8] sm:$0xff] }
 0xa45   :  { %3021 = vmatpush.msra.mxu3 %v4796_v4  ;;  %3038 = vmatpush.msrb.mxu1 %v4809_v20  ;;  %v4805_v45 = vld [vmem:[%s9243_s3 + $0x14b8] sm:$0xff]  ;;  %v4848_v4 = vld [vmem:[%s9243_s3 + $0x15e8] sm:$0xff]  ;;  %v4847_v20 = vld [vmem:[%s9243_s3 + $0x15e0] sm:$0xff] }
 0xa46   :  { %3140 = vmatpush.msra.mxu0 %v4848_v4 }
 0xa47   :  { %3022 = vmatpush.msra.mxu3 %v4792_v15  ;;  %3039 = vmatpush.msrb.mxu1 %v4805_v45  ;;  %v4840_v15 = vld [vmem:[%s9243_s3 + $0x15a8] sm:$0xff] }
 0xa48   :  { %3141 = vmatpush.msra.mxu0 %v4844_v12  ;;  %v4836_v45 = vld [vmem:[%s9243_s3 + $0x1588] sm:$0xff] }
 0xa49   :  { %3023 = vmatpush.msra.mxu3 %v4788_v58  ;;  %3040 = vmatpush.msrb.mxu1 %v4801_v1  ;;  %v4843_v58 = vld [vmem:[%s9243_s3 + $0x15c0] sm:$0xff]  ;;  %v4828_v1 = vld [vmem:[%s9243_s3 + $0x1548] sm:$0xff] }
 0xa4a   :  { %3142 = vmatpush.msra.mxu0 %v4840_v15 }
 0xa4b   :  { %3024 = vmatpush.msra.mxu3 %v4784_v29  ;;  %3041 = vmatpush.msrb.mxu1 %v4797_v3  ;;  %v4832_v29 = vld [vmem:[%s9243_s3 + $0x1568] sm:$0xff] }
 0xa4c   :  { %3143 = vmatpush.msra.mxu0 %v4836_v45  ;;  %v4824_v3 = vld [vmem:[%s9243_s3 + $0x1528] sm:$0xff]  ;;  %v4849_v45 = vld [vmem:[%s9243_s3 + $0x15f0] sm:$0xff] }
 0xa4d   :  { %3042 = vmatpush.msrb.mxu1 %v4793_v5  ;;  %3120 = vmatpush.msrb.mxu3 %v4847_v20  ;;  %v4839_v20 = vld [vmem:[%s9243_s3 + $0x15a0] sm:$0xff] }
 0xa4e   :  { %3144 = vmatpush.msra.mxu0 %v4832_v29  ;;  %v4831_v29 = vld [vmem:[%s9243_s3 + $0x1560] sm:$0xff] }
 0xa4f   :  { %3043 = vmatpush.msrb.mxu1 %v4789_v8  ;;  %3121 = vmatpush.msrb.mxu3 %v4843_v58  ;;  %v4835_v58 = vld [vmem:[%s9243_s3 + $0x1580] sm:$0xff] }
 0xa50   :  { %3145 = vmatpush.msra.mxu0 %v4828_v1  ;;  %v4845_v1 = vld [vmem:[%s9243_s3 + $0x15d0] sm:$0xff] }
 0xa51   :  { %3044 = vmatpush.msrb.mxu1 %v4785_v7  ;;  %v4820_v7 = vld [vmem:[%s9243_s3 + $0x1508] sm:$0xff]  ;;  %3122 = vmatpush.msrb.mxu3 %v4839_v20  ;;  %v4829_v20 = vld [vmem:[%s9243_s3 + $0x1550] sm:$0xff] }
 0xa52   :  { %3146 = vmatpush.msra.mxu0 %v4824_v3  ;;  %v4827_v3 = vld [vmem:[%s9243_s3 + $0x1540] sm:$0xff] }
 0xa53   :  { %3123 = vmatpush.msrb.mxu3 %v4835_v58  ;;  %v4846_v58 = vld [vmem:[%s9243_s3 + $0x15d8] sm:$0xff] }
 0xa54   :  { %3147 = vmatpush.msra.mxu0 %v4820_v7  ;;  %v4823_v7 = vld [vmem:[%s9243_s3 + $0x1520] sm:$0xff] }
 0xa55   :  { %3124 = vmatpush.msrb.mxu3 %v4831_v29  ;;  %v4842_v29 = vld [vmem:[%s9243_s3 + $0x15b8] sm:$0xff] }
 0xa56   :  { %3198 = vmatpush.msrb.mxu0 %v7706_v9 }
 0xa57   :  { %3125 = vmatpush.msrb.mxu3 %v4827_v3  ;;  %v4838_v3 = vld [vmem:[%s9243_s3 + $0x1598] sm:$0xff] }
 0xa58   :  { %3199 = vmatpush.msrb.mxu0 %v7712_v10 }
 0xa59   :  { %3126 = vmatpush.msrb.mxu3 %v4823_v7  ;;  %v4830_v7 = vld [vmem:[%s9243_s3 + $0x1558] sm:$0xff] }
 0xa5a   :  { %3200 = vmatpush.msrb.mxu0 %v7724_v14 }
 0xa5c   :  { %3201 = vmatpush.msrb.mxu0 %v7730_v26 }
 0xa5e   :  { %3202 = vmatpush.msrb.mxu0 %v7742_v24 }
 0xa60   :  { %3203 = vmatpush.msrb.mxu0 %v7748_v55 }
 0xa62   :  { %3204 = vmatpush.msrb.mxu0 %v7757_v54 }
 0xa64   :  { %3205 = vmatpush.msrb.mxu0 %v7764_v23 }
 0xa66   :  { %3206 = vmatpush.msrb.mxu0 %v7770_v63 }
 0xa68   :  { %3207 = vmatpush.msrb.mxu0 %v7776_v32 }
 0xa6a   :  { %3208 = vmatpush.msrb.mxu0 %v7782_v34 }
 0xa6c   :  { %3209 = vmatpush.msrb.mxu0 %v7788_v37 }
 0xa6e   :  { %3210 = vmatpush.msrb.mxu0 %v7794_v35 }
 0xa70   :  { %3211 = vmatpush.msrb.mxu0 %v7800_v38 }
 0xa72   :  { %3212 = vmatpush.msrb.mxu0 %v7806_v40 }
 0xa74   :  { %3213 = vmatpush.msrb.mxu0 %v7812_v33 }
 0xab9   :  { %v2863_v5 = vpop.f32.mrf.mxu0 }
 0xaba   :  { %v8150_v8 = vadd.f32 %v2863_v5, %v8036_v56  ;;  %v4818_v56 = vld [vmem:[%s9240_s0 + $0x2a] sm:$0x3]  ;;  %v4841_v5 = vld [vmem:[%s9243_s3 + $0x15b0] sm:$0xff] }
 0xac1   :  { %v2929_v4 = vpop.f32.mrf.mxu0 }
 0xac2   :  { %v2930_v12 = vadd.f32 %v7718_v11, %v2929_v4  ;;  %v4837_v4 = vld [vmem:[%s9243_s3 + $0x1590] sm:$0xff] }
 0xac4   :  { %v2932_v15 = vmax.f32 %v2930_v12, 0.0  ;;  %v4819_v12 = vld [vmem:[%s9243_s3 + $0x1500] sm:$0xff] }
 0xac5   :  { %3127 = vmatpush.msrb.mxu3 %v4819_v12  ;;  %v4822_v12 = vld [vmem:[%s9243_s3 + $0x1518] sm:$0xff] }
 0xac6   :  { %4814 = vmatmul.msk.f32.vlgmr.msra.gmra.mxu1 %vm169_vm0, %v2932_v15  ;;  %4815 = vmatmul.msk.f32.vlgmr.msrb.gmra.mxu2 %vm169_vm0, %v2932_v15 }
 0xac7   :  { %4816 = vmatmul.msk.f32.vlgmr.msra.gmra.mxu3 %vm169_vm0, %v2932_v15  ;;  %3160 = vmatpush.msra.mxu1 %v4849_v45  ;;  %v4825_v45 = vld [vmem:[%s9243_s3 + $0x1530] sm:$0xff] }
 0xac9   :  { %3161 = vmatpush.msra.mxu1 %v4845_v1  ;;  %v4821_v1 = vld [vmem:[%s9243_s3 + $0x1510] sm:$0xff] }
 0xacb   :  { %3162 = vmatpush.msra.mxu1 %v4841_v5  ;;  %v4834_v5 = vld [vmem:[%s9243_s3 + $0x1578] sm:$0xff] }
 0xacd   :  { %3163 = vmatpush.msra.mxu1 %v4837_v4  ;;  %v4826_v4 = vld [vmem:[%s9243_s3 + $0x1538] sm:$0xff] }
 0xace   :  { %4817 = vmatmul.msk.f32.vlgmr.msrb.gmra.mxu1 %vm169_vm0, %v2932_v15  ;;  %3071 = vmatmul.f32.vlgmr.msra.gmra.mxu2 %v4818_v56  ;;  %v4833_v15 = vld [vmem:[%s9243_s3 + $0x1570] sm:$0xff]  ;;  %v4850_v56 = vld [vmem:[%s9243_s3 + $0x15f8] sm:$0xff] }
 0xacf   :  { %3164 = vmatpush.msra.mxu1 %v4833_v15  ;;  %3180 = vmatpush.msra.mxu3 %v4850_v56  ;;  %v4885_v15 = vld [vmem:[%s9243_s3 + $0x16e8] sm:$0xff] }
 0xad0   :  { %v4881_v56 = vld [vmem:[%s9243_s3 + $0x16c8] sm:$0xff]  ;;  %3283 = vmatpush.msrb.mxu2 %v4885_v15 }
 0xad1   :  { %3165 = vmatpush.msra.mxu1 %v4829_v20  ;;  %3181 = vmatpush.msra.mxu3 %v4846_v58  ;;  %v4877_v20 = vld [vmem:[%s9243_s3 + $0x16a8] sm:$0xff]  ;;  %v4884_v58 = vld [vmem:[%s9243_s3 + $0x16e0] sm:$0xff] }
 0xad2   :  { %3284 = vmatpush.msrb.mxu2 %v4881_v56 }
 0xad3   :  { %3166 = vmatpush.msra.mxu1 %v4825_v45  ;;  %3182 = vmatpush.msra.mxu3 %v4842_v29  ;;  %v4880_v45 = vld [vmem:[%s9243_s3 + $0x16c0] sm:$0xff]  ;;  %v4873_v29 = vld [vmem:[%s9243_s3 + $0x1688] sm:$0xff] }
 0xad4   :  { %3285 = vmatpush.msrb.mxu2 %v4877_v20  ;;  %v4857_v20 = vld [vmem:[%s9243_s3 + $0x1608] sm:$0xff] }
 0xad5   :  { %3167 = vmatpush.msra.mxu1 %v4821_v1  ;;  %3183 = vmatpush.msra.mxu3 %v4838_v3  ;;  %v4876_v1 = vld [vmem:[%s9243_s3 + $0x16a0] sm:$0xff]  ;;  %v4869_v3 = vld [vmem:[%s9243_s3 + $0x1668] sm:$0xff] }
 0xad6   :  { %3286 = vmatpush.msrb.mxu2 %v4873_v29 }
 0xad7   :  { %3184 = vmatpush.msra.mxu3 %v4834_v5  ;;  %3263 = vmatpush.msrb.mxu1 %v4884_v58  ;;  %v4872_v5 = vld [vmem:[%s9243_s3 + $0x1680] sm:$0xff] }
 0xad8   :  { %3287 = vmatpush.msrb.mxu2 %v4869_v3  ;;  %v4882_v3 = vld [vmem:[%s9243_s3 + $0x16d0] sm:$0xff] }
 0xad9   :  { %3185 = vmatpush.msra.mxu3 %v4830_v7  ;;  %3264 = vmatpush.msrb.mxu1 %v4880_v45  ;;  %v4865_v7 = vld [vmem:[%s9243_s3 + $0x1648] sm:$0xff] }
 0xada   :  { %3288 = vmatpush.msrb.mxu2 %v4865_v7  ;;  %v4878_v7 = vld [vmem:[%s9243_s3 + $0x16b0] sm:$0xff] }
 0xadb   :  { %3186 = vmatpush.msra.mxu3 %v4826_v4  ;;  %3265 = vmatpush.msrb.mxu1 %v4876_v1  ;;  %v4868_v4 = vld [vmem:[%s9243_s3 + $0x1660] sm:$0xff]  ;;  %v4855_v1 = vld [vmem:[%s9240_s0 + $0x2c] sm:$0x3] }
 0xadd   :  { %3187 = vmatpush.msra.mxu3 %v4822_v12  ;;  %v4861_v12 = vld [vmem:[%s9243_s3 + $0x1628] sm:$0xff]  ;;  %3266 = vmatpush.msrb.mxu1 %v4872_v5  ;;  %v4864_v5 = vld [vmem:[%s9243_s3 + $0x1640] sm:$0xff] }
 0xade   :  { %3289 = vmatpush.msrb.mxu2 %v4861_v12  ;;  %v4874_v12 = vld [vmem:[%s9243_s3 + $0x1690] sm:$0xff] }
 0xadf   :  { %3267 = vmatpush.msrb.mxu1 %v4868_v4  ;;  %v4860_v4 = vld [vmem:[%s9243_s3 + $0x1620] sm:$0xff] }
 0xae0   :  { %3290 = vmatpush.msrb.mxu2 %v4857_v20  ;;  %v4870_v20 = vld [vmem:[%s9243_s3 + $0x1670] sm:$0xff] }
 0xae1   :  { %3268 = vmatpush.msrb.mxu1 %v4864_v5  ;;  %v4875_v5 = vld [vmem:[%s9243_s3 + $0x1698] sm:$0xff] }
 0xae2   :  { %3341 = vmatpush.msra.mxu2 %v7706_v9 }
 0xae3   :  { %3269 = vmatpush.msrb.mxu1 %v4860_v4  ;;  %v4867_v4 = vld [vmem:[%s9243_s3 + $0x1658] sm:$0xff] }
 0xae4   :  { %3342 = vmatpush.msra.mxu2 %v7712_v10 }
 0xae6   :  { %3343 = vmatpush.msra.mxu2 %v7724_v14 }
 0xae8   :  { %3344 = vmatpush.msra.mxu2 %v7730_v26 }
 0xaea   :  { %3345 = vmatpush.msra.mxu2 %v7742_v24 }
 0xaec   :  { %3346 = vmatpush.msra.mxu2 %v7748_v55 }
 0xaee   :  { %3347 = vmatpush.msra.mxu2 %v7757_v54 }
 0xaf0   :  { %3348 = vmatpush.msra.mxu2 %v7764_v23 }
 0xaf2   :  { %3349 = vmatpush.msra.mxu2 %v7770_v63 }
 0xaf4   :  { %3350 = vmatpush.msra.mxu2 %v7776_v32 }
 0xaf6   :  { %3351 = vmatpush.msra.mxu2 %v7782_v34 }
 0xaf8   :  { %3352 = vmatpush.msra.mxu2 %v7788_v37 }
 0xafa   :  { %3353 = vmatpush.msra.mxu2 %v7794_v35 }
 0xafc   :  { %3354 = vmatpush.msra.mxu2 %v7800_v38 }
 0xafe   :  { %3355 = vmatpush.msra.mxu2 %v7806_v40 }
 0xb00   :  { %3356 = vmatpush.msra.mxu2 %v7812_v33 }
 0xb49   :  { %v3006_v15 = vpop.f32.mrf.mxu2 }
 0xb4a   :  { %v8282_v56 = vadd.f32 %v3006_v15, %v8150_v8  ;;  %v4886_v8 = vld [vmem:[%s9243_s3 + $0x16f0] sm:$0xff]  ;;  %v4856_v15 = vld [vmem:[%s9243_s3 + $0x1600] sm:$0xff] }
 0xb4b   :  { %3270 = vmatpush.msrb.mxu1 %v4856_v15  ;;  %v4859_v15 = vld [vmem:[%s9243_s3 + $0x1618] sm:$0xff] }
 0xb51   :  { %v3072_v58 = vpop.f32.mrf.mxu2 }
 0xb52   :  { %v3073_v45 = vadd.f32 %v7718_v11, %v3072_v58  ;;  %v4887_v58 = vld [vmem:[%s9243_s3 + $0x16f8] sm:$0xff] }
 0xb54   :  { %v3075_v29 = vmax.f32 %v3073_v45, 0.0  ;;  %v4866_v45 = vld [vmem:[%s9243_s3 + $0x1650] sm:$0xff] }
 0xb56   :  { %4851 = vmatmul.msk.f32.vlgmr.msrb.gmra.mxu3 %vm169_vm0, %v3075_v29  ;;  %4852 = vmatmul.msk.f32.vlgmr.msra.gmra.mxu0 %vm169_vm0, %v3075_v29 }
 0xb57   :  { %4853 = vmatmul.msk.f32.vlgmr.msra.gmra.mxu1 %vm169_vm0, %v3075_v29  ;;  %3303 = vmatpush.msrb.mxu3 %v4886_v8  ;;  %v4862_v8 = vld [vmem:[%s9243_s3 + $0x1630] sm:$0xff] }
 0xb58   :  { %3323 = vmatpush.msra.mxu1 %v4887_v58  ;;  %v4918_v58 = vld [vmem:[%s9243_s3 + $0x17c8] sm:$0xff] }
 0xb59   :  { %3304 = vmatpush.msrb.mxu3 %v4882_v3  ;;  %v4858_v3 = vld [vmem:[%s9243_s3 + $0x1610] sm:$0xff] }
 0xb5b   :  { %3305 = vmatpush.msrb.mxu3 %v4878_v7  ;;  %v4871_v7 = vld [vmem:[%s9243_s3 + $0x1678] sm:$0xff] }
 0xb5d   :  { %3306 = vmatpush.msrb.mxu3 %v4874_v12  ;;  %v4863_v12 = vld [vmem:[%s9243_s3 + $0x1638] sm:$0xff] }
 0xb5e   :  { %4854 = vmatmul.msk.f32.vlgmr.msra.gmra.mxu3 %vm169_vm0, %v3075_v29  ;;  %3214 = vmatmul.f32.vlgmr.msrb.gmra.mxu0 %v4855_v1  ;;  %v4883_v29 = vld [vmem:[%s9243_s3 + $0x16d8] sm:$0xff] }
 0xb5f   :  { %3307 = vmatpush.msrb.mxu3 %v4870_v20  ;;  %3324 = vmatpush.msra.mxu1 %v4883_v29  ;;  %v4879_v1 = vld [vmem:[%s9243_s3 + $0x16b8] sm:$0xff]  ;;  %v4922_v20 = vld [vmem:[%s9243_s3 + $0x17e8] sm:$0xff]  ;;  %v4921_v29 = vld [vmem:[%s9243_s3 + $0x17e0] sm:$0xff] }
 0xb60   :  { %3426 = vmatpush.msra.mxu0 %v4922_v20 }
 0xb61   :  { %3308 = vmatpush.msrb.mxu3 %v4866_v45  ;;  %3325 = vmatpush.msra.mxu1 %v4879_v1  ;;  %v4914_v45 = vld [vmem:[%s9243_s3 + $0x17a8] sm:$0xff] }
 0xb62   :  { %3427 = vmatpush.msra.mxu0 %v4918_v58  ;;  %v4910_v1 = vld [vmem:[%s9243_s3 + $0x1788] sm:$0xff] }
 0xb63   :  { %3309 = vmatpush.msrb.mxu3 %v4862_v8  ;;  %3326 = vmatpush.msra.mxu1 %v4875_v5  ;;  %v4917_v8 = vld [vmem:[%s9243_s3 + $0x17c0] sm:$0xff]  ;;  %v4902_v5 = vld [vmem:[%s9243_s3 + $0x1748] sm:$0xff] }
 0xb64   :  { %3428 = vmatpush.msra.mxu0 %v4914_v45 }
 0xb65   :  { %3310 = vmatpush.msrb.mxu3 %v4858_v3  ;;  %3327 = vmatpush.msra.mxu1 %v4871_v7  ;;  %v4906_v3 = vld [vmem:[%s9243_s3 + $0x1768] sm:$0xff] }
 0xb66   :  { %3429 = vmatpush.msra.mxu0 %v4910_v1  ;;  %v4898_v7 = vld [vmem:[%s9243_s3 + $0x1728] sm:$0xff]  ;;  %v4904_v1 = vld [vmem:[%s9243_s3 + $0x1758] sm:$0xff] }
 0xb67   :  { %3328 = vmatpush.msra.mxu1 %v4867_v4  ;;  %3406 = vmatpush.msra.mxu3 %v4921_v29  ;;  %v4912_v29 = vld [vmem:[%s9243_s3 + $0x1798] sm:$0xff] }
 0xb68   :  { %3430 = vmatpush.msra.mxu0 %v4906_v3  ;;  %v4900_v3 = vld [vmem:[%s9243_s3 + $0x1738] sm:$0xff] }
 0xb69   :  { %3329 = vmatpush.msra.mxu1 %v4863_v12  ;;  %3407 = vmatpush.msra.mxu3 %v4917_v8  ;;  %v4908_v8 = vld [vmem:[%s9243_s3 + $0x1778] sm:$0xff] }
 0xb6a   :  { %3431 = vmatpush.msra.mxu0 %v4902_v5  ;;  %v4896_v5 = vld [vmem:[%s9243_s3 + $0x1718] sm:$0xff] }
 0xb6b   :  { %3330 = vmatpush.msra.mxu1 %v4859_v15  ;;  %v4894_v15 = vld [vmem:[%s9243_s3 + $0x1708] sm:$0xff] }
 0xb6c   :  { %3432 = vmatpush.msra.mxu0 %v4898_v7  ;;  %v4958_v7 = vld [vmem:[%s9243_s3 + $0x18e0] sm:$0xff] }
 0xb6e   :  { %3433 = vmatpush.msra.mxu0 %v4894_v15  ;;  %v4959_v15 = vld [vmem:[%s9243_s3 + $0x18e8] sm:$0xff] }
 0xb70   :  { %3484 = vmatpush.msrb.mxu0 %v7706_v9  ;;  %v4892_v9 = vld [vmem:[%s9240_s0 + $0x2e] sm:$0x3] }
 0xb72   :  { %3485 = vmatpush.msrb.mxu0 %v7712_v10  ;;  %v4913_v10 = vld [vmem:[%s9243_s3 + $0x17a0] sm:$0xff] }
 0xb73   :  { %3408 = vmatpush.msra.mxu3 %v4913_v10 }
 0xb74   :  { %3486 = vmatpush.msrb.mxu0 %v7724_v14  ;;  %v4923_v14 = vld [vmem:[%s9243_s3 + $0x17f0] sm:$0xff] }
 0xb76   :  { %3487 = vmatpush.msrb.mxu0 %v7730_v26  ;;  %v4905_v26 = vld [vmem:[%s9243_s3 + $0x1760] sm:$0xff] }
 0xb78   :  { %3488 = vmatpush.msrb.mxu0 %v7742_v24  ;;  %v4919_v24 = vld [vmem:[%s9243_s3 + $0x17d0] sm:$0xff] }
 0xb7a   :  { %3489 = vmatpush.msrb.mxu0 %v7748_v55  ;;  %v4901_v55 = vld [vmem:[%s9243_s3 + $0x1740] sm:$0xff] }
 0xb7c   :  { %3490 = vmatpush.msrb.mxu0 %v7757_v54  ;;  %v4915_v54 = vld [vmem:[%s9243_s3 + $0x17b0] sm:$0xff] }
 0xb7e   :  { %3491 = vmatpush.msrb.mxu0 %v7764_v23  ;;  %v4897_v23 = vld [vmem:[%s9243_s3 + $0x1720] sm:$0xff] }
 0xb80   :  { %3492 = vmatpush.msrb.mxu0 %v7770_v63  ;;  %v4911_v63 = vld [vmem:[%s9243_s3 + $0x1790] sm:$0xff] }
 0xb82   :  { %3493 = vmatpush.msrb.mxu0 %v7776_v32  ;;  %v4893_v32 = vld [vmem:[%s9243_s3 + $0x1700] sm:$0xff] }
 0xb84   :  { %3494 = vmatpush.msrb.mxu0 %v7782_v34  ;;  %v4907_v34 = vld [vmem:[%s9243_s3 + $0x1770] sm:$0xff] }
 0xb86   :  { %3495 = vmatpush.msrb.mxu0 %v7788_v37  ;;  %v4924_v37 = vld [vmem:[%s9243_s3 + $0x17f8] sm:$0xff] }
 0xb88   :  { %3496 = vmatpush.msrb.mxu0 %v7794_v35  ;;  %v4903_v35 = vld [vmem:[%s9243_s3 + $0x1750] sm:$0xff] }
 0xb8a   :  { %3497 = vmatpush.msrb.mxu0 %v7800_v38  ;;  %v4920_v38 = vld [vmem:[%s9243_s3 + $0x17d8] sm:$0xff] }
 0xb8c   :  { %3498 = vmatpush.msrb.mxu0 %v7806_v40  ;;  %v4899_v40 = vld [vmem:[%s9243_s3 + $0x1730] sm:$0xff] }
 0xb8e   :  { %3499 = vmatpush.msrb.mxu0 %v7812_v33  ;;  %v4916_v33 = vld [vmem:[%s9243_s3 + $0x17b8] sm:$0xff] }
 0xbd3   :  { %v3149_v4 = vpop.f32.mrf.mxu0 }
 0xbd4   :  { %v8396_v12 = vadd.f32 %v3149_v4, %v8282_v56  ;;  %v4895_v56 = vld [vmem:[%s9243_s3 + $0x1710] sm:$0xff]  ;;  %v4954_v4 = vld [vmem:[%s9243_s3 + $0x18c0] sm:$0xff] }
 0xbdb   :  { %v3215_v20 = vpop.f32.mrf.mxu0 }
 0xbdc   :  { %v3216_v58 = vadd.f32 %v7718_v11, %v3215_v20  ;;  %v4909_v11 = vld [vmem:[%s9243_s3 + $0x1780] sm:$0xff] }
 0xbdd   :  { %3409 = vmatpush.msra.mxu3 %v4909_v11  ;;  %v4950_v20 = vld [vmem:[%s9243_s3 + $0x18a0] sm:$0xff] }
 0xbde   :  { %v3218_v45 = vmax.f32 %v3216_v58, 0.0  ;;  %v4946_v58 = vld [vmem:[%s9243_s3 + $0x1880] sm:$0xff] }
 0xbdf   :  { %3410 = vmatpush.msra.mxu3 %v4905_v26 }
 0xbe0   :  { %4888 = vmatmul.msk.f32.vlgmr.msrb.gmra.mxu1 %vm169_vm0, %v3218_v45  ;;  %4889 = vmatmul.msk.f32.vlgmr.msrb.gmra.mxu2 %vm169_vm0, %v3218_v45 }
 0xbe1   :  { %4890 = vmatmul.msk.f32.vlgmr.msrb.gmra.mxu3 %vm169_vm0, %v3218_v45  ;;  %3446 = vmatpush.msrb.mxu1 %v4923_v14  ;;  %v8515_v14 = vld [vmem:[%s9242_s2] ss:$0 sm:$0xff] }
 0xbe2   :  { %3411 = vmatpush.msra.mxu3 %v4901_v55  ;;  %3569 = vmatpush.msrb.mxu2 %v4959_v15  ;;  %v4960_v55 = vld [vmem:[%s9243_s3 + $0x18f0] sm:$0xff]  ;;  %v4931_v15 = vld [vmem:[%s9243_s3 + $0x1808] sm:$0xff] }
 0xbe3   :  { %3447 = vmatpush.msrb.mxu1 %v4919_v24 }
 0xbe4   :  { %3412 = vmatpush.msra.mxu3 %v4897_v23  ;;  %v4956_v23 = vld [vmem:[%s9243_s3 + $0x18d0] sm:$0xff] }
 0xbe5   :  { %3448 = vmatpush.msrb.mxu1 %v4915_v54  ;;  %v4955_v54 = vld [vmem:[%s9243_s3 + $0x18c8] sm:$0xff] }
 0xbe6   :  { %3413 = vmatpush.msra.mxu3 %v4893_v32  ;;  %3570 = vmatpush.msrb.mxu2 %v4955_v54  ;;  %v4951_v32 = vld [vmem:[%s9243_s3 + $0x18a8] sm:$0xff]  ;;  %v3737_v54 = vld [vmem:[%s9245_s5 + $0x2f0] sm:$0xff] }
 0xbe7   :  { %3449 = vmatpush.msrb.mxu1 %v4911_v63  ;;  %v4938_v63 = vld [vmem:[%s9243_s3 + $0x1840] sm:$0xff] }
 0xbe8   :  { %4891 = vmatmul.msk.f32.vlgmr.msra.gmra.mxu1 %vm169_vm0, %v3218_v45  ;;  %3357 = vmatmul.f32.vlgmr.msra.gmra.mxu2 %v4892_v9  ;;  %v4942_v45 = vld [vmem:[%s9243_s3 + $0x1860] sm:$0xff] }
 0xbe9   :  { %3450 = vmatpush.msrb.mxu1 %v4907_v34  ;;  %3466 = vmatpush.msrb.mxu3 %v4924_v37  ;;  %v4952_v34 = vld [vmem:[%s9243_s3 + $0x18b0] sm:$0xff]  ;;  %v4934_v37 = vld [vmem:[%s9243_s3 + $0x1820] sm:$0xff] }
 0xbea   :  { %3571 = vmatpush.msrb.mxu2 %v4951_v32  ;;  %v3735_v32 = vld [vmem:[%s9245_s5 + $0x2e0] sm:$0xff] }
 0xbeb   :  { %3451 = vmatpush.msrb.mxu1 %v4903_v35  ;;  %3467 = vmatpush.msrb.mxu3 %v4920_v38  ;;  %v4947_v35 = vld [vmem:[%s9243_s3 + $0x1888] sm:$0xff]  ;;  %v4948_v38 = vld [vmem:[%s9243_s3 + $0x1890] sm:$0xff] }
 0xbec   :  { %3572 = vmatpush.msrb.mxu2 %v4947_v35  ;;  %v3733_v35 = vld [vmem:[%s9245_s5 + $0x2d0] sm:$0xff] }
 0xbed   :  { %3452 = vmatpush.msrb.mxu1 %v4899_v40  ;;  %3468 = vmatpush.msrb.mxu3 %v4916_v33  ;;  %v4930_v40 = vld [vmem:[%s9243_s3 + $0x1800] sm:$0xff]  ;;  %v4943_v33 = vld [vmem:[%s9243_s3 + $0x1868] sm:$0xff] }
 0xbee   :  { %3573 = vmatpush.msrb.mxu2 %v4943_v33  ;;  %v3665_v33 = vld [vmem:[%s9245_s5 + $0xb0] sm:$0xff] }
 0xbef   :  { %3453 = vmatpush.msrb.mxu1 %v4895_v56  ;;  %3469 = vmatpush.msrb.mxu3 %v4912_v29  ;;  %v4944_v56 = vld [vmem:[%s9243_s3 + $0x1870] sm:$0xff]  ;;  %v4961_v29 = vld [vmem:[%s9243_s3 + $0x18f8] sm:$0xff] }
 0xbf1   :  { %3470 = vmatpush.msrb.mxu3 %v4908_v8  ;;  %3549 = vmatpush.msra.mxu1 %v4958_v7  ;;  %v4939_v8 = vld [vmem:[%s9243_s3 + $0x1848] sm:$0xff]  ;;  %v4936_v7 = vld [vmem:[%s9243_s3 + $0x1830] sm:$0xff] }
 0xbf2   :  { %3574 = vmatpush.msrb.mxu2 %v4939_v8  ;;  %v3663_v8 = vld [vmem:[%s9245_s5 + $0xa0] sm:$0xff] }
 0xbf3   :  { %3471 = vmatpush.msrb.mxu3 %v4904_v1  ;;  %3550 = vmatpush.msra.mxu1 %v4954_v4  ;;  %v4940_v1 = vld [vmem:[%s9243_s3 + $0x1850] sm:$0xff]  ;;  %v4953_v4 = vld [vmem:[%s9243_s3 + $0x18b8] sm:$0xff] }
 0xbf5   :  { %3472 = vmatpush.msrb.mxu3 %v4900_v3  ;;  %3551 = vmatpush.msra.mxu1 %v4950_v20  ;;  %v4957_v3 = vld [vmem:[%s9243_s3 + $0x18d8] sm:$0xff]  ;;  %v4932_v20 = vld [vmem:[%s9243_s3 + $0x1810] sm:$0xff] }
 0xbf7   :  { %3473 = vmatpush.msrb.mxu3 %v4896_v5  ;;  %3552 = vmatpush.msra.mxu1 %v4946_v58  ;;  %v4935_v5 = vld [vmem:[%s9243_s3 + $0x1828] sm:$0xff]  ;;  %v4949_v58 = vld [vmem:[%s9243_s3 + $0x1898] sm:$0xff] }
 0xbf8   :  { %3575 = vmatpush.msrb.mxu2 %v4935_v5  ;;  %v3661_v5 = vld [vmem:[%s9245_s5 + $0x90] sm:$0xff] }
 0xbf9   :  { %3553 = vmatpush.msra.mxu1 %v4942_v45  ;;  %v4945_v45 = vld [vmem:[%s9243_s3 + $0x1878] sm:$0xff] }
 0xbfa   :  { %3576 = vmatpush.msrb.mxu2 %v4931_v15  ;;  %v3725_v15 = vld [vmem:[%s9245_s5 + $0x290] sm:$0xff] }
 0xbfb   :  { %3554 = vmatpush.msra.mxu1 %v4938_v63  ;;  %v3703_v63 = vld [vmem:[%s9245_s5 + $0x1e0] sm:$0xff] }
 0xbfd   :  { %3555 = vmatpush.msra.mxu1 %v4934_v37  ;;  %v3667_v37 = vld [vmem:[%s9245_s5 + $0xc0] sm:$0xff] }
 0xbff   :  { %3556 = vmatpush.msra.mxu1 %v4930_v40  ;;  %v3731_v40 = vld [vmem:[%s9245_s5 + $0x2c0] sm:$0xff] }
 0xc63   :  { %v3292_v9 = vpop.f32.mrf.mxu2 }
 0xc64   :  { %v8510_v10 = vadd.f32 %v3292_v9, %v8396_v12  ;;  %v4929_v12 = vld [vmem:[%s9240_s0 + $0x30] sm:$0x3]  ;;  %v4941_v9 = vld [vmem:[%s9243_s3 + $0x1858] sm:$0xff] }
 0xc6b   :  { %v3358_v11 = vpop.f32.mrf.mxu2 }
 0xc6c   :  { %v3359_v26 = vadd.f32 %v8515_v14, %v3358_v11  ;;  %v4937_v11 = vld [vmem:[%s9243_s3 + $0x1838] sm:$0xff] }
 0xc6e   :  { %v3361_v24 = vmax.f32 %v3359_v26, 0.0  ;;  %v4933_v26 = vld [vmem:[%s9243_s3 + $0x1818] sm:$0xff] }
 0xc70   :  { %4925 = vmatmul.msk.f32.vlgmr.msra.gmra.mxu3 %vm169_vm0, %v3361_v24  ;;  %4926 = vmatmul.msk.f32.vlgmr.msra.gmra.mxu0 %vm169_vm0, %v3361_v24 }
 0xc71   :  { %4927 = vmatmul.msk.f32.vlgmr.msrb.gmra.mxu1 %vm169_vm0, %v3361_v24  ;;  %3589 = vmatpush.msra.mxu3 %v4960_v55  ;;  %v3671_v55 = vld [vmem:[%s9245_s5 + $0xe0] sm:$0xff] }
 0xc72   :  { %3609 = vmatpush.msrb.mxu1 %v4961_v29  ;;  %3817 = vmatpush.msra.mxu0 %v3737_v54  ;;  %v3729_v29 = vld [vmem:[%s9245_s5 + $0x2b0] sm:$0xff] }
 0xc73   :  { %3590 = vmatpush.msra.mxu3 %v4956_v23  ;;  %v3669_v23 = vld [vmem:[%s9245_s5 + $0xd0] sm:$0xff] }
 0xc74   :  { %3610 = vmatpush.msrb.mxu1 %v4957_v3  ;;  %3818 = vmatpush.msra.mxu0 %v3735_v32  ;;  %v3727_v3 = vld [vmem:[%s9245_s5 + $0x2a0] sm:$0xff]  ;;  %v3653_v54 = vld [vmem:[%s9245_s5 + $0x50] sm:$0xff] }
 0xc75   :  { %3591 = vmatpush.msra.mxu3 %v4952_v34  ;;  %v3701_v34 = vld [vmem:[%s9245_s5 + $0x1d0] sm:$0xff] }
 0xc76   :  { %3611 = vmatpush.msrb.mxu1 %v4953_v4  ;;  %3819 = vmatpush.msra.mxu0 %v3733_v35  ;;  %v3693_v4 = vld [vmem:[%s9245_s5 + $0x190] sm:$0xff] }
 0xc77   :  { %3592 = vmatpush.msra.mxu3 %v4948_v38  ;;  %v3699_v38 = vld [vmem:[%s9245_s5 + $0x1c0] sm:$0xff]  ;;  %v3717_v32 = vld [vmem:[%s9245_s5 + $0x250] sm:$0xff] }
 0xc78   :  { %4928 = vmatmul.msk.f32.vlgmr.msrb.gmra.mxu3 %vm169_vm0, %v3361_v24  ;;  %3500 = vmatmul.f32.vlgmr.msrb.gmra.mxu0 %v4929_v12  ;;  %v3673_v24 = vld [vmem:[%s9245_s5 + $0xf0] sm:$0xff] }
 0xc79   :  { %3593 = vmatpush.msra.mxu3 %v4944_v56  ;;  %3612 = vmatpush.msrb.mxu1 %v4949_v58  ;;  %v3705_v12 = vld [vmem:[%s9245_s5 + $0x1f0] sm:$0xff]  ;;  %v3659_v58 = vld [vmem:[%s9245_s5 + $0x80] sm:$0xff] }
 0xc7a   :  { %3777 = vmatpush.msra.mxu2 %v3673_v24  ;;  %v3697_v56 = vld [vmem:[%s9245_s5 + $0x1b0] sm:$0xff]  ;;  %3820 = vmatpush.msra.mxu0 %v3731_v40  ;;  %v3655_v24 = vld [vmem:[%s9245_s5 + $0x60] sm:$0xff] }
 0xc7b   :  { %3594 = vmatpush.msra.mxu3 %v4940_v1  ;;  %3613 = vmatpush.msrb.mxu1 %v4945_v45  ;;  %v3695_v1 = vld [vmem:[%s9245_s5 + $0x1a0] sm:$0xff]  ;;  %v3649_v40 = vld [vmem:[%s9245_s5 + $0x30] sm:$0xff] }
 0xc7c   :  { %3778 = vmatpush.msra.mxu2 %v3671_v55  ;;  %3821 = vmatpush.msra.mxu0 %v3729_v29  ;;  %v3691_v45 = vld [vmem:[%s9245_s5 + $0x180] sm:$0xff] }
 0xc7d   :  { %3595 = vmatpush.msra.mxu3 %v4936_v7  ;;  %3614 = vmatpush.msrb.mxu1 %v4941_v9  ;;  %v3723_v9 = vld [vmem:[%s9245_s5 + $0x280] sm:$0xff] }
 0xc7e   :  { %3779 = vmatpush.msra.mxu2 %v3669_v23  ;;  %3822 = vmatpush.msra.mxu0 %v3727_v3  ;;  %v3687_v55 = vld [vmem:[%s9245_s5 + $0x160] sm:$0xff]  ;;  %v3713_v3 = vld [vmem:[%s9245_s5 + $0x230] sm:$0xff] }
 0xc7f   :  { %3596 = vmatpush.msra.mxu3 %v4932_v20  ;;  %3615 = vmatpush.msrb.mxu1 %v4937_v11  ;;  %v3689_v11 = vld [vmem:[%s9245_s5 + $0x170] sm:$0xff]  ;;  %v3647_v29 = vld [vmem:[%s9245_s5 + $0x20] sm:$0xff] }
 0xc80   :  { %3780 = vmatpush.msra.mxu2 %v3667_v37  ;;  %3823 = vmatpush.msra.mxu0 %v3725_v15  ;;  %v3651_v37 = vld [vmem:[%s9245_s5 + $0x40] sm:$0xff] }
 0xc81   :  { %3616 = vmatpush.msrb.mxu1 %v4933_v26  ;;  %3797 = vmatpush.msrb.mxu3 %v3705_v12  ;;  %v3721_v26 = vld [vmem:[%s9245_s5 + $0x270] sm:$0xff]  ;;  %v3719_v12 = vld [vmem:[%s9245_s5 + $0x260] sm:$0xff] }
 0xc82   :  { %3781 = vmatpush.msra.mxu2 %v3665_v33  ;;  %3824 = vmatpush.msra.mxu0 %v3723_v9  ;;  %v3767_v33 = vld [vmem:[%s9245_s5 + $0x3e0] sm:$0xff]  ;;  %v3674_v9 = vld [vmem:[%s9245_s5 + $0xf8] sm:$0xff] }
 0xc83   :  { %3798 = vmatpush.msrb.mxu3 %v3703_v63  ;;  %v3685_v63 = vld [vmem:[%s9245_s5 + $0x150] sm:$0xff]  ;;  %v3711_v15 = vld [vmem:[%s9245_s5 + $0x220] sm:$0xff] }
 0xc84   :  { %3782 = vmatpush.msra.mxu2 %v3663_v8  ;;  %3825 = vmatpush.msra.mxu0 %v3721_v26  ;;  %v3681_v8 = vld [vmem:[%s9245_s5 + $0x130] sm:$0xff]  ;;  %v3759_v26 = vld [vmem:[%s9245_s5 + $0x3a0] sm:$0xff] }
 0xc85   :  { %3799 = vmatpush.msrb.mxu3 %v3701_v34 }
 0xc86   :  { %3783 = vmatpush.msra.mxu2 %v3661_v5  ;;  %3826 = vmatpush.msra.mxu0 %v3719_v12  ;;  %v3645_v5 = vld [vmem:[%s9245_s5 + $0x10] sm:$0xff]  ;;  %v3707_v12 = vld [vmem:[%s9245_s5 + $0x200] sm:$0xff] }
 0xc87   :  { %3800 = vmatpush.msrb.mxu3 %v3699_v38  ;;  %v3769_v38 = vld [vmem:[%s9245_s5 + $0x3f0] sm:$0xff] }
 0xc88   :  { %3784 = vmatpush.msra.mxu2 %v3659_v58  ;;  %3827 = vmatpush.msra.mxu0 %v3717_v32  ;;  %v3643_v58 = vld [vmem:[%s9245_s5] sm:$0xff]  ;;  %v3738_v32 = vld [vmem:[%s9245_s5 + $0x2f8] sm:$0xff] }
 0xc89   :  { %3801 = vmatpush.msrb.mxu3 %v3697_v56  ;;  %v3715_v56 = vld [vmem:[%s9245_s5 + $0x240] sm:$0xff] }
 0xc8a   :  { %3828 = vmatpush.msra.mxu0 %v3715_v56  ;;  %v3734_v56 = vld [vmem:[%s9245_s5 + $0x2d8] sm:$0xff] }
 0xc8b   :  { %3802 = vmatpush.msrb.mxu3 %v3695_v1  ;;  %v3765_v1 = vld [vmem:[%s9245_s5 + $0x3d0] sm:$0xff] }
 0xc8c   :  { %3829 = vmatpush.msra.mxu0 %v3713_v3  ;;  %v3732_v3 = vld [vmem:[%s9245_s5 + $0x2c8] sm:$0xff] }
 0xc8d   :  { %3803 = vmatpush.msrb.mxu3 %v3693_v4  ;;  %v3763_v4 = vld [vmem:[%s9245_s5 + $0x3c0] sm:$0xff] }
 0xc8e   :  { %3830 = vmatpush.msra.mxu0 %v3711_v15  ;;  %v3730_v15 = vld [vmem:[%s9245_s5 + $0x2b8] sm:$0xff] }
 0xc8f   :  { %3804 = vmatpush.msrb.mxu3 %v3691_v45  ;;  %v3761_v45 = vld [vmem:[%s9245_s5 + $0x3b0] sm:$0xff] }
 0xc91   :  { %3805 = vmatpush.msrb.mxu3 %v3689_v11  ;;  %v3709_v11 = vld [vmem:[%s9245_s5 + $0x210] sm:$0xff] }
 0xc92   :  { %3831 = vmatpush.msra.mxu0 %v3709_v11  ;;  %v3741_v11 = vld [vmem:[%s9245_s5 + $0x310] sm:$0xff] }
 0xc93   :  { %3806 = vmatpush.msrb.mxu3 %v3687_v55  ;;  %v3675_v55 = vld [vmem:[%s9245_s5 + $0x100] sm:$0xff] }
 0xc94   :  { %3832 = vmatpush.msra.mxu0 %v3707_v12  ;;  %v3768_v12 = vld [vmem:[%s9245_s5 + $0x3e8] sm:$0xff] }
 0xc95   :  { %3807 = vmatpush.msrb.mxu3 %v3685_v63  ;;  %v3706_v63 = vld [vmem:[%s9245_s5 + $0x1f8] sm:$0xff] }
 0xc96   :  { %3897 = vmatpush.msrb.mxu0 %v3738_v32  ;;  %v8873_v32 = vpop.f32.mrf.mxu3 }
 0xced   :  { %v3435_v7 = vpop.f32.mrf.mxu0 }
 0xcee   :  { %v8667_v20 = vadd.f32 %v3435_v7, %v8510_v10  ;;  %v3657_v10 = vld [vmem:[%s9245_s5 + $0x70] sm:$0xff]  ;;  %v3679_v7 = vld [vmem:[%s9245_s5 + $0x120] sm:$0xff] }
 0xcef   :  { %3785 = vmatpush.msra.mxu2 %v3657_v10  ;;  %v3677_v10 = vld [vmem:[%s9245_s5 + $0x110] sm:$0xff] }
 0xcf1   :  { %3786 = vmatpush.msra.mxu2 %v3655_v24  ;;  %v3672_v24 = vld [vmem:[%s9245_s5 + $0xe8] sm:$0xff] }
 0xcf3   :  { %3787 = vmatpush.msra.mxu2 %v3653_v54  ;;  %v3757_v54 = vld [vmem:[%s9245_s5 + $0x390] sm:$0xff] }
 0xcf5   :  { %v3501_v23 = vpop.f32.mrf.mxu0  ;;  %3788 = vmatpush.msra.mxu2 %v3651_v37  ;;  %v3668_v37 = vld [vmem:[%s9245_s5 + $0xc8] sm:$0xff] }
 0xcf6   :  { %v3502_v34 = vadd.f32 %v8515_v14, %v3501_v23  ;;  %v3683_v14 = vld [vmem:[%s9245_s5 + $0x140] sm:$0xff]  ;;  %v3670_v23 = vld [vmem:[%s9245_s5 + $0xd8] sm:$0xff] }
 0xcf7   :  { %3789 = vmatpush.msra.mxu2 %v3649_v40  ;;  %3808 = vmatpush.msrb.mxu3 %v3683_v14  ;;  %v3753_v40 = vld [vmem:[%s9245_s5 + $0x370] sm:$0xff]  ;;  %v3666_v14 = vld [vmem:[%s9245_s5 + $0xb8] sm:$0xff] }
 0xcf8   :  { %v3504_v35 = vmax.f32 %v3502_v34, 0.0  ;;  %v3755_v34 = vld [vmem:[%s9245_s5 + $0x380] sm:$0xff] }
 0xcf9   :  { %3790 = vmatpush.msra.mxu2 %v3647_v29  ;;  %3809 = vmatpush.msrb.mxu3 %v3681_v8  ;;  %v3751_v29 = vld [vmem:[%s9245_s5 + $0x360] sm:$0xff]  ;;  %v3664_v8 = vld [vmem:[%s9245_s5 + $0xa8] sm:$0xff] }
 0xcfa   :  { %4962 = vmatmul.msk.f32.vlgmr.msra.gmra.mxu1 %vm169_vm0, %v3504_v35  ;;  %4963 = vmatmul.msk.f32.vlgmr.msrb.gmra.mxu2 %vm169_vm0, %v3504_v35 }
 0xcfb   :  { %4964 = vmatmul.msk.f32.vlgmr.msra.gmra.mxu3 %vm169_vm0, %v3504_v35  ;;  %3837 = vmatpush.msra.mxu1 %v3769_v38  ;;  %v3736_v38 = vld [vmem:[%s9245_s5 + $0x2e8] sm:$0xff] }
 0xcfc   :  { %3791 = vmatpush.msra.mxu2 %v3645_v5  ;;  %3810 = vmatpush.msrb.mxu3 %v3679_v7  ;;  %v3749_v5 = vld [vmem:[%s9245_s5 + $0x350] sm:$0xff]  ;;  %v3662_v7 = vld [vmem:[%s9245_s5 + $0x98] sm:$0xff] }
 0xcfd   :  { %3838 = vmatpush.msra.mxu1 %v3767_v33  ;;  %v3702_v33 = vld [vmem:[%s9245_s5 + $0x1d8] sm:$0xff]  ;;  %3898 = vmatpush.msrb.mxu0 %v3736_v38 }
 0xcfe   :  { %3792 = vmatpush.msra.mxu2 %v3643_v58  ;;  %3811 = vmatpush.msrb.mxu3 %v3677_v10  ;;  %v3747_v58 = vld [vmem:[%s9245_s5 + $0x340] sm:$0xff] }
 0xcff   :  { %3839 = vmatpush.msra.mxu1 %v3765_v1  ;;  %v3700_v1 = vld [vmem:[%s9245_s5 + $0x1c8] sm:$0xff]  ;;  %3899 = vmatpush.msrb.mxu0 %v3734_v56  ;;  %v3743_v10 = vld [vmem:[%s9245_s5 + $0x320] sm:$0xff] }
 0xd00   :  { %3857 = vmatpush.msrb.mxu2 %v3674_v9  ;;  %3812 = vmatpush.msrb.mxu3 %v3675_v55  ;;  %v3745_v9 = vld [vmem:[%s9245_s5 + $0x330] sm:$0xff]  ;;  %v8860_v55 = vpop.f32.mrf.mxu1 }
 0xd01   :  { %3840 = vmatpush.msra.mxu1 %v3763_v4  ;;  %v3698_v4 = vld [vmem:[%s9245_s5 + $0x1b8] sm:$0xff]  ;;  %3900 = vmatpush.msrb.mxu0 %v3732_v3 }
 0xd02   :  { %4965 = vmatmul.msk.f32.vlgmr.msrb.gmra.mxu1 %vm169_vm0, %v3504_v35  ;;  %3858 = vmatpush.msrb.mxu2 %v3672_v24  ;;  %v3704_v35 = vld [vmem:[%s9245_s5 + $0x1e8] sm:$0xff]  ;;  %v3770_v24 = vld [vmem:[%s9245_s5 + $0x3f8] sm:$0xff] }
 0xd03   :  { %3841 = vmatpush.msra.mxu1 %v3761_v45  ;;  %3877 = vmatpush.msra.mxu3 %v3706_v63  ;;  %v3660_v45 = vld [vmem:[%s9245_s5 + $0x88] sm:$0xff] }
 0xd04   :  { %3859 = vmatpush.msrb.mxu2 %v3670_v23  ;;  %3901 = vmatpush.msrb.mxu0 %v3730_v15  ;;  %v3764_v23 = vld [vmem:[%s9245_s5 + $0x3c8] sm:$0xff] }
 0xd05   :  { %3842 = vmatpush.msra.mxu1 %v3759_v26  ;;  %3878 = vmatpush.msra.mxu3 %v3704_v35  ;;  %v3739_v26 = vld [vmem:[%s9245_s5 + $0x300] sm:$0xff] }
 0xd06   :  { %3860 = vmatpush.msrb.mxu2 %v3668_v37  ;;  %v8877_v37 = vpop.f32.mrf.mxu3 }
 0xd07   :  { %3843 = vmatpush.msra.mxu1 %v3757_v54  ;;  %3879 = vmatpush.msra.mxu3 %v3702_v33  ;;  %v3766_v54 = vld [vmem:[%s9245_s5 + $0x3d8] sm:$0xff] }
 0xd08   :  { %3861 = vmatpush.msrb.mxu2 %v3666_v14  ;;  %v8871_v63 = vpop.f32.mrf.mxu1 }
 0xd09   :  { %3844 = vmatpush.msra.mxu1 %v3755_v34  ;;  %3880 = vmatpush.msra.mxu3 %v3700_v1  ;;  %v334_v1 = vadd.f32 %v7013_v50, %v6997_v43  ;;  %v3728_v43 = vld [vmem:[%s9245_s5 + $0x2a8] sm:$0xff] }
 0xd0a   :  { %3862 = vmatpush.msrb.mxu2 %v3664_v8  ;;  %v314_v8 = vadd.f32 %v5698_v21, %v5670_v60  ;;  %v3658_v60 = vld [vmem:[%s9245_s5 + $0x78] sm:$0xff]  ;;  %v3696_v21 = vld [vmem:[%s9245_s5 + $0x1a8] sm:$0xff]  ;;  %3902 = vmatpush.msrb.mxu0 %v3728_v43 }
 0xd0b   :  { %3845 = vmatpush.msra.mxu1 %v3753_v40  ;;  %3881 = vmatpush.msra.mxu3 %v3698_v4 }
 0xd0c   :  { %3863 = vmatpush.msrb.mxu2 %v3662_v7  ;;  %v478_v7 = vadd.f32 %v7018_v51, %v334_v1  ;;  %v3762_v51 = vld [vmem:[%s9245_s5 + $0x3b8] sm:$0xff] }
 0xd0d   :  { %3846 = vmatpush.msra.mxu1 %v3751_v29  ;;  %3882 = vmatpush.msra.mxu3 %v3696_v21  ;;  %v3686_v21 = vld [vmem:[%s9245_s5 + $0x158] sm:$0xff] }
 0xd0e   :  { %3864 = vmatpush.msrb.mxu2 %v3660_v45  ;;  %v8881_v38 = vpop.f32.mrf.mxu3 }
 0xd0f   :  { %3847 = vmatpush.msra.mxu1 %v3749_v5  ;;  %v477_v5 = vadd.f32 %v7026_v25, %v314_v8  ;;  %v3722_v8 = vld [vmem:[%s9245_s5 + $0x278] sm:$0xff] }
 0xd10   :  { %v8875_v34 = vpop.f32.mrf.mxu1  ;;  %3865 = vmatpush.msrb.mxu2 %v3658_v60  ;;  %v3648_v60 = vld [vmem:[%s9245_s5 + $0x28] sm:$0xff] }
 0xd11   :  { %3848 = vmatpush.msra.mxu1 %v3747_v58  ;;  %v620_v4 = vadd.f32 %v7030_v0, %v477_v5  ;;  %v621_v58 = vadd.f32 %v7038_v6, %v478_v7  ;;  %v3656_v0 = vld [vmem:[%s9245_s5 + $0x68] sm:$0xff]  ;;  %v3694_v6 = vld [vmem:[%s9245_s5 + $0x198] sm:$0xff] }
 0xd12   :  { %3866 = vmatpush.msrb.mxu2 %v3656_v0  ;;  %3883 = vmatpush.msra.mxu3 %v3694_v6  ;;  %v3650_v7 = vld [vmem:[%s9245_s5 + $0x38] sm:$0xff] }
 0xd13   :  { %3849 = vmatpush.msra.mxu1 %v3745_v9  ;;  %v763_v45 = vadd.f32 %v7042_v48, %v620_v4  ;;  %v764_v50 = vadd.f32 %v7040_v28, %v621_v58  ;;  %v3726_v28 = vld [vmem:[%s9245_s5 + $0x298] sm:$0xff]  ;;  %v3688_v4 = vld [vmem:[%s9245_s5 + $0x168] sm:$0xff] }
 0xd14   :  { %3903 = vmatpush.msrb.mxu0 %v3726_v28 }
 0xd15   :  { %3850 = vmatpush.msra.mxu1 %v3743_v10  ;;  %v906_v25 = vadd.f32 %v7044_v49, %v763_v45  ;;  %v907_v48 = vadd.f32 %v7046_v19, %v764_v50  ;;  %v3760_v49 = vld [vmem:[%s9245_s5 + $0x3a8] sm:$0xff]  ;;  %v3654_v10 = vld [vmem:[%s9245_s5 + $0x58] sm:$0xff] }
 0xd16   :  { %v8885_v14 = vpop.f32.mrf.mxu3  ;;  %v3724_v19 = vld [vmem:[%s9245_s5 + $0x288] sm:$0xff]  ;;  %3867 = vmatpush.msrb.mxu2 %v3654_v10 }
 0xd17   :  { %3851 = vmatpush.msra.mxu1 %v3741_v11  ;;  %v1049_v9 = vadd.f32 %v7050_v59, %v906_v25  ;;  %v3692_v11 = vld [vmem:[%s9245_s5 + $0x188] sm:$0xff]  ;;  %v3758_v59 = vld [vmem:[%s9245_s5 + $0x398] sm:$0xff]  ;;  %3904 = vmatpush.msrb.mxu0 %v3724_v19 }
 0xd18   :  { %v8879_v35 = vpop.f32.mrf.mxu1  ;;  %3884 = vmatpush.msra.mxu3 %v3692_v11  ;;  %v3684_v25 = vld [vmem:[%s9245_s5 + $0x148] sm:$0xff] }
 0xd19   :  { %3852 = vmatpush.msra.mxu1 %v3739_v26  ;;  %v1050_v26 = vadd.f32 %v7048_v57, %v907_v48  ;;  %v3690_v57 = vld [vmem:[%s9245_s5 + $0x178] sm:$0xff]  ;;  %3905 = vmatpush.msrb.mxu0 %v3722_v8  ;;  %v3644_v48 = vld [vmem:[%s9245_s5 + $0x8] sm:$0xff] }
 0xd1a   :  { %3885 = vmatpush.msra.mxu3 %v3690_v57  ;;  %v3680_v10 = vld [vmem:[%s9245_s5 + $0x128] sm:$0xff] }
 0xd1b   :  { %3917 = vmatpush.msrb.mxu1 %v3770_v24  ;;  %v1193_v1 = vadd.f32 %v7054_v16, %v1050_v26  ;;  %v3720_v16 = vld [vmem:[%s9245_s5 + $0x268] sm:$0xff] }
 0xd1c   :  { %3886 = vmatpush.msra.mxu3 %v3688_v4  ;;  %3906 = vmatpush.msrb.mxu0 %v3720_v16  ;;  %v3712_v11 = vld [vmem:[%s9245_s5 + $0x228] sm:$0xff] }
 0xd1d   :  { %3918 = vmatpush.msrb.mxu1 %v3768_v12  ;;  %v1192_v12 = vadd.f32 %v7052_v61, %v1049_v9  ;;  %v3756_v61 = vld [vmem:[%s9245_s5 + $0x388] sm:$0xff]  ;;  %v1336_v58 = vadd.f32 %v7056_v17, %v1193_v1  ;;  %v3718_v17 = vld [vmem:[%s9245_s5 + $0x258] sm:$0xff] }
 0xd1e   :  { %v8889_v56 = vpop.f32.mrf.mxu3  ;;  %3887 = vmatpush.msra.mxu3 %v3686_v21  ;;  %3907 = vmatpush.msrb.mxu0 %v3718_v17  ;;  %v3676_v8 = vld [vmem:[%s9245_s5 + $0x108] sm:$0xff] }
 0xd1f   :  { %3919 = vmatpush.msrb.mxu1 %v3766_v54  ;;  %v1335_v5 = vadd.f32 %v7058_v18, %v1192_v12  ;;  %v3754_v18 = vld [vmem:[%s9245_s5 + $0x378] sm:$0xff]  ;;  %v1479_v43 = vadd.f32 %v7100_v47, %v1336_v58  ;;  %v3716_v47 = vld [vmem:[%s9245_s5 + $0x248] sm:$0xff] }
 0xd20   :  { %v8883_v40 = vpop.f32.mrf.mxu1  ;;  %3888 = vmatpush.msra.mxu3 %v3684_v25  ;;  %3908 = vmatpush.msrb.mxu0 %v3716_v47  ;;  %v3740_v16 = vld [vmem:[%s9245_s5 + $0x308] sm:$0xff] }
 0xd21   :  { %3920 = vmatpush.msrb.mxu1 %v3764_v23  ;;  %v3652_v23 = vld [vmem:[%s9245_s5 + $0x48] sm:$0xff]  ;;  %v1478_v45 = vadd.f32 %v7060_v22, %v1335_v5  ;;  %v1622_v0 = vadd.f32 %v7109_v53, %v1479_v43  ;;  %v3682_v53 = vld [vmem:[%s9245_s5 + $0x138] sm:$0xff] }
 0xd22   :  { %3868 = vmatpush.msrb.mxu2 %v3652_v23  ;;  %v3752_v22 = vld [vmem:[%s9245_s5 + $0x368] sm:$0xff]  ;;  %3889 = vmatpush.msra.mxu3 %v3682_v53  ;;  %v3710_v23 = vld [vmem:[%s9245_s5 + $0x218] sm:$0xff] }
 0xd23   :  { %3921 = vmatpush.msrb.mxu1 %v3762_v51  ;;  %v1621_v50 = vadd.f32 %v7123_v36, %v1478_v45  ;;  %v3646_v51 = vld [vmem:[%s9245_s5 + $0x18] sm:$0xff]  ;;  %v1765_v9 = vadd.f32 %v7270_v41, %v1622_v0 }
 0xd24   :  { %3869 = vmatpush.msrb.mxu2 %v3650_v7  ;;  %v3750_v36 = vld [vmem:[%s9245_s5 + $0x358] sm:$0xff]  ;;  %3890 = vmatpush.msra.mxu3 %v3680_v10  ;;  %v2763_v7 = vadd.f32 %v8875_v34, %v7908_v42 }
 0xd25   :  { %3922 = vmatpush.msrb.mxu1 %v3760_v49  ;;  %v1764_v28 = vadd.f32 %v7134_v52, %v1621_v50  ;;  %v3714_v49 = vld [vmem:[%s9245_s5 + $0x238] sm:$0xff]  ;;  %v3748_v52 = vld [vmem:[%s9245_s5 + $0x348] sm:$0xff]  ;;  %v1908_v12 = vadd.f32 %v7370_v31, %v1765_v9 }
 0xd26   :  { %v8897_v3 = vpop.f32.mrf.mxu3  ;;  %3870 = vmatpush.msrb.mxu2 %v3648_v60  ;;  %3909 = vmatpush.msrb.mxu0 %v3714_v49  ;;  %v3746_v41 = vld [vmem:[%s9245_s5 + $0x338] sm:$0xff]  ;;  %v3708_v31 = vld [vmem:[%s9245_s5 + $0x208] sm:$0xff] }
 0xd27   :  { %3923 = vmatpush.msrb.mxu1 %v3758_v59  ;;  %v1907_v19 = vadd.f32 %v7290_v30, %v1764_v28  ;;  %v3678_v59 = vld [vmem:[%s9245_s5 + $0x118] sm:$0xff]  ;;  %v3744_v30 = vld [vmem:[%s9245_s5 + $0x328] sm:$0xff]  ;;  %v2051_v1 = vadd.f32 %v7530_v62, %v1908_v12 }
 0xd28   :  { %v8887_v33 = vpop.f32.mrf.mxu1  ;;  %3871 = vmatpush.msrb.mxu2 %v3646_v51  ;;  %3910 = vmatpush.msrb.mxu0 %v3712_v11  ;;  %v3970_v12 = vld [vmem:[%s9247_s7 + $0xf8] sm:$0xff] }
 0xd29   :  { %3924 = vmatpush.msrb.mxu1 %v3756_v61  ;;  %v2050_v57 = vadd.f32 %v7393_v39, %v1907_v19  ;;  %3891 = vmatpush.msra.mxu3 %v3678_v59  ;;  %v3742_v61 = vld [vmem:[%s9245_s5 + $0x318] sm:$0xff]  ;;  %v2194_v39 = vadd.f32 %v7630_v27, %v2051_v1  ;;  %v3951_v19 = vld [vmem:[%s9247_s7 + $0x60] sm:$0xff] }
 0xd2a   :  { %3872 = vmatpush.msrb.mxu2 %v3644_v48  ;;  %3911 = vmatpush.msrb.mxu0 %v3710_v23  ;;  %v3950_v59 = vld [vmem:[%s9247_s7 + $0x58] sm:$0xff]  ;;  %v3949_v23 = vld [vmem:[%s9247_s7 + $0x50] sm:$0xff]  ;;  %v3947_v1 = vld [vmem:[%s9247_s7 + $0x40] sm:$0xff] }
 0xd2b   :  { %3925 = vmatpush.msrb.mxu1 %v3754_v18  ;;  %v2193_v5 = vadd.f32 %v7550_v2, %v2050_v57  ;;  %3892 = vmatpush.msra.mxu3 %v3676_v8  ;;  %v2337_v58 = vadd.f32 %v7875_v46, %v2194_v39  ;;  %v2906_v2 = vadd.f32 %v8881_v38, %v2763_v7  ;;  %v3625_v46 = vld [vmem:[%s9244_s4] sm:$0xf]  ;;  %v3948_v57 = vld [vmem:[%s9247_s7 + $0x48] sm:$0xff]  ;;  %v3945_v39 = vld [vmem:[%s9247_s7 + $0x30] sm:$0xff]  ;;  %s4063_s4 = sshll.u32 %s5048_s13, 4  ;;  %s4064_s4 = int_to_ptr.vmem [resolvable:$true] %s4063_s4 }
 0xd2c   :  { %3912 = vmatpush.msrb.mxu0 %v3708_v31  ;;  %v3627_v43 = vperm.slane %v3625_v46, 0  ;;  %v3628_v47 = vperm.slane %v3625_v46, 1  ;;  %v3968_v8 = vld [vmem:[%s9247_s7 + $0xe8] sm:$0xff]  ;;  %v3967_v31 = vld [vmem:[%s9247_s7 + $0xe0] sm:$0xff]  ;;  %v3965_v7 = vld [vmem:[%s9247_s7 + $0xd0] sm:$0xff] }
 0xd2d   :  { %3926 = vmatpush.msrb.mxu1 %v3752_v22  ;;  %v2336_v62 = vadd.f32 %v7653_v13, %v2193_v5  ;;  %v2480_v42 = vadd.f32 %v8860_v55, %v2337_v58  ;;  %v3049_v34 = vadd.f32 %v8887_v33, %v2906_v2  ;;  %v3966_v5 = vld [vmem:[%s9247_s7 + $0xd8] sm:$0xff]  ;;  %v3963_v58 = vld [vmem:[%s9247_s7 + $0xc0] sm:$0xff] }
 0xd2e   :  { %v8944_v24 = vpop.f32.mrf.mxu3  ;;  %v3942_v2 = vld [vmem:[%s9247_s7 + $0x18] sm:$0xff] }
 0xd2f   :  { %3927 = vmatpush.msrb.mxu1 %v3750_v36  ;;  %v2479_v18 = vadd.f32 %v7895_v44, %v2336_v62  ;;  %v2623_v45 = vadd.f32 %v8873_v32, %v2480_v42  ;;  %v3192_v60 = vadd.f32 %v8897_v3, %v3049_v34  ;;  %v3629_v36 = vperm.slane %v3625_v46, 2  ;;  %v3964_v62 = vld [vmem:[%s9247_s7 + $0xc8] sm:$0xff]  ;;  %v3961_v42 = vld [vmem:[%s9247_s7 + $0xb0] sm:$0xff] }
 0xd30   :  { %v8891_v29 = vpop.f32.mrf.mxu1  ;;  %v3940_v34 = vld [vmem:[%s9247_s7 + $0x8] sm:$0xff] }
 0xd31   :  { %3928 = vmatpush.msrb.mxu1 %v3748_v52  ;;  %v2622_v13 = vadd.f32 %v8871_v63, %v2479_v18  ;;  %v2766_v44 = vadd.f32 %v8879_v35, %v2623_v45  ;;  %v3952_v52 = vld [vmem:[%s9247_s7 + $0x68] sm:$0xff]  ;;  %v3962_v18 = vld [vmem:[%s9247_s7 + $0xb8] sm:$0xff]  ;;  %v3939_v45 = vld [vmem:[%s9247_s7] sm:$0xff] }
 0xd33   :  { %3929 = vmatpush.msrb.mxu1 %v3746_v41  ;;  %v2765_v21 = vadd.f32 %v8877_v37, %v2622_v13  ;;  %v2909_v33 = vadd.f32 %v8885_v14, %v2766_v44  ;;  %v3954_v14 = vld [vmem:[%s9247_s7 + $0x78] sm:$0xff]  ;;  %v3960_v13 = vld [vmem:[%s9247_s7 + $0xa8] sm:$0xff] }
 0xd34   :  { %v3956_v44 = vld [vmem:[%s9247_s7 + $0x88] sm:$0xff] }
 0xd35   :  { %3930 = vmatpush.msrb.mxu1 %v3744_v30  ;;  %v2908_v55 = vadd.f32 %v8883_v40, %v2765_v21  ;;  %v3052_v37 = vadd.f32 %v8891_v29, %v2909_v33  ;;  %v3969_v30 = vld [vmem:[%s9247_s7 + $0xf0] sm:$0xff]  ;;  %v3958_v21 = vld [vmem:[%s9247_s7 + $0x98] sm:$0xff] }
 0xd36   :  { %v9004_v6 = vpop.f32.mrf.mxu3  ;;  %v4030_v33 = vld [vmem:[%s9249_s9 + $0x70] sm:$0xff] }
 0xd37   :  { %3931 = vmatpush.msrb.mxu1 %v3742_v61  ;;  %v3051_v32 = vadd.f32 %v8889_v56, %v2908_v55  ;;  %v3195_v51 = vadd.f32 %v8944_v24, %v3052_v37  ;;  %v3953_v24 = vld [vmem:[%s9247_s7 + $0x70] sm:$0xff]  ;;  %v3946_v61 = vld [vmem:[%s9247_s7 + $0x38] sm:$0xff] }
 0xd38   :  { %v8902_v15 = vpop.f32.mrf.mxu1  ;;  %v4031_v55 = vld [vmem:[%s9249_s9 + $0x78] sm:$0xff] }
 0xd39   :  { %3932 = vmatpush.msrb.mxu1 %v3740_v16  ;;  %v3194_v50 = vadd.f32 %v8902_v15, %v3051_v32  ;;  %v3630_v15 = vperm.slane %v3625_v46, 3  ;;  %v3943_v16 = vld [vmem:[%s9247_s7 + $0x20] sm:$0xff]  ;;  %v3957_v46 = vld [vmem:[%s9247_s7 + $0x90] sm:$0xff] }
 0xd3a   :  { %v3771_v32 = vld [vmem:[%s9246_s6] sm:$0x3] }
 0xd3e   :  { %v3415_v4 = vpop.f32.mrf.mxu3 }
 0xd40   :  { %v8950_v54 = vpop.f32.mrf.mxu1 }
 0xd41   :  { %v3335_v38 = vadd.f32 %v8950_v54, %v3192_v60  ;;  %v3337_v54 = vadd.f32 %v9004_v6, %v3194_v50  ;;  %v3959_v60 = vld [vmem:[%s9247_s7 + $0xa0] sm:$0xff]  ;;  %v4025_v50 = vld [vmem:[%s9249_s9 + $0x48] sm:$0xff] }
 0xd43   :  { %v3478_v17 = vadd.f32 %v3415_v4, %v3335_v38  ;;  %v3944_v4 = vld [vmem:[%s9247_s7 + $0x28] sm:$0xff]  ;;  %v3955_v38 = vld [vmem:[%s9247_s7 + $0x80] sm:$0xff] }
 0xd46   :  { %v3475_v63 = vpop.f32.mrf.mxu3 }
 0xd48   :  { %v3332_v26 = vpop.f32.mrf.mxu1 }
 0xd49   :  { %v3338_v25 = vadd.f32 %v3332_v26, %v3195_v51  ;;  %v4024_v51 = vld [vmem:[%s9249_s9 + $0x40] sm:$0xff] }
 0xd4b   :  { %v3481_v28 = vadd.f32 %v3475_v63, %v3338_v25  ;;  %v4028_v63 = vld [vmem:[%s9249_s9 + $0x60] sm:$0xff] }
 0xd50   :  { %v3455_v27 = vpop.f32.mrf.mxu1 }
 0xd51   :  { %v3480_v0 = vadd.f32 %v3455_v27, %v3337_v54  ;;  %v3941_v27 = vld [vmem:[%s9247_s7 + $0x10] sm:$0xff]  ;;  %v4023_v54 = vld [vmem:[%s9249_s9 + $0x38] sm:$0xff] }
 0xd77   :  { %v3558_v3 = vpop.f32.mrf.mxu1 }
 0xd78   :  { %v3621_v22 = vadd.f32 %v3558_v3, %v3478_v17  ;;  %v4029_v17 = vld [vmem:[%s9249_s9 + $0x68] sm:$0xff]  ;;  %v4026_v3 = vld [vmem:[%s9249_s9 + $0x50] sm:$0xff] }
 0xd7a   :  { %v3635_v35 = vadd.f32 %v3627_v43, %v3621_v22  ;;  %v4027_v43 = vld [vmem:[%s9249_s9 + $0x58] sm:$0xff]  ;;  %v3773_v22 = vperm.slane %v3771_v32, 0 }
 0xd7c   :  { %v3639_v40 = vmax.f32 %v3635_v35, 0.0 }
 0xd7d   :  { %v3578_v56 = vpop.f32.mrf.mxu2 }
 0xd7e   :  { %v3622_v29 = vadd.f32 %v3578_v56, %v8667_v20  ;;  %v3598_v48 = vpop.f32.mrf.mxu3  ;;  %3793 = vmatmul.f32.vlgmr.msra.gmra.mxu2 %v3639_v40  ;;  %v3774_v56 = vperm.slane %v3771_v32, 1 }
 0xd7f   :  { %v3623_v6 = vadd.f32 %v3598_v48, %v3480_v0  ;;  %v3618_v53 = vpop.f32.mrf.mxu1  ;;  %3975 = vmatpush.msra.mxu2 %v3954_v14 }
 0xd80   :  { %v3636_v49 = vadd.f32 %v3628_v47, %v3622_v29  ;;  %v3624_v9 = vadd.f32 %v3618_v53, %v3481_v28 }
 0xd81   :  { %v3637_v10 = vadd.f32 %v3629_v36, %v3623_v6  ;;  %3976 = vmatpush.msra.mxu2 %v3953_v24 }
 0xd82   :  { %v3640_v11 = vmax.f32 %v3636_v49, 0.0  ;;  %v3638_v20 = vadd.f32 %v3630_v15, %v3624_v9 }
 0xd83   :  { %v3641_v26 = vmax.f32 %v3637_v10, 0.0  ;;  %3977 = vmatpush.msra.mxu2 %v3952_v52  ;;  %v4022_v10 = vld [vmem:[%s9249_s9 + $0x30] sm:$0xff] }
 0xd84   :  { %v3642_v41 = vmax.f32 %v3638_v20, 0.0  ;;  %3813 = vmatmul.f32.vlgmr.msrb.gmra.mxu3 %v3640_v11  ;;  %v4020_v20 = vld [vmem:[%s9249_s9 + $0x20] sm:$0xff] }
 0xd85   :  { %3833 = vmatmul.f32.vlgmr.msra.gmra.mxu0 %v3641_v26  ;;  %3978 = vmatpush.msra.mxu2 %v3951_v19  ;;  %v4019_v19 = vld [vmem:[%s9249_s9 + $0x18] sm:$0xff] }
 0xd86   :  { %3853 = vmatmul.f32.vlgmr.msra.gmra.mxu1 %v3642_v41  ;;  %3873 = vmatmul.f32.vlgmr.msrb.gmra.mxu2 %v3639_v40 }
 0xd87   :  { %3979 = vmatpush.msra.mxu2 %v3950_v59  ;;  %3995 = vmatpush.msrb.mxu3 %v3970_v12  ;;  %v4016_v59 = vld [vmem:[%s9249_s9] sm:$0xff] }
 0xd88   :  { %4036 = vmatpush.msra.mxu0 %v4031_v55  ;;  %v4968_v12 = vld [vmem:[%s9248_s8] ss:$0 sm:$0xff] }
 0xd89   :  { %3980 = vmatpush.msra.mxu2 %v3949_v23  ;;  %3996 = vmatpush.msrb.mxu3 %v3969_v30 }
 0xd8a   :  { %4037 = vmatpush.msra.mxu0 %v4030_v33 }
 0xd8b   :  { %3981 = vmatpush.msra.mxu2 %v3948_v57  ;;  %3997 = vmatpush.msrb.mxu3 %v3968_v8 }
 0xd8c   :  { %3893 = vmatmul.f32.vlgmr.msra.gmra.mxu3 %v3640_v11  ;;  %4038 = vmatpush.msra.mxu0 %v4029_v17  ;;  %v4021_v11 = vld [vmem:[%s9249_s9 + $0x28] sm:$0xff] }
 0xd8d   :  { %3913 = vmatmul.f32.vlgmr.msrb.gmra.mxu0 %v3641_v26  ;;  %3982 = vmatpush.msra.mxu2 %v3947_v1  ;;  %v4018_v26 = vld [vmem:[%s9249_s9 + $0x10] sm:$0xff] }
 0xd8e   :  { %3933 = vmatmul.f32.vlgmr.msrb.gmra.mxu1 %v3642_v41  ;;  %3998 = vmatpush.msrb.mxu3 %v3967_v31  ;;  %v4017_v41 = vld [vmem:[%s9249_s9 + $0x8] sm:$0xff]  ;;  %v4969_v31 = vld [vmem:[%s9250_s10] ss:$0 sm:$0xff]  ;;  %s4065_s9 = sshll.u32 %s9251_s11, 4  ;;  %s4066_s9 = int_to_ptr.hbm [resolvable:$true] %s4065_s9 }
 0xd8f   :  { %3983 = vmatpush.msra.mxu2 %v3946_v61  ;;  %4039 = vmatpush.msra.mxu0 %v4028_v63 }
 0xd90   :  { %3999 = vmatpush.msrb.mxu3 %v3966_v5 }
 0xd91   :  { %3984 = vmatpush.msra.mxu2 %v3945_v39  ;;  %4040 = vmatpush.msra.mxu0 %v4027_v43 }
 0xd92   :  { %4000 = vmatpush.msrb.mxu3 %v3965_v7 }
 0xd93   :  { %3985 = vmatpush.msra.mxu2 %v3944_v4  ;;  %4041 = vmatpush.msra.mxu0 %v4026_v3 }
 0xd94   :  { %4001 = vmatpush.msrb.mxu3 %v3964_v62 }
 0xd95   :  { %3986 = vmatpush.msra.mxu2 %v3943_v16  ;;  %4042 = vmatpush.msra.mxu0 %v4025_v50 }
 0xd96   :  { %4002 = vmatpush.msrb.mxu3 %v3963_v58 }
 0xd97   :  { %3987 = vmatpush.msra.mxu2 %v3942_v2  ;;  %4043 = vmatpush.msra.mxu0 %v4024_v51 }
 0xd98   :  { %4003 = vmatpush.msrb.mxu3 %v3962_v18 }
 0xd99   :  { %3988 = vmatpush.msra.mxu2 %v3941_v27  ;;  %4044 = vmatpush.msra.mxu0 %v4023_v54 }
 0xd9a   :  { %4004 = vmatpush.msrb.mxu3 %v3961_v42 }
 0xd9b   :  { %3989 = vmatpush.msra.mxu2 %v3940_v34  ;;  %4045 = vmatpush.msra.mxu0 %v4022_v10 }
 0xd9c   :  { %4005 = vmatpush.msrb.mxu3 %v3960_v13 }
 0xd9d   :  { %3990 = vmatpush.msra.mxu2 %v3939_v45  ;;  %4046 = vmatpush.msra.mxu0 %v4021_v11 }
 0xd9e   :  { %4006 = vmatpush.msrb.mxu3 %v3959_v60 }
 0xd9f   :  { %4047 = vmatpush.msra.mxu0 %v4020_v20 }
 0xda0   :  { %4007 = vmatpush.msrb.mxu3 %v3958_v21 }
 0xda1   :  { %4048 = vmatpush.msra.mxu0 %v4019_v19 }
 0xda2   :  { %4008 = vmatpush.msrb.mxu3 %v3957_v46 }
 0xda3   :  { %4049 = vmatpush.msra.mxu0 %v4018_v26 }
 0xda4   :  { %4009 = vmatpush.msrb.mxu3 %v3956_v44 }
 0xda5   :  { %4050 = vmatpush.msra.mxu0 %v4017_v41 }
 0xda6   :  { %4010 = vmatpush.msrb.mxu3 %v3955_v38 }
 0xda7   :  { %4051 = vmatpush.msra.mxu0 %v4016_v59 }
 0xe01   :  { %v3794_v37 = vpop.f32.mrf.mxu2 }
 0xe02   :  { %v3795_v35 = vadd.f32 %v3794_v37, %v3773_v22  ;;  %v3834_v25 = vpop.f32.mrf.mxu0 }
 0xe03   :  { %v3854_v14 = vpop.f32.mrf.mxu1 }
 0xe07   :  { %v3814_v40 = vpop.f32.mrf.mxu3 }
 0xe08   :  { %v3815_v47 = vadd.f32 %v3814_v40, %v3795_v35 }
 0xe09   :  { %v3874_v36 = vpop.f32.mrf.mxu2 }
 0xe0a   :  { %v3835_v0 = vadd.f32 %v3834_v25, %v3815_v47  ;;  %v3875_v48 = vadd.f32 %v3874_v36, %v3774_v56  ;;  %v3914_v6 = vpop.f32.mrf.mxu0 }
 0xe0b   :  { %v3934_v49 = vpop.f32.mrf.mxu1 }
 0xe0c   :  { %v3855_v28 = vadd.f32 %v3854_v14, %v3835_v0 }
 0xe0e   :  { %v3937_v29 = vmax.f32 %v3855_v28, 0.0 }
 0xe0f   :  { %v3894_v15 = vpop.f32.mrf.mxu3 }
 0xe10   :  { %v3895_v24 = vadd.f32 %v3894_v15, %v3875_v48  ;;  %3991 = vmatmul.f32.vlgmr.msra.gmra.mxu2 %v3937_v29 }
 0xe12   :  { %v3915_v53 = vadd.f32 %v3914_v6, %v3895_v24 }
 0xe14   :  { %v3935_v9 = vadd.f32 %v3934_v49, %v3915_v53 }
 0xe16   :  { %v3938_v52 = vmax.f32 %v3935_v9, 0.0 }
 0xe18   :  { %4011 = vmatmul.f32.vlgmr.msrb.gmra.mxu3 %v3938_v52 }
 0xe93   :  { %v3992_v23 = vpop.f32.mrf.mxu2 }
 0xe94   :  { %v3993_v30 = vadd.f32 %v4968_v12, %v3992_v23 }
 0xe9b   :  { %v4012_v57 = vpop.f32.mrf.mxu3 }
 0xe9c   :  { %v4013_v8 = vadd.f32 %v4012_v57, %v3993_v30 }
 0xe9e   :  { %v4015_v1 = vmax.f32 %v4013_v8, 0.0 }
 0xea0   :  { %4052 = vmatmul.f32.vlgmr.msra.gmra.mxu0 %v4015_v1 }
 0xf1d   :  { %v4053_v61 = vpop.f32.mrf.mxu0 }
 0xf1e   :  { %v4054_v5 = vadd.f32 %v4969_v31, %v4053_v61 }
 0xf20   :  { %4057 = vst.msk [vmem:[#allocation2] sm:$0x3] %vm4056_vm1, %v4054_v5 }
 0xf21   :  { %4068 = dma.vmem_to_hbm [thread:$0]  %s4064_s4, 32, %s4066_s9, [#allocation3]  }
 0xf22   :  { %5046 = dma.done.wait [#allocation3], 32  }
 0xf23   :  { %5047 = vsyncadd [#allocation3], 4294967264 }
 0xf24   :  { %4073 = vsyncpa [#allocation3], 1 }

</bundles_post_ra>
